<compile_context>
chip_gen: v6e
topology: v6e:2x2x1
jax: 0.10.0
libtpu: 0.0.40
codegen_flags: <defaults>
</compile_context>

<pallas_src>
import jax
import jax.numpy as jnp
from jax import lax
from jax.experimental import pallas as pl
from jax.experimental.pallas import tpu as pltpu


# ----------------------------- in-kernel helpers ---------------------------- #

def _conv_bn_relu_pool(xp_ref, w_ref, s_ref, b_ref, out_ref, H, W):
    """Fused Conv2d(3x3, pad=1) + folded BN + ReLU + MaxPool2d(2) on VMEM data.

    xp_ref : (N, H+2, W+2, Cin)   zero-padded input activations, bf16 (VMEM)
    w_ref  : (9*Cin, Cout)        im2col conv weights (tap-major, cin-minor), bf16
    s_ref  : (1, Cout) f32        folded BN scale
    b_ref  : (1, Cout) f32        folded BN bias (includes conv bias)
    out_ref: (N, H//2+2, W//2+2, Cout) padded output scratch (interior written),
             or None -> return the pooled f32 value (N*H//2, W//2, Cout).
    """
    N = xp_ref.shape[0]
    Cin = xp_ref.shape[3]
    Cout = w_ref.shape[1]
    Ho, Wo = H // 2, W // 2

    # im2col: 9 shifted views concatenated along channels -> one deep-K MXU dot.
    taps = [xp_ref[:, kh:kh + H, kw:kw + W, :]
            for kh in range(3) for kw in range(3)]
    im2col = jnp.concatenate(taps, axis=-1).reshape(N * H * W, 9 * Cin)
    acc = jnp.dot(im2col, w_ref[...], preferred_element_type=jnp.float32)

    # Folded BatchNorm (eval mode) + ReLU epilogue in f32 on the VPU.
    y = jnp.maximum(acc * s_ref[...] + b_ref[...], 0.0)          # (N*H*W, Cout)

    # 2x2 max-pool: elementwise max of paired rows, then paired columns.
    y = y.reshape(N * Ho, 2, W, Cout)
    y = jnp.maximum(y[:, 0], y[:, 1])                            # (N*Ho, W, Cout)
    y = y.reshape(N * Ho, Wo, 2, Cout)
    pooled = jnp.maximum(y[:, :, 0, :], y[:, :, 1, :])           # (N*Ho, Wo, Cout)

    if out_ref is None:
        return pooled
    out_ref[:, 1:Ho + 1, 1:Wo + 1, :] = (
        pooled.reshape(N, Ho, Wo, Cout).astype(out_ref.dtype))
    return None


def _fused_model_kernel(x_ref,
                        w1_ref, s1_ref, b1_ref,
                        w2_ref, s2_ref, b2_ref,
                        w3_ref, s3_ref, b3_ref,
                        fc1w_ref, fc1b_ref, fc2w_ref, fc2b_ref,
                        o_ref,
                        p1_ref, p2_ref, p3_ref):
    """Whole ImprovedConvolutionalModel forward, activations resident in VMEM."""
    N, H, W, _ = x_ref.shape
    H2, W2 = H // 2, W // 2
    H3, W3 = H // 4, W // 4

    # Zero-fill halo scratch once, then write interiors (no HBM pad round trips).
    p1_ref[...] = jnp.zeros(p1_ref.shape, p1_ref.dtype)
    p2_ref[...] = jnp.zeros(p2_ref.shape, p2_ref.dtype)
    p3_ref[...] = jnp.zeros(p3_ref.shape, p3_ref.dtype)
    p1_ref[:, 1:H + 1, 1:W + 1, :] = x_ref[...]

    # Three fused conv blocks, chained through padded VMEM scratch.
    _conv_bn_relu_pool(p1_ref, w1_ref, s1_ref, b1_ref, p2_ref, H, W)
    _conv_bn_relu_pool(p2_ref, w2_ref, s2_ref, b2_ref, p3_ref, H2, W2)
    pooled3 = _conv_bn_relu_pool(p3_ref, w3_ref, s3_ref, b3_ref, None, H3, W3)

    # Global average pool fused into block3's epilogue (f32).
    C3 = pooled3.shape[-1]
    Hf, Wf = H3 // 2, W3 // 2
    gap = jnp.mean(pooled3.reshape(N, Hf * Wf, C3), axis=1)      # (N, 256) f32

    # Classifier head: Dropout(0.5)/Dropout(0.3) are identity in eval mode.
    h = jnp.dot(gap.astype(fc1w_ref.dtype), fc1w_ref[...],
                preferred_element_type=jnp.float32)
    h = jnp.maximum(h + fc1b_ref[...], 0.0)
    o = jnp.dot(h.astype(fc2w_ref.dtype), fc2w_ref[...],
                preferred_element_type=jnp.float32)
    o_ref[...] = o + fc2b_ref[...]


# --------------------------- pallas_call wrapper ---------------------------- #

def fused_forward(x_nhwc_bf16, params):
    """Single fused pallas_call for the whole model (one launch, zero HBM hops)."""
    N, H, W, Cin = x_nhwc_bf16.shape
    b1, b2, b3 = params["block1"], params["block2"], params["block3"]
    C1 = b1["w_im2col"].shape[1]
    C2 = b2["w_im2col"].shape[1]
    out_dim = params["fc2"]["w_bf16"].shape[1]
    H2, W2, H3, W3 = H // 2, W // 2, H // 4, W // 4

    vmem_spec = pl.BlockSpec(memory_space=pltpu.MemorySpace.VMEM)
    num_inputs = 14
    return pl.pallas_call(
        _fused_model_kernel,
        out_shape=jax.ShapeDtypeStruct((N, out_dim), jnp.float32),
        in_specs=[vmem_spec] * num_inputs,
        out_specs=vmem_spec,
        scratch_shapes=[
            pltpu.VMEM((N, H + 2, W + 2, Cin), jnp.bfloat16),    # padded block1 input
            pltpu.VMEM((N, H2 + 2, W2 + 2, C1), jnp.bfloat16),   # padded block2 input
            pltpu.VMEM((N, H3 + 2, W3 + 2, C2), jnp.bfloat16),   # padded block3 input
        ],
    )(x_nhwc_bf16,
      b1["w_im2col"], b1["scale"], b1["bias"],
      b2["w_im2col"], b2["scale"], b2["bias"],
      b3["w_im2col"], b3["scale"], b3["bias"],
      params["fc1"]["w_bf16"], params["fc1"]["b"],
      params["fc2"]["w_bf16"], params["fc2"]["b"])


# ----------------------------- parameter setup ------------------------------ #

def make_conv_block_params(key, cin, cout, eps=1e-5):
    k = jax.random.split(key, 6)
    conv_w = jax.random.normal(k[0], (cout, cin, 3, 3), jnp.float32) * 0.05   # OIHW
    conv_b = jax.random.normal(k[1], (cout,), jnp.float32) * 0.05
    gamma = 1.0 + 0.1 * jax.random.normal(k[2], (cout,), jnp.float32)
    beta = 0.1 * jax.random.normal(k[3], (cout,), jnp.float32)
    running_mean = 0.1 * jax.random.normal(k[4], (cout,), jnp.float32)
    running_var = jnp.abs(jax.random.normal(k[5], (cout,), jnp.float32)) + 0.5

    # Fold conv bias + BatchNorm (eval mode) into a per-channel affine.
    inv_std = gamma / jnp.sqrt(running_var + eps)
    scale = inv_std
    bias = beta + (conv_b - running_mean) * inv_std

    # OIHW -> (kh, kw, cin, cout) -> (9*cin, cout): tap-major / cin-minor im2col
    # weight layout, matching the in-kernel channel concatenation order.
    w_im2col = conv_w.transpose(2, 3, 1, 0).reshape(9 * cin, cout).astype(jnp.bfloat16)
    return {
        "w_im2col": w_im2col,
        "scale": scale.reshape(1, cout),
        "bias": bias.reshape(1, cout),
        # f32 masters for the pure-JAX reference check
        "conv_w": conv_w, "conv_b": conv_b, "gamma": gamma, "beta": beta,
        "running_mean": running_mean, "running_var": running_var, "eps": eps,
    }


def make_linear_params(key, fan_in, fan_out):
    k1, k2 = jax.random.split(key)
    w = jax.random.normal(k1, (fan_in, fan_out), jnp.float32) * 0.05
    b = jax.random.normal(k2, (fan_out,), jnp.float32) * 0.05
    return {"w": w, "w_bf16": w.astype(jnp.bfloat16), "b": b.reshape(1, fan_out)}


def make_params(input_channels, output_shape, seed=0):
    key = jax.random.PRNGKey(seed)
    kb1, kb2, kb3, kl1, kl2 = jax.random.split(key, 5)
    return {
        "block1": make_conv_block_params(kb1, input_channels, 64),
        "block2": make_conv_block_params(kb2, 64, 128),
        "block3": make_conv_block_params(kb3, 128, 256),
        "fc1": make_linear_params(kl1, 256, 512),
        "fc2": make_linear_params(kl2, 512, output_shape),
    }


# ------------------------------ forward passes ------------------------------ #

@jax.jit
def forward_pallas(x_nchw, params):
    x = jnp.transpose(x_nchw, (0, 2, 3, 1)).astype(jnp.bfloat16)   # NCHW -> NHWC, bf16
    return fused_forward(x, params)


def _ref_conv_block(x_nhwc, p):
    y = lax.conv_general_dilated(
        x_nhwc, p["conv_w"].transpose(2, 3, 1, 0),   # HWIO
        window_strides=(1, 1), padding=((1, 1), (1, 1)),
        dimension_numbers=("NHWC", "HWIO", "NHWC"))
    y = y + p["conv_b"]
    y = (y - p["running_mean"]) / jnp.sqrt(p["running_var"] + p["eps"]) * p["gamma"] + p["beta"]
    y = jnp.maximum(y, 0.0)
    y = lax.reduce_window(y, -jnp.inf, lax.max, (1, 2, 2, 1), (1, 2, 2, 1), "VALID")
    return y


def forward_reference(x_nchw, params):
    x = jnp.transpose(x_nchw, (0, 2, 3, 1)).astype(jnp.float32)
    x = _ref_conv_block(x, params["block1"])
    x = _ref_conv_block(x, params["block2"])
    x = _ref_conv_block(x, params["block3"])
    x = jnp.mean(x, axis=(1, 2))
    x = jnp.maximum(x @ params["fc1"]["w"] + params["fc1"]["b"], 0.0)
    x = x @ params["fc2"]["w"] + params["fc2"]["b"]
    return x


# ----------------------------------- main ----------------------------------- #

if __name__ == "__main__":
    batch, in_channels, spatial, out_classes = 2, 4, 16, 10
    hidden_units = 32  # constructor arg of the PyTorch module; unused by its forward graph

    params = make_params(in_channels, out_classes, seed=0)
    x = jax.random.normal(jax.random.PRNGKey(0),
                          (batch, in_channels, spatial, spatial), jnp.float32)  # NCHW

    out = jax.block_until_ready(forward_pallas(x, params))
    assert out.shape == (batch, out_classes), out.shape

    ref = jax.block_until_ready(forward_reference(x, params))
    max_err = float(jnp.max(jnp.abs(out - ref)))
    # bf16 MXU operands vs. the f32 reference => relaxed tolerance.
    assert jnp.allclose(out, ref, rtol=5e-2, atol=2e-2), max_err

    print("KERNEL_OK")
</pallas_src>

<mosaic_0001>
module attributes {stable_mosaic.version = 11 : i64} {
  func.func @_fused_model_kernel(%arg0: memref<2x16x16x4xbf16, #tpu.memory_space<vmem>>, %arg1: memref<36x64xbf16, #tpu.memory_space<vmem>>, %arg2: memref<1x64xf32, #tpu.memory_space<vmem>>, %arg3: memref<1x64xf32, #tpu.memory_space<vmem>>, %arg4: memref<576x128xbf16, #tpu.memory_space<vmem>>, %arg5: memref<1x128xf32, #tpu.memory_space<vmem>>, %arg6: memref<1x128xf32, #tpu.memory_space<vmem>>, %arg7: memref<1152x256xbf16, #tpu.memory_space<vmem>>, %arg8: memref<1x256xf32, #tpu.memory_space<vmem>>, %arg9: memref<1x256xf32, #tpu.memory_space<vmem>>, %arg10: memref<256x512xbf16, #tpu.memory_space<vmem>>, %arg11: memref<1x512xf32, #tpu.memory_space<vmem>>, %arg12: memref<512x10xbf16, #tpu.memory_space<vmem>>, %arg13: memref<1x10xf32, #tpu.memory_space<vmem>>, %arg14: memref<2x10xf32, #tpu.memory_space<vmem>>, %arg15: memref<2x18x18x4xbf16, #tpu.memory_space<vmem>>, %arg16: memref<2x10x10x64xbf16, #tpu.memory_space<vmem>>, %arg17: memref<2x6x6x128xbf16, #tpu.memory_space<vmem>>) attributes {dimension_semantics = [], scalar_prefetch = 0 : i64, scratch_operands = 3 : i64, tpu.core_type = #tpu.core_type<tc>} {
    %cst = arith.constant 0.000000e+00 : bf16
    %0 = vector.broadcast %cst : bf16 to vector<2x18x18x4xbf16>
    %c0 = arith.constant 0 : index
    %c0_0 = arith.constant 0 : index
    %c0_1 = arith.constant 0 : index
    %c0_2 = arith.constant 0 : index
    %1 = vector.load %arg15[%c0, %c0_0, %c0_1, %c0_2] : memref<2x18x18x4xbf16, #tpu.memory_space<vmem>>, vector<2x18x18x4xbf16>
    tpu.vector_store %arg15[%c0, %c0_0, %c0_1, %c0_2], %0 {strides = array<i32>} : memref<2x18x18x4xbf16, #tpu.memory_space<vmem>>, vector<2x18x18x4xbf16>,
    %cst_3 = arith.constant 0.000000e+00 : bf16
    %2 = vector.broadcast %cst_3 : bf16 to vector<2x10x10x64xbf16>
    %c0_4 = arith.constant 0 : index
    %c0_5 = arith.constant 0 : index
    %c0_6 = arith.constant 0 : index
    %c0_7 = arith.constant 0 : index
    %3 = vector.load %arg16[%c0_4, %c0_5, %c0_6, %c0_7] : memref<2x10x10x64xbf16, #tpu.memory_space<vmem>>, vector<2x10x10x64xbf16>
    tpu.vector_store %arg16[%c0_4, %c0_5, %c0_6, %c0_7], %2 {strides = array<i32>} : memref<2x10x10x64xbf16, #tpu.memory_space<vmem>>, vector<2x10x10x64xbf16>,
    %cst_8 = arith.constant 0.000000e+00 : bf16
    %4 = vector.broadcast %cst_8 : bf16 to vector<2x6x6x128xbf16>
    %c0_9 = arith.constant 0 : index
    %c0_10 = arith.constant 0 : index
    %c0_11 = arith.constant 0 : index
    %c0_12 = arith.constant 0 : index
    %5 = vector.load %arg17[%c0_9, %c0_10, %c0_11, %c0_12] : memref<2x6x6x128xbf16, #tpu.memory_space<vmem>>, vector<2x6x6x128xbf16>
    tpu.vector_store %arg17[%c0_9, %c0_10, %c0_11, %c0_12], %4 {strides = array<i32>} : memref<2x6x6x128xbf16, #tpu.memory_space<vmem>>, vector<2x6x6x128xbf16>,
    %c0_13 = arith.constant 0 : index
    %c0_14 = arith.constant 0 : index
    %c0_15 = arith.constant 0 : index
    %c0_16 = arith.constant 0 : index
    %6 = vector.load %arg0[%c0_13, %c0_14, %c0_15, %c0_16] : memref<2x16x16x4xbf16, #tpu.memory_space<vmem>>, vector<2x16x16x4xbf16>
    %c0_17 = arith.constant 0 : index
    %c1 = arith.constant 1 : index
    %c1_18 = arith.constant 1 : index
    %c0_19 = arith.constant 0 : index
    %7 = vector.load %arg15[%c0_17, %c1, %c1_18, %c0_19] : memref<2x18x18x4xbf16, #tpu.memory_space<vmem>>, vector<2x16x16x4xbf16>
    tpu.vector_store %arg15[%c0_17, %c1, %c1_18, %c0_19], %6 {strides = array<i32>} : memref<2x18x18x4xbf16, #tpu.memory_space<vmem>>, vector<2x16x16x4xbf16>,
    %c0_20 = arith.constant 0 : index
    %c0_21 = arith.constant 0 : index
    %c0_22 = arith.constant 0 : index
    %c0_23 = arith.constant 0 : index
    %8 = vector.load %arg15[%c0_20, %c0_21, %c0_22, %c0_23] : memref<2x18x18x4xbf16, #tpu.memory_space<vmem>>, vector<2x16x16x4xbf16>
    %c0_24 = arith.constant 0 : index
    %c0_25 = arith.constant 0 : index
    %c1_26 = arith.constant 1 : index
    %c0_27 = arith.constant 0 : index
    %9 = vector.load %arg15[%c0_24, %c0_25, %c1_26, %c0_27] : memref<2x18x18x4xbf16, #tpu.memory_space<vmem>>, vector<2x16x16x4xbf16>
    %c0_28 = arith.constant 0 : index
    %c0_29 = arith.constant 0 : index
    %c2 = arith.constant 2 : index
    %c0_30 = arith.constant 0 : index
    %10 = vector.load %arg15[%c0_28, %c0_29, %c2, %c0_30] : memref<2x18x18x4xbf16, #tpu.memory_space<vmem>>, vector<2x16x16x4xbf16>
    %c0_31 = arith.constant 0 : index
    %c1_32 = arith.constant 1 : index
    %c0_33 = arith.constant 0 : index
    %c0_34 = arith.constant 0 : index
    %11 = vector.load %arg15[%c0_31, %c1_32, %c0_33, %c0_34] : memref<2x18x18x4xbf16, #tpu.memory_space<vmem>>, vector<2x16x16x4xbf16>
    %c0_35 = arith.constant 0 : index
    %c1_36 = arith.constant 1 : index
    %c1_37 = arith.constant 1 : index
    %c0_38 = arith.constant 0 : index
    %12 = vector.load %arg15[%c0_35, %c1_36, %c1_37, %c0_38] : memref<2x18x18x4xbf16, #tpu.memory_space<vmem>>, vector<2x16x16x4xbf16>
    %c0_39 = arith.constant 0 : index
    %c1_40 = arith.constant 1 : index
    %c2_41 = arith.constant 2 : index
    %c0_42 = arith.constant 0 : index
    %13 = vector.load %arg15[%c0_39, %c1_40, %c2_41, %c0_42] : memref<2x18x18x4xbf16, #tpu.memory_space<vmem>>, vector<2x16x16x4xbf16>
    %c0_43 = arith.constant 0 : index
    %c2_44 = arith.constant 2 : index
    %c0_45 = arith.constant 0 : index
    %c0_46 = arith.constant 0 : index
    %14 = vector.load %arg15[%c0_43, %c2_44, %c0_45, %c0_46] : memref<2x18x18x4xbf16, #tpu.memory_space<vmem>>, vector<2x16x16x4xbf16>
    %c0_47 = arith.constant 0 : index
    %c2_48 = arith.constant 2 : index
    %c1_49 = arith.constant 1 : index
    %c0_50 = arith.constant 0 : index
    %15 = vector.load %arg15[%c0_47, %c2_48, %c1_49, %c0_50] : memref<2x18x18x4xbf16, #tpu.memory_space<vmem>>, vector<2x16x16x4xbf16>
    %c0_51 = arith.constant 0 : index
    %c2_52 = arith.constant 2 : index
    %c2_53 = arith.constant 2 : index
    %c0_54 = arith.constant 0 : index
    %16 = vector.load %arg15[%c0_51, %c2_52, %c2_53, %c0_54] : memref<2x18x18x4xbf16, #tpu.memory_space<vmem>>, vector<2x16x16x4xbf16>
    %17 = tpu.concatenate %8, %9, %10, %11, %12, %13, %14, %15, %16 in 3 : vector<2x16x16x4xbf16>, vector<2x16x16x4xbf16>, vector<2x16x16x4xbf16>, vector<2x16x16x4xbf16>, vector<2x16x16x4xbf16>, vector<2x16x16x4xbf16>, vector<2x16x16x4xbf16>, vector<2x16x16x4xbf16>, vector<2x16x16x4xbf16> -> vector<2x16x16x36xbf16>
    %18 = vector.shape_cast %17 : vector<2x16x16x36xbf16> to vector<512x36xbf16>
    %c0_55 = arith.constant 0 : index
    %c0_56 = arith.constant 0 : index
    %19 = vector.load %arg1[%c0_55, %c0_56] : memref<36x64xbf16, #tpu.memory_space<vmem>>, vector<36x64xbf16>
    %cst_57 = arith.constant dense<0.000000e+00> : vector<512x64xf32>
    %20 = tpu.matmul %18, %19, %cst_57 {dimension_numbers = #tpu.dot_dimension_numbers<[1], [0], [0], [1], [0, 0, 1, 1], [], []>} : vector<512x36xbf16>, vector<36x64xbf16>, vector<512x64xf32> -> vector<512x64xf32>
    %c0_58 = arith.constant 0 : index
    %c0_59 = arith.constant 0 : index
    %21 = vector.load %arg2[%c0_58, %c0_59] : memref<1x64xf32, #tpu.memory_space<vmem>>, vector<1x64xf32>
    %22 = vector.broadcast %21 : vector<1x64xf32> to vector<512x64xf32>
    %23 = arith.mulf %20, %22 : vector<512x64xf32>
    %c0_60 = arith.constant 0 : index
    %c0_61 = arith.constant 0 : index
    %24 = vector.load %arg3[%c0_60, %c0_61] : memref<1x64xf32, #tpu.memory_space<vmem>>, vector<1x64xf32>
    %25 = vector.broadcast %24 : vector<1x64xf32> to vector<512x64xf32>
    %26 = arith.addf %23, %25 : vector<512x64xf32>
    %cst_62 = arith.constant 0.000000e+00 : f32
    %27 = vector.broadcast %cst_62 : f32 to vector<512x64xf32>
    %28 = arith.maximumf %26, %27 : vector<512x64xf32>
    %29 = vector.shape_cast %28 : vector<512x64xf32> to vector<16x2x16x64xf32>
    %30 = vector.extract_strided_slice %29 {offsets = [0, 0, 0, 0], sizes = [16, 1, 16, 64], strides = [1, 1, 1, 1]} : vector<16x2x16x64xf32> to vector<16x1x16x64xf32>
    %31 = vector.shape_cast %30 : vector<16x1x16x64xf32> to vector<16x16x64xf32>
    %32 = vector.extract_strided_slice %29 {offsets = [0, 1, 0, 0], sizes = [16, 1, 16, 64], strides = [1, 1, 1, 1]} : vector<16x2x16x64xf32> to vector<16x1x16x64xf32>
    %33 = vector.shape_cast %32 : vector<16x1x16x64xf32> to vector<16x16x64xf32>
    %34 = arith.maximumf %31, %33 : vector<16x16x64xf32>
    %35 = vector.shape_cast %34 : vector<16x16x64xf32> to vector<16x8x2x64xf32>
    %36 = vector.extract_strided_slice %35 {offsets = [0, 0, 0, 0], sizes = [16, 8, 1, 64], strides = [1, 1, 1, 1]} : vector<16x8x2x64xf32> to vector<16x8x1x64xf32>
    %37 = vector.shape_cast %36 : vector<16x8x1x64xf32> to vector<16x8x64xf32>
    %38 = vector.extract_strided_slice %35 {offsets = [0, 0, 1, 0], sizes = [16, 8, 1, 64], strides = [1, 1, 1, 1]} : vector<16x8x2x64xf32> to vector<16x8x1x64xf32>
    %39 = vector.shape_cast %38 : vector<16x8x1x64xf32> to vector<16x8x64xf32>
    %40 = arith.maximumf %37, %39 : vector<16x8x64xf32>
    %41 = vector.shape_cast %40 : vector<16x8x64xf32> to vector<2x8x8x64xf32>
    %42 = arith.truncf %41 : vector<2x8x8x64xf32> to vector<2x8x8x64xbf16>
    %c0_63 = arith.constant 0 : index
    %c1_64 = arith.constant 1 : index
    %c1_65 = arith.constant 1 : index
    %c0_66 = arith.constant 0 : index
    %43 = vector.load %arg16[%c0_63, %c1_64, %c1_65, %c0_66] : memref<2x10x10x64xbf16, #tpu.memory_space<vmem>>, vector<2x8x8x64xbf16>
    tpu.vector_store %arg16[%c0_63, %c1_64, %c1_65, %c0_66], %42 {strides = array<i32>} : memref<2x10x10x64xbf16, #tpu.memory_space<vmem>>, vector<2x8x8x64xbf16>,
    %c0_67 = arith.constant 0 : index
    %c0_68 = arith.constant 0 : index
    %c0_69 = arith.constant 0 : index
    %c0_70 = arith.constant 0 : index
    %44 = vector.load %arg16[%c0_67, %c0_68, %c0_69, %c0_70] : memref<2x10x10x64xbf16, #tpu.memory_space<vmem>>, vector<2x8x8x64xbf16>
    %c0_71 = arith.constant 0 : index
    %c0_72 = arith.constant 0 : index
    %c1_73 = arith.constant 1 : index
    %c0_74 = arith.constant 0 : index
    %45 = vector.load %arg16[%c0_71, %c0_72, %c1_73, %c0_74] : memref<2x10x10x64xbf16, #tpu.memory_space<vmem>>, vector<2x8x8x64xbf16>
    %c0_75 = arith.constant 0 : index
    %c0_76 = arith.constant 0 : index
    %c2_77 = arith.constant 2 : index
    %c0_78 = arith.constant 0 : index
    %46 = vector.load %arg16[%c0_75, %c0_76, %c2_77, %c0_78] : memref<2x10x10x64xbf16, #tpu.memory_space<vmem>>, vector<2x8x8x64xbf16>
    %c0_79 = arith.constant 0 : index
    %c1_80 = arith.constant 1 : index
    %c0_81 = arith.constant 0 : index
    %c0_82 = arith.constant 0 : index
    %47 = vector.load %arg16[%c0_79, %c1_80, %c0_81, %c0_82] : memref<2x10x10x64xbf16, #tpu.memory_space<vmem>>, vector<2x8x8x64xbf16>
    %c0_83 = arith.constant 0 : index
    %c1_84 = arith.constant 1 : index
    %c1_85 = arith.constant 1 : index
    %c0_86 = arith.constant 0 : index
    %48 = vector.load %arg16[%c0_83, %c1_84, %c1_85, %c0_86] : memref<2x10x10x64xbf16, #tpu.memory_space<vmem>>, vector<2x8x8x64xbf16>
    %c0_87 = arith.constant 0 : index
    %c1_88 = arith.constant 1 : index
    %c2_89 = arith.constant 2 : index
    %c0_90 = arith.constant 0 : index
    %49 = vector.load %arg16[%c0_87, %c1_88, %c2_89, %c0_90] : memref<2x10x10x64xbf16, #tpu.memory_space<vmem>>, vector<2x8x8x64xbf16>
    %c0_91 = arith.constant 0 : index
    %c2_92 = arith.constant 2 : index
    %c0_93 = arith.constant 0 : index
    %c0_94 = arith.constant 0 : index
    %50 = vector.load %arg16[%c0_91, %c2_92, %c0_93, %c0_94] : memref<2x10x10x64xbf16, #tpu.memory_space<vmem>>, vector<2x8x8x64xbf16>
    %c0_95 = arith.constant 0 : index
    %c2_96 = arith.constant 2 : index
    %c1_97 = arith.constant 1 : index
    %c0_98 = arith.constant 0 : index
    %51 = vector.load %arg16[%c0_95, %c2_96, %c1_97, %c0_98] : memref<2x10x10x64xbf16, #tpu.memory_space<vmem>>, vector<2x8x8x64xbf16>
    %c0_99 = arith.constant 0 : index
    %c2_100 = arith.constant 2 : index
    %c2_101 = arith.constant 2 : index
    %c0_102 = arith.constant 0 : index
    %52 = vector.load %arg16[%c0_99, %c2_100, %c2_101, %c0_102] : memref<2x10x10x64xbf16, #tpu.memory_space<vmem>>, vector<2x8x8x64xbf16>
    %53 = tpu.concatenate %44, %45, %46, %47, %48, %49, %50, %51, %52 in 3 : vector<2x8x8x64xbf16>, vector<2x8x8x64xbf16>, vector<2x8x8x64xbf16>, vector<2x8x8x64xbf16>, vector<2x8x8x64xbf16>, vector<2x8x8x64xbf16>, vector<2x8x8x64xbf16>, vector<2x8x8x64xbf16>, vector<2x8x8x64xbf16> -> vector<2x8x8x576xbf16>
    %54 = vector.shape_cast %53 : vector<2x8x8x576xbf16> to vector<128x576xbf16>
    %c0_103 = arith.constant 0 : index
    %c0_104 = arith.constant 0 : index
    %55 = vector.load %arg4[%c0_103, %c0_104] : memref<576x128xbf16, #tpu.memory_space<vmem>>, vector<576x128xbf16>
    %cst_105 = arith.constant dense<0.000000e+00> : vector<128x128xf32>
    %56 = tpu.matmul %54, %55, %cst_105 {dimension_numbers = #tpu.dot_dimension_numbers<[1], [0], [0], [1], [0, 0, 1, 1], [], []>} : vector<128x576xbf16>, vector<576x128xbf16>, vector<128x128xf32> -> vector<128x128xf32>
    %c0_106 = arith.constant 0 : index
    %c0_107 = arith.constant 0 : index
    %57 = vector.load %arg5[%c0_106, %c0_107] : memref<1x128xf32, #tpu.memory_space<vmem>>, vector<1x128xf32>
    %58 = vector.broadcast %57 : vector<1x128xf32> to vector<128x128xf32>
    %59 = arith.mulf %56, %58 : vector<128x128xf32>
    %c0_108 = arith.constant 0 : index
    %c0_109 = arith.constant 0 : index
    %60 = vector.load %arg6[%c0_108, %c0_109] : memref<1x128xf32, #tpu.memory_space<vmem>>, vector<1x128xf32>
    %61 = vector.broadcast %60 : vector<1x128xf32> to vector<128x128xf32>
    %62 = arith.addf %59, %61 : vector<128x128xf32>
    %cst_110 = arith.constant 0.000000e+00 : f32
    %63 = vector.broadcast %cst_110 : f32 to vector<128x128xf32>
    %64 = arith.maximumf %62, %63 : vector<128x128xf32>
    %65 = vector.shape_cast %64 : vector<128x128xf32> to vector<8x2x8x128xf32>
    %66 = vector.extract_strided_slice %65 {offsets = [0, 0, 0, 0], sizes = [8, 1, 8, 128], strides = [1, 1, 1, 1]} : vector<8x2x8x128xf32> to vector<8x1x8x128xf32>
    %67 = vector.shape_cast %66 : vector<8x1x8x128xf32> to vector<8x8x128xf32>
    %68 = vector.extract_strided_slice %65 {offsets = [0, 1, 0, 0], sizes = [8, 1, 8, 128], strides = [1, 1, 1, 1]} : vector<8x2x8x128xf32> to vector<8x1x8x128xf32>
    %69 = vector.shape_cast %68 : vector<8x1x8x128xf32> to vector<8x8x128xf32>
    %70 = arith.maximumf %67, %69 : vector<8x8x128xf32>
    %71 = vector.shape_cast %70 : vector<8x8x128xf32> to vector<8x4x2x128xf32>
    %72 = vector.extract_strided_slice %71 {offsets = [0, 0, 0, 0], sizes = [8, 4, 1, 128], strides = [1, 1, 1, 1]} : vector<8x4x2x128xf32> to vector<8x4x1x128xf32>
    %73 = vector.shape_cast %72 : vector<8x4x1x128xf32> to vector<8x4x128xf32>
    %74 = vector.extract_strided_slice %71 {offsets = [0, 0, 1, 0], sizes = [8, 4, 1, 128], strides = [1, 1, 1, 1]} : vector<8x4x2x128xf32> to vector<8x4x1x128xf32>
    %75 = vector.shape_cast %74 : vector<8x4x1x128xf32> to vector<8x4x128xf32>
    %76 = arith.maximumf %73, %75 : vector<8x4x128xf32>
    %77 = vector.shape_cast %76 : vector<8x4x128xf32> to vector<2x4x4x128xf32>
    %78 = arith.truncf %77 : vector<2x4x4x128xf32> to vector<2x4x4x128xbf16>
    %c0_111 = arith.constant 0 : index
    %c1_112 = arith.constant 1 : index
    %c1_113 = arith.constant 1 : index
    %c0_114 = arith.constant 0 : index
    %79 = vector.load %arg17[%c0_111, %c1_112, %c1_113, %c0_114] : memref<2x6x6x128xbf16, #tpu.memory_space<vmem>>, vector<2x4x4x128xbf16>
    tpu.vector_store %arg17[%c0_111, %c1_112, %c1_113, %c0_114], %78 {strides = array<i32>} : memref<2x6x6x128xbf16, #tpu.memory_space<vmem>>, vector<2x4x4x128xbf16>,
    %c0_115 = arith.constant 0 : index
    %c0_116 = arith.constant 0 : index
    %c0_117 = arith.constant 0 : index
    %c0_118 = arith.constant 0 : index
    %80 = vector.load %arg17[%c0_115, %c0_116, %c0_117, %c0_118] : memref<2x6x6x128xbf16, #tpu.memory_space<vmem>>, vector<2x4x4x128xbf16>
    %c0_119 = arith.constant 0 : index
    %c0_120 = arith.constant 0 : index
    %c1_121 = arith.constant 1 : index
    %c0_122 = arith.constant 0 : index
    %81 = vector.load %arg17[%c0_119, %c0_120, %c1_121, %c0_122] : memref<2x6x6x128xbf16, #tpu.memory_space<vmem>>, vector<2x4x4x128xbf16>
    %c0_123 = arith.constant 0 : index
    %c0_124 = arith.constant 0 : index
    %c2_125 = arith.constant 2 : index
    %c0_126 = arith.constant 0 : index
    %82 = vector.load %arg17[%c0_123, %c0_124, %c2_125, %c0_126] : memref<2x6x6x128xbf16, #tpu.memory_space<vmem>>, vector<2x4x4x128xbf16>
    %c0_127 = arith.constant 0 : index
    %c1_128 = arith.constant 1 : index
    %c0_129 = arith.constant 0 : index
    %c0_130 = arith.constant 0 : index
    %83 = vector.load %arg17[%c0_127, %c1_128, %c0_129, %c0_130] : memref<2x6x6x128xbf16, #tpu.memory_space<vmem>>, vector<2x4x4x128xbf16>
    %c0_131 = arith.constant 0 : index
    %c1_132 = arith.constant 1 : index
    %c1_133 = arith.constant 1 : index
    %c0_134 = arith.constant 0 : index
    %84 = vector.load %arg17[%c0_131, %c1_132, %c1_133, %c0_134] : memref<2x6x6x128xbf16, #tpu.memory_space<vmem>>, vector<2x4x4x128xbf16>
    %c0_135 = arith.constant 0 : index
    %c1_136 = arith.constant 1 : index
    %c2_137 = arith.constant 2 : index
    %c0_138 = arith.constant 0 : index
    %85 = vector.load %arg17[%c0_135, %c1_136, %c2_137, %c0_138] : memref<2x6x6x128xbf16, #tpu.memory_space<vmem>>, vector<2x4x4x128xbf16>
    %c0_139 = arith.constant 0 : index
    %c2_140 = arith.constant 2 : index
    %c0_141 = arith.constant 0 : index
    %c0_142 = arith.constant 0 : index
    %86 = vector.load %arg17[%c0_139, %c2_140, %c0_141, %c0_142] : memref<2x6x6x128xbf16, #tpu.memory_space<vmem>>, vector<2x4x4x128xbf16>
    %c0_143 = arith.constant 0 : index
    %c2_144 = arith.constant 2 : index
    %c1_145 = arith.constant 1 : index
    %c0_146 = arith.constant 0 : index
    %87 = vector.load %arg17[%c0_143, %c2_144, %c1_145, %c0_146] : memref<2x6x6x128xbf16, #tpu.memory_space<vmem>>, vector<2x4x4x128xbf16>
    %c0_147 = arith.constant 0 : index
    %c2_148 = arith.constant 2 : index
    %c2_149 = arith.constant 2 : index
    %c0_150 = arith.constant 0 : index
    %88 = vector.load %arg17[%c0_147, %c2_148, %c2_149, %c0_150] : memref<2x6x6x128xbf16, #tpu.memory_space<vmem>>, vector<2x4x4x128xbf16>
    %89 = tpu.concatenate %80, %81, %82, %83, %84, %85, %86, %87, %88 in 3 : vector<2x4x4x128xbf16>, vector<2x4x4x128xbf16>, vector<2x4x4x128xbf16>, vector<2x4x4x128xbf16>, vector<2x4x4x128xbf16>, vector<2x4x4x128xbf16>, vector<2x4x4x128xbf16>, vector<2x4x4x128xbf16>, vector<2x4x4x128xbf16> -> vector<2x4x4x1152xbf16>
    %90 = vector.shape_cast %89 : vector<2x4x4x1152xbf16> to vector<32x1152xbf16>
    %c0_151 = arith.constant 0 : index
    %c0_152 = arith.constant 0 : index
    %91 = vector.load %arg7[%c0_151, %c0_152] : memref<1152x256xbf16, #tpu.memory_space<vmem>>, vector<1152x256xbf16>
    %cst_153 = arith.constant dense<0.000000e+00> : vector<32x256xf32>
    %92 = tpu.matmul %90, %91, %cst_153 {dimension_numbers = #tpu.dot_dimension_numbers<[1], [0], [0], [1], [0, 0, 1, 1], [], []>} : vector<32x1152xbf16>, vector<1152x256xbf16>, vector<32x256xf32> -> vector<32x256xf32>
    %c0_154 = arith.constant 0 : index
    %c0_155 = arith.constant 0 : index
    %93 = vector.load %arg8[%c0_154, %c0_155] : memref<1x256xf32, #tpu.memory_space<vmem>>, vector<1x256xf32>
    %94 = vector.broadcast %93 : vector<1x256xf32> to vector<32x256xf32>
    %95 = arith.mulf %92, %94 : vector<32x256xf32>
    %c0_156 = arith.constant 0 : index
    %c0_157 = arith.constant 0 : index
    %96 = vector.load %arg9[%c0_156, %c0_157] : memref<1x256xf32, #tpu.memory_space<vmem>>, vector<1x256xf32>
    %97 = vector.broadcast %96 : vector<1x256xf32> to vector<32x256xf32>
    %98 = arith.addf %95, %97 : vector<32x256xf32>
    %cst_158 = arith.constant 0.000000e+00 : f32
    %99 = vector.broadcast %cst_158 : f32 to vector<32x256xf32>
    %100 = arith.maximumf %98, %99 : vector<32x256xf32>
    %101 = vector.shape_cast %100 : vector<32x256xf32> to vector<4x2x4x256xf32>
    %102 = vector.extract_strided_slice %101 {offsets = [0, 0, 0, 0], sizes = [4, 1, 4, 256], strides = [1, 1, 1, 1]} : vector<4x2x4x256xf32> to vector<4x1x4x256xf32>
    %103 = vector.shape_cast %102 : vector<4x1x4x256xf32> to vector<4x4x256xf32>
    %104 = vector.extract_strided_slice %101 {offsets = [0, 1, 0, 0], sizes = [4, 1, 4, 256], strides = [1, 1, 1, 1]} : vector<4x2x4x256xf32> to vector<4x1x4x256xf32>
    %105 = vector.shape_cast %104 : vector<4x1x4x256xf32> to vector<4x4x256xf32>
    %106 = arith.maximumf %103, %105 : vector<4x4x256xf32>
    %107 = vector.shape_cast %106 : vector<4x4x256xf32> to vector<4x2x2x256xf32>
    %108 = vector.extract_strided_slice %107 {offsets = [0, 0, 0, 0], sizes = [4, 2, 1, 256], strides = [1, 1, 1, 1]} : vector<4x2x2x256xf32> to vector<4x2x1x256xf32>
    %109 = vector.shape_cast %108 : vector<4x2x1x256xf32> to vector<4x2x256xf32>
    %110 = vector.extract_strided_slice %107 {offsets = [0, 0, 1, 0], sizes = [4, 2, 1, 256], strides = [1, 1, 1, 1]} : vector<4x2x2x256xf32> to vector<4x2x1x256xf32>
    %111 = vector.shape_cast %110 : vector<4x2x1x256xf32> to vector<4x2x256xf32>
    %112 = arith.maximumf %109, %111 : vector<4x2x256xf32>
    %113 = vector.shape_cast %112 : vector<4x2x256xf32> to vector<2x4x256xf32>
    %cst_159 = arith.constant dense<0.000000e+00> : vector<2x256xf32>
    %114 = vector.multi_reduction <add>, %113, %cst_159 [1] : vector<2x4x256xf32> to vector<2x256xf32>
    %cst_160 = arith.constant 4.000000e+00 : f32
    %115 = vector.broadcast %cst_160 : f32 to vector<2x256xf32>
    %116 = arith.divf %114, %115 : vector<2x256xf32>
    %117 = arith.truncf %116 : vector<2x256xf32> to vector<2x256xbf16>
    %c0_161 = arith.constant 0 : index
    %c0_162 = arith.constant 0 : index
    %118 = vector.load %arg10[%c0_161, %c0_162] : memref<256x512xbf16, #tpu.memory_space<vmem>>, vector<256x512xbf16>
    %cst_163 = arith.constant dense<0.000000e+00> : vector<2x512xf32>
    %119 = tpu.matmul %117, %118, %cst_163 {dimension_numbers = #tpu.dot_dimension_numbers<[1], [0], [0], [1], [0, 0, 1, 1], [], []>} : vector<2x256xbf16>, vector<256x512xbf16>, vector<2x512xf32> -> vector<2x512xf32>
    %c0_164 = arith.constant 0 : index
    %c0_165 = arith.constant 0 : index
    %120 = vector.load %arg11[%c0_164, %c0_165] : memref<1x512xf32, #tpu.memory_space<vmem>>, vector<1x512xf32>
    %121 = vector.broadcast %120 : vector<1x512xf32> to vector<2x512xf32>
    %122 = arith.addf %119, %121 : vector<2x512xf32>
    %cst_166 = arith.constant 0.000000e+00 : f32
    %123 = vector.broadcast %cst_166 : f32 to vector<2x512xf32>
    %124 = arith.maximumf %122, %123 : vector<2x512xf32>
    %125 = arith.truncf %124 : vector<2x512xf32> to vector<2x512xbf16>
    %c0_167 = arith.constant 0 : index
    %c0_168 = arith.constant 0 : index
    %126 = vector.load %arg12[%c0_167, %c0_168] : memref<512x10xbf16, #tpu.memory_space<vmem>>, vector<512x10xbf16>
    %cst_169 = arith.constant dense<0.000000e+00> : vector<2x10xf32>
    %127 = tpu.matmul %125, %126, %cst_169 {dimension_numbers = #tpu.dot_dimension_numbers<[1], [0], [0], [1], [0, 0, 1, 1], [], []>} : vector<2x512xbf16>, vector<512x10xbf16>, vector<2x10xf32> -> vector<2x10xf32>
    %c0_170 = arith.constant 0 : index
    %c0_171 = arith.constant 0 : index
    %128 = vector.load %arg13[%c0_170, %c0_171] : memref<1x10xf32, #tpu.memory_space<vmem>>, vector<1x10xf32>
    %129 = vector.broadcast %128 : vector<1x10xf32> to vector<2x10xf32>
    %130 = arith.addf %127, %129 : vector<2x10xf32>
    %c0_172 = arith.constant 0 : index
    %c0_173 = arith.constant 0 : index
    %131 = vector.load %arg14[%c0_172, %c0_173] : memref<2x10xf32, #tpu.memory_space<vmem>>, vector<2x10xf32>
    tpu.vector_store %arg14[%c0_172, %c0_173], %130 {strides = array<i32>} : memref<2x10xf32, #tpu.memory_space<vmem>>, vector<2x10xf32>,
    return
  }
}

</mosaic_0001>

<bundles_post_ra>
// kernel: forward_pallas.1
= control target key start
LH: loop header
LB: loop body
LE: loop exit
PB: predicated region body
PF: predicated region fallthrough
CT: control target
= control target key end

     0   :  { %19 = vsyncpa [#allocation6], 0  ;;  %s22122_s0 = inlined_call_operand.vmem [shape: bf16[2,16,16,4], index: 0, kind: input, shape index: {}]   ;;  %s22123_s1 = inlined_call_operand.vmem [shape: bf16[36,64], index: 1, kind: input, shape index: {}]   ;;  %s22124_s2 = inlined_call_operand.vmem [shape: f32[1,64], index: 2, kind: input, shape index: {}]   ;;  %s22125_s3 = inlined_call_operand.hbm [shape: f32[1,64], index: 3, kind: input, shape index: {}]   ;;  %s22126_s4 = inlined_call_operand.vmem [shape: bf16[576,128], index: 4, kind: input, shape index: {}]   ;;  %s22127_s5 = inlined_call_operand.hbm [shape: f32[1,128], index: 5, kind: input, shape index: {}]   ;;  %s22128_s6 = inlined_call_operand.hbm [shape: f32[1,128], index: 6, kind: input, shape index: {}]   ;;  %s22129_s7 = inlined_call_operand.hbm [shape: bf16[1152,256], index: 7, kind: input, shape index: {}]   ;;  %s22130_s8 = inlined_call_operand.hbm [shape: f32[1,256], index: 8, kind: input, shape index: {}]   ;;  %s22131_s9 = inlined_call_operand.hbm [shape: f32[1,256], index: 9, kind: input, shape index: {}]   ;;  %s22132_s10 = inlined_call_operand.vmem [shape: bf16[256,512], index: 10, kind: input, shape index: {}]   ;;  %s22133_s11 = inlined_call_operand.hbm [shape: f32[1,512], index: 11, kind: input, shape index: {}]   ;;  %s22134_s12 = inlined_call_operand.vmem [shape: bf16[512,10], index: 12, kind: input, shape index: {}]   ;;  %s22135_s13 = inlined_call_operand.hbm [shape: f32[1,10], index: 13, kind: input, shape index: {}]   ;;  %s22136_s14 = inlined_call_operand.hbm [shape: f32[2,10], index: 14, kind: output, shape index: {}]  }
   0x1   :  { %20 = vsyncpa [#allocation9], 0 }
   0x2   :  { %21 = vsyncpa [#allocation12], 0 }
   0x3   :  { %22 = vsyncpa [#allocation15], 0 }
   0x4   :  { %23 = vsyncpa [#allocation18], 0 }
   0x5   :  { %24 = vsyncpa [#allocation7], 0  ;;  %s16696_s29 = smov [#allocation8]   ;;  %s16697_s15 = smov [#allocation11]  }
   0x6   :  { %s49_s30 = sshll.u32 %s16696_s29, 4  ;;  %s68_s16 = sshll.u32 %s16697_s15, 4  ;;  %s50_s30 = int_to_ptr.vmem [resolvable:$true] %s49_s30  ;;  %s69_s16 = int_to_ptr.vmem [resolvable:$true] %s68_s16 }
   0x7   :  { %s16512_s17 = scalar_lea.vmem %s50_s30, 16  ;;  %s16516_s18 = scalar_lea.vmem %s50_s30, 32 }
   0x8   :  { %p16513_p0 = scmp.ne.s32.totalorder %s50_s30, %s16512_s17  ;;  %p16517_p1 = scmp.lt.s32.totalorder %s50_s30, %s50_s30 }
   0x9   :  { %p16518_p2 = scmp.lt.s32.totalorder %s16516_s18, %s16512_s17 }
   0xb   :  { %p16519_p3 = por %p16518_p2, %p16517_p1 }
   0xd   :  { %p16520_p4 = pnand %p16519_p3, %p16513_p0 }
   0xf   :  { %16523 = shalt.err (!%p16520_p4)
}
  0x10   :  { %52 = dma.hbm_to_vmem [thread:$0]  %s22127_s5, 16, %s50_s30, [#allocation9]  }
  0x11   :  { %s16532_s21 = scalar_lea.vmem %s69_s16, 18432  ;;  %p16537_p6 = scmp.lt.s32.totalorder %s69_s16, %s69_s16 }
  0x12   :  { %p16533_p5 = scmp.ne.s32.totalorder %s69_s16, %s16532_s21  ;;  %p16538_p7 = scmp.lt.s32.totalorder %s16532_s21, %s16532_s21 }
  0x14   :  { %p16539_p8 = por %p16538_p7, %p16537_p6 }
  0x16   :  { %p16540_p9 = pnand %p16539_p8, %p16533_p5 }
  0x18   :  { %16543 = shalt.err (!%p16540_p9)
}
  0x19   :  { %s16698_s22 = smov 128   ;;  %s16699_s23 = smov 8  }
  0x1a   :  { %74 = dma.hbm_to_vmem [thread:$0]  %s22129_s7, 18432, %s69_s16, [#allocation12], %s16698_s22, %s16698_s22, %s16699_s23  }
  0x1b   :  { %s16700_s26 = smov [#allocation14]   ;;  %s16701_s28 = smov [#allocation5]  }
  0x1c   :  { %s91_s27 = sshll.u32 %s16700_s26, 4  ;;  %s37_s29 = sshll.u32 %s16701_s28, 4  ;;  %s92_s27 = int_to_ptr.vmem [resolvable:$true] %s91_s27  ;;  %s38_s29 = int_to_ptr.vmem [resolvable:$true] %s37_s29 }
  0x1d   :  { %s16552_s5 = scalar_lea.vmem %s92_s27, 32  ;;  %p16557_p11 = scmp.lt.s32.totalorder %s92_s27, %s92_s27 }
  0x1e   :  { %p16553_p10 = scmp.ne.s32.totalorder %s92_s27, %s16552_s5  ;;  %p16558_p12 = scmp.lt.s32.totalorder %s16552_s5, %s16552_s5 }
  0x20   :  { %p16559_p13 = por %p16558_p12, %p16557_p11 }
  0x22   :  { %p16560_p0 = pnand %p16559_p13, %p16553_p10 }
  0x24   :  { %16563 = shalt.err (!%p16560_p0)
}
  0x25   :  { %94 = dma.hbm_to_vmem [thread:$0]  %s22131_s9, 32, %s92_s27, [#allocation15]  }
  0x26   :  { %s16572_s17 = scalar_lea.vmem %s38_s29, 16  ;;  %s16576_s7 = scalar_lea.vmem %s38_s29, 32 }
  0x27   :  { %p16573_p1 = scmp.ne.s32.totalorder %s38_s29, %s16572_s17  ;;  %p16577_p2 = scmp.lt.s32.totalorder %s38_s29, %s38_s29 }
  0x28   :  { %p16578_p3 = scmp.lt.s32.totalorder %s16576_s7, %s16572_s17 }
  0x2a   :  { %p16579_p4 = por %p16578_p3, %p16577_p2 }
  0x2c   :  { %p16580_p5 = pnand %p16579_p4, %p16573_p1 }
  0x2e   :  { %16583 = shalt.err (!%p16580_p5)
}
  0x2f   :  { %40 = dma.hbm_to_vmem [thread:$0]  %s22125_s3, 16, %s38_s29, [#allocation6]  }
  0x30   :  { %s16702_s19 = smov [#allocation10]   ;;  %s16703_s21 = smov [#allocation13]  }
  0x31   :  { %s59_s20 = sshll.u32 %s16702_s19, 4  ;;  %s81_s22 = sshll.u32 %s16703_s21, 4  ;;  %s60_s20 = int_to_ptr.vmem [resolvable:$true] %s59_s20  ;;  %s82_s22 = int_to_ptr.vmem [resolvable:$true] %s81_s22 }
  0x32   :  { %s16592_s24 = scalar_lea.vmem %s60_s20, 16  ;;  %s16596_s9 = scalar_lea.vmem %s60_s20, 32 }
  0x33   :  { %p16593_p6 = scmp.ne.s32.totalorder %s60_s20, %s16592_s24  ;;  %p16597_p7 = scmp.lt.s32.totalorder %s60_s20, %s60_s20 }
  0x34   :  { %p16598_p8 = scmp.lt.s32.totalorder %s16596_s9, %s16592_s24 }
  0x36   :  { %p16599_p9 = por %p16598_p8, %p16597_p7 }
  0x38   :  { %p16600_p10 = pnand %p16599_p9, %p16593_p6 }
  0x3a   :  { %16603 = shalt.err (!%p16600_p10)
}
  0x3b   :  { %62 = dma.hbm_to_vmem [thread:$0]  %s22128_s6, 16, %s60_s20, [#allocation9]  }
  0x3c   :  { %s16612_s27 = scalar_lea.vmem %s82_s22, 32  ;;  %p16617_p12 = scmp.lt.s32.totalorder %s82_s22, %s82_s22 }
  0x3d   :  { %p16613_p11 = scmp.ne.s32.totalorder %s82_s22, %s16612_s27  ;;  %p16618_p13 = scmp.lt.s32.totalorder %s16612_s27, %s16612_s27 }
  0x3f   :  { %p16619_p0 = por %p16618_p13, %p16617_p12 }
  0x41   :  { %p16620_p1 = pnand %p16619_p0, %p16613_p11 }
  0x43   :  { %16623 = shalt.err (!%p16620_p1)
}
  0x44   :  { %84 = dma.hbm_to_vmem [thread:$0]  %s22130_s8, 32, %s82_s22, [#allocation12]  }
  0x45   :  { %s16704_s29 = smov [#allocation16]   ;;  %s16705_s30 = smov [#allocation17]  }
  0x46   :  { %s103_s5 = sshll.u32 %s16704_s29, 4  ;;  %s115_s15 = sshll.u32 %s16705_s30, 4  ;;  %s104_s5 = int_to_ptr.vmem [resolvable:$true] %s103_s5  ;;  %s116_s15 = int_to_ptr.vmem [resolvable:$true] %s115_s15 }
  0x47   :  { %s16632_s17 = scalar_lea.vmem %s104_s5, 64  ;;  %p16637_p3 = scmp.lt.s32.totalorder %s104_s5, %s104_s5 }
  0x48   :  { %p16633_p2 = scmp.ne.s32.totalorder %s104_s5, %s16632_s17  ;;  %p16638_p4 = scmp.lt.s32.totalorder %s16632_s17, %s16632_s17 }
  0x4a   :  { %p16639_p5 = por %p16638_p4, %p16637_p3 }
  0x4c   :  { %p16640_p6 = pnand %p16639_p5, %p16633_p2 }
  0x4e   :  { %16643 = shalt.err (!%p16640_p6)
}
  0x4f   :  { %106 = dma.hbm_to_vmem [thread:$0]  %s22133_s11, 64, %s104_s5, [#allocation15]  }
  0x50   :  { %s16652_s16 = scalar_lea.vmem %s116_s15, 16  ;;  %s16656_s8 = scalar_lea.vmem %s116_s15, 32 }
  0x51   :  { %p16653_p7 = scmp.ne.s32.totalorder %s116_s15, %s16652_s16  ;;  %p16657_p8 = scmp.lt.s32.totalorder %s116_s15, %s116_s15 }
  0x52   :  { %p16658_p9 = scmp.lt.s32.totalorder %s16656_s8, %s16652_s16 }
  0x54   :  { %p16659_p10 = por %p16658_p9, %p16657_p8 }
  0x56   :  { %p16660_p11 = pnand %p16659_p10, %p16653_p7 }
  0x58   :  { %16663 = shalt.err (!%p16660_p11)
}
  0x59   :  { %118 = dma.hbm_to_vmem [thread:$0]  %s22135_s13, 16, %s116_s15, [#allocation18]  }
  0x5a   :  { %16684 = dma.done.wait [#allocation6], 16  }
  0x5b   :  { %16685 = vsyncadd [#allocation6], 4294967280 }
  0x5c   :  { %16686 = dma.done.wait [#allocation9], 32  }
  0x5d   :  { %16687 = vsyncadd [#allocation9], 4294967264 }
  0x5e   :  { %16688 = dma.done.wait [#allocation12], 18464  }
  0x5f   :  { %16689 = vsyncadd [#allocation12], 4294948832 }
  0x60   :  { %16690 = dma.done.wait [#allocation15], 96  }
  0x61   :  { %16691 = vsyncadd [#allocation15], 4294967200 }
  0x62   :  { %16692 = dma.done.wait [#allocation18], 16  }
  0x63   :  { %16693 = vsyncadd [#allocation18], 4294967280  ;;  %vm22169_vm0 = vcmask 27648   ;;  %vm147_vm1 = vcmask 24576   ;;  %v22137_v0 = vmov 0   ;;  %vm22170_vm2 = vcmask 1046528  }
  0x64   :  { %145 = vst.msk [vmem:[#allocation2] sm:$0xf] %vm22169_vm0, %v22137_v0  ;;  %146 = vst.msk [vmem:[#allocation2 + $0x4] sm:$0xf] %vm22169_vm0, %v22137_v0  ;;  %vm22156_vm3 = vsmask.f32 256 }
  0x65   :  { %148 = vst.msk [vmem:[#allocation2 + $0x8] sm:$0x1] %vm147_vm1, %v22137_v0  ;;  %151 = vst.msk [vmem:[#allocation2 + $0x14] sm:$0x1] %vm147_vm1, %v22137_v0  ;;  %vm373_vm4 = vsmask.f32 4368 }
  0x66   :  { %149 = vst.msk [vmem:[#allocation2 + $0xc] sm:$0xf] %vm22169_vm0, %v22137_v0  ;;  %150 = vst.msk [vmem:[#allocation2 + $0x10] sm:$0xf] %vm22169_vm0, %v22137_v0  ;;  %vm22140_vm5 = vsmask.f32 7938 }
  0x67   :  { %152 = vst.msk [vmem:[#allocation2 + $0x18] sm:$0xf] %vm22169_vm0, %v22137_v0  ;;  %153 = vst.msk [vmem:[#allocation2 + $0x1c] sm:$0xf] %vm22169_vm0, %v22137_v0  ;;  %vm22171_vm6 = vsmask.f32 7424 }
  0x68   :  { %154 = vst.msk [vmem:[#allocation2 + $0x20] sm:$0x1] %vm147_vm1, %v22137_v0  ;;  %157 = vst.msk [vmem:[#allocation2 + $0x2c] sm:$0x1] %vm147_vm1, %v22137_v0  ;;  %v310_v1 = vld [vmem:[%s22122_s0 + $0x8] sm:$0xf] }
  0x69   :  { %155 = vst.msk [vmem:[#allocation2 + $0x24] sm:$0xf] %vm22169_vm0, %v22137_v0  ;;  %156 = vst.msk [vmem:[#allocation2 + $0x28] sm:$0xf] %vm22169_vm0, %v22137_v0  ;;  %v311_v2 = vld [vmem:[%s22122_s0 + $0xc] sm:$0xf] }
  0x6a   :  { %158 = vst.msk [vmem:[#allocation2 + $0x30] sm:$0xf] %vm22169_vm0, %v22137_v0  ;;  %159 = vst.msk [vmem:[#allocation2 + $0x34] sm:$0xf] %vm22169_vm0, %v22137_v0  ;;  %v308_v3 = vld [vmem:[%s22122_s0] sm:$0xf] }
  0x6b   :  { %160 = vst.msk [vmem:[#allocation2 + $0x38] sm:$0x1] %vm147_vm1, %v22137_v0  ;;  %163 = vst.msk [vmem:[#allocation2 + $0x44] sm:$0x1] %vm147_vm1, %v22137_v0  ;;  %v1246_v4 = vld [vmem:[#allocation2 + $0x4] sm:$0xf] }
  0x6c   :  { %161 = vst.msk [vmem:[#allocation2 + $0x3c] sm:$0xf] %vm22169_vm0, %v22137_v0  ;;  %162 = vst.msk [vmem:[#allocation2 + $0x40] sm:$0xf] %vm22169_vm0, %v22137_v0  ;;  %v1341_v5 = vld [vmem:[#allocation2] sm:$0xe] }
  0x6d   :  { %164 = vst.msk [vmem:[#allocation2 + $0x48] sm:$0xf] %vm22169_vm0, %v22137_v0  ;;  %165 = vst.msk [vmem:[#allocation2 + $0x4c] sm:$0xf] %vm22169_vm0, %v22137_v0  ;;  %v14019_v7 = vcombine.low %v1341_v5, %v1246_v4  ;;  %v1245_v8 = vld [vmem:[#allocation2] sm:$0xf] }
  0x6e   :  { %166 = vst.msk [vmem:[#allocation2 + $0x50] sm:$0x1] %vm147_vm1, %v22137_v0  ;;  %169 = vst.msk [vmem:[#allocation2 + $0x5c] sm:$0x1] %vm147_vm1, %v22137_v0  ;;  %v393_v9 = vshrl.u32 %v310_v1, 16  ;;  %v17054_v10 = vcombine.low %v1245_v8, %v1246_v4  ;;  %v396_v11 = vshll.u32 %v310_v1, 16 }
  0x6f   :  { %167 = vst.msk [vmem:[#allocation2 + $0x54] sm:$0xf] %vm22169_vm0, %v22137_v0  ;;  %168 = vst.msk [vmem:[#allocation2 + $0x58] sm:$0xf] %vm22169_vm0, %v22137_v0  ;;  %v401_v12 = vshrl.u32 %v311_v2, 16  ;;  %v404_v13 = vshll.u32 %v311_v2, 16 }
  0x70   :  { %170 = vst.msk [vmem:[#allocation2 + $0x60] sm:$0xf] %vm22169_vm0, %v22137_v0  ;;  %171 = vst.msk [vmem:[#allocation2 + $0x64] sm:$0xf] %vm22169_vm0, %v22137_v0  ;;  %v2432_v14 = vrot.slane %v14019_v7, 1  ;;  %v395_v17 = vrot.slane %v393_v9, 7 }
  0x71   :  { %172 = vst.msk [vmem:[#allocation2 + $0x68] sm:$0x1] %vm147_vm1, %v22137_v0  ;;  %175 = vst.msk [vmem:[#allocation2 + $0x74] sm:$0x1] %vm147_vm1, %v22137_v0  ;;  %v1028_v18 = vld [vmem:[#allocation2 + $0x18] sm:$0xf] }
  0x72   :  { %173 = vst.msk [vmem:[#allocation2 + $0x6c] sm:$0xf] %vm22169_vm0, %v22137_v0  ;;  %174 = vst.msk [vmem:[#allocation2 + $0x70] sm:$0xf] %vm22169_vm0, %v22137_v0  ;;  %v1888_v19 = vshrl.u32 %v17054_v10, 16  ;;  %v1890_v20 = vshll.u32 %v17054_v10, 16  ;;  %v398_v28 = vor.u32 %v396_v11, %v395_v17 }
  0x73   :  { %176 = vst.msk [vmem:[#allocation2 + $0x78] sm:$0xf] %vm22169_vm0, %v22137_v0  ;;  %177 = vst.msk [vmem:[#allocation2 + $0x7c] sm:$0xf] %vm22169_vm0, %v22137_v0  ;;  %v403_v21 = vrot.slane %v401_v12, 7  ;;  %v376_v24 = vshrl.u32 %v308_v3, 16 }
  0x74   :  { %178 = vst.msk [vmem:[#allocation2 + $0x80] sm:$0x1] %vm147_vm1, %v22137_v0  ;;  %181 = vst.msk [vmem:[#allocation2 + $0x8c] sm:$0x1] %vm147_vm1, %v22137_v0  ;;  %v309_v23 = vld [vmem:[%s22122_s0 + $0x4] sm:$0xf] }
  0x75   :  { %179 = vst.msk [vmem:[#allocation2 + $0x84] sm:$0xf] %vm22169_vm0, %v22137_v0  ;;  %180 = vst.msk [vmem:[#allocation2 + $0x88] sm:$0xf] %vm22169_vm0, %v22137_v0  ;;  %v399_v29 = vrot.slane %v395_v17, 4  ;;  %v1892_v31 = vrot.slane %v1890_v20, 1  ;;  %v406_v32 = vor.u32 %v404_v13, %v403_v21 }
  0x76   :  { %182 = vst.msk [vmem:[#allocation2 + $0x90] sm:$0xf] %vm22169_vm0, %v22137_v0  ;;  %183 = vst.msk [vmem:[#allocation2 + $0x94] sm:$0xf] %vm22169_vm0, %v22137_v0  ;;  %v312_v30 = vld [vmem:[%s22122_s0 + $0x10] sm:$0xf] }
  0x77   :  { %184 = vst.msk [vmem:[#allocation2 + $0x98] sm:$0x1] %vm147_vm1, %v22137_v0  ;;  %187 = vst.msk [vmem:[#allocation2 + $0xa4] sm:$0x1] %vm147_vm1, %v22137_v0  ;;  %v378_v33 = vrot.slane %v376_v24, 7  ;;  %v379_v34 = vshll.u32 %v308_v3, 16  ;;  %v1893_v41 = vor.u32 %v1892_v31, %v1888_v19 }
  0x78   :  { %185 = vst.msk [vmem:[#allocation2 + $0x9c] sm:$0xf] %vm22169_vm0, %v22137_v0  ;;  %186 = vst.msk [vmem:[#allocation2 + $0xa0] sm:$0xf] %vm22169_vm0, %v22137_v0  ;;  %v313_v35 = vld [vmem:[%s22122_s0 + $0x14] sm:$0xf] }
  0x79   :  { %188 = vst.msk [vmem:[#allocation2 + $0xa8] sm:$0xf] %vm22169_vm0, %v22137_v0  ;;  %189 = vst.msk [vmem:[#allocation2 + $0xac] sm:$0xf] %vm22169_vm0, %v22137_v0  ;;  %v384_v37 = vshrl.u32 %v309_v23, 16  ;;  %v387_v38 = vshll.u32 %v309_v23, 16  ;;  %v381_v43 = vor.u32 %v379_v34, %v378_v33 }
  0x7a   :  { %190 = vst.msk [vmem:[#allocation2 + $0xb0] sm:$0x1] %vm147_vm1, %v22137_v0  ;;  %193 = vst.msk [vmem:[#allocation2 + $0xbc] sm:$0x1] %vm147_vm1, %v22137_v0  ;;  %v1019_v39 = vld [vmem:[#allocation2 + $0xc] sm:$0xf] }
  0x7b   :  { %191 = vst.msk [vmem:[#allocation2 + $0xb4] sm:$0xf] %vm22169_vm0, %v22137_v0  ;;  %192 = vst.msk [vmem:[#allocation2 + $0xb8] sm:$0xf] %vm22169_vm0, %v22137_v0  ;;  %v410_v40 = vshrl.u32 %v312_v30, 16  ;;  %v382_v44 = vrot.slane %v378_v33, 4 }
  0x7c   :  { %194 = vst.msk [vmem:[#allocation2 + $0xc0] sm:$0xf] %vm22169_vm0, %v22137_v0  ;;  %195 = vst.msk [vmem:[#allocation2 + $0xc4] sm:$0xf] %vm22169_vm0, %v22137_v0  ;;  %v1032_v45 = vld [vmem:[#allocation2 + $0x20] sm:$0x1] }
  0x7d   :  { %196 = vst.msk [vmem:[#allocation2 + $0xc8] sm:$0x1] %vm147_vm1, %v22137_v0  ;;  %199 = vst.msk [vmem:[#allocation2 + $0xd4] sm:$0x1] %vm147_vm1, %v22137_v0  ;;  %v386_v46 = vrot.slane %v384_v37, 7  ;;  %v412_v47 = vrot.slane %v410_v40, 7 }
  0x7e   :  { %197 = vst.msk [vmem:[#allocation2 + $0xcc] sm:$0xf] %vm22169_vm0, %v22137_v0  ;;  %198 = vst.msk [vmem:[#allocation2 + $0xd0] sm:$0xf] %vm22169_vm0, %v22137_v0  ;;  %v413_v48 = vshll.u32 %v312_v30, 16  ;;  %v418_v49 = vshrl.u32 %v313_v35, 16 }
  0x7f   :  { %200 = vst.msk [vmem:[#allocation2 + $0xd8] sm:$0xf] %vm22169_vm0, %v22137_v0  ;;  %201 = vst.msk [vmem:[#allocation2 + $0xdc] sm:$0xf] %vm22169_vm0, %v22137_v0  ;;  %v314_v50 = vld [vmem:[%s22122_s0 + $0x18] sm:$0xf]  ;;  %v389_v56 = vor.u32 %v387_v38, %v386_v46 }
  0x80   :  { %202 = vst.msk [vmem:[#allocation2 + $0xe0] sm:$0x1] %vm147_vm1, %v22137_v0  ;;  %205 = vst.msk [vmem:[#allocation2 + $0xec] sm:$0x1] %vm147_vm1, %v22137_v0  ;;  %v421_v53 = vshll.u32 %v313_v35, 16  ;;  %v408_v55 = vrot.slane %v403_v21, 4  ;;  %v415_v57 = vor.u32 %v413_v48, %v412_v47 }
  0x81   :  { %203 = vst.msk [vmem:[#allocation2 + $0xe4] sm:$0xf] %vm22169_vm0, %v22137_v0  ;;  %204 = vst.msk [vmem:[#allocation2 + $0xe8] sm:$0xf] %vm22169_vm0, %v22137_v0  ;;  %v1035_v54 = vld [vmem:[#allocation2 + $0x24] sm:$0xf] }
  0x82   :  { %206 = vst.msk [vmem:[#allocation2 + $0xf0] sm:$0xf] %vm22169_vm0, %v22137_v0  ;;  %207 = vst.msk [vmem:[#allocation2 + $0xf4] sm:$0xf] %vm22169_vm0, %v22137_v0  ;;  %s16707_s30 = smov 4   ;;  %v416_v58 = vrot.slane %v412_v47, 4 }
  0x83   :  { %208 = vst.msk [vmem:[#allocation2 + $0xf8] sm:$0x1] %vm147_vm1, %v22137_v0  ;;  %211 = vst.msk [vmem:[#allocation2 + $0x104] sm:$0x1] %vm147_vm1, %v22137_v0  ;;  %v420_v59 = vrot.slane %v418_v49, 7  ;;  %v391_v62 = vrot.slane %v386_v46, 4 }
  0x84   :  { %209 = vst.msk [vmem:[#allocation2 + $0xfc] sm:$0xf] %vm22169_vm0, %v22137_v0  ;;  %210 = vst.msk [vmem:[#allocation2 + $0x100] sm:$0xf] %vm22169_vm0, %v22137_v0  ;;  %v1025_v61 = vld [vmem:[#allocation2 + $0x14] sm:$0x1] }
  0x85   :  { %212 = vst.msk [vmem:[#allocation2 + $0x108] sm:$0xf] %vm22169_vm0, %v22137_v0  ;;  %213 = vst.msk [vmem:[#allocation2 + $0x10c] sm:$0xf] %vm22169_vm0, %v22137_v0  ;;  %v1039_v1 = vld [vmem:[#allocation2 + $0x2c] sm:$0x1]  ;;  %v423_v5 = vor.u32 %v421_v53, %v420_v59 }
  0x86   :  { %214 = vst.msk [vmem:[#allocation2 + $0x110] sm:$0x1] %vm147_vm1, %v22137_v0  ;;  %217 = vst.msk [vmem:[#allocation2 + $0x11c] sm:$0x1] %vm147_vm1, %v22137_v0  ;;  %v427_v2 = vshrl.u32 %v314_v50, 16  ;;  %v430_v3 = vshll.u32 %v314_v50, 16 }
  0x87   :  { %215 = vst.msk [vmem:[#allocation2 + $0x114] sm:$0xf] %vm22169_vm0, %v22137_v0  ;;  %216 = vst.msk [vmem:[#allocation2 + $0x118] sm:$0xf] %vm22169_vm0, %v22137_v0  ;;  %v425_v7 = vrot.slane %v420_v59, 4  ;;  %s16708_s6 = smov 12  }
  0x88   :  { %218 = vst.msk [vmem:[#allocation2 + $0x120] sm:$0xf] %vm22169_vm0, %v22137_v0  ;;  %219 = vst.msk [vmem:[#allocation2 + $0x124] sm:$0xf] %vm22169_vm0, %v22137_v0  ;;  %v17111_v9 = vld [vmem:[%s22122_s0 + $0x1c] sm:$0xf] }
  0x89   :  { %220 = vst.msk [vmem:[#allocation2 + $0x128] sm:$0x1] %vm147_vm1, %v22137_v0  ;;  %223 = vst.msk [vmem:[#allocation2 + $0x134] sm:$0x1] %vm147_vm1, %v22137_v0  ;;  %v17113_v11 = vrot.slane %v427_v2, 7  ;;  %v438_v33 = vshll.u32 %v17111_v9, 16 }
  0x8a   :  { %221 = vst.msk [vmem:[#allocation2 + $0x12c] sm:$0xf] %vm22169_vm0, %v22137_v0  ;;  %222 = vst.msk [vmem:[#allocation2 + $0x130] sm:$0xf] %vm22169_vm0, %v22137_v0  ;;  %v1042_v12 = vld [vmem:[#allocation2 + $0x30] sm:$0xf] }
  0x8b   :  { %224 = vst.msk [vmem:[#allocation2 + $0x138] sm:$0xf] %vm22169_vm0, %v22137_v0  ;;  %225 = vst.msk [vmem:[#allocation2 + $0x13c] sm:$0xf] %vm22169_vm0, %v22137_v0  ;;  %v432_v21 = vor.u32 %v430_v3, %v17113_v11  ;;  %s16709_s7 = smov 24   ;;  %s16710_s16 = smov 20  }
  0x8c   :  { %226 = vst.msk [vmem:[#allocation2 + $0x140] sm:$0x1] %vm147_vm1, %v22137_v0  ;;  %229 = vst.msk [vmem:[#allocation2 + $0x14c] sm:$0x1] %vm147_vm1, %v22137_v0  ;;  %s16711_s8 = smov 32   ;;  %s16712_s18 = smov 16  }
  0x8d   :  { %227 = vst.msk [vmem:[#allocation2 + $0x144] sm:$0xf] %vm22169_vm0, %v22137_v0  ;;  %228 = vst.msk [vmem:[#allocation2 + $0x148] sm:$0xf] %vm22169_vm0, %v22137_v0  ;;  %s16713_s13 = smov 28   ;;  %vm5245_vm10 = vcmask 1041408  }
  0x8e   :  { %230 = vst.msk [vmem:[#allocation2 + $0x150] sm:$0xf] %vm22169_vm0, %v22137_v0  ;;  %231 = vst.msk [vmem:[#allocation2 + $0x154] sm:$0xf] %vm22169_vm0, %v22137_v0  ;;  %vm22174_vm11 = vcmask 31744   ;;  %vm22168_vm12 = vcmask 64512  }
  0x8f   :  { %232 = vst.msk [vmem:[#allocation2 + $0x158] sm:$0x1] %vm147_vm1, %v22137_v0  ;;  %235 = vst.msk [vmem:[#allocation2 + $0x164] sm:$0x1] %vm147_vm1, %v22137_v0  ;;  %vm22166_vm13 = vcmask 97280   ;;  %vm22165_vm14 = vcmask 130048  }
  0x90   :  { %233 = vst.msk [vmem:[#allocation2 + $0x15c] sm:$0xf] %vm22169_vm0, %v22137_v0  ;;  %234 = vst.msk [vmem:[#allocation2 + $0x160] sm:$0xf] %vm22169_vm0, %v22137_v0  ;;  %vm22167_vm15 = vcmask 162816  }
  0x91   :  { %236 = vst.msk [vmem:[#allocation2 + $0x168] sm:$0xf] %vm22169_vm0, %v22137_v0  ;;  %237 = vst.msk [vmem:[#allocation2 + $0x16c] sm:$0xf] %vm22169_vm0, %v22137_v0  ;;  %v20401_v60 = vld [vmem:[%s22124_s2] ss:$0 sm:$0xff] }
  0x92   :  { %238 = vst.msk [vmem:[#allocation2 + $0x170] sm:$0x1] %vm147_vm1, %v22137_v0  ;;  %241 = vst.msk [vmem:[#allocation2 + $0x17c] sm:$0x1] %vm147_vm1, %v22137_v0 }
  0x93   :  { %239 = vst.msk [vmem:[#allocation2 + $0x174] sm:$0xf] %vm22169_vm0, %v22137_v0  ;;  %240 = vst.msk [vmem:[#allocation2 + $0x178] sm:$0xf] %vm22169_vm0, %v22137_v0 }
  0x94   :  { %242 = vst.msk [vmem:[#allocation2 + $0x180] sm:$0xf] %vm22169_vm0, %v22137_v0  ;;  %243 = vst.msk [vmem:[#allocation2 + $0x184] sm:$0xf] %vm22169_vm0, %v22137_v0 }
  0x95   :  { %244 = vst.msk [vmem:[#allocation2 + $0x188] sm:$0x1] %vm147_vm1, %v22137_v0  ;;  %247 = vst.msk [vmem:[#allocation2 + $0x194] sm:$0x1] %vm147_vm1, %v22137_v0 }
  0x96   :  { %245 = vst.msk [vmem:[#allocation2 + $0x18c] sm:$0xf] %vm22169_vm0, %v22137_v0  ;;  %246 = vst.msk [vmem:[#allocation2 + $0x190] sm:$0xf] %vm22169_vm0, %v22137_v0 }
  0x97   :  { %248 = vst.msk [vmem:[#allocation2 + $0x198] sm:$0xf] %vm22169_vm0, %v22137_v0  ;;  %249 = vst.msk [vmem:[#allocation2 + $0x19c] sm:$0xf] %vm22169_vm0, %v22137_v0 }
  0x98   :  { %250 = vst.msk [vmem:[#allocation2 + $0x1a0] sm:$0x1] %vm147_vm1, %v22137_v0  ;;  %253 = vst.msk [vmem:[#allocation2 + $0x1ac] sm:$0x1] %vm147_vm1, %v22137_v0 }
  0x99   :  { %251 = vst.msk [vmem:[#allocation2 + $0x1a4] sm:$0xf] %vm22169_vm0, %v22137_v0  ;;  %252 = vst.msk [vmem:[#allocation2 + $0x1a8] sm:$0xf] %vm22169_vm0, %v22137_v0 }
  0x9a   :  { %296 = vst [vmem:[#allocation4] sm:$0x7] %v22137_v0  ;;  %297 = vst [vmem:[#allocation4 + $0x4] sm:$0x7] %v22137_v0 }
  0x9b   :  { %298 = vst [vmem:[#allocation4 + $0x8] sm:$0x7] %v22137_v0  ;;  %299 = vst [vmem:[#allocation4 + $0xc] sm:$0x7] %v22137_v0 }
  0x9c   :  { %300 = vst [vmem:[#allocation4 + $0x10] sm:$0x7] %v22137_v0  ;;  %301 = vst [vmem:[#allocation4 + $0x14] sm:$0x7] %v22137_v0 }
  0x9d   :  { %302 = vst [vmem:[#allocation4 + $0x18] sm:$0x7] %v22137_v0  ;;  %303 = vst [vmem:[#allocation4 + $0x1c] sm:$0x7] %v22137_v0 }
  0x9e   :  { %304 = vst [vmem:[#allocation4 + $0x20] sm:$0x7] %v22137_v0  ;;  %305 = vst [vmem:[#allocation4 + $0x24] sm:$0x7] %v22137_v0 }
  0x9f   :  { %306 = vst [vmem:[#allocation4 + $0x28] sm:$0x7] %v22137_v0  ;;  %307 = vst [vmem:[#allocation4 + $0x2c] sm:$0x7] %v22137_v0 }
  0xa0   :  { %v15638_v6 = vld [vmem:[#allocation2 + $0x8] ss:$0 sps:$4 sm:$0x11]   ;;  %vm17060_vm7 = vmand %vm22169_vm0, %vm22140_vm5  ;;  %vm22157_vm5 = vcmask 293888  }
  0xa1   :  { %v2433_v15 = vrot.slane %v15638_v6, 1  ;;  %v1895_v16 = vshll.u32 %v15638_v6, 16  ;;  %vm17070_vm8 = vmor %vm22156_vm3, %vm373_vm4  ;;  %v1029_v36 = vsel %vm17060_vm7, %v398_v28, %v1028_v18  ;;  %v1020_v52 = vsel %vm17060_vm7, %v381_v43, %v1019_v39 }
  0xa2   :  { %v407_v42 = vsel %vm17070_vm8, %v399_v29, %v406_v32  ;;  %1030 = vst [vmem:[#allocation2 + $0x18] sm:$0xf] %v1029_v36  ;;  %1021 = vst [vmem:[#allocation2 + $0xc] sm:$0xf] %v1020_v52  ;;  %v390_v4 = vsel %vm17070_vm8, %v382_v44, %v389_v56  ;;  %v1036_v6 = vsel %vm17060_vm7, %v415_v57, %v1035_v54  ;;  %vm22176_vm4 = vcmask 228352  }
  0xa3   :  { %v2434_v25 = vsel %vm22170_vm2, %v2432_v14, %v2433_v15  ;;  %v1897_v26 = vrot.slane %v1895_v16, 1  ;;  %1031 = vst.msk [vmem:[#allocation2 + $0x1c] sm:$0xf] %vm22169_vm0, %v407_v42  ;;  %vm17095_vm9 = vmand %vm147_vm1, %vm22156_vm3  ;;  %v424_v15 = vsel %vm17070_vm8, %v416_v58, %v423_v5  ;;  %v1043_v28 = vsel %vm17060_vm7, %v432_v21, %v1042_v12 }
  0xa4   :  { %2528 = vrot.lane.b32.xlu1 %v2434_v25, %s16699_s23  ;;  %v1033_v63 = vsel %vm17095_vm9, %v408_v55, %v1032_v45  ;;  %1022 = vst.msk [vmem:[#allocation2 + $0x10] sm:$0xf] %vm22169_vm0, %v390_v4  ;;  %1037 = vst [vmem:[#allocation2 + $0x24] sm:$0xf] %v1036_v6  ;;  %v1026_v8 = vsel %vm17095_vm9, %v391_v62, %v1025_v61  ;;  %v1040_v17 = vsel %vm17095_vm9, %v425_v7, %v1039_v1  ;;  %vm22177_vm1 = vcmask 195584  }
  0xa5   :  { %v1898_v51 = vsel %vm22171_vm6, %v1893_v41, %v1897_v26  ;;  %1034 = vst [vmem:[#allocation2 + $0x20] sm:$0x1] %v1033_v63  ;;  %1027 = vst [vmem:[#allocation2 + $0x14] sm:$0x1] %v1026_v8  ;;  %v435_v26 = vshrl.u32 %v17111_v9, 16  ;;  %vm22162_vm3 = vcmask 519168  }
  0xa6   :  { %2271 = vrot.lane.b32.xlu0 %v1898_v51, %s16707_s30  ;;  %1038 = vst.msk [vmem:[#allocation2 + $0x28] sm:$0xf] %vm22169_vm0, %v424_v15  ;;  %1041 = vst [vmem:[#allocation2 + $0x2c] sm:$0x1] %v1040_v17 }
  0xa7   :  { %1044 = vst [vmem:[#allocation2 + $0x30] sm:$0xf] %v1043_v28 }
  0xa9   :  { %v1375_v13 = vld [vmem:[#allocation2 + $0x18] sm:$0xf]  ;;  %v1373_v30 = vld [vmem:[#allocation2 + $0xc] sm:$0xf] }
  0xaa   :  { %v1470_v14 = vld [vmem:[#allocation2 + $0x18] sm:$0xe]  ;;  %v1376_v18 = vld [vmem:[#allocation2 + $0x1c] sm:$0xf]  ;;  %v1469_v31 = vld [vmem:[#allocation2 + $0xc] sm:$0xe] }
  0xab   :  { %v1502_v16 = vld [vmem:[#allocation2 + $0x18] sm:$0xf]  ;;  %v1503_v19 = vld [vmem:[#allocation2 + $0x1c] sm:$0xf]  ;;  %v14052_v23 = vcombine.low %v1375_v13, %v1376_v18  ;;  %v14116_v24 = vcombine.low %v1470_v14, %v1376_v18  ;;  %v1342_v35 = vld [vmem:[#allocation2 + $0xc] sm:$0xe] }
  0xac   :  { %v1598_v20 = vld [vmem:[#allocation2 + $0x18] sm:$0xe]  ;;  %v17121_v25 = vcombine.low %v1502_v16, %v1503_v19  ;;  %v1374_v37 = vld [vmem:[#allocation2 + $0x10] sm:$0xf]  ;;  %v1504_v38 = vld [vmem:[#allocation2 + $0x24] sm:$0xf] }
  0xad   :  { %v2927_v29 = vshll.u32 %v14052_v23, 16  ;;  %2754 = vrot.lane.b32.xlu1 %v14052_v23, %s16708_s6  ;;  %v14211_v32 = vcombine.low %v1598_v20, %v1503_v19  ;;  %v3459_v36 = vrot.slane %v14116_v24, 1  ;;  %v1599_v39 = vld [vmem:[#allocation2 + $0x24] sm:$0xe]  ;;  %v1247_v40 = vld [vmem:[#allocation2 + $0xc] sm:$0xf]  ;;  %v17129_v42 = vcombine.low %v1373_v30, %v1374_v37 }
  0xae   :  { %v3939_v34 = vshll.u32 %v17121_v25, 16  ;;  %v15653_v41 = vld [vmem:[#allocation2 + $0x20] ss:$0 sps:$4 sm:$0x11]   ;;  %v14115_v43 = vcombine.low %v1469_v31, %v1374_v37  ;;  %v1248_v44 = vld [vmem:[#allocation2 + $0x10] sm:$0xf] }
  0xaf   :  { %v1249_v45 = vld [vmem:[#allocation2 + $0x18] sm:$0xf]  ;;  %v17131_v46 = vld [vmem:[#allocation2 + $0x1c] sm:$0xf]  ;;  %v1505_v47 = vld [vmem:[#allocation2 + $0x28] sm:$0xf]  ;;  %v14020_v49 = vcombine.low %v1342_v35, %v1248_v44  ;;  %2752 = vrot.lane.b32.xlu0 %v17129_v42, %s16708_s6  ;;  %v17139_v61 = vcombine.low %v1247_v40, %v1248_v44 }
  0xb0   :  { %v17133_v48 = vld [vmem:[#allocation2 + $0x14] ss:$0 sps:$4 sm:$0x11]   ;;  %v4480_v50 = vrot.slane %v14211_v32, 1  ;;  %v14148_v51 = vcombine.low %v1504_v38, %v1505_v47  ;;  %v14212_v52 = vcombine.low %v1599_v39, %v1505_v47  ;;  %v3456_v54 = vrot.slane %v14115_v43, 1 }
  0xb1   :  { %v15652_v53 = vld [vmem:[#allocation2 + $0x14] ss:$0 sps:$4 sm:$0x11]   ;;  %v2925_v55 = vshrl.u32 %v14052_v23, 16  ;;  %v2435_v56 = vrot.slane %v14020_v49, 1  ;;  %v2436_v57 = vrot.slane %v17133_v48, 1  ;;  %v17145_v5 = vcombine.low %v1249_v45, %v17131_v46 }
  0xb2   :  { %v2929_v58 = vrot.slane %v2927_v29, 1  ;;  %v3951_v59 = vshll.u32 %v14148_v51, 16  ;;  %3778 = vrot.lane.b32.xlu1 %v14148_v51, %s16709_s7  ;;  %v3457_v62 = vrot.slane %v15652_v53, 1  ;;  %v17141_v63 = vld [vmem:[#allocation2 + $0x20] ss:$0 sps:$4 sm:$0x11]  }
  0xb3   :  { %v2932_v1 = vshll.u32 %v15653_v41, 16  ;;  %v2437_v2 = vsel %vm22170_vm2, %v2435_v56, %v2436_v57  ;;  %v3460_v3 = vrot.slane %v15653_v41, 1  ;;  %v15655_v4 = vld [vmem:[#allocation2 + $0x2c] ss:$0 sps:$4 sm:$0x11]   ;;  %v2915_v6 = vshll.u32 %v17129_v42, 16  ;;  %3776 = vrot.lane.b32.xlu0 %v17121_v25, %s16709_s7 }
  0xb4   :  { %v3458_v7 = vsel %vm22170_vm2, %v3456_v54, %v3457_v62  ;;  %v4481_v8 = vrot.slane %v17141_v63, 1  ;;  %v4483_v12 = vrot.slane %v14212_v52, 1  ;;  %v4484_v14 = vrot.slane %v15655_v4, 1  ;;  %v17154_v20 = vld [vmem:[#allocation2 + $0x20] ss:$0 sps:$4 sm:$0x11]  }
  0xb5   :  { %v2934_v13 = vrot.slane %v2932_v1, 1  ;;  %v3949_v15 = vshrl.u32 %v14148_v51, 16  ;;  %v3953_v16 = vrot.slane %v3951_v59, 1  ;;  %v2930_v17 = vor.u32 %v2929_v58, %v2925_v55  ;;  %v1251_v23 = vld [vmem:[#allocation2 + $0x24] sm:$0xf] }
  0xb6   :  { %2530 = vrot.lane.b32.xlu1 %v2437_v2, %s16699_s23  ;;  %v3956_v18 = vshll.u32 %v15655_v4, 16  ;;  %v1902_v19 = vshll.u32 %v17139_v61, 16  ;;  %v3461_v21 = vsel %vm22170_vm2, %v3459_v36, %v3460_v3  ;;  %v17157_v24 = vld [vmem:[#allocation2 + $0x28] sm:$0xf]  ;;  %v1900_v28 = vshrl.u32 %v17139_v61, 16 }
  0xb7   :  { %3552 = vrot.lane.b32.xlu0 %v3458_v7, %s16710_s16  ;;  %v1907_v30 = vshll.u32 %v17133_v48, 16  ;;  %v1914_v31 = vshll.u32 %v17145_v5, 16  ;;  %v4482_v32 = vsel %vm22170_vm2, %v4480_v50, %v4481_v8  ;;  %v2913_v35 = vshrl.u32 %v17129_v42, 16  ;;  %v17171_v43 = vld [vmem:[#allocation2 + $0x2c] ss:$0 sps:$4 sm:$0x11]  }
  0xb8   :  { %v1904_v29 = vrot.slane %v1902_v19, 1  ;;  %v2917_v37 = vrot.slane %v2915_v6, 1  ;;  %v2920_v38 = vshll.u32 %v15652_v53, 16  ;;  %v2935_v36 = vsel %vm22171_vm6, %v2930_v17, %v2934_v13  ;;  %v1343_v52 = vld [vmem:[#allocation2 + $0x18] sm:$0xe] }
  0xb9   :  { %v4485_v39 = vsel %vm22170_vm2, %v4483_v12, %v4484_v14  ;;  %v3954_v40 = vor.u32 %v3953_v16, %v3949_v15  ;;  %v17169_v41 = vcombine.low %v1251_v23, %v17157_v24  ;;  %v3958_v44 = vrot.slane %v3956_v18, 1  ;;  %v1344_v62 = vld [vmem:[#allocation2 + $0x24] sm:$0xe]  ;;  %v17191_v7 = vld [vmem:[#allocation2 + $0x28] sm:$0xf] }
  0xba   :  { %3554 = vrot.lane.b32.xlu1 %v3461_v21, %s16710_s16  ;;  %v1912_v45 = vshrl.u32 %v17145_v5, 16  ;;  %v1916_v47 = vrot.slane %v1914_v31, 1  ;;  %v1919_v42 = vshll.u32 %v17154_v20, 16  ;;  %v1905_v48 = vor.u32 %v1904_v29, %v1900_v28  ;;  %v1377_v6 = vld [vmem:[#allocation2 + $0x24] sm:$0xf] }
  0xbb   :  { %4576 = vrot.lane.b32.xlu0 %v4482_v32, %s16711_s8  ;;  %v1909_v49 = vrot.slane %v1907_v30, 1  ;;  %v2918_v50 = vor.u32 %v2917_v37, %v2913_v35  ;;  %v1926_v51 = vshll.u32 %v17169_v41, 16  ;;  %v2922_v53 = vrot.slane %v2920_v38, 1  ;;  %v1046_v15 = vld [vmem:[#allocation2 + $0x38] sm:$0x1] }
  0xbc   :  { %v3937_v54 = vshrl.u32 %v17121_v25, 16  ;;  %v3941_v55 = vrot.slane %v3939_v34, 1  ;;  %v3944_v56 = vshll.u32 %v17141_v63, 16  ;;  %v1924_v57 = vshrl.u32 %v17169_v41, 16  ;;  %v317_v18 = vld [vmem:[%s22122_s0 + $0x24] sm:$0xf] }
  0xbd   :  { %v1928_v58 = vrot.slane %v1926_v51, 1  ;;  %v1931_v59 = vshll.u32 %v17171_v43, 16  ;;  %v3959_v1 = vsel %vm22171_vm6, %v3954_v40, %v3958_v44  ;;  %v1917_v2 = vor.u32 %v1916_v47, %v1912_v45  ;;  %v318_v28 = vld [vmem:[%s22122_s0 + $0x28] sm:$0xf]  ;;  %v319_v31 = vld [vmem:[%s22122_s0 + $0x2c] sm:$0xf] }
  0xbe   :  { %3298 = vrot.lane.b32.xlu1 %v2935_v36, %s16712_s18  ;;  %v1921_v3 = vrot.slane %v1919_v42, 1  ;;  %v14021_v4 = vcombine.low %v1343_v52, %v17131_v46  ;;  %v1910_v25 = vsel %vm22171_vm6, %v1905_v48, %v1909_v49  ;;  %v433_v34 = vrot.slane %v17113_v11, 4  ;;  %v316_v46 = vld [vmem:[%s22122_s0 + $0x20] sm:$0xf]  ;;  %v1053_v51 = vld [vmem:[#allocation2 + $0x44] sm:$0x1] }
  0xbf   :  { %4578 = vrot.lane.b32.xlu0 %v4485_v39, %s16711_s8  ;;  %v437_v63 = vrot.slane %v435_v26, 7  ;;  %v2923_v8 = vsel %vm22171_vm6, %v2918_v50, %v2922_v53  ;;  %v3942_v12 = vor.u32 %v3941_v55, %v3937_v54  ;;  %v3946_v13 = vrot.slane %v3944_v56, 1  ;;  %v17225_v36 = vld [vmem:[#allocation2 + $0x2c] ss:$0 sps:$4 sm:$0x11]  }
  0xc0   :  { %v14022_v14 = vcombine.low %v1344_v62, %v17157_v24  ;;  %v1929_v11 = vor.u32 %v1928_v58, %v1924_v57  ;;  %v1933_v16 = vrot.slane %v1931_v59, 1  ;;  %v1922_v19 = vsel %vm22171_vm6, %v1917_v2, %v1921_v3  ;;  %v1056_v58 = vld [vmem:[#allocation2 + $0x48] sm:$0xf]  ;;  %v1379_v59 = vld [vmem:[#allocation2 + $0x30] sm:$0xf] }
  0xc1   :  { %v440_v26 = vor.u32 %v438_v33, %v437_v63  ;;  %v442_v17 = vrot.slane %v437_v63, 4  ;;  %v2442_v21 = vrot.slane %v17171_v43, 1  ;;  %v2438_v23 = vrot.slane %v14021_v4, 1  ;;  %v1049_v43 = vld [vmem:[#allocation2 + $0x3c] sm:$0xf] }
  0xc2   :  { %4322 = vrot.lane.b32.xlu1 %v3959_v1, %s16713_s13  ;;  %v17207_v24 = vcombine.low %v1377_v6, %v17191_v7  ;;  %v2439_v9 = vrot.slane %v17154_v20, 1  ;;  %v444_v30 = vshrl.u32 %v316_v46, 16  ;;  %v3947_v32 = vsel %vm22171_vm6, %v3942_v12, %v3946_v13  ;;  %v1472_v62 = vld [vmem:[#allocation2 + $0x30] sm:$0xe]  ;;  %v1471_v6 = vld [vmem:[#allocation2 + $0x24] sm:$0xe] }
  0xc3   :  { %2273 = vrot.lane.b32.xlu0 %v1910_v25, %s16707_s30  ;;  %v441_v33 = vsel %vm17070_vm8, %v433_v34, %v440_v26  ;;  %v1047_v29 = vsel %vm17095_vm9, %v442_v17, %v1046_v15  ;;  %v2441_v35 = vrot.slane %v14022_v14, 1  ;;  %v447_v37 = vshll.u32 %v316_v46, 16  ;;  %v1060_v12 = vld [vmem:[#allocation2 + $0x50] sm:$0x1] }
  0xc4   :  { %1045 = vst.msk [vmem:[#allocation2 + $0x34] sm:$0xf] %vm22169_vm0, %v441_v33  ;;  %1048 = vst [vmem:[#allocation2 + $0x38] sm:$0x1] %v1047_v29  ;;  %v452_v38 = vshrl.u32 %v317_v18, 16  ;;  %v1934_v20 = vsel %vm22171_vm6, %v1929_v11, %v1933_v16  ;;  %v446_v39 = vrot.slane %v444_v30, 7  ;;  %v2440_v16 = vsel %vm22170_vm2, %v2438_v23, %v2439_v9 }
  0xc5   :  { %v455_v40 = vshll.u32 %v317_v18, 16  ;;  %v461_v44 = vshrl.u32 %v318_v28, 16  ;;  %v2939_v45 = vshll.u32 %v17207_v24, 16  ;;  %v464_v42 = vshll.u32 %v318_v28, 16  ;;  %v1506_v46 = vld [vmem:[#allocation2 + $0x30] sm:$0xf] }
  0xc6   :  { %2275 = vrot.lane.b32.xlu1 %v1922_v19, %s16707_s30  ;;  %v454_v47 = vrot.slane %v452_v38, 7  ;;  %v469_v48 = vshrl.u32 %v319_v31, 16  ;;  %v449_v49 = vor.u32 %v447_v37, %v446_v39  ;;  %v450_v50 = vrot.slane %v446_v39, 4 }
  0xc7   :  { %3296 = vrot.lane.b32.xlu0 %v2923_v8, %s16712_s18  ;;  %v463_v52 = vrot.slane %v461_v44, 7  ;;  %v472_v53 = vshll.u32 %v319_v31, 16  ;;  %v2443_v54 = vsel %vm22170_vm2, %v2441_v35, %v2442_v21  ;;  %v2937_v1 = vshrl.u32 %v17207_v24, 16  ;;  %v1253_v21 = vld [vmem:[#allocation2 + $0x30] sm:$0xf] }
  0xc8   :  { %v457_v55 = vor.u32 %v455_v40, %v454_v47  ;;  %v459_v56 = vrot.slane %v454_v47, 4  ;;  %v471_v57 = vrot.slane %v469_v48, 7  ;;  %v1050_v2 = vsel %vm17060_vm7, %v449_v49, %v1049_v43 }
  0xc9   :  { %v466_v3 = vor.u32 %v464_v42, %v463_v52  ;;  %v467_v4 = vrot.slane %v463_v52, 4  ;;  %1051 = vst [vmem:[#allocation2 + $0x3c] sm:$0xf] %v1050_v2  ;;  %v2941_v14 = vrot.slane %v2939_v45, 1  ;;  %v2944_v15 = vshll.u32 %v17225_v36, 16 }
  0xca   :  { %2277 = vrot.lane.b32.xlu1 %v1934_v20, %s16707_s30  ;;  %v458_v25 = vsel %vm17070_vm8, %v450_v50, %v457_v55  ;;  %v1054_v34 = vsel %vm17095_vm9, %v459_v56, %v1053_v51  ;;  %v474_v63 = vor.u32 %v472_v53, %v471_v57  ;;  %v476_v8 = vrot.slane %v471_v57, 4  ;;  %v1600_v50 = vld [vmem:[#allocation2 + $0x30] sm:$0xe] }
  0xcb   :  { %4320 = vrot.lane.b32.xlu0 %v3947_v32, %s16713_s13  ;;  %v1380_v13 = vld [vmem:[#allocation2 + $0x34] sm:$0xf]  ;;  %1052 = vst.msk [vmem:[#allocation2 + $0x40] sm:$0xf] %vm22169_vm0, %v458_v25  ;;  %1055 = vst [vmem:[#allocation2 + $0x44] sm:$0x1] %v1054_v34  ;;  %v1057_v11 = vsel %vm17060_vm7, %v466_v3, %v1056_v58  ;;  %v14117_v18 = vcombine.low %v1471_v6, %v17191_v7  ;;  %v2942_v37 = vor.u32 %v2941_v14, %v2937_v1 }
  0xcc   :  { %v14054_v26 = vcombine.low %v1379_v59, %v1380_v13  ;;  %v15666_v17 = vld [vmem:[#allocation2 + $0x38] ss:$0 sps:$4 sm:$0x11]   ;;  %1058 = vst [vmem:[#allocation2 + $0x48] sm:$0xf] %v1057_v11  ;;  %v475_v33 = vsel %vm17070_vm8, %v467_v4, %v474_v63  ;;  %v1061_v29 = vsel %vm17095_vm9, %v476_v8, %v1060_v12  ;;  %v14118_v23 = vcombine.low %v1472_v62, %v1380_v13 }
  0xcd   :  { %v17246_v19 = vld [vmem:[#allocation2 + $0x34] sm:$0xf]  ;;  %v2956_v31 = vshll.u32 %v15666_v17, 16  ;;  %1059 = vst.msk [vmem:[#allocation2 + $0x4c] sm:$0xf] %vm22169_vm0, %v475_v33  ;;  %v2946_v7 = vrot.slane %v2944_v15, 1 }
  0xce   :  { %2534 = vrot.lane.b32.xlu1 %v2443_v54, %s16699_s23  ;;  %v17248_v28 = vld [vmem:[#allocation2 + $0x34] sm:$0xf]  ;;  %v2951_v30 = vshll.u32 %v14054_v26, 16  ;;  %v2949_v9 = vshrl.u32 %v14054_v26, 16  ;;  %1062 = vst [vmem:[#allocation2 + $0x50] sm:$0x1] %v1061_v29  ;;  %v14149_v38 = vcombine.low %v1506_v46, %v17246_v19  ;;  %v14213_v25 = vcombine.low %v1600_v50, %v17246_v19 }
  0xcf   :  { %2532 = vrot.lane.b32.xlu0 %v2440_v16, %s16699_s23  ;;  %v2958_v35 = vrot.slane %v2956_v31, 1  ;;  %v3462_v20 = vrot.slane %v14117_v18, 1  ;;  %v17259_v40 = vcombine.low %v1253_v21, %v17248_v28  ;;  %v3465_v44 = vrot.slane %v14118_v23, 1  ;;  %v15673_v42 = vld [vmem:[#allocation2 + $0x38] ss:$0 sps:$4 sm:$0x11]  }
  0xd0   :  { %v2953_v32 = vrot.slane %v2951_v30, 1  ;;  %v1508_v39 = vld [vmem:[#allocation2 + $0x3c] sm:$0xf]  ;;  %v3466_v45 = vrot.slane %v15666_v17, 1  ;;  %v3463_v48 = vrot.slane %v17225_v36, 1  ;;  %v2947_v54 = vsel %vm22171_vm6, %v2942_v37, %v2946_v7 }
  0xd1   :  { %v1255_v52 = vld [vmem:[#allocation2 + $0x3c] sm:$0xf]  ;;  %v3963_v55 = vshll.u32 %v14149_v38, 16  ;;  %v17271_v58 = vld [vmem:[#allocation2 + $0x38] ss:$0 sps:$4 sm:$0x11]  }
  0xd2   :  { %2758 = vrot.lane.b32.xlu1 %v14054_v26, %s16708_s6  ;;  %v2954_v43 = vor.u32 %v2953_v32, %v2949_v9  ;;  %v1509_v47 = vld [vmem:[#allocation2 + $0x40] sm:$0xf]  ;;  %v17264_v51 = vld [vmem:[#allocation2 + $0x44] ss:$0 sps:$4 sm:$0x11]   ;;  %v3467_v36 = vsel %vm22170_vm2, %v3465_v44, %v3466_v45  ;;  %v3464_v2 = vsel %vm22170_vm2, %v3462_v20, %v3463_v48  ;;  %v3961_v34 = vshrl.u32 %v14149_v38, 16 }
  0xd3   :  { %2756 = vrot.lane.b32.xlu0 %v17207_v24, %s16708_s6  ;;  %v14150_v49 = vcombine.low %v1508_v39, %v1509_v47  ;;  %v17268_v56 = vld [vmem:[#allocation2 + $0x40] sm:$0xf]  ;;  %v1938_v24 = vshll.u32 %v17259_v40, 16  ;;  %v3980_v62 = vshll.u32 %v17264_v51, 16  ;;  %v320_v4 = vld [vmem:[%s22122_s0 + $0x30] sm:$0xf] }
  0xd4   :  { %v2959_v53 = vsel %vm22171_vm6, %v2954_v43, %v2958_v35  ;;  %v17277_v1 = vcombine.low %v1255_v52, %v17268_v56  ;;  %v1601_v6 = vld [vmem:[#allocation2 + $0x3c] sm:$0xe]  ;;  %v3965_v63 = vrot.slane %v3963_v55, 1  ;;  %v3968_v8 = vshll.u32 %v15673_v42, 16  ;;  %v1345_v17 = vld [vmem:[#allocation2 + $0x30] sm:$0xe] }
  0xd5   :  { %v3975_v57 = vshll.u32 %v14150_v49, 16  ;;  %v3973_v59 = vshrl.u32 %v14150_v49, 16  ;;  %v1936_v12 = vshrl.u32 %v17259_v40, 16  ;;  %v1940_v13 = vrot.slane %v1938_v24, 1  ;;  %v1346_v31 = vld [vmem:[#allocation2 + $0x3c] sm:$0xe] }
  0xd6   :  { %3302 = vrot.lane.b32.xlu1 %v2959_v53, %s16712_s18  ;;  %22186 = vst [vmem:[#allocation26_spill] sm:$0xff] %v17277_v1  ;;  %v1943_v14 = vshll.u32 %v17271_v58, 16  ;;  %v17288_v15 = vld [vmem:[#allocation2 + $0x44] ss:$0 sps:$4 sm:$0x11]   ;;  %v3982_v11 = vrot.slane %v3980_v62, 1  ;;  %v14214_v26 = vcombine.low %v1601_v6, %v1509_v47  ;;  %v3966_v19 = vor.u32 %v3965_v63, %v3961_v34 }
  0xd7   :  { %3300 = vrot.lane.b32.xlu0 %v2947_v54, %s16712_s18  ;;  %v3977_v3 = vrot.slane %v3975_v57, 1  ;;  %v1950_v16 = vshll.u32 %v17277_v1, 16  ;;  %v478_v18 = vshrl.u32 %v320_v4, 16  ;;  %v3970_v21 = vrot.slane %v3968_v8, 1  ;;  %v321_v37 = vld [vmem:[%s22122_s0 + $0x34] sm:$0xf] }
  0xd8   :  { %v4486_v33 = vrot.slane %v14213_v25, 1  ;;  %v4487_v29 = vrot.slane %v15673_v42, 1  ;;  %v1941_v30 = vor.u32 %v1940_v13, %v1936_v12  ;;  %v1945_v23 = vrot.slane %v1943_v14, 1  ;;  %v1383_v43 = vld [vmem:[#allocation2 + $0x48] sm:$0xf] }
  0xd9   :  { %v3978_v46 = vor.u32 %v3977_v3, %v3973_v59  ;;  %v1955_v9 = vshll.u32 %v17288_v15, 16  ;;  %v1948_v32 = vshrl.u32 %v17277_v1, 16  ;;  %v1952_v35 = vrot.slane %v1950_v16, 1  ;;  %v17301_v44 = vld [vmem:[#allocation2 + $0x4c] sm:$0xf] }
  0xda   :  { %3558 = vrot.lane.b32.xlu1 %v3467_v36, %s16710_s16  ;;  %v4489_v20 = vrot.slane %v14214_v26, 1  ;;  %v14023_v39 = vcombine.low %v1345_v17, %v17248_v28  ;;  %v480_v45 = vrot.slane %v478_v18, 7  ;;  %v3971_v47 = vsel %vm22171_vm6, %v3966_v19, %v3970_v21  ;;  %v17306_v50 = vld [vmem:[#allocation2 + $0x40] sm:$0xf]  ;;  %v1063_v36 = vld [vmem:[#allocation2 + $0x54] sm:$0xf] }
  0xdb   :  { %3556 = vrot.lane.b32.xlu0 %v3464_v2, %s16710_s16  ;;  %v3983_v7 = vsel %vm22171_vm6, %v3978_v46, %v3982_v11  ;;  %v4488_v42 = vsel %vm22170_vm2, %v4486_v33, %v4487_v29  ;;  %v14024_v48 = vcombine.low %v1346_v31, %v17268_v56  ;;  %v1957_v52 = vrot.slane %v1955_v9, 1  ;;  %v1067_v3 = vld [vmem:[#allocation2 + $0x5c] sm:$0x1]  ;;  %v322_v34 = vld [vmem:[%s22122_s0 + $0x38] sm:$0xf] }
  0xdc   :  { %v4490_v28 = vrot.slane %v17264_v51, 1  ;;  %v481_v53 = vshll.u32 %v320_v4, 16  ;;  %v1953_v54 = vor.u32 %v1952_v35, %v1948_v32  ;;  %v17312_v55 = vcombine.low %v1383_v43, %v17301_v44  ;;  %v17324_v63 = vld [vmem:[#allocation2 + $0x50] ss:$0 sps:$4 sm:$0x11]  }
  0xdd   :  { %v486_v57 = vshrl.u32 %v321_v37, 16  ;;  %v489_v24 = vshll.u32 %v321_v37, 16  ;;  %v2448_v56 = vrot.slane %v17288_v15, 1  ;;  %v2444_v59 = vrot.slane %v14023_v39, 1  ;;  %v1474_v13 = vld [vmem:[#allocation2 + $0x48] sm:$0xe] }
  0xde   :  { %3782 = vrot.lane.b32.xlu1 %v14150_v49, %s16709_s7  ;;  %v1381_v49 = vld [vmem:[#allocation2 + $0x3c] sm:$0xf]  ;;  %v483_v2 = vor.u32 %v481_v53, %v480_v45  ;;  %v2447_v6 = vrot.slane %v14024_v48, 1  ;;  %v2445_v51 = vrot.slane %v17271_v58, 1  ;;  %v484_v4 = vrot.slane %v480_v45, 4 }
  0xdf   :  { %3780 = vrot.lane.b32.xlu0 %v14149_v38, %s16709_s7  ;;  %v1946_v38 = vsel %vm22171_vm6, %v1941_v30, %v1945_v23  ;;  %v17317_v62 = vcombine.low %v1381_v49, %v17306_v50  ;;  %v488_v25 = vrot.slane %v486_v57, 7  ;;  %v1958_v12 = vsel %vm22171_vm6, %v1953_v54, %v1957_v52  ;;  %v323_v46 = vld [vmem:[%s22122_s0 + $0x3c] sm:$0xf]  ;;  %v17337_v26 = vld [vmem:[#allocation2 + $0x44] ss:$0 sps:$4 sm:$0x11]  }
  0xe0   :  { %v1064_v8 = vsel %vm17060_vm7, %v483_v2, %v1063_v36  ;;  %v2975_v14 = vshll.u32 %v17312_v55, 16  ;;  %v17334_v11 = vld [vmem:[#allocation2 + $0x3c] sm:$0xe]  ;;  %v17342_v17 = vld [vmem:[%s22122_s0 + $0x40] sm:$0xf]  ;;  %v4491_v18 = vsel %vm22170_vm2, %v4489_v20, %v4490_v28  ;;  %v2973_v19 = vshrl.u32 %v17312_v55, 16 }
  0xe1   :  { %v491_v15 = vor.u32 %v489_v24, %v488_v25  ;;  %1065 = vst [vmem:[#allocation2 + $0x54] sm:$0xf] %v1064_v8  ;;  %v493_v58 = vrot.slane %v488_v25, 4  ;;  %v2963_v16 = vshll.u32 %v17317_v62, 16  ;;  %v14120_v29 = vcombine.low %v1474_v13, %v17301_v44  ;;  %v1070_v37 = vld [vmem:[#allocation2 + $0x60] sm:$0xf] }
  0xe2   :  { %4326 = vrot.lane.b32.xlu1 %v3983_v7, %s16713_s13  ;;  %v2980_v30 = vshll.u32 %v17324_v63, 16  ;;  %v2961_v23 = vshrl.u32 %v17317_v62, 16  ;;  %v495_v9 = vshrl.u32 %v322_v34, 16  ;;  %v2449_v31 = vsel %vm22170_vm2, %v2447_v6, %v2448_v56  ;;  %v1510_v43 = vld [vmem:[#allocation2 + $0x48] sm:$0xf] }
  0xe3   :  { %4324 = vrot.lane.b32.xlu0 %v3971_v47, %s16713_s13  ;;  %v492_v21 = vsel %vm17070_vm8, %v484_v4, %v491_v15  ;;  %v1068_v33 = vsel %vm17095_vm9, %v493_v58, %v1067_v3  ;;  %v2977_v7 = vrot.slane %v2975_v14, 1  ;;  %v498_v32 = vshll.u32 %v322_v34, 16  ;;  %v1074_v47 = vld [vmem:[#allocation2 + $0x68] sm:$0x1]  ;;  %v17361_v49 = vld [vmem:[#allocation2 + $0x4c] sm:$0xf] }
  0xe4   :  { %1066 = vst.msk [vmem:[#allocation2 + $0x58] sm:$0xf] %vm22169_vm0, %v492_v21  ;;  %1069 = vst [vmem:[#allocation2 + $0x5c] sm:$0x1] %v1068_v33  ;;  %v503_v35 = vshrl.u32 %v323_v46, 16  ;;  %v2965_v20 = vrot.slane %v2963_v16, 1  ;;  %v14119_v48 = vcombine.low %v17334_v11, %v17306_v50  ;;  %v17370_v4 = vcombine.low %v1510_v43, %v17361_v49 }
  0xe5   :  { %v2968_v39 = vshll.u32 %v17337_v26, 16  ;;  %v497_v44 = vrot.slane %v495_v9, 7  ;;  %v506_v45 = vshll.u32 %v323_v46, 16  ;;  %v512_v52 = vshrl.u32 %v17342_v17, 16  ;;  %v1257_v57 = vld [vmem:[#allocation2 + $0x48] sm:$0xf] }
  0xe6   :  { %2279 = vrot.lane.b32.xlu1 %v1946_v38, %s16707_s30  ;;  %v505_v38 = vrot.slane %v503_v35, 7  ;;  %v2982_v28 = vrot.slane %v2980_v30, 1  ;;  %v3471_v53 = vrot.slane %v14120_v29, 1  ;;  %v3472_v54 = vrot.slane %v17324_v63, 1  ;;  %v17366_v2 = vld [vmem:[#allocation2 + $0x4c] sm:$0xf] }
  0xe7   :  { %4580 = vrot.lane.b32.xlu0 %v4488_v42, %s16711_s8  ;;  %v2446_v42 = vsel %vm22170_vm2, %v2444_v59, %v2445_v51  ;;  %v500_v24 = vor.u32 %v498_v32, %v497_v44  ;;  %v2978_v36 = vor.u32 %v2977_v7, %v2973_v19  ;;  %v501_v59 = vrot.slane %v497_v44, 4  ;;  %v17386_v15 = vld [vmem:[#allocation2 + $0x50] ss:$0 sps:$4 sm:$0x11]   ;;  %v1602_v29 = vld [vmem:[#allocation2 + $0x48] sm:$0xe] }
  0xe8   :  { %v1512_v56 = vld [vmem:[#allocation2 + $0x54] sm:$0xf]  ;;  %v508_v3 = vor.u32 %v506_v45, %v505_v38  ;;  %v510_v50 = vrot.slane %v505_v38, 4  ;;  %v2966_v6 = vor.u32 %v2965_v20, %v2961_v23  ;;  %v2970_v51 = vrot.slane %v2968_v39, 1  ;;  %v325_v23 = vld [vmem:[%s22122_s0 + $0x44] sm:$0xf] }
  0xe9   :  { %v1071_v25 = vsel %vm17060_vm7, %v500_v24, %v1070_v37  ;;  %v515_v13 = vshll.u32 %v17342_v17, 16  ;;  %v17389_v58 = vcombine.low %v1257_v57, %v17366_v2  ;;  %v17391_v46 = vld [vmem:[#allocation2 + $0x50] ss:$0 sps:$4 sm:$0x11]   ;;  %v2983_v11 = vsel %vm22171_vm6, %v2978_v36, %v2982_v28  ;;  %v1259_v17 = vld [vmem:[#allocation2 + $0x54] sm:$0xf] }
  0xea   :  { %2281 = vrot.lane.b32.xlu1 %v1958_v12, %s16707_s30  ;;  %v509_v63 = vsel %vm17070_vm8, %v501_v59, %v508_v3  ;;  %1072 = vst [vmem:[#allocation2 + $0x60] sm:$0xf] %v1071_v25  ;;  %v1075_v8 = vsel %vm17095_vm9, %v510_v50, %v1074_v47  ;;  %v17380_v12 = vrot.slane %v512_v52, 7  ;;  %v2971_v21 = vsel %vm22171_vm6, %v2966_v6, %v2970_v51  ;;  %v1077_v7 = vld [vmem:[#allocation2 + $0x6c] sm:$0xf] }
  0xeb   :  { %4582 = vrot.lane.b32.xlu0 %v4491_v18, %s16711_s8  ;;  %v17374_v34 = vld [vmem:[#allocation2 + $0x58] sm:$0xf]  ;;  %22187 = vst [vmem:[#allocation27_spill] sm:$0xff] %v17389_v58  ;;  %1073 = vst.msk [vmem:[#allocation2 + $0x64] sm:$0xf] %vm22169_vm0, %v509_v63  ;;  %v3469_v33 = vrot.slane %v17337_v26, 1  ;;  %v14215_v20 = vcombine.low %v1602_v29, %v17361_v49 }
  0xec   :  { %v14152_v14 = vcombine.low %v1512_v56, %v17374_v34  ;;  %1076 = vst [vmem:[#allocation2 + $0x68] sm:$0x1] %v1075_v8  ;;  %v17395_v16 = vld [vmem:[#allocation2 + $0x5c] ss:$0 sps:$4 sm:$0x11]   ;;  %v3987_v30 = vshll.u32 %v17370_v4, 16  ;;  %v517_v9 = vor.u32 %v515_v13, %v17380_v12 }
  0xed   :  { %v17399_v19 = vld [vmem:[#allocation2 + $0x58] sm:$0xf]  ;;  %v4004_v26 = vshll.u32 %v17395_v16, 16  ;;  %v3992_v39 = vshll.u32 %v17386_v15, 16  ;;  %v1967_v43 = vshll.u32 %v17391_v46, 16  ;;  %v520_v44 = vshrl.u32 %v325_v23, 16 }
  0xee   :  { %2538 = vrot.lane.b32.xlu1 %v2449_v31, %s16699_s23  ;;  %v3999_v18 = vshll.u32 %v14152_v14, 16  ;;  %v1962_v31 = vshll.u32 %v17389_v58, 16  ;;  %v3997_v32 = vshrl.u32 %v14152_v14, 16  ;;  %v17413_v37 = vcombine.low %v1259_v17, %v17399_v19  ;;  %v1347_v56 = vld [vmem:[#allocation2 + $0x48] sm:$0xe] }
  0xef   :  { %2536 = vrot.lane.b32.xlu0 %v2446_v42, %s16699_s23  ;;  %v3985_v47 = vshrl.u32 %v17370_v4, 16  ;;  %v3989_v42 = vrot.slane %v3987_v30, 1  ;;  %v1960_v38 = vshrl.u32 %v17389_v58, 16  ;;  %v4006_v28 = vrot.slane %v4004_v26, 1  ;;  %v1603_v3 = vld [vmem:[#allocation2 + $0x54] sm:$0xe] }
  0xf0   :  { %v4001_v35 = vrot.slane %v3999_v18, 1  ;;  %22188 = vst [vmem:[#allocation28_spill] sm:$0xff] %v17413_v37  ;;  %v1964_v52 = vrot.slane %v1962_v31, 1  ;;  %v3994_v57 = vrot.slane %v3992_v39, 1  ;;  %v1969_v24 = vrot.slane %v1967_v43, 1 }
  0xf1   :  { %v4492_v36 = vrot.slane %v14215_v20, 1  ;;  %v522_v59 = vrot.slane %v520_v44, 7  ;;  %v3990_v50 = vor.u32 %v3989_v42, %v3985_v47  ;;  %v1348_v6 = vld [vmem:[#allocation2 + $0x54] sm:$0xe]  ;;  %v17430_v63 = vld [vmem:[#allocation2 + $0x58] sm:$0xf] }
  0xf2   :  { %2762 = vrot.lane.b32.xlu1 %v17312_v55, %s16708_s6  ;;  %v3468_v55 = vrot.slane %v14119_v48, 1  ;;  %v1078_v48 = vsel %vm17060_vm7, %v517_v9, %v1077_v7  ;;  %v4002_v49 = vor.u32 %v4001_v35, %v3997_v32  ;;  %v1965_v51 = vor.u32 %v1964_v52, %v1960_v38  ;;  %v1385_v25 = vld [vmem:[#allocation2 + $0x54] sm:$0xf]  ;;  %v1387_v29 = vld [vmem:[#allocation2 + $0x60] sm:$0xf] }
  0xf3   :  { %2760 = vrot.lane.b32.xlu0 %v17317_v62, %s16708_s6  ;;  %v3473_v62 = vsel %vm22170_vm2, %v3471_v53, %v3472_v54  ;;  %1079 = vst [vmem:[#allocation2 + $0x6c] sm:$0xf] %v1078_v48  ;;  %v17425_v53 = vld [vmem:[#allocation2 + $0x5c] ss:$0 sps:$4 sm:$0x11]   ;;  %v1974_v54 = vshll.u32 %v17413_v37, 16  ;;  %v3995_v9 = vsel %vm22171_vm6, %v3990_v50, %v3994_v57 }
  0xf4   :  { %v3470_v45 = vsel %vm22170_vm2, %v3468_v55, %v3469_v33  ;;  %v518_v8 = vrot.slane %v17380_v12, 4  ;;  %v523_v13 = vshll.u32 %v325_v23, 16  ;;  %v4007_v17 = vsel %vm22171_vm6, %v4002_v49, %v4006_v28  ;;  %v17440_v30 = vld [vmem:[#allocation2 + $0x64] sm:$0xf] }
  0xf5   :  { %v1972_v55 = vshrl.u32 %v17413_v37, 16  ;;  %v1976_v18 = vrot.slane %v1974_v54, 1  ;;  %v14025_v33 = vcombine.low %v1347_v56, %v17366_v2  ;;  %v14216_v23 = vcombine.low %v1603_v3, %v17374_v34  ;;  %v327_v34 = vld [vmem:[%s22122_s0 + $0x4c] sm:$0xf]  ;;  %v1084_v3 = vld [vmem:[#allocation2 + $0x78] sm:$0xf] }
  0xf6   :  { %3306 = vrot.lane.b32.xlu1 %v2983_v11, %s16712_s18  ;;  %v1081_v11 = vld [vmem:[#allocation2 + $0x74] sm:$0x1]  ;;  %v525_v12 = vor.u32 %v523_v13, %v522_v59  ;;  %v527_v31 = vrot.slane %v522_v59, 4  ;;  %v1970_v7 = vsel %vm22171_vm6, %v1965_v51, %v1969_v24  ;;  %v17459_v35 = vcombine.low %v1387_v29, %v17440_v30  ;;  %v15720_v20 = vld [vmem:[%s22123_s1 + $0x10] ss:$0 sps:$4 sm:$0x33]  }
  0xf7   :  { %3304 = vrot.lane.b32.xlu0 %v2971_v21, %s16712_s18  ;;  %v1979_v21 = vshll.u32 %v17425_v53, 16  ;;  %v2450_v43 = vrot.slane %v14025_v33, 1  ;;  %v2451_v44 = vrot.slane %v17391_v46, 1  ;;  %v4495_v47 = vrot.slane %v14216_v23, 1  ;;  %v1514_v51 = vld [vmem:[#allocation2 + $0x60] sm:$0xf]  ;;  %15616 = vmatprep.subr.msk.bf16.mxu0 %vm5245_vm10, %v15720_v20 }
  0xf8   :  { %v526_v2 = vsel %vm17070_vm8, %v518_v8, %v525_v12  ;;  %v1082_v26 = vsel %vm17095_vm9, %v527_v31, %v1081_v11  ;;  %v4496_v42 = vrot.slane %v17395_v16, 1  ;;  %v2454_v38 = vrot.slane %v17425_v53, 1  ;;  %v17476_v49 = vld [vmem:[#allocation2 + $0x68] ss:$0 sps:$4 sm:$0x11]  }
  0xf9   :  { %v1981_v32 = vrot.slane %v1979_v21, 1  ;;  %1080 = vst.msk [vmem:[#allocation2 + $0x70] sm:$0xf] %vm22169_vm0, %v526_v2  ;;  %1083 = vst [vmem:[#allocation2 + $0x74] sm:$0x1] %v1082_v26  ;;  %v2999_v46 = vshll.u32 %v17459_v35, 16 }
  0xfa   :  { %3562 = vrot.lane.b32.xlu1 %v3473_v62, %s16710_s16  ;;  %v14026_v62 = vcombine.low %v1348_v6, %v17399_v19  ;;  %v1977_v19 = vor.u32 %v1976_v18, %v1972_v55  ;;  %v15723_v16 = vld [vmem:[%s22123_s1 + $0x8] sm:$0xff]   ;;  %v540_v59 = vshll.u32 %v327_v34, 16  ;;  %v4497_v50 = vsel %vm22170_vm2, %v4495_v47, %v4496_v42  ;;  %v1475_v6 = vld [vmem:[#allocation2 + $0x54] sm:$0xe]  ;;  %v1476_v11 = vld [vmem:[#allocation2 + $0x60] sm:$0xe] }
  0xfb   :  { %3560 = vrot.lane.b32.xlu0 %v3470_v45, %s16710_s16  ;;  %v17470_v45 = vld [vmem:[#allocation2 + $0x5c] ss:$0 sps:$4 sm:$0x11]   ;;  %v5247_v13 = vsel %vm5245_vm10, %v15720_v20, 0  ;;  %v3004_v55 = vshll.u32 %v17476_v49, 16  ;;  %v3001_v29 = vrot.slane %v2999_v46, 1  ;;  %v14121_v26 = vcombine.low %v1475_v6, %v17430_v63 }
  0xfc   :  { %v2453_v48 = vrot.slane %v14026_v62, 1  ;;  %v1982_v57 = vsel %vm22171_vm6, %v1977_v19, %v1981_v32  ;;  %v2992_v53 = vshll.u32 %v17470_v45, 16  ;;  %15523 = vmatpush3.bf16.msra.mxu0 %v5247_v13  ;;  %v1516_v12 = vld [vmem:[#allocation2 + $0x6c] sm:$0xf]  ;;  %v1261_v23 = vld [vmem:[#allocation2 + $0x60] sm:$0xf] }
  0xfd   :  { %15524 = vmatprep.subr.bf16.mxu0 %v15723_v16  ;;  %v17506_v19 = vld [vmem:[#allocation2 + $0x68] ss:$0 sps:$4 sm:$0x11]   ;;  %v17508_v32 = vld [vmem:[#allocation2 + $0x64] sm:$0xf]  ;;  %v3006_v42 = vrot.slane %v3004_v55, 1 }
  0xfe   :  { %3786 = vrot.lane.b32.xlu1 %v14152_v14, %s16709_s7  ;;  %v4493_v14 = vrot.slane %v17386_v15, 1  ;;  %v326_v15 = vld [vmem:[%s22122_s0 + $0x48] sm:$0xf]  ;;  %v2455_v33 = vsel %vm22170_vm2, %v2453_v48, %v2454_v38  ;;  %v2994_v20 = vrot.slane %v2992_v53, 1  ;;  %v3478_v46 = vrot.slane %v17476_v49, 1 }
  0xff   :  { %3784 = vrot.lane.b32.xlu0 %v17370_v4, %s16709_s7  ;;  %v17448_v4 = vcombine.low %v1385_v25, %v17430_v63  ;;  %v529_v28 = vshrl.u32 %v326_v15, 16  ;;  %v532_v54 = vshll.u32 %v326_v15, 16  ;;  %v17487_v25 = vld [vmem:[#allocation2 + $0x64] sm:$0xf]  ;;  %v2452_v15 = vsel %vm22170_vm2, %v2450_v43, %v2451_v44  ;;  %v1604_v43 = vld [vmem:[#allocation2 + $0x60] sm:$0xe] }
 0x100   :  { %v4494_v39 = vsel %vm22170_vm2, %v4492_v36, %v4493_v14  ;;  %v537_v36 = vshrl.u32 %v327_v34, 16  ;;  %v15724_v14 = vld [vmem:[%s22123_s1] sm:$0xff]   ;;  %v17500_v62 = vcombine.low %v1514_v51, %v17487_v25  ;;  %v14122_v34 = vcombine.low %v1476_v11, %v17440_v30  ;;  %15525 = vmatpush3.bf16.msra.mxu0 %v15723_v16  ;;  %v17520_v63 = vld [vmem:[#allocation2 + $0x68] ss:$0 sps:$4 sm:$0x11]  }
 0x101   :  { %v2987_v52 = vshll.u32 %v17448_v4, 16  ;;  %v2985_v24 = vshrl.u32 %v17448_v4, 16  ;;  %v531_v56 = vrot.slane %v529_v28, 7  ;;  %v1088_v30 = vld [vmem:[#allocation2 + $0x80] sm:$0x1]  ;;  %15526 = vmatprep.subr.bf16.mxu0 %v15724_v14  ;;  %v3474_v16 = vrot.slane %v14121_v26, 1 }
 0x102   :  { %4330 = vrot.lane.b32.xlu1 %v4007_v17, %s16713_s13  ;;  %v539_v8 = vrot.slane %v537_v36, 7  ;;  %v2997_v17 = vshrl.u32 %v17459_v35, 16  ;;  %v4011_v44 = vshll.u32 %v17500_v62, 16  ;;  %v329_v36 = vld [vmem:[%s22122_s0 + $0x54] sm:$0xf]  ;;  %v3475_v53 = vrot.slane %v17470_v45, 1 }
 0x103   :  { %4328 = vrot.lane.b32.xlu0 %v3995_v9, %s16713_s13  ;;  %v2989_v18 = vrot.slane %v2987_v52, 1  ;;  %v534_v21 = vor.u32 %v532_v54, %v531_v56  ;;  %v17497_v9 = vld [vmem:[#allocation2 + $0x70] sm:$0xf]  ;;  %v535_v31 = vrot.slane %v531_v56, 4  ;;  %v17518_v52 = vcombine.low %v1261_v23, %v17508_v32  ;;  %v1119_v37 = vld [vmem:[#allocation2 + $0xb4] sm:$0xf] }
 0x104   :  { %v3002_v47 = vor.u32 %v3001_v29, %v2997_v17  ;;  %v17513_v38 = vcombine.low %v1516_v12, %v17497_v9  ;;  %v328_v54 = vld [vmem:[%s22122_s0 + $0x50] sm:$0xf]  ;;  %v14217_v56 = vcombine.low %v1604_v43, %v17487_v25  ;;  %15527 = vmatpush3.bf16.msra.mxu0 %v15724_v14  ;;  %v4013_v45 = vrot.slane %v4011_v44, 1 }
 0x105   :  { %v1085_v2 = vsel %vm17060_vm7, %v534_v21, %v1084_v3  ;;  %v2990_v48 = vor.u32 %v2989_v18, %v2985_v24  ;;  %22189 = vst [vmem:[#allocation29_spill] sm:$0xff] %v17518_v52  ;;  %v4016_v24 = vshll.u32 %v17506_v19, 16  ;;  %v17537_v3 = vld [vmem:[#allocation2 + $0x70] sm:$0xf]  ;;  %v1984_v25 = vshrl.u32 %v17518_v52, 16 }
 0x106   :  { %2283 = vrot.lane.b32.xlu1 %v1970_v7, %s16707_s30  ;;  %v542_v7 = vor.u32 %v540_v59, %v539_v8  ;;  %1086 = vst [vmem:[#allocation2 + $0x78] sm:$0xf] %v1085_v2  ;;  %v1263_v59 = vld [vmem:[#allocation2 + $0x6c] sm:$0xf]  ;;  %v4023_v51 = vshll.u32 %v17513_v38, 16  ;;  %v1986_v13 = vshll.u32 %v17518_v52, 16 }
 0x107   :  { %4584 = vrot.lane.b32.xlu0 %v4494_v39, %s16711_s8  ;;  %v544_v39 = vrot.slane %v539_v8, 4  ;;  %v2995_v6 = vsel %vm22171_vm6, %v2990_v48, %v2994_v20  ;;  %v17544_v8 = vld [vmem:[#allocation2 + $0x74] ss:$0 sps:$4 sm:$0x11]   ;;  %v1991_v11 = vshll.u32 %v17520_v63, 16  ;;  %v17553_v55 = vrot.slane %v4016_v24, 1 }
 0x108   :  { %v543_v28 = vsel %vm17070_vm8, %v535_v31, %v542_v7  ;;  %v1349_v18 = vld [vmem:[#allocation2 + $0x60] sm:$0xe]  ;;  %v546_v21 = vshrl.u32 %v328_v54, 16  ;;  %v549_v14 = vshll.u32 %v328_v54, 16  ;;  %v17556_v29 = vrot.slane %v14217_v56, 1 }
 0x109   :  { %1087 = vst.msk [vmem:[#allocation2 + $0x7c] sm:$0xf] %vm22169_vm0, %v543_v28  ;;  %v1089_v49 = vsel %vm17095_vm9, %v544_v39, %v1088_v30  ;;  %v554_v12 = vshrl.u32 %v329_v36, 16  ;;  %v557_v23 = vshll.u32 %v329_v36, 16  ;;  %v1091_v31 = vld [vmem:[#allocation2 + $0x84] sm:$0xf]  ;;  %v3476_v20 = vsel %vm22170_vm2, %v3474_v16, %v3475_v53 }
 0x10a   :  { %2285 = vrot.lane.b32.xlu1 %v1982_v57, %s16707_s30  ;;  %v3477_v57 = vrot.slane %v14122_v34, 1  ;;  %1090 = vst [vmem:[#allocation2 + $0x80] sm:$0x1] %v1089_v49  ;;  %v4021_v7 = vshrl.u32 %v17513_v38, 16  ;;  %v4025_v2 = vrot.slane %v4023_v51, 1  ;;  %v548_v26 = vrot.slane %v546_v21, 7 }
 0x10b   :  { %4586 = vrot.lane.b32.xlu0 %v4497_v50, %s16711_s8  ;;  %v3007_v50 = vsel %vm22171_vm6, %v3002_v47, %v3006_v42  ;;  %v1350_v34 = vld [vmem:[#allocation2 + $0x6c] sm:$0xe]  ;;  %v4499_v47 = vrot.slane %v17506_v19, 1  ;;  %v14027_v42 = vcombine.low %v1349_v18, %v17508_v32  ;;  %v17569_v43 = vld [vmem:[#allocation2 + $0x70] sm:$0xf]  ;;  %v556_v30 = vrot.slane %v554_v12, 7 }
 0x10c   :  { %v3479_v17 = vsel %vm22170_vm2, %v3477_v57, %v3478_v46  ;;  %v1389_v48 = vld [vmem:[#allocation2 + $0x6c] sm:$0xf]  ;;  %v1988_v44 = vrot.slane %v1986_v13, 1  ;;  %v1993_v28 = vrot.slane %v1991_v11, 1  ;;  %v2457_v57 = vrot.slane %v17520_v63, 1 }
 0x10d   :  { %v17571_v54 = vld [vmem:[#allocation2 + $0x74] ss:$0 sps:$4 sm:$0x11]   ;;  %v551_v46 = vor.u32 %v549_v14, %v548_v26  ;;  %v552_v16 = vrot.slane %v548_v26, 4  ;;  %v559_v53 = vor.u32 %v557_v23, %v556_v30  ;;  %v1095_v32 = vld [vmem:[#allocation2 + $0x8c] sm:$0x1]  ;;  %v4026_v56 = vor.u32 %v4025_v2, %v4021_v7 }
 0x10e   :  { %2542 = vrot.lane.b32.xlu1 %v2455_v33, %s16699_s23  ;;  %v1605_v33 = vld [vmem:[#allocation2 + $0x6c] sm:$0xe]  ;;  %v2456_v13 = vrot.slane %v14027_v42, 1  ;;  %v1391_v11 = vld [vmem:[#allocation2 + $0x78] sm:$0xf]  ;;  %v1989_v14 = vor.u32 %v1988_v44, %v1984_v25  ;;  %v561_v12 = vrot.slane %v556_v30, 4 }
 0x10f   :  { %2540 = vrot.lane.b32.xlu0 %v2452_v15, %s16699_s23  ;;  %v4028_v15 = vshll.u32 %v17544_v8, 16  ;;  %v14218_v24 = vcombine.low %v1605_v33, %v17497_v9  ;;  %v1477_v49 = vld [vmem:[#allocation2 + $0x6c] sm:$0xe]  ;;  %v14028_v9 = vcombine.low %v1350_v34, %v17537_v3  ;;  %v560_v18 = vsel %vm17070_vm8, %v552_v16, %v559_v53  ;;  %v1518_v44 = vld [vmem:[#allocation2 + $0x78] sm:$0xf] }
 0x110   :  { %v1392_v33 = vld [vmem:[#allocation2 + $0x7c] sm:$0xf]  ;;  %1094 = vst.msk [vmem:[#allocation2 + $0x88] sm:$0xf] %vm22169_vm0, %v560_v18  ;;  %v4502_v2 = vrot.slane %v17544_v8, 1  ;;  %v1096_v34 = vsel %vm17095_vm9, %v561_v12, %v1095_v32  ;;  %v2460_v30 = vrot.slane %v17571_v54, 1  ;;  %v1994_v32 = vsel %vm22171_vm6, %v1989_v14, %v1993_v28 }
 0x111   :  { %v4501_v7 = vrot.slane %v14218_v24, 1  ;;  %v2459_v26 = vrot.slane %v14028_v9, 1  ;;  %v17609_v8 = vcombine.low %v1391_v11, %v1392_v33  ;;  %1097 = vst [vmem:[#allocation2 + $0x8c] sm:$0x1] %v1096_v34  ;;  %v4500_v28 = vsel %vm22170_vm2, %v17556_v29, %v4499_v47  ;;  %v1606_v14 = vld [vmem:[#allocation2 + $0x78] sm:$0xe] }
 0x112   :  { %2766 = vrot.lane.b32.xlu1 %v17459_v35, %s16708_s6  ;;  %v4009_v35 = vshrl.u32 %v17500_v62, 16  ;;  %vm5095_vm10 = vcmask 261120  }
 0x113   :  { %2764 = vrot.lane.b32.xlu0 %v17448_v4, %s16708_s6  ;;  %v17559_v4 = vcombine.low %v1263_v59, %v17537_v3  ;;  %v4030_v59 = vrot.slane %v4028_v15, 1  ;;  %v1478_v15 = vld [vmem:[#allocation2 + $0x78] sm:$0xe]  ;;  %v3023_v9 = vshll.u32 %v17609_v8, 16  ;;  %v3021_v34 = vshrl.u32 %v17609_v8, 16 }
 0x114   :  { %v4014_v21 = vor.u32 %v4013_v45, %v4009_v35  ;;  %v17601_v35 = vld [vmem:[%s22122_s0 + $0x58] sm:$0xf]  ;;  %v14124_v16 = vcombine.low %v1478_v15, %v1392_v33  ;;  %v17643_v33 = vld [vmem:[#allocation2 + $0x80] ss:$0 sps:$4 sm:$0x11]  }
 0x115   :  { %22190 = vst [vmem:[#allocation30_spill] sm:$0xff] %v17559_v4  ;;  %v1998_v36 = vshll.u32 %v17559_v4, 16  ;;  %v1996_v3 = vshrl.u32 %v17559_v4, 16  ;;  %v4031_v45 = vsel %vm22171_vm6, %v4026_v56, %v4030_v59  ;;  %v563_v24 = vshrl.u32 %v17601_v35, 16  ;;  %v1265_v59 = vld [vmem:[#allocation2 + $0x78] sm:$0xf] }
 0x116   :  { %3310 = vrot.lane.b32.xlu1 %v3007_v50, %s16712_s18  ;;  %v17565_v39 = vpop.permute.xlu1 %2528  ;;  %v17578_v50 = vcombine.low %v1389_v48, %v17569_v43  ;;  %v4019_v48 = vsel %vm22171_vm6, %v4014_v21, %v17553_v55  ;;  %v566_v29 = vshll.u32 %v17601_v35, 16 }
 0x117   :  { %3308 = vrot.lane.b32.xlu0 %v2995_v6, %s16712_s18  ;;  %v1092_v6 = vsel %vm17060_vm7, %v551_v46, %v1091_v31  ;;  %v2003_v31 = vshll.u32 %v17571_v54, 16  ;;  %v2000_v25 = vrot.slane %v1998_v36, 1  ;;  %v17616_v46 = vld [vmem:[#allocation2 + $0x7c] sm:$0xf]  ;;  %v17645_v12 = vrot.slane %v563_v24, 7 }
 0x118   :  { %v17583_v51 = vpop.permute.xlu0 %2271  ;;  %1093 = vst [vmem:[#allocation2 + $0x84] sm:$0xf] %v1092_v6  ;;  %v3009_v55 = vshrl.u32 %v17578_v50, 16  ;;  %v17632_v21 = vcombine.low %v1518_v44, %v17616_v46  ;;  %v1098_v24 = vld [vmem:[#allocation2 + $0x90] sm:$0xf] }
 0x119   :  { %v2001_v56 = vor.u32 %v2000_v25, %v1996_v3  ;;  %v4642_v63 = vsel %vm22174_vm11, %v17054_v10, %v17583_v51  ;;  %v17658_v25 = vld [vmem:[#allocation2 + $0x80] ss:$0 sps:$4 sm:$0x11]   ;;  %v2461_v10 = vsel %vm22170_vm2, %v2459_v26, %v2460_v30  ;;  %v14219_v51 = vcombine.low %v1606_v14, %v17616_v46 }
 0x11a   :  { %3566 = vrot.lane.b32.xlu1 %v3479_v17, %s16710_s16  ;;  %v17586_v17 = vld [vmem:[#allocation2 + $0x74] ss:$0 sps:$4 sm:$0x11]   ;;  %v4035_v35 = vshll.u32 %v17632_v21, 16  ;;  %v568_v44 = vor.u32 %v566_v29, %v17645_v12  ;;  %v4033_v30 = vshrl.u32 %v17632_v21, 16 }
 0x11b   :  { %3564 = vrot.lane.b32.xlu0 %v3476_v20, %s16710_s16  ;;  %v14123_v20 = vcombine.low %v1477_v49, %v17569_v43  ;;  %v3016_v42 = vshll.u32 %v17586_v17, 16  ;;  %v15721_v43 = vld [vmem:[#allocation2 + $0x80] ss:$0 sps:$4 sm:$0x11]   ;;  %v3481_v53 = vrot.slane %v17586_v17, 1  ;;  %v17641_v17 = vsel %vm22170_vm2, %v2456_v13, %v2457_v57 }
 0x11c   :  { %v17625_v49 = vld [vmem:[#allocation2 + $0x7c] sm:$0xf]  ;;  %v3484_v13 = vrot.slane %v15721_v43, 1  ;;  %v1102_v29 = vld [vmem:[#allocation2 + $0x98] sm:$0x1] }
 0x11d   :  { %v3018_v11 = vrot.slane %v3016_v42, 1  ;;  %v3480_v18 = vrot.slane %v14123_v20, 1  ;;  %v17651_v19 = vcombine.low %v1265_v59, %v17625_v49  ;;  %v3025_v20 = vrot.slane %v3023_v9, 1 }
 0x11e   :  { %3790 = vrot.lane.b32.xlu1 %v17513_v38, %s16709_s7  ;;  %v3011_v38 = vshll.u32 %v17578_v50, 16  ;;  %v4040_v42 = vshll.u32 %v17643_v33, 16  ;;  %v4037_v59 = vrot.slane %v4035_v35, 1 }
 0x11f   :  { %v17593_v23 = vpop.permute.xlu1 %2754  ;;  %3788 = vrot.lane.b32.xlu0 %v17500_v62, %s16709_s7  ;;  %v2005_v62 = vrot.slane %v2003_v31, 1  ;;  %v3028_v31 = vshll.u32 %v15721_v43, 16  ;;  %22191 = vst [vmem:[#allocation31_spill] sm:$0xff] %v17651_v19  ;;  %v17681_v26 = vsel %vm22170_vm2, %v3480_v18, %v3481_v53  ;;  %v2010_v46 = vshll.u32 %v17651_v19, 16  ;;  %v17726_v35 = vld [vmem:[#allocation2 + $0x84] sm:$0xe] }
 0x120   :  { %v3013_v54 = vrot.slane %v3011_v38, 1  ;;  %v4503_v38 = vsel %vm22170_vm2, %v4501_v7, %v4502_v2  ;;  %v17675_v7 = vsel %vm22168_vm12, %v4642_v63, %v17565_v39  ;;  %v2015_v53 = vshll.u32 %v17658_v25, 16  ;;  %v17741_v0 = vld [vmem:[#allocation2 + $0x84] sm:$0xe] }
 0x121   :  { %v17619_v36 = vpop.permute.xlu0 %2752  ;;  %v2006_v47 = vsel %vm22171_vm6, %v2001_v56, %v2005_v62  ;;  %v332_v62 = vld [vmem:[%s22122_s0 + $0x60] sm:$0xf]  ;;  %v17694_v56 = vld [vmem:[#allocation2 + $0x88] sm:$0xf] }
 0x122   :  { %4334 = vrot.lane.b32.xlu1 %v4031_v45, %s16713_s13  ;;  %v3483_v45 = vrot.slane %v14124_v16, 1  ;;  %v3014_v57 = vor.u32 %v3013_v54, %v3009_v55  ;;  %v3030_v16 = vrot.slane %v3028_v31, 1  ;;  %v3026_v54 = vor.u32 %v3025_v20, %v3021_v34  ;;  %v17724_v20 = vld [vmem:[%s22122_s0 + $0x68] sm:$0xf] }
 0x123   :  { %4332 = vrot.lane.b32.xlu0 %v4019_v48, %s16713_s13  ;;  %v331_v48 = vld [vmem:[%s22122_s0 + $0x5c] sm:$0xf]  ;;  %v17708_v31 = vrot.slane %v14219_v51, 1  ;;  %v17728_v51 = vrot.slane %v2015_v53, 1 }
 0x124   :  { %v17628_v6 = vpop.permute.xlu1 %3778  ;;  %v17689_v39 = vsel %vm22171_vm6, %v3014_v57, %v3018_v11  ;;  %v17692_v43 = vsel %vm22170_vm2, %v3483_v45, %v3484_v13  ;;  %v571_v9 = vshrl.u32 %v331_v48, 16  ;;  %v574_v18 = vshll.u32 %v331_v48, 16  ;;  %v17703_v11 = vld [vmem:[%s22122_s0 + $0x64] sm:$0xf]  ;;  %v1351_v13 = vld [vmem:[#allocation2 + $0x78] sm:$0xe] }
 0x125   :  { %v17647_v3 = vpop.permute.xlu0 %3776  ;;  %v1099_v45 = vsel %vm17060_vm7, %v568_v44, %v1098_v24  ;;  %v17718_v57 = vrot.slane %v2010_v46, 1  ;;  %v580_v48 = vshrl.u32 %v332_v62, 16  ;;  %v3031_v44 = vsel %vm22171_vm6, %v3026_v54, %v3030_v16  ;;  %v1267_v24 = vld [vmem:[#allocation2 + $0x84] sm:$0xf] }
 0x126   :  { %2287 = vrot.lane.b32.xlu1 %v1994_v32, %s16707_s30  ;;  %v1520_v32 = vld [vmem:[#allocation2 + $0x84] sm:$0xf]  ;;  %v573_v34 = vrot.slane %v571_v9, 7  ;;  %1100 = vst [vmem:[#allocation2 + $0x90] sm:$0xf] %v1099_v45  ;;  %v17737_v46 = vor.u32 %v4037_v59, %v4033_v30  ;;  %v588_v14 = vshrl.u32 %v17703_v11, 16 }
 0x127   :  { %4588 = vrot.lane.b32.xlu0 %v4500_v28, %s16711_s8  ;;  %v17705_v28 = vrot.slane %v4040_v42, 1  ;;  %v1105_v45 = vld [vmem:[#allocation2 + $0x9c] sm:$0xf]  ;;  %v14029_v42 = vcombine.low %v1351_v13, %v17625_v49  ;;  %v17750_v16 = vld [vmem:[#allocation2 + $0x8c] ss:$0 sps:$4 sm:$0x11]  }
 0x128   :  { %v17661_v15 = vpop.permute.xlu1 %2530  ;;  %v576_v53 = vor.u32 %v574_v18, %v573_v34  ;;  %v578_v9 = vrot.slane %v573_v34, 4  ;;  %v591_v49 = vshll.u32 %v17703_v11, 16  ;;  %v590_v13 = vrot.slane %v588_v14, 7 }
 0x129   :  { %v17677_v2 = vpop.permute.xlu0 %3552  ;;  %v4772_v34 = vsel %vm22166_vm13, %v17675_v7, %v17619_v36  ;;  %v14220_v11 = vcombine.low %v17726_v35, %v17694_v56  ;;  %v600_v14 = vshll.u32 %v17724_v20, 16  ;;  %v17778_v7 = vrot.slane %v14029_v42, 1 }
 0x12a   :  { %2289 = vrot.lane.b32.xlu1 %v2006_v47, %s16707_s30  ;;  %v17716_v47 = vcombine.low %v1520_v32, %v17694_v56  ;;  %v17739_v32 = vld [vmem:[#allocation2 + $0x88] sm:$0xf]  ;;  %v1103_v59 = vsel %vm17095_vm9, %v578_v9, %v1102_v29  ;;  %v1109_v56 = vld [vmem:[#allocation2 + $0xa4] sm:$0x1]  ;;  %v4052_v42 = vshll.u32 %v17750_v16, 16 }
 0x12b   :  { %4590 = vrot.lane.b32.xlu0 %v4503_v38, %s16711_s8  ;;  %v569_v38 = vrot.slane %v17645_v12, 4  ;;  %1104 = vst [vmem:[#allocation2 + $0x98] sm:$0x1] %v1103_v59  ;;  %v17769_v29 = vcombine.low %v1267_v24, %v17739_v32  ;;  %v14030_v36 = vcombine.low %v17741_v0, %v17739_v32 }
 0x12c   :  { %v17698_v55 = vpop.permute.xlu1 %3554  ;;  %v4047_v30 = vshll.u32 %v17716_v47, 16  ;;  %v4045_v24 = vshrl.u32 %v17716_v47, 16 }
 0x12d   :  { %v17712_v63 = vpop.permute.xlu0 %4576  ;;  %v577_v54 = vsel %vm17070_vm8, %v569_v38, %v576_v53  ;;  %22192 = vst [vmem:[#allocation32_spill] sm:$0xff] %v17769_v29  ;;  %v17774_v53 = vld [vmem:[#allocation2 + $0x8c] ss:$0 sps:$4 sm:$0x11]  }
 0x12e   :  { %2546 = vrot.lane.b32.xlu1 %v2461_v10, %s16699_s23  ;;  %v582_v10 = vrot.slane %v580_v48, 7  ;;  %1101 = vst.msk [vmem:[#allocation2 + $0x94] sm:$0xf] %vm22169_vm0, %v577_v54  ;;  %v1393_v48 = vld [vmem:[#allocation2 + $0x84] sm:$0xf]  ;;  %v595_v54 = vrot.slane %v590_v13, 4 }
 0x12f   :  { %2544 = vrot.lane.b32.xlu0 %v17641_v17, %s16699_s23  ;;  %v583_v17 = vshll.u32 %v332_v62, 16 }
 0x130   :  { %v17734_v12 = vpop.permute.xlu1 %3298  ;;  %v586_v18 = vrot.slane %v582_v10, 4 }
 0x131   :  { %v17745_v4 = vpop.permute.xlu0 %4578  ;;  %v585_v62 = vor.u32 %v583_v17, %v582_v10  ;;  %v17771_v10 = vld [vmem:[#allocation2 + $0x88] sm:$0xf]  ;;  %v1479_v17 = vld [vmem:[#allocation2 + $0x84] sm:$0xe] }
 0x132   :  { %2770 = vrot.lane.b32.xlu1 %v17609_v8, %s16708_s6  ;;  %v597_v8 = vshrl.u32 %v17724_v20, 16  ;;  %v4049_v20 = vrot.slane %v4047_v30, 1  ;;  %v17790_v32 = vcombine.low %v1393_v48, %v17771_v10  ;;  %v17810_v48 = vld [vmem:[#allocation2 + $0x8c] ss:$0 sps:$4 sm:$0x11]  }
 0x133   :  { %2768 = vrot.lane.b32.xlu0 %v17578_v50, %s16708_s6  ;;  %v593_v50 = vor.u32 %v591_v49, %v590_v13  ;;  %v1106_v9 = vsel %vm17060_vm7, %v585_v62, %v1105_v45  ;;  %v1112_v45 = vld [vmem:[#allocation2 + $0xa8] sm:$0xf]  ;;  %v2020_v62 = vshrl.u32 %v17769_v29, 16 }
 0x134   :  { %v17764_v38 = vpop.permute.xlu1 %4322  ;;  %1107 = vst [vmem:[#allocation2 + $0x9c] sm:$0xf] %v1106_v9  ;;  %v17784_v59 = vrot.slane %v597_v8, 7  ;;  %v2022_v8 = vshll.u32 %v17769_v29, 16 }
 0x135   :  { %v2274_v35 = vpop.permute.xlu0 %2273 }
 0x136   :  { %3314 = vrot.lane.b32.xlu1 %v3031_v44, %s16712_s18  ;;  %v4644_v0 = vsel %vm22174_vm11, %v17139_v61, %v2274_v35  ;;  %v594_v44 = vsel %vm17070_vm8, %v586_v18, %v593_v50  ;;  %v1110_v61 = vsel %vm17095_vm9, %v595_v54, %v1109_v56  ;;  %v602_v13 = vor.u32 %v600_v14, %v17784_v59 }
 0x137   :  { %v4709_v30 = vsel %vm22168_vm12, %v4644_v0, %v17661_v15  ;;  %3312 = vrot.lane.b32.xlu0 %v17689_v39, %s16712_s18  ;;  %1108 = vst.msk [vmem:[#allocation2 + $0xa0] sm:$0xf] %vm22169_vm0, %v594_v44  ;;  %v2027_v15 = vshll.u32 %v17774_v53, 16  ;;  %v14125_v39 = vcombine.low %v1479_v17, %v17771_v10  ;;  %1111 = vst [vmem:[#allocation2 + $0xa4] sm:$0x1] %v1110_v61  ;;  %v17816_v56 = vrot.slane %v14220_v11, 1 }
 0x138   :  { %v17798_v49 = vpop.permute.xlu1 %2275  ;;  %v4774_v18 = vsel %vm22166_vm13, %v4709_v30, %v17593_v23  ;;  %v4050_v14 = vor.u32 %v4049_v20, %v4045_v24  ;;  %v17821_v23 = vld [vmem:[%s22122_s0 + $0x6c] sm:$0xf]  ;;  %v1113_v10 = vsel %vm17060_vm7, %v602_v13, %v1112_v45  ;;  %v4054_v17 = vrot.slane %v4052_v42, 1  ;;  %v1395_v44 = vld [vmem:[#allocation2 + $0x90] sm:$0xf] }
 0x139   :  { %v4839_v50 = vsel %vm22165_vm14, %v4774_v18, %v17734_v12  ;;  %v3297_v9 = vpop.permute.xlu0 %3296  ;;  %v3035_v54 = vshll.u32 %v17790_v32, 16  ;;  %1114 = vst [vmem:[#allocation2 + $0xa8] sm:$0xf] %v1113_v10  ;;  %v2465_v20 = vrot.slane %v14030_v36, 1  ;;  %v2024_v0 = vrot.slane %v2022_v8, 1 }
 0x13a   :  { %3570 = vrot.lane.b32.xlu1 %v17692_v43, %s16710_s16  ;;  %v4837_v35 = vsel %vm22165_vm14, %v4772_v34, %v3297_v9  ;;  %v4904_v12 = vsel %vm22167_vm15, %v4839_v50, %v17698_v55  ;;  %v4508_v34 = vrot.slane %v17750_v16, 1  ;;  %v2466_v42 = vrot.slane %v17774_v53, 1  ;;  %v17852_v36 = vld [vmem:[#allocation2 + $0x94] sm:$0xf]  ;;  %v17858_v18 = vld [vmem:[#allocation2 + $0xd0] sm:$0xf] }
 0x13b   :  { %v4902_v43 = vsel %vm22167_vm15, %v4837_v35, %v17677_v2  ;;  %3568 = vrot.lane.b32.xlu0 %v17681_v26, %s16710_s16  ;;  %v4969_v24 = vsel %vm22177_vm1, %v4904_v12, %v17628_v6  ;;  %v3040_v2 = vshll.u32 %v17810_v48, 16  ;;  %v4043_v6 = vsel %vm22171_vm6, %v17737_v46, %v17705_v28  ;;  %22194 = vst [vmem:[#allocation33_spill] sm:$0xff] %v17858_v18  ;;  %v17870_v9 = vld [vmem:[%s22122_s0 + $0x70] sm:$0xf] }
 0x13c   :  { %v17833_v11 = vpop.permute.xlu1 %2277  ;;  %v4967_v55 = vsel %vm22177_vm1, %v4902_v43, %v17647_v3  ;;  %v5034_v26 = vsel %vm22176_vm4, %v4969_v24, %v17764_v38  ;;  %v22193_v16 = vshrl.u32 %v17651_v19, 16  ;;  %v605_v53 = vshrl.u32 %v17821_v23, 16  ;;  %v1532_v38 = vld [vmem:[#allocation2 + $0xcc] sm:$0xf]  ;;  %v1522_v35 = vld [vmem:[#allocation2 + $0x90] sm:$0xf] }
 0x13d   :  { %v4321_v45 = vpop.permute.xlu0 %4320  ;;  %v4055_v61 = vsel %vm22171_vm6, %v4050_v14, %v4054_v17  ;;  %v3037_v13 = vrot.slane %v3035_v54, 1  ;;  %v2029_v46 = vrot.slane %v2027_v15, 1  ;;  %v3486_v8 = vrot.slane %v14125_v39, 1  ;;  %v17885_v12 = vld [vmem:[#allocation2 + $0x98] ss:$0 sps:$4 sm:$0x11]  }
 0x13e   :  { %3794 = vrot.lane.b32.xlu1 %v17716_v47, %s16709_s7  ;;  %v2013_v3 = vor.u32 %v17718_v57, %v22193_v16  ;;  %v5032_v30 = vsel %vm22176_vm4, %v4967_v55, %v4321_v45  ;;  %v3033_v47 = vshrl.u32 %v17790_v32, 16  ;;  %v3487_v50 = vrot.slane %v17810_v48, 1  ;;  %v1277_v54 = vld [vmem:[#allocation2 + $0xd8] sm:$0xf]  ;;  %v17891_v43 = vld [vmem:[#allocation2 + $0xdc] sm:$0xf] }
 0x13f   :  { %3792 = vrot.lane.b32.xlu0 %v17632_v21, %s16709_s7  ;;  %v5097_v28 = vsel %vm5095_vm10, %v5032_v30, %v17712_v63  ;;  %v5099_v14 = vsel %vm5095_vm10, %v5034_v26, %v17745_v4  ;;  %v1480_v21 = vld [vmem:[#allocation2 + $0x90] sm:$0xe]  ;;  %v17876_v10 = vcombine.low %v1395_v44, %v17852_v36  ;;  %v3042_v63 = vrot.slane %v3040_v2, 1  ;;  %v17887_v4 = vld [vmem:[#allocation2 + $0x94] sm:$0xf] }
 0x140   :  { %v17864_v57 = vpop.permute.xlu1 %2534  ;;  %15528 = vmatprep.mubr.msk.bf16.mxu0 %vm22157_vm5, %v5097_v28  ;;  %v608_v15 = vshll.u32 %v17821_v23, 16  ;;  %v2025_v48 = vor.u32 %v2024_v0, %v2020_v62  ;;  %v17889_v17 = vrot.slane %v605_v53, 7  ;;  %v2018_v23 = vsel %vm22171_vm6, %v2013_v3, %v17728_v51  ;;  %v1524_v2 = vld [vmem:[#allocation2 + $0x9c] sm:$0xf]  ;;  %v17899_v62 = vld [vmem:[#allocation2 + $0xa0] sm:$0xf] }
 0x141   :  { %15529 = vmatmul.mubr.msk.bf16.vlgmr.msra.gmra.mxu0 %vm22157_vm5, %v5099_v14  ;;  %v17880_v39 = vpop.permute.xlu0 %2532  ;;  %v22195_v24 = vrot.slane %v17643_v33, 1  ;;  %v3038_v44 = vor.u32 %v3037_v13, %v3033_v47  ;;  %v4509_v45 = vsel %vm22170_vm2, %v17816_v56, %v4508_v34  ;;  %v22196_v26 = vrot.slane %v17658_v25, 1  ;;  %v17916_v3 = vld [vmem:[#allocation2 + $0xcc] sm:$0xe]  ;;  %v17925_v34 = vld [vmem:[#allocation2 + $0x94] sm:$0xf] }
 0x142   :  { %4338 = vrot.lane.b32.xlu1 %v4055_v61, %s16713_s13  ;;  %v14126_v33 = vcombine.low %v1480_v21, %v17852_v36  ;;  %v17914_v16 = vcombine.low %v1532_v38, %v17858_v18  ;;  %22198 = vst [vmem:[#allocation35_spill] sm:$0xff] %v17916_v3  ;;  %v3047_v53 = vshll.u32 %v17876_v10, 16  ;;  %v17921_v56 = vcombine.low %v1522_v35, %v17887_v4  ;;  %v17923_v25 = vld [vmem:[#allocation2 + $0x98] ss:$0 sps:$4 sm:$0x11]  }
 0x143   :  { %v4506_v55 = vsel %vm22170_vm2, %v17708_v31, %v22195_v24  ;;  %4336 = vrot.lane.b32.xlu0 %v4043_v6, %s16713_s13  ;;  %v17910_v51 = vsel %vm22170_vm2, %v17778_v7, %v22196_v26  ;;  %v1269_v31 = vld [vmem:[#allocation2 + $0x90] sm:$0xf]  ;;  %v2467_v6 = vsel %vm22170_vm2, %v2465_v20, %v2466_v42  ;;  %v2030_v30 = vsel %vm22171_vm6, %v2025_v48, %v2029_v46  ;;  %v17936_v47 = vld [vmem:[#allocation2 + $0xa4] ss:$0 sps:$4 sm:$0x11]  }
 0x144   :  { %v17902_v0 = vpop.permute.xlu1 %2758  ;;  %22197 = vst [vmem:[#allocation34_spill] sm:$0xff] %v17914_v16  ;;  %v3052_v61 = vshll.u32 %v17885_v12, 16  ;;  %v17934_v20 = vcombine.low %v1524_v2, %v17899_v62  ;;  %v1608_v42 = vld [vmem:[#allocation2 + $0x90] sm:$0xe]  ;;  %v603_v13 = vrot.slane %v17784_v59, 4  ;;  %v17940_v38 = vsel %vm22171_vm6, %v3038_v44, %v3042_v63 }
 0x145   :  { %v17928_v36 = vpop.permute.xlu0 %2756  ;;  %v17943_v28 = vsel %vm22170_vm2, %v3486_v8, %v3487_v50  ;;  %v17945_v14 = vld [vmem:[#allocation2 + $0x98] ss:$0 sps:$4 sm:$0x11]   ;;  %v610_v46 = vor.u32 %v608_v15, %v17889_v17  ;;  %v17949_v21 = vcombine.low %v1277_v54, %v17891_v43  ;;  %v3045_v48 = vshrl.u32 %v17876_v10, 16  ;;  %v17957_v63 = vld [vmem:[#allocation2 + $0x9c] sm:$0xe] }
 0x146   :  { %2291 = vrot.lane.b32.xlu1 %v2018_v23, %s16707_s30  ;;  %v17955_v59 = vrot.slane %v14126_v33, 1  ;;  %v17960_v8 = vcombine.low %v1269_v31, %v17925_v34  ;;  %v612_v50 = vrot.slane %v17889_v17, 4  ;;  %v4646_v15 = vsel %vm22174_vm11, %v17145_v5, %v17798_v49  ;;  %v1271_v24 = vld [vmem:[#allocation2 + $0x9c] sm:$0xf]  ;;  %v1116_v44 = vld [vmem:[#allocation2 + $0xb0] sm:$0x1] }
 0x147   :  { %22199 = vst [vmem:[#allocation36_spill] sm:$0xff] %v17949_v21  ;;  %4592 = vrot.lane.b32.xlu0 %v4506_v55, %s16711_s8  ;;  %v3049_v54 = vrot.slane %v3047_v53, 1  ;;  %v4059_v23 = vshll.u32 %v17921_v56, 16  ;;  %v17967_v55 = vld [vmem:[#allocation2 + $0xa0] sm:$0xf]  ;;  %v3054_v33 = vrot.slane %v3052_v61, 1  ;;  %v17980_v49 = vsel %vm22174_vm11, %v17169_v41, %v17833_v11 }
 0x148   :  { %v17952_v35 = vpop.permute.xlu1 %3302  ;;  %22200 = vst [vmem:[#allocation37_spill] sm:$0xff] %v17960_v8  ;;  %v4071_v31 = vshll.u32 %v17934_v20, 16  ;;  %v4076_v5 = vshll.u32 %v17936_v47, 16  ;;  %v14221_v53 = vcombine.low %v1608_v42, %v17887_v4  ;;  %v4064_v2 = vshll.u32 %v17923_v25, 16  ;;  %v337_v4 = vld [vmem:[%s22122_s0 + $0x74] sm:$0xf] }
 0x149   :  { %v17971_v26 = vpop.permute.xlu0 %3300  ;;  %v2039_v7 = vshll.u32 %v17945_v14, 16  ;;  %v17985_v29 = vld [vmem:[#allocation2 + $0xa4] ss:$0 sps:$4 sm:$0x11]   ;;  %v14222_v61 = vcombine.low %v17957_v63, %v17899_v62  ;;  %v2034_v17 = vshll.u32 %v17960_v8, 16  ;;  %v17994_v41 = vcombine.low %v1271_v24, %v17967_v55 }
 0x14a   :  { %2293 = vrot.lane.b32.xlu1 %v2030_v30, %s16707_s30  ;;  %v611_v11 = vsel %vm17070_vm8, %v603_v13, %v610_v46  ;;  %v3050_v42 = vor.u32 %v3049_v54, %v3045_v48  ;;  %v18003_v52 = vrot.slane %v4059_v23, 1  ;;  %v1353_v62 = vld [vmem:[#allocation2 + $0x90] sm:$0xe]  ;;  %v4711_v63 = vsel %vm22168_vm12, %v4646_v15, %v17880_v39  ;;  %v1354_v48 = vld [vmem:[#allocation2 + $0x9c] sm:$0xe] }
 0x14b   :  { %4594 = vrot.lane.b32.xlu0 %v4509_v45, %s16711_s8  ;;  %22201 = vst [vmem:[#allocation38_spill] sm:$0xff] %v17994_v41  ;;  %1115 = vst.msk [vmem:[#allocation2 + $0xac] sm:$0xf] %vm22169_vm0, %v611_v11  ;;  %v18011_v13 = vrot.slane %v4071_v31, 1  ;;  %v18013_v46 = vrot.slane %v4076_v5, 1  ;;  %v1117_v54 = vsel %vm17095_vm9, %v612_v50, %v1116_v44  ;;  %v18017_v23 = vrot.slane %v4064_v2, 1 }
 0x14c   :  { %v17988_v30 = vpop.permute.xlu1 %3558  ;;  %v18020_v11 = vrot.slane %v2039_v7, 1  ;;  %v2051_v39 = vshll.u32 %v17985_v29, 16  ;;  %1118 = vst [vmem:[#allocation2 + $0xb0] sm:$0x1] %v1117_v54  ;;  %v18027_v15 = vrot.slane %v2034_v17, 1  ;;  %v18029_v31 = vrot.slane %v14221_v53, 1 }
 0x14d   :  { %v18008_v24 = vpop.permute.xlu0 %3556  ;;  %v2046_v44 = vshll.u32 %v17994_v41, 16  ;;  %v14032_v2 = vcombine.low %v1354_v48, %v17967_v55  ;;  %v1397_v7 = vld [vmem:[#allocation2 + $0x9c] sm:$0xf]  ;;  %v18034_v5 = vld [vmem:[#allocation2 + $0xa0] sm:$0xf]  ;;  %v22202_v54 = vshrl.u32 %v17870_v9, 16  ;;  %v14031_v55 = vcombine.low %v1353_v62, %v17925_v34 }
 0x14e   :  { %2550 = vrot.lane.b32.xlu1 %v2467_v6, %s16699_s23  ;;  %v18036_v19 = vld [vmem:[#allocation2 + $0xa4] ss:$0 sps:$4 sm:$0x11]   ;;  %v617_v45 = vshll.u32 %v17870_v9, 16  ;;  %v622_v17 = vshrl.u32 %v337_v4, 16  ;;  %v18044_v58 = vrot.slane %v14222_v61, 1  ;;  %v3055_v18 = vsel %vm22171_vm6, %v3050_v42, %v3054_v33 }
 0x14f   :  { %2548 = vrot.lane.b32.xlu0 %v17910_v51, %s16699_s23  ;;  %v616_v51 = vrot.slane %v22202_v54, 7  ;;  %v625_v48 = vshll.u32 %v337_v4, 16  ;;  %v18048_v3 = vrot.slane %v2051_v39, 1  ;;  %v1123_v9 = vld [vmem:[#allocation2 + $0xbc] sm:$0x1]  ;;  %v4776_v33 = vsel %vm22166_vm13, %v4711_v63, %v17928_v36 }
 0x150   :  { %v18025_v6 = vpop.permute.xlu1 %3782  ;;  %v624_v21 = vrot.slane %v622_v17, 7  ;;  %v1481_v34 = vld [vmem:[#allocation2 + $0x9c] sm:$0xe]  ;;  %v18058_v62 = vld [vmem:[#allocation2 + $0xd8] sm:$0xe]  ;;  %v18062_v42 = vrot.slane %v14032_v2, 1  ;;  %v18069_v50 = vcombine.low %v1397_v7, %v18034_v5  ;;  %v4713_v36 = vsel %vm22168_vm12, %v17980_v49, %v17864_v57 }
 0x151   :  { %v3781_v53 = vpop.permute.xlu0 %3780  ;;  %v619_v54 = vor.u32 %v617_v45, %v616_v51  ;;  %v620_v4 = vrot.slane %v616_v51, 4  ;;  %v2469_v45 = vrot.slane %v17945_v14, 1  ;;  %v1526_v61 = vld [vmem:[#allocation2 + $0xa8] sm:$0xf]  ;;  %v4841_v63 = vsel %vm22165_vm14, %v4776_v33, %v17971_v26 }
 0x152   :  { %2774 = vrot.lane.b32.xlu1 %v17876_v10, %s16708_s6  ;;  %v18054_v10 = vrot.slane %v2046_v44, 1  ;;  %v627_v39 = vor.u32 %v625_v48, %v624_v21  ;;  %v18066_v44 = vrot.slane %v14031_v55, 1  ;;  %v629_v1 = vrot.slane %v624_v21, 4  ;;  %v18082_v55 = vld [vmem:[#allocation2 + $0xac] sm:$0xf] }
 0x153   :  { %2772 = vrot.lane.b32.xlu0 %v17790_v32, %s16708_s6  ;;  %v1399_v32 = vld [vmem:[#allocation2 + $0xa8] sm:$0xf]  ;;  %v1120_v51 = vsel %vm17060_vm7, %v619_v54, %v1119_v37  ;;  %v22203_v2 = vrot.slane %v17885_v12, 1  ;;  %v3064_v7 = vshll.u32 %v18036_v19, 16  ;;  %v4906_v21 = vsel %vm22167_vm15, %v4841_v63, %v18008_v24  ;;  %v18098_v48 = vld [vmem:[#allocation2 + $0xac] sm:$0xf] }
 0x154   :  { %v18052_v16 = vpop.permute.xlu1 %4326  ;;  %1121 = vst [vmem:[#allocation2 + $0xb4] sm:$0xf] %v1120_v51  ;;  %v1273_v37 = vld [vmem:[#allocation2 + $0xa8] sm:$0xf]  ;;  %v14127_v26 = vcombine.low %v1481_v34, %v18034_v5  ;;  %v628_v12 = vsel %vm17070_vm8, %v620_v4, %v627_v39  ;;  %v1124_v49 = vsel %vm17095_vm9, %v629_v1, %v1123_v9  ;;  %v4778_v24 = vsel %vm22166_vm13, %v4713_v36, %v17902_v0  ;;  %v18123_v51 = vld [vmem:[%s22122_s0 + $0x78] sm:$0xf] }
 0x155   :  { %v4325_v17 = vpop.permute.xlu0 %4324  ;;  %v4971_v54 = vsel %vm22177_vm1, %v4906_v21, %v3781_v53  ;;  %v18106_v5 = vld [vmem:[#allocation2 + $0xb0] ss:$0 sps:$4 sm:$0x11]   ;;  %v1482_v34 = vld [vmem:[#allocation2 + $0xa8] sm:$0xe]  ;;  %v18114_v0 = vcombine.low %v1399_v32, %v18082_v55  ;;  %v3057_v53 = vshrl.u32 %v18069_v50, 16 }
 0x156   :  { %3318 = vrot.lane.b32.xlu1 %v3055_v18, %s16712_s18  ;;  %v3491_v18 = vsel %vm22170_vm2, %v17955_v59, %v22203_v2  ;;  %v18094_v59 = vld [vmem:[#allocation2 + $0xac] sm:$0xf]  ;;  %1122 = vst.msk [vmem:[#allocation2 + $0xb8] sm:$0xf] %vm22169_vm0, %v628_v12  ;;  %1125 = vst [vmem:[#allocation2 + $0xbc] sm:$0x1] %v1124_v49  ;;  %v5036_v9 = vsel %vm22176_vm4, %v4971_v54, %v4325_v17  ;;  %v4843_v17 = vsel %vm22165_vm14, %v4778_v24, %v17952_v35 }
 0x157   :  { %3316 = vrot.lane.b32.xlu0 %v17940_v38, %s16712_s18  ;;  %v22204_v38 = vshrl.u32 %v17934_v20, 16  ;;  %v18118_v39 = vld [vmem:[#allocation2 + $0xb0] ss:$0 sps:$4 sm:$0x11]   ;;  %v18128_v63 = vrot.slane %v3064_v7, 1  ;;  %v18131_v32 = vcombine.low %v1526_v61, %v18094_v59  ;;  %v4908_v2 = vsel %vm22167_vm15, %v4843_v17, %v17988_v30 }
 0x158   :  { %v18089_v57 = vpop.permute.xlu1 %2279  ;;  %v22205_v21 = vshrl.u32 %v17921_v56, 16  ;;  %v18143_v12 = vrot.slane %v14127_v26, 1  ;;  %v18146_v7 = vcombine.low %v1273_v37, %v18098_v48  ;;  %v18148_v61 = vld [vmem:[#allocation2 + $0xb0] ss:$0 sps:$4 sm:$0x11]   ;;  %v4973_v30 = vsel %vm22177_vm1, %v4908_v2, %v18025_v6 }
 0x159   :  { %v4074_v33 = vor.u32 %v18011_v13, %v22204_v38  ;;  %v4581_v4 = vpop.permute.xlu0 %4580  ;;  %v3059_v13 = vshll.u32 %v18069_v50, 16  ;;  %v22206_v49 = vshrl.u32 %v17960_v8, 16  ;;  %v3493_v54 = vrot.slane %v18036_v19, 1  ;;  %v1355_v19 = vld [vmem:[#allocation2 + $0xa8] sm:$0xe] }
 0x15a   :  { %3574 = vrot.lane.b32.xlu1 %v3491_v18, %s16710_s16  ;;  %v5101_v36 = vsel %vm5095_vm10, %v5036_v9, %v4581_v4  ;;  %v4062_v35 = vor.u32 %v18003_v52, %v22205_v21  ;;  %v5038_v52 = vsel %vm22176_vm4, %v4973_v30, %v18052_v16  ;;  %v3071_v37 = vshll.u32 %v18114_v0, 16  ;;  %v1610_v9 = vld [vmem:[#allocation2 + $0xa8] sm:$0xe] }
 0x15b   :  { %3572 = vrot.lane.b32.xlu0 %v17943_v28, %s16710_s16  ;;  %15532 = vmatprep.mubr.msk.bf16.mxu0 %vm22157_vm5, %v5101_v36  ;;  %v4079_v28 = vsel %vm22171_vm6, %v4074_v33, %v18013_v46  ;;  %v2037_v24 = vor.u32 %v18027_v15, %v22206_v49  ;;  %v3061_v38 = vrot.slane %v3059_v13, 1  ;;  %v14128_v6 = vcombine.low %v1482_v34, %v18082_v55  ;;  %v1528_v13 = vld [vmem:[#allocation2 + $0xb4] sm:$0xf] }
 0x15c   :  { %v18138_v18 = vpop.permute.xlu1 %2281  ;;  %v3076_v33 = vshll.u32 %v18106_v5, 16  ;;  %v4083_v15 = vshll.u32 %v18131_v32, 16  ;;  %v631_v4 = vshrl.u32 %v18123_v51, 16  ;;  %v22207_v55 = vrot.slane %v17923_v25, 1 }
 0x15d   :  { %v4583_v26 = vpop.permute.xlu0 %4582  ;;  %v4088_v17 = vshll.u32 %v18118_v39, 16  ;;  %v2058_v36 = vshll.u32 %v18146_v7, 16  ;;  %v22208_v2 = vshrl.u32 %v17994_v41, 16  ;;  %v18186_v30 = vld [vmem:[#allocation2 + $0xb8] sm:$0xf]  ;;  %v14223_v25 = vcombine.low %v1610_v9, %v18094_v59 }
 0x15e   :  { %3798 = vrot.lane.b32.xlu1 %v17934_v20, %s16709_s7  ;;  %v5103_v46 = vsel %vm5095_vm10, %v5038_v52, %v4583_v26  ;;  %v4067_v20 = vsel %vm22171_vm6, %v4062_v35, %v18017_v23  ;;  %v4512_v34 = vsel %vm22170_vm2, %v18029_v31, %v22207_v55  ;;  %v2063_v23 = vshll.u32 %v18148_v61, 16  ;;  %v18263_v1 = vld [vmem:[#allocation2 + $0xb8] sm:$0xf] }
 0x15f   :  { %3796 = vrot.lane.b32.xlu0 %v17921_v56, %s16709_s7  ;;  %15533 = vmatmul.mubr.msk.bf16.gmra.mxu0 %vm22157_vm5, %v5103_v46  ;;  %v2042_v56 = vsel %vm22171_vm6, %v2037_v24, %v18020_v11  ;;  %v2049_v21 = vor.u32 %v18054_v10, %v22208_v2  ;;  %v3069_v31 = vshrl.u32 %v18114_v0, 16  ;;  %v3073_v49 = vrot.slane %v3071_v37, 1 }
 0x160   :  { %v18171_v16 = vpop.permute.xlu1 %2538  ;;  %v3495_v52 = vrot.slane %v14128_v6, 1  ;;  %v3496_v11 = vrot.slane %v18106_v5, 1  ;;  %v18195_v24 = vrot.slane %v3076_v33, 1  ;;  %v4081_v10 = vshrl.u32 %v18131_v32, 16  ;;  %v1275_v33 = vld [vmem:[#allocation2 + $0xb4] sm:$0xf] }
 0x161   :  { %v18190_v35 = vpop.permute.xlu0 %2536  ;;  %v4085_v26 = vrot.slane %v4083_v15, 1  ;;  %v14033_v46 = vcombine.low %v1355_v19, %v18098_v48  ;;  %v22209_v9 = vrot.slane %v17936_v47, 1  ;;  %v18207_v37 = vcombine.low %v1528_v13, %v18186_v30  ;;  %v18212_v15 = vld [vmem:[#allocation2 + $0xb8] sm:$0xf]  ;;  %v339_v48 = vld [vmem:[%s22122_s0 + $0x7c] sm:$0xf] }
 0x162   :  { %4342 = vrot.lane.b32.xlu1 %v4079_v28, %s16713_s13  ;;  %v18209_v5 = vrot.slane %v4088_v17, 1  ;;  %v3062_v47 = vor.u32 %v3061_v38, %v3057_v53  ;;  %v18219_v19 = vrot.slane %v2058_v36, 1  ;;  %v2054_v13 = vsel %vm22171_vm6, %v2049_v21, %v18048_v3  ;;  %v18238_v38 = vld [vmem:[#allocation2 + $0xbc] ss:$0 sps:$4 sm:$0x11]  }
 0x163   :  { %4340 = vrot.lane.b32.xlu0 %v4067_v20, %s16713_s13  ;;  %v4515_v28 = vsel %vm22170_vm2, %v18044_v58, %v22209_v9  ;;  %v18221_v58 = vrot.slane %v2063_v23, 1  ;;  %v18223_v20 = vrot.slane %v14223_v25, 1  ;;  %v22210_v17 = vrot.slane %v17985_v29, 1  ;;  %v1611_v23 = vld [vmem:[#allocation2 + $0xb4] sm:$0xe] }
 0x164   :  { %v18200_v59 = vpop.permute.xlu1 %2762  ;;  %v2470_v53 = vsel %vm22170_vm2, %v18066_v44, %v2469_v45  ;;  %v4517_v36 = vrot.slane %v18118_v39, 1  ;;  %v18246_v3 = vcombine.low %v1275_v33, %v18212_v15  ;;  %v18248_v29 = vld [vmem:[#allocation2 + $0xbc] ss:$0 sps:$4 sm:$0x11]   ;;  %v1126_v21 = vld [vmem:[#allocation2 + $0xc0] sm:$0xf]  ;;  %v3074_v9 = vor.u32 %v3073_v49, %v3069_v31 }
 0x165   :  { %v18225_v55 = vpop.permute.xlu0 %2760  ;;  %v2473_v2 = vsel %vm22170_vm2, %v18062_v42, %v22210_v17  ;;  %v18250_v42 = vrot.slane %v14033_v46, 1  ;;  %v4095_v39 = vshll.u32 %v18207_v37, 16  ;;  %v1401_v25 = vld [vmem:[#allocation2 + $0xb4] sm:$0xf]  ;;  %v18261_v46 = vsel %vm22171_vm6, %v3062_v47, %v18128_v63 }
 0x166   :  { %2295 = vrot.lane.b32.xlu1 %v2042_v56, %s16707_s30  ;;  %v18243_v56 = vsel %vm22170_vm2, %v18143_v12, %v3493_v54  ;;  %v633_v12 = vrot.slane %v631_v4, 7  ;;  %v634_v54 = vshll.u32 %v18123_v51, 16  ;;  %v639_v33 = vshrl.u32 %v339_v48, 16  ;;  %v1130_v51 = vld [vmem:[#allocation2 + $0xc8] sm:$0x1] }
 0x167   :  { %4596 = vrot.lane.b32.xlu0 %v4512_v34, %s16711_s8  ;;  %v642_v17 = vshll.u32 %v339_v48, 16  ;;  %v4100_v14 = vshll.u32 %v18238_v38, 16  ;;  %v4086_v44 = vor.u32 %v4085_v26, %v4081_v10  ;;  %v14224_v4 = vcombine.low %v1611_v23, %v18186_v30  ;;  %v1356_v63 = vld [vmem:[#allocation2 + $0xb4] sm:$0xe] }
 0x168   :  { %v18254_v45 = vpop.permute.xlu1 %3306  ;;  %v636_v6 = vor.u32 %v634_v54, %v633_v12  ;;  %v2070_v49 = vshll.u32 %v18246_v3, 16  ;;  %v637_v47 = vrot.slane %v633_v12, 4  ;;  %v641_v41 = vrot.slane %v639_v33, 7  ;;  %v18284_v23 = vld [vmem:[#allocation2 + $0xbc] ss:$0 sps:$4 sm:$0x11]  }
 0x169   :  { %v3305_v34 = vpop.permute.xlu0 %3304  ;;  %v4650_v48 = vsel %vm22174_vm11, %v17259_v40, %v18089_v57  ;;  %v18280_v10 = vsel %vm22170_vm2, %v3495_v52, %v3496_v11  ;;  %v2075_v12 = vshll.u32 %v18248_v29, 16  ;;  %v18288_v40 = vcombine.low %v1401_v25, %v18263_v1  ;;  %v18295_v52 = vld [vmem:[%s22122_s0 + $0x80] sm:$0xf]  ;;  %v1483_v33 = vld [vmem:[#allocation2 + $0xb4] sm:$0xe] }
 0x16a   :  { %2297 = vrot.lane.b32.xlu1 %v2054_v13, %s16707_s30  ;;  %v22211_v13 = vld [vmem:[#allocation26_spill] sm:$0xff]  ;;  %v1127_v26 = vsel %vm17060_vm7, %v636_v6, %v1126_v21  ;;  %v644_v54 = vor.u32 %v642_v17, %v641_v41  ;;  %v646_v57 = vrot.slane %v641_v41, 4  ;;  %v4097_v6 = vrot.slane %v4095_v39, 1  ;;  %v18306_v41 = vld [vmem:[%s22122_s0 + $0x84] sm:$0xf] }
 0x16b   :  { %v4652_v8 = vsel %vm22174_vm11, %v22211_v13, %v18138_v18  ;;  %4598 = vrot.lane.b32.xlu0 %v4515_v28, %s16711_s8  ;;  %1128 = vst [vmem:[#allocation2 + $0xc0] sm:$0xf] %v1127_v26  ;;  %v18290_v18 = vld [vmem:[#allocation2 + $0xd4] ss:$0 sps:$4 sm:$0x11]   ;;  %v3079_v28 = vsel %vm22171_vm6, %v3074_v9, %v18195_v24  ;;  %v18300_v21 = vrot.slane %v14224_v4, 1  ;;  %v14034_v25 = vcombine.low %v1356_v63, %v18212_v15 }
 0x16c   :  { %v18277_v30 = vpop.permute.xlu1 %3562  ;;  %v18308_v17 = vrot.slane %v4100_v14, 1  ;;  %v18312_v13 = vsel %vm22171_vm6, %v4086_v44, %v18209_v5  ;;  %v645_v24 = vsel %vm17070_vm8, %v637_v47, %v644_v54  ;;  %v22212_v39 = vshrl.u32 %v18146_v7, 16 }
 0x16d   :  { %v3561_v11 = vpop.permute.xlu0 %3560  ;;  %v18326_v14 = vsel %vm22170_vm2, %v18223_v20, %v4517_v36  ;;  %v18328_v5 = vrot.slane %v2070_v49, 1  ;;  %1129 = vst.msk [vmem:[#allocation2 + $0xc4] sm:$0xf] %vm22169_vm0, %v645_v24  ;;  %v18332_v4 = vrot.slane %v2075_v12, 1  ;;  %v14129_v63 = vcombine.low %v1483_v33, %v18263_v1  ;;  %v22213_v12 = vld [vmem:[#allocation34_spill] sm:$0xff] }
 0x16e   :  { %2554 = vrot.lane.b32.xlu1 %v2473_v2, %s16699_s23  ;;  %v1131_v2 = vsel %vm17095_vm9, %v646_v57, %v1130_v51  ;;  %v2061_v9 = vor.u32 %v18219_v19, %v22212_v39  ;;  %v3088_v51 = vshll.u32 %v18284_v23, 16  ;;  %v4717_v19 = vsel %vm22168_vm12, %v4652_v8, %v18171_v16 }
 0x16f   :  { %2552 = vrot.lane.b32.xlu0 %v2470_v53, %s16699_s23  ;;  %1132 = vst [vmem:[#allocation2 + $0xc8] sm:$0x1] %v1131_v2  ;;  %v3083_v53 = vshll.u32 %v18288_v40, 16  ;;  %v4715_v20 = vsel %vm22168_vm12, %v4650_v48, %v18190_v35  ;;  %v18343_v49 = vrot.slane %v14034_v25, 1  ;;  %v648_v47 = vshrl.u32 %v18295_v52, 16  ;;  %v22214_v2 = vld [vmem:[#allocation36_spill] sm:$0xff] }
 0x170   :  { %v18319_v15 = vpop.permute.xlu1 %3786  ;;  %v4780_v26 = vsel %vm22166_vm13, %v4715_v20, %v18225_v55  ;;  %v4119_v54 = vshll.u32 %v22213_v12, 16  ;;  %v4124_v1 = vshll.u32 %v18290_v18, 16  ;;  %v656_v8 = vshrl.u32 %v18306_v41, 16  ;;  %v18357_v25 = vld [vmem:[#allocation2 + $0xe0] ss:$0 sps:$4 sm:$0x11]  }
 0x171   :  { %v3785_v36 = vpop.permute.xlu0 %3784  ;;  %v4845_v16 = vsel %vm22165_vm14, %v4780_v26, %v3305_v34  ;;  %v18359_v55 = vrot.slane %v3083_v53, 1  ;;  %v18361_v33 = vrot.slane %v3088_v51, 1  ;;  %v18363_v24 = vrot.slane %v14129_v63, 1  ;;  %v1133_v63 = vld [vmem:[#allocation2 + $0xe4] sm:$0xf] }
 0x172   :  { %2778 = vrot.lane.b32.xlu1 %v18114_v0, %s16708_s6  ;;  %v2082_v34 = vshll.u32 %v22214_v2, 16  ;;  %v651_v20 = vshll.u32 %v18295_v52, 16  ;;  %v18368_v26 = vrot.slane %v656_v8, 7  ;;  %v659_v57 = vshll.u32 %v18306_v41, 16 }
 0x173   :  { %2776 = vrot.lane.b32.xlu0 %v18069_v50, %s16708_s6  ;;  %v650_v50 = vrot.slane %v648_v47, 7  ;;  %v18372_v53 = vrot.slane %v4119_v54, 1  ;;  %v18374_v51 = vrot.slane %v4124_v1, 1  ;;  %v4782_v0 = vsel %vm22166_vm13, %v4717_v19, %v18200_v59  ;;  %v1403_v47 = vld [vmem:[#allocation2 + $0xc0] sm:$0xf] }
 0x174   :  { %v4331_v35 = vpop.permute.xlu1 %4330  ;;  %v18386_v41 = vsel %vm22171_vm6, %v2061_v9, %v18221_v58  ;;  %v2087_v54 = vshll.u32 %v18357_v25, 16  ;;  %v4847_v1 = vsel %vm22165_vm14, %v4782_v0, %v18254_v45  ;;  %v22215_v59 = vshrl.u32 %v18207_v37, 16  ;;  %v1404_v19 = vld [vmem:[#allocation2 + $0xc4] sm:$0xf]  ;;  %v1530_v9 = vld [vmem:[#allocation2 + $0xc0] sm:$0xf] }
 0x175   :  { %v4329_v39 = vpop.permute.xlu0 %4328  ;;  %v653_v31 = vor.u32 %v651_v20, %v650_v50  ;;  %v654_v44 = vrot.slane %v650_v50, 4  ;;  %v661_v45 = vor.u32 %v659_v57, %v18368_v26  ;;  %v342_v57 = vld [vmem:[%s22122_s0 + $0x88] sm:$0xf] }
 0x176   :  { %3322 = vrot.lane.b32.xlu1 %v3079_v28, %s16712_s18  ;;  %v4910_v28 = vsel %vm22167_vm15, %v4845_v16, %v3561_v11  ;;  %v4098_v11 = vor.u32 %v4097_v6, %v22215_v59  ;;  %v1484_v16 = vld [vmem:[#allocation2 + $0xc0] sm:$0xe]  ;;  %v4912_v6 = vsel %vm22167_vm15, %v4847_v1, %v18277_v30  ;;  %v22217_v30 = vshrl.u32 %v18246_v3, 16  ;;  %v18427_v20 = vld [vmem:[#allocation2 + $0xc8] ss:$0 sps:$4 sm:$0x11]  }
 0x177   :  { %3320 = vrot.lane.b32.xlu0 %v18261_v46, %s16712_s18  ;;  %v4975_v8 = vsel %vm22177_vm1, %v4910_v28, %v3785_v36  ;;  %v18394_v46 = vrot.slane %v2082_v34, 1  ;;  %v1137_v36 = vld [vmem:[#allocation2 + $0xec] sm:$0x1]  ;;  %v22216_v34 = vrot.slane %v18238_v38, 1  ;;  %v18409_v28 = vld [vmem:[#allocation2 + $0xc4] sm:$0xf]  ;;  %v4977_v50 = vsel %vm22177_vm1, %v4912_v6, %v18319_v15 }
 0x178   :  { %v18382_v52 = vpop.permute.xlu1 %2283  ;;  %v5040_v48 = vsel %vm22176_vm4, %v4975_v8, %v4329_v39  ;;  %v343_v15 = vld [vmem:[%s22122_s0 + $0x8c] sm:$0xf]  ;;  %v22218_v1 = vrot.slane %v18148_v61, 1  ;;  %v22219_v59 = vld [vmem:[#allocation35_spill] sm:$0xff]  ;;  %v344_v6 = vld [vmem:[%s22122_s0 + $0x90] sm:$0xf]  ;;  %v14130_v61 = vcombine.low %v1484_v16, %v1404_v19 }
 0x179   :  { %v4585_v58 = vpop.permute.xlu0 %4584  ;;  %v18407_v39 = vsel %vm22170_vm2, %v18300_v21, %v22216_v34  ;;  %v2073_v21 = vor.u32 %v18328_v5, %v22217_v30  ;;  %v22220_v5 = vld [vmem:[#allocation33_spill] sm:$0xff]  ;;  %v22222_v34 = vcombine.low %v18058_v62, %v17891_v43  ;;  %v18464_v30 = vld [vmem:[%s22122_s0 + $0x94] sm:$0xf]  ;;  %v665_v16 = vshrl.u32 %v342_v57, 16 }
 0x17a   :  { %3578 = vrot.lane.b32.xlu1 %v18280_v10, %s16710_s16  ;;  %v5105_v0 = vsel %vm5095_vm10, %v5040_v48, %v4585_v58  ;;  %v663_v10 = vrot.slane %v18368_v26, 4  ;;  %v18425_v48 = vcombine.low %v1403_v47, %v1404_v19  ;;  %v18429_v26 = vrot.slane %v2087_v54, 1  ;;  %v18472_v19 = vld [vmem:[#allocation2 + $0xc8] ss:$0 sps:$4 sm:$0x11]  }
 0x17b   :  { %3576 = vrot.lane.b32.xlu0 %v18243_v56, %s16710_s16  ;;  %15536 = vmatprep.mubr.msk.bf16.mxu0 %vm22157_vm5, %v5105_v0  ;;  %v5042_v56 = vsel %vm22176_vm4, %v4977_v50, %v4331_v35  ;;  %v18439_v8 = vsel %vm22170_vm2, %v18250_v42, %v22218_v1  ;;  %v22221_v47 = vcombine.low %v22219_v59, %v22220_v5  ;;  %v18459_v50 = vrot.slane %v22222_v34, 1  ;;  %v1147_v34 = vld [vmem:[#allocation2 + $0xfc] sm:$0xf] }
 0x17c   :  { %v18420_v38 = vpop.permute.xlu1 %2285  ;;  %v662_v42 = vsel %vm17070_vm8, %v654_v44, %v661_v45  ;;  %v1134_v35 = vsel %vm17060_vm7, %v653_v31, %v1133_v63  ;;  %v18470_v44 = vcombine.low %v1530_v9, %v18409_v28  ;;  %v1138_v43 = vsel %vm17095_vm9, %v663_v10, %v1137_v36  ;;  %v1612_v45 = vld [vmem:[#allocation2 + $0xc0] sm:$0xe] }
 0x17d   :  { %v18444_v58 = vrot.slane %v22221_v47, 1  ;;  %v4587_v0 = vpop.permute.xlu0 %4586  ;;  %1135 = vst [vmem:[#allocation2 + $0xe4] sm:$0xf] %v1134_v35  ;;  %1136 = vst.msk [vmem:[#allocation2 + $0xe8] sm:$0xf] %vm22169_vm0, %v662_v42  ;;  %v2078_v31 = vsel %vm22171_vm6, %v2073_v21, %v18332_v4  ;;  %v3093_v9 = vshrl.u32 %v18425_v48, 16 }
 0x17e   :  { %3802 = vrot.lane.b32.xlu1 %v18207_v37, %s16709_s7  ;;  %v5107_v1 = vsel %vm5095_vm10, %v5042_v56, %v4587_v0  ;;  %v4103_v37 = vsel %vm22171_vm6, %v4098_v11, %v18308_v17  ;;  %v22223_v17 = vrot.slane %v18248_v29, 1  ;;  %v3095_v11 = vshll.u32 %v18425_v48, 16  ;;  %1139 = vst [vmem:[#allocation2 + $0xec] sm:$0x1] %v1138_v43  ;;  %v1140_v56 = vld [vmem:[#allocation2 + $0xf0] sm:$0xf] }
 0x17f   :  { %3800 = vrot.lane.b32.xlu0 %v18131_v32, %s16709_s7  ;;  %15537 = vmatmul.mubr.msk.bf16.gmra.mxu0 %vm22157_vm5, %v5107_v1  ;;  %v3100_v32 = vshll.u32 %v18427_v20, 16  ;;  %v668_v36 = vshll.u32 %v342_v57, 16  ;;  %v673_v10 = vshrl.u32 %v343_v15, 16  ;;  %v18496_v29 = vrot.slane %v14130_v61, 1  ;;  %v1144_v0 = vld [vmem:[#allocation2 + $0xf8] sm:$0x1] }
 0x180   :  { %v18480_v62 = vpop.permute.xlu1 %2542  ;;  %v18488_v63 = vsel %vm22170_vm2, %v18343_v49, %v22223_v17  ;;  %v667_v4 = vrot.slane %v665_v16, 7  ;;  %v676_v49 = vshll.u32 %v343_v15, 16  ;;  %v682_v21 = vshrl.u32 %v344_v6, 16 }
 0x181   :  { %v18493_v59 = vpop.permute.xlu0 %2540  ;;  %v4107_v5 = vshll.u32 %v18470_v44, 16  ;;  %v675_v47 = vrot.slane %v673_v10, 7  ;;  %v685_v42 = vshll.u32 %v344_v6, 16  ;;  %v690_v35 = vshrl.u32 %v18464_v30, 16 }
 0x182   :  { %4346 = vrot.lane.b32.xlu1 %v4103_v37, %s16713_s13  ;;  %v3097_v1 = vrot.slane %v3095_v11, 1  ;;  %v670_v37 = vor.u32 %v668_v36, %v667_v4  ;;  %v671_v61 = vrot.slane %v667_v4, 4  ;;  %v18504_v43 = vrot.slane %v682_v21, 7 }
 0x183   :  { %4344 = vrot.lane.b32.xlu0 %v18312_v13, %s16713_s13  ;;  %v4112_v15 = vshll.u32 %v18472_v19, 16  ;;  %v14225_v17 = vcombine.low %v1612_v45, %v18409_v28  ;;  %v678_v16 = vor.u32 %v676_v49, %v675_v47  ;;  %v680_v10 = vrot.slane %v675_v47, 4 }
 0x184   :  { %v18502_v57 = vpop.permute.xlu1 %2766  ;;  %v1279_v54 = vld [vmem:[#allocation2 + $0xe4] sm:$0xf]  ;;  %v18512_v13 = vld [vmem:[#allocation2 + $0xe8] sm:$0xf]  ;;  %v1141_v11 = vsel %vm17060_vm7, %v670_v37, %v1140_v56  ;;  %v687_v36 = vor.u32 %v685_v42, %v18504_v43  ;;  %v18517_v4 = vrot.slane %v690_v35, 7  ;;  %v693_v21 = vshll.u32 %v18464_v30, 16 }
 0x185   :  { %v18508_v6 = vpop.permute.xlu0 %2764  ;;  %v22224_v28 = vshrl.u32 %v18288_v40, 16  ;;  %v22225_v49 = vrot.slane %v18284_v23, 1  ;;  %v18530_v47 = vcombine.low %v1279_v54, %v18512_v13  ;;  %v18532_v56 = vld [vmem:[#allocation2 + $0xec] ss:$0 sps:$4 sm:$0x11]   ;;  %v679_v42 = vsel %vm17070_vm8, %v671_v61, %v678_v16 }
 0x186   :  { %2299 = vrot.lane.b32.xlu1 %v18386_v41, %s16707_s30  ;;  %1142 = vst [vmem:[#allocation2 + $0xf0] sm:$0xf] %v1141_v11  ;;  %v22227_v23 = vshrl.u32 %v22213_v12, 16  ;;  %1143 = vst.msk [vmem:[#allocation2 + $0xf4] sm:$0xf] %vm22169_vm0, %v679_v42  ;;  %v1145_v61 = vsel %vm17095_vm9, %v680_v10, %v1144_v0  ;;  %v3102_v16 = vrot.slane %v3100_v32, 1 }
 0x187   :  { %v3086_v45 = vor.u32 %v18359_v55, %v22224_v28  ;;  %v18527_v41 = vsel %vm22170_vm2, %v18363_v24, %v22225_v49  ;;  %22226 = vst [vmem:[#allocation26_spill] sm:$0xff] %v18530_v47  ;;  %4600 = vrot.lane.b32.xlu0 %v18326_v14, %s16711_s8  ;;  %v22228_v24 = vshrl.u32 %v22214_v2, 16  ;;  %v1405_v35 = vld [vmem:[#allocation2 + $0xe4] sm:$0xf]  ;;  %v18547_v37 = vld [vmem:[#allocation2 + $0xe8] sm:$0xf]  ;;  %v1148_v14 = vsel %vm17060_vm7, %v687_v36, %v1147_v34 }
 0x188   :  { %v18538_v30 = vpop.permute.xlu1 %3310  ;;  %v4122_v55 = vor.u32 %v18372_v53, %v22227_v23  ;;  %v3502_v11 = vrot.slane %v18427_v20, 1  ;;  %v4105_v53 = vshrl.u32 %v18470_v44, 16  ;;  %v4522_v28 = vrot.slane %v14225_v17, 1  ;;  %1146 = vst [vmem:[#allocation2 + $0xf8] sm:$0x1] %v1145_v61  ;;  %v22230_v36 = vld [vmem:[#allocation28_spill] sm:$0xff] }
 0x189   :  { %v2085_v54 = vor.u32 %v18394_v46, %v22228_v24  ;;  %1149 = vst [vmem:[#allocation2 + $0xfc] sm:$0xf] %v1148_v14  ;;  %v18555_v46 = vpop.permute.xlu0 %3308  ;;  %v4109_v49 = vrot.slane %v4107_v5, 1  ;;  %v4523_v42 = vrot.slane %v18472_v19, 1  ;;  %v1358_v23 = vld [vmem:[#allocation2 + $0xe4] sm:$0xe]  ;;  %v695_v34 = vor.u32 %v693_v21, %v18517_v4 }
 0x18a   :  { %2301 = vrot.lane.b32.xlu1 %v2078_v31, %s16707_s30  ;;  %v688_v0 = vrot.slane %v18504_v43, 4  ;;  %v3098_v20 = vor.u32 %v3097_v1, %v3093_v9  ;;  %v4114_v32 = vrot.slane %v4112_v15, 1  ;;  %v2094_v17 = vshll.u32 %v18530_v47, 16  ;;  %v18584_v43 = vld [vmem:[#allocation2 + $0xec] ss:$0 sps:$4 sm:$0x11]  }
 0x18b   :  { %v18565_v10 = vcombine.low %v1405_v35, %v18547_v37  ;;  %4602 = vrot.lane.b32.xlu0 %v18407_v39, %s16711_s8  ;;  %v18573_v19 = vsel %vm22171_vm6, %v3086_v45, %v18361_v33  ;;  %v18577_v5 = vsel %vm22171_vm6, %v4122_v55, %v18374_v51  ;;  %v18581_v9 = vsel %vm22171_vm6, %v2085_v54, %v18429_v26  ;;  %v22229_v39 = vld [vmem:[#allocation27_spill] sm:$0xff]  ;;  %v1485_v26 = vld [vmem:[#allocation2 + $0xe4] sm:$0xe] }
 0x18c   :  { %v18569_v31 = vpop.permute.xlu1 %3566  ;;  %v2099_v1 = vshll.u32 %v18532_v56, 16  ;;  %v4654_v15 = vsel %vm22174_vm11, %v22229_v39, %v18382_v52  ;;  %v4656_v33 = vsel %vm22174_vm11, %v22230_v36, %v18420_v38  ;;  %v18594_v51 = vsel %vm22170_vm2, %v18496_v29, %v3502_v11 }
 0x18d   :  { %v14036_v21 = vcombine.low %v1358_v23, %v18512_v13  ;;  %v3565_v45 = vpop.permute.xlu0 %3564  ;;  %v4110_v55 = vor.u32 %v4109_v49, %v4105_v53  ;;  %v2092_v24 = vshrl.u32 %v18530_v47, 16  ;;  %v2481_v52 = vrot.slane %v18357_v25, 1  ;;  %v1407_v13 = vld [vmem:[#allocation2 + $0xf0] sm:$0xf]  ;;  %v18607_v61 = vld [vmem:[#allocation2 + $0xf4] sm:$0xf] }
 0x18e   :  { %2558 = vrot.lane.b32.xlu1 %v18488_v63, %s16699_s23  ;;  %v696_v54 = vsel %vm17070_vm8, %v688_v0, %v695_v34  ;;  %v3103_v38 = vsel %vm22171_vm6, %v3098_v20, %v3102_v16  ;;  %v18605_v29 = vsel %vm22170_vm2, %v4522_v28, %v4523_v42  ;;  %v2096_v35 = vrot.slane %v2094_v17, 1  ;;  %v1151_v49 = vld [vmem:[#allocation2 + $0x104] sm:$0x1]  ;;  %v1534_v20 = vld [vmem:[#allocation2 + $0xf0] sm:$0xf] }
 0x18f   :  { %v3107_v14 = vshll.u32 %v18565_v10, 16  ;;  %1150 = vst.msk [vmem:[#allocation2 + $0x100] sm:$0xf] %vm22169_vm0, %v696_v54  ;;  %v4721_v63 = vsel %vm22168_vm12, %v4656_v33, %v18480_v62  ;;  %2556 = vrot.lane.b32.xlu0 %v18439_v8, %s16699_s23  ;;  %v22231_v16 = vrot.slane %v18290_v18, 1  ;;  %v3112_v53 = vshll.u32 %v18584_v43, 16 }
 0x190   :  { %v18615_v25 = vpop.permute.xlu1 %3790  ;;  %v14131_v28 = vcombine.low %v1485_v26, %v18547_v37  ;;  %v2101_v42 = vrot.slane %v2099_v1, 1  ;;  %v2483_v23 = vrot.slane %v14036_v21, 1  ;;  %v2484_v62 = vrot.slane %v18532_v56, 1  ;;  %v1486_v56 = vld [vmem:[#allocation2 + $0xf0] sm:$0xe] }
 0x191   :  { %v18621_v11 = vsel %vm22170_vm2, %v18444_v58, %v22231_v16  ;;  %v697_v0 = vrot.slane %v18517_v4, 4  ;;  %v4719_v8 = vsel %vm22168_vm12, %v4654_v15, %v18493_v59  ;;  %v3789_v34 = vpop.permute.xlu0 %3788  ;;  %v18632_v18 = vsel %vm22171_vm6, %v4110_v55, %v4114_v32  ;;  %v18641_v4 = vld [vmem:[#allocation2 + $0xf4] sm:$0xf]  ;;  %v18643_v59 = vld [vmem:[#allocation2 + $0xf8] ss:$0 sps:$4 sm:$0x11]  }
 0x192   :  { %2782 = vrot.lane.b32.xlu1 %v18425_v48, %s16708_s6  ;;  %v18636_v58 = vsel %vm22170_vm2, %v18459_v50, %v2481_v52  ;;  %v18639_v37 = vcombine.low %v1407_v13, %v18607_v61  ;;  %v2097_v17 = vor.u32 %v2096_v35, %v2092_v24  ;;  %v3105_v1 = vshrl.u32 %v18565_v10, 16  ;;  %v18651_v50 = vld [vmem:[%s22122_s0 + $0x98] sm:$0xf]  ;;  %v1536_v52 = vld [vmem:[#allocation2 + $0xfc] sm:$0xf] }
 0x193   :  { %v3109_v48 = vrot.slane %v3107_v14, 1  ;;  %v1152_v32 = vsel %vm17095_vm9, %v697_v0, %v1151_v49  ;;  %v4786_v39 = vsel %vm22166_vm13, %v4721_v63, %v18502_v57  ;;  %2780 = vrot.lane.b32.xlu0 %v18288_v40, %s16708_s6  ;;  %v3114_v36 = vrot.slane %v3112_v53, 1  ;;  %v1281_v54 = vld [vmem:[#allocation2 + $0xf0] sm:$0xf]  ;;  %v18666_v40 = vld [vmem:[#allocation2 + $0xf4] sm:$0xf] }
 0x194   :  { %v4335_v15 = vpop.permute.xlu1 %4334  ;;  %v3504_v33 = vrot.slane %v14131_v28, 1  ;;  %v3505_v21 = vrot.slane %v18584_v43, 1  ;;  %1153 = vst [vmem:[#allocation2 + $0x104] sm:$0x1] %v1152_v32  ;;  %v4784_v26 = vsel %vm22166_vm13, %v4719_v8, %v18508_v6  ;;  %v4851_v55 = vsel %vm22165_vm14, %v4786_v39, %v18538_v30  ;;  %v1614_v8 = vld [vmem:[#allocation2 + $0xf0] sm:$0xe] }
 0x195   :  { %v14132_v24 = vcombine.low %v1486_v56, %v18607_v61  ;;  %v18664_v57 = vcombine.low %v1534_v20, %v18641_v4  ;;  %v4849_v35 = vsel %vm22165_vm14, %v4784_v26, %v18555_v46  ;;  %v4916_v43 = vsel %vm22167_vm15, %v4851_v55, %v18569_v31  ;;  %v4333_v13 = vpop.permute.xlu0 %4332  ;;  %v18679_v14 = vld [vmem:[#allocation2 + $0xf8] ss:$0 sps:$4 sm:$0x11]   ;;  %v1283_v32 = vld [vmem:[#allocation2 + $0xfc] sm:$0xf] }
 0x196   :  { %3326 = vrot.lane.b32.xlu1 %v3103_v38, %s16712_s18  ;;  %v18674_v6 = vsel %vm22170_vm2, %v2483_v23, %v2484_v62  ;;  %v3119_v30 = vshll.u32 %v18639_v37, 16  ;;  %v18677_v61 = vld [vmem:[#allocation2 + $0x100] sm:$0xf]  ;;  %v4914_v63 = vsel %vm22167_vm15, %v4849_v35, %v3565_v45  ;;  %v18683_v16 = vsel %vm22171_vm6, %v2097_v17, %v2101_v42  ;;  %v18697_v45 = vld [vmem:[#allocation2 + $0xf8] ss:$0 sps:$4 sm:$0x11]  }
 0x197   :  { %v3124_v46 = vshll.u32 %v18643_v59, 16  ;;  %v3110_v31 = vor.u32 %v3109_v48, %v3105_v1  ;;  %3324 = vrot.lane.b32.xlu0 %v18573_v19, %s16712_s18  ;;  %v3117_v53 = vshrl.u32 %v18639_v37, 16  ;;  %v18692_v28 = vcombine.low %v1536_v52, %v18677_v61 }
 0x198   :  { %v18688_v38 = vpop.permute.xlu1 %2287  ;;  %v18695_v49 = vcombine.low %v1281_v54, %v18666_v40  ;;  %v699_v42 = vshrl.u32 %v18651_v50, 16  ;;  %v4979_v23 = vsel %vm22177_vm1, %v4914_v63, %v3789_v34  ;;  %v3507_v62 = vrot.slane %v14132_v24, 1  ;;  %v18710_v34 = vld [vmem:[#allocation2 + $0x100] sm:$0xf]  ;;  %v1615_v24 = vld [vmem:[#allocation2 + $0xfc] sm:$0xe] }
 0x199   :  { %v3508_v0 = vrot.slane %v18643_v59, 1  ;;  %v4131_v19 = vshll.u32 %v18664_v57, 16  ;;  %v5044_v56 = vsel %vm22176_vm4, %v4979_v23, %v4333_v13  ;;  %v4589_v20 = vpop.permute.xlu0 %4588  ;;  %v3121_v17 = vrot.slane %v3119_v30, 1  ;;  %v1360_v23 = vld [vmem:[#allocation2 + $0xfc] sm:$0xe] }
 0x19a   :  { %22232 = vst [vmem:[#allocation34_spill] sm:$0xff] %v18695_v49  ;;  %3582 = vrot.lane.b32.xlu1 %v18594_v51, %s16710_s16  ;;  %v18707_v1 = vsel %vm22170_vm2, %v3504_v33, %v3505_v21  ;;  %v4136_v48 = vshll.u32 %v18679_v14, 16  ;;  %v4981_v59 = vsel %vm22177_vm1, %v4916_v43, %v18615_v25  ;;  %v5109_v39 = vsel %vm5095_vm10, %v5044_v56, %v4589_v20 }
 0x19b   :  { %v3126_v26 = vrot.slane %v3124_v46, 1  ;;  %v4129_v55 = vshrl.u32 %v18664_v57, 16  ;;  %3580 = vrot.lane.b32.xlu0 %v18527_v41, %s16710_s16  ;;  %15540 = vmatprep.mubr.msk.bf16.mxu0 %vm22157_vm5, %v5109_v39  ;;  %v4143_v33 = vshll.u32 %v18692_v28, 16  ;;  %v2106_v21 = vshll.u32 %v18695_v49, 16 }
 0x19c   :  { %v18719_v51 = vpop.permute.xlu1 %2289  ;;  %v2111_v52 = vshll.u32 %v18697_v45, 16  ;;  %v14227_v25 = vcombine.low %v1614_v8, %v18641_v4  ;;  %v5046_v54 = vsel %vm22176_vm4, %v4981_v59, %v4335_v15  ;;  %v18727_v35 = vsel %vm22171_vm6, %v3110_v31, %v3114_v36  ;;  %v18729_v43 = vld [vmem:[#allocation2 + $0x104] ss:$0 sps:$4 sm:$0x11]   ;;  %v347_v36 = vld [vmem:[%s22122_s0 + $0x9c] sm:$0xf] }
 0x19d   :  { %v4133_v41 = vrot.slane %v4131_v19, 1  ;;  %v18732_v13 = vcombine.low %v1283_v32, %v18710_v34  ;;  %v4591_v30 = vpop.permute.xlu0 %4590  ;;  %v3122_v63 = vor.u32 %v3121_v17, %v3117_v53  ;;  %v18737_v46 = vsel %vm22170_vm2, %v3507_v62, %v3508_v0  ;;  %v18746_v56 = vld [vmem:[#allocation2 + $0x104] ss:$0 sps:$4 sm:$0x11]   ;;  %v1359_v17 = vld [vmem:[#allocation2 + $0xf0] sm:$0xe] }
 0x19e   :  { %3806 = vrot.lane.b32.xlu1 %v22213_v12, %s16709_s7  ;;  %v4138_v4 = vrot.slane %v4136_v48, 1  ;;  %v4529_v15 = vrot.slane %v18679_v14, 1  ;;  %v5111_v31 = vsel %vm5095_vm10, %v5046_v54, %v4591_v30  ;;  %v14228_v12 = vcombine.low %v1615_v24, %v18677_v61  ;;  %v1158_v30 = vld [vmem:[#allocation2 + $0x110] sm:$0x1] }
 0x19f   :  { %3804 = vrot.lane.b32.xlu0 %v18470_v44, %s16709_s7  ;;  %15541 = vmatmul.mubr.msk.bf16.gmra.mxu0 %vm22157_vm5, %v5111_v31  ;;  %v18754_v53 = vrot.slane %v4143_v33, 1  ;;  %v18756_v62 = vrot.slane %v2106_v21, 1  ;;  %v18758_v0 = vrot.slane %v2111_v52, 1  ;;  %v4528_v20 = vrot.slane %v14227_v25, 1  ;;  %v1154_v44 = vld [vmem:[#allocation2 + $0x108] sm:$0xf] }
 0x1a0   :  { %v18752_v14 = vpop.permute.xlu1 %2546  ;;  %v4148_v48 = vshll.u32 %v18729_v43, 16  ;;  %v4134_v32 = vor.u32 %v4133_v41, %v4129_v55  ;;  %v2118_v59 = vshll.u32 %v18732_v13, 16  ;;  %v18768_v24 = vsel %vm22171_vm6, %v3122_v63, %v3126_v26  ;;  %v348_v31 = vld [vmem:[%s22122_s0 + $0xa0] sm:$0xf] }
 0x1a1   :  { %v18763_v39 = vpop.permute.xlu0 %2544  ;;  %v701_v33 = vrot.slane %v699_v42, 7  ;;  %v702_v21 = vshll.u32 %v18651_v50, 16  ;;  %v707_v52 = vshrl.u32 %v347_v36, 16  ;;  %v2123_v25 = vshll.u32 %v18746_v56, 16 }
 0x1a2   :  { %4350 = vrot.lane.b32.xlu1 %v18577_v5, %s16713_s13  ;;  %v18772_v55 = vrot.slane %v14228_v12, 1  ;;  %v14038_v54 = vcombine.low %v1360_v23, %v18710_v34  ;;  %v710_v41 = vshll.u32 %v347_v36, 16  ;;  %v22233_v5 = vld [vmem:[#allocation29_spill] sm:$0xff]  ;;  %v1409_v34 = vld [vmem:[#allocation2 + $0xfc] sm:$0xf]  ;;  %v18792_v61 = vrot.slane %v4148_v48, 1 }
 0x1a3   :  { %v18781_v26 = vsel %vm22174_vm11, %v22233_v5, %v18688_v38  ;;  %4348 = vrot.lane.b32.xlu0 %v18632_v18, %s16713_s13  ;;  %v704_v42 = vor.u32 %v702_v21, %v701_v33  ;;  %v705_v63 = vrot.slane %v701_v33, 4  ;;  %v709_v12 = vrot.slane %v707_v52, 7  ;;  %v18787_v23 = vld [vmem:[#allocation2 + $0x100] sm:$0xf]  ;;  %v349_v36 = vld [vmem:[%s22122_s0 + $0xa4] sm:$0xf] }
 0x1a4   :  { %v18785_v50 = vpop.permute.xlu1 %2770  ;;  %v18795_v38 = vsel %vm22171_vm6, %v4134_v32, %v4138_v4  ;;  %v14037_v18 = vcombine.low %v1359_v17, %v18666_v40  ;;  %v18799_v19 = vld [vmem:[#allocation2 + $0x104] ss:$0 sps:$4 sm:$0x11]   ;;  %v350_v33 = vld [vmem:[%s22122_s0 + $0xa8] sm:$0xf]  ;;  %v2120_v48 = vrot.slane %v2118_v59, 1  ;;  %v18811_v40 = vsel %vm22170_vm2, %v4528_v20, %v4529_v15 }
 0x1a5   :  { %v18804_v21 = vpop.permute.xlu0 %2768  ;;  %v712_v52 = vor.u32 %v710_v41, %v709_v12  ;;  %v1155_v4 = vsel %vm17060_vm7, %v704_v42, %v1154_v44  ;;  %v714_v32 = vrot.slane %v709_v12, 4  ;;  %v1487_v5 = vld [vmem:[#allocation2 + $0xfc] sm:$0xe]  ;;  %v18813_v17 = vrot.slane %v2123_v25, 1  ;;  %v1161_v42 = vld [vmem:[#allocation2 + $0x114] sm:$0xf] }
 0x1a6   :  { %2303 = vrot.lane.b32.xlu1 %v18581_v9, %s16707_s30  ;;  %v18815_v8 = vrot.slane %v14038_v54, 1  ;;  %1156 = vst [vmem:[#allocation2 + $0x108] sm:$0xf] %v1155_v4  ;;  %v716_v15 = vshrl.u32 %v348_v31, 16  ;;  %v719_v20 = vshll.u32 %v348_v31, 16  ;;  %v18826_v25 = vrot.slane %v14037_v18, 1 }
 0x1a7   :  { %4604 = vrot.lane.b32.xlu0 %v18605_v29, %s16711_s8  ;;  %v713_v59 = vsel %vm17070_vm8, %v705_v63, %v712_v52  ;;  %v1159_v44 = vsel %vm17095_vm9, %v714_v32, %v1158_v30  ;;  %v18831_v41 = vcombine.low %v1409_v34, %v18787_v23  ;;  %v724_v29 = vshrl.u32 %v349_v36, 16  ;;  %v1165_v31 = vld [vmem:[#allocation2 + $0x11c] sm:$0x1] }
 0x1a8   :  { %v18820_v9 = vpop.permute.xlu1 %3314  ;;  %1157 = vst.msk [vmem:[#allocation2 + $0x10c] sm:$0xf] %vm22169_vm0, %v713_v59  ;;  %1160 = vst [vmem:[#allocation2 + $0x110] sm:$0x1] %v1159_v44  ;;  %v718_v30 = vrot.slane %v716_v15, 7  ;;  %v727_v63 = vshll.u32 %v349_v36, 16  ;;  %v14133_v59 = vcombine.low %v1487_v5, %v18787_v23 }
 0x1a9   :  { %v18833_v12 = vpop.permute.xlu0 %3312  ;;  %v733_v18 = vshrl.u32 %v350_v33, 16  ;;  %v736_v52 = vshll.u32 %v350_v33, 16  ;;  %v22234_v4 = vshrl.u32 %v18695_v49, 16  ;;  %v3136_v34 = vshll.u32 %v18799_v19, 16  ;;  %v1168_v33 = vld [vmem:[#allocation2 + $0x120] sm:$0xf] }
 0x1aa   :  { %2305 = vrot.lane.b32.xlu1 %v18683_v16, %s16707_s30  ;;  %v726_v44 = vrot.slane %v724_v29, 7  ;;  %v3511_v16 = vrot.slane %v18799_v19, 1  ;;  %v721_v36 = vor.u32 %v719_v20, %v718_v30  ;;  %v722_v15 = vrot.slane %v718_v30, 4 }
 0x1ab   :  { %v2109_v32 = vor.u32 %v18756_v62, %v22234_v4  ;;  %4606 = vrot.lane.b32.xlu0 %v18621_v11, %s16711_s8  ;;  %v18847_v47 = vrot.slane %v733_v18, 7  ;;  %v22235_v49 = vshrl.u32 %v18692_v28, 16  ;;  %v22236_v4 = vshrl.u32 %v18732_v13, 16 }
 0x1ac   :  { %v18844_v54 = vpop.permute.xlu1 %3570  ;;  %v729_v5 = vor.u32 %v727_v63, %v726_v44  ;;  %v731_v29 = vrot.slane %v726_v44, 4  ;;  %v3129_v19 = vshrl.u32 %v18831_v41, 16  ;;  %v3131_v20 = vshll.u32 %v18831_v41, 16  ;;  %v18872_v44 = vld [vmem:[%s22122_s0 + $0xac] sm:$0xf] }
 0x1ad   :  { %v4146_v62 = vor.u32 %v18754_v53, %v22235_v49  ;;  %v2121_v23 = vor.u32 %v2120_v48, %v22236_v4  ;;  %v18854_v2 = vpop.permute.xlu0 %3568  ;;  %v1411_v11 = vld [vmem:[#allocation2 + $0x108] sm:$0xf]  ;;  %v1162_v30 = vsel %vm17060_vm7, %v721_v36, %v1161_v42  ;;  %v738_v49 = vor.u32 %v736_v52, %v18847_v47  ;;  %v22237_v42 = vld [vmem:[#allocation30_spill] sm:$0xff] }
 0x1ae   :  { %2562 = vrot.lane.b32.xlu1 %v18674_v6, %s16699_s23  ;;  %v1538_v18 = vld [vmem:[#allocation2 + $0x108] sm:$0xf]  ;;  %v18863_v53 = vrot.slane %v3136_v34, 1  ;;  %v3510_v48 = vrot.slane %v14133_v59, 1  ;;  %v730_v63 = vsel %vm17070_vm8, %v722_v15, %v729_v5  ;;  %1163 = vst [vmem:[#allocation2 + $0x114] sm:$0xf] %v1162_v30  ;;  %v1166_v6 = vsel %vm17095_vm9, %v731_v29, %v1165_v31 }
 0x1af   :  { %v4660_v36 = vsel %vm22174_vm11, %v22237_v42, %v18719_v51  ;;  %2560 = vrot.lane.b32.xlu0 %v18636_v58, %s16699_s23  ;;  %v18881_v34 = vsel %vm22171_vm6, %v2109_v32, %v18758_v0  ;;  %v22238_v59 = vrot.slane %v18729_v43, 1  ;;  %v1412_v15 = vld [vmem:[#allocation2 + $0x10c] sm:$0xf]  ;;  %v1488_v4 = vld [vmem:[#allocation2 + $0x108] sm:$0xe]  ;;  %v1169_v58 = vsel %vm17060_vm7, %v738_v49, %v1168_v33 }
 0x1b0   :  { %v3795_v52 = vpop.permute.xlu1 %3794  ;;  %1164 = vst.msk [vmem:[#allocation2 + $0x118] sm:$0xf] %vm22169_vm0, %v730_v63  ;;  %v18890_v5 = vld [vmem:[#allocation2 + $0x10c] sm:$0xf]  ;;  %1167 = vst [vmem:[#allocation2 + $0x11c] sm:$0x1] %v1166_v6  ;;  %v4725_v51 = vsel %vm22168_vm12, %v4660_v36, %v18752_v14  ;;  %v18898_v43 = vsel %vm22171_vm6, %v4146_v62, %v18792_v61  ;;  %v18900_v0 = vcombine.low %v1411_v11, %v1412_v15 }
 0x1b1   :  { %v18887_v31 = vsel %vm22170_vm2, %v18772_v55, %v22238_v59  ;;  %v18902_v55 = vld [vmem:[#allocation2 + $0x110] ss:$0 sps:$4 sm:$0x11]   ;;  %v18905_v32 = vcombine.low %v1538_v18, %v18890_v5  ;;  %1170 = vst [vmem:[#allocation2 + $0x120] sm:$0xf] %v1169_v58  ;;  %v4723_v29 = vsel %vm22168_vm12, %v18781_v26, %v18763_v39  ;;  %v3793_v33 = vpop.permute.xlu0 %3792  ;;  %v18914_v14 = vsel %vm22171_vm6, %v2121_v23, %v18813_v17 }
 0x1b2   :  { %2786 = vrot.lane.b32.xlu1 %v18639_v37, %s16708_s6  ;;  %v22239_v61 = vrot.slane %v18746_v56, 1  ;;  %v3133_v11 = vrot.slane %v3131_v20, 1  ;;  %v18922_v30 = vld [vmem:[#allocation2 + $0x110] ss:$0 sps:$4 sm:$0x11]   ;;  %v4790_v39 = vsel %vm22166_vm13, %v4725_v51, %v18785_v50  ;;  %v4788_v37 = vsel %vm22166_vm13, %v4723_v29, %v18804_v21 }
 0x1b3   :  { %v1285_v18 = vld [vmem:[#allocation2 + $0x108] sm:$0xf]  ;;  %v22240_v26 = vrot.slane %v18697_v45, 1  ;;  %v3143_v56 = vshll.u32 %v18900_v0, 16  ;;  %v4855_v23 = vsel %vm22165_vm14, %v4790_v39, %v18820_v9  ;;  %2784 = vrot.lane.b32.xlu0 %v18565_v10, %s16708_s6  ;;  %v18942_v20 = vsel %vm22170_vm2, %v3510_v48, %v3511_v16 }
 0x1b4   :  { %v18920_v62 = vsel %vm22170_vm2, %v18815_v8, %v22239_v61  ;;  %v18935_v8 = vld [vmem:[#allocation2 + $0x10c] sm:$0xf]  ;;  %v4339_v50 = vpop.permute.xlu1 %4338  ;;  %v4155_v45 = vshll.u32 %v18905_v32, 16  ;;  %v1616_v21 = vld [vmem:[#allocation2 + $0x108] sm:$0xe]  ;;  %v3141_v49 = vshrl.u32 %v18900_v0, 16  ;;  %v14134_v6 = vcombine.low %v1488_v4, %v1412_v15 }
 0x1b5   :  { %v18932_v17 = vsel %vm22170_vm2, %v18826_v25, %v22240_v26  ;;  %v741_v25 = vshrl.u32 %v18872_v44, 16  ;;  %v3148_v63 = vshll.u32 %v18902_v55, 16  ;;  %v18948_v42 = vld [vmem:[#allocation2 + $0x110] ss:$0 sps:$4 sm:$0x11]   ;;  %v4337_v36 = vpop.permute.xlu0 %4336  ;;  %v3145_v10 = vrot.slane %v3143_v56, 1 }
 0x1b6   :  { %3330 = vrot.lane.b32.xlu1 %v18768_v24, %s16712_s18  ;;  %v1540_v16 = vld [vmem:[#allocation2 + $0x114] sm:$0xf]  ;;  %v4153_v48 = vshrl.u32 %v18905_v32, 16  ;;  %v4160_v59 = vshll.u32 %v18922_v30, 16  ;;  %v18956_v58 = vcombine.low %v1285_v18, %v18935_v8  ;;  %v4853_v15 = vsel %vm22165_vm14, %v4788_v37, %v18833_v12 }
 0x1b7   :  { %v4920_v4 = vsel %vm22167_vm15, %v4855_v23, %v18844_v54  ;;  %v3134_v51 = vor.u32 %v3133_v11, %v3129_v19  ;;  %v18964_v29 = vld [vmem:[#allocation2 + $0x118] sm:$0xf]  ;;  %v14229_v24 = vcombine.low %v1616_v21, %v18890_v5  ;;  %v1287_v61 = vld [vmem:[#allocation2 + $0x114] sm:$0xf]  ;;  %v4918_v39 = vsel %vm22167_vm15, %v4853_v15, %v18854_v2  ;;  %3328 = vrot.lane.b32.xlu0 %v18727_v35, %s16712_s18 }
 0x1b8   :  { %v4985_v18 = vsel %vm22177_vm1, %v4920_v4, %v3795_v52  ;;  %v2292_v12 = vpop.permute.xlu1 %2291  ;;  %v18972_v37 = vld [vmem:[#allocation2 + $0x11c] ss:$0 sps:$4 sm:$0x11]   ;;  %v4157_v54 = vrot.slane %v4155_v45, 1  ;;  %v2135_v26 = vshll.u32 %v18948_v42, 16  ;;  %v4983_v19 = vsel %vm22177_vm1, %v4918_v39, %v3793_v33 }
 0x1b9   :  { %v3513_v11 = vrot.slane %v14134_v6, 1  ;;  %v18977_v5 = vcombine.low %v1540_v16, %v18964_v29  ;;  %v18979_v56 = vld [vmem:[#allocation2 + $0x118] sm:$0xf]  ;;  %v5048_v52 = vsel %vm22176_vm4, %v4983_v19, %v4337_v36  ;;  %v4593_v23 = vpop.permute.xlu0 %4592  ;;  %v3150_v35 = vrot.slane %v3148_v63, 1  ;;  %v1413_v2 = vld [vmem:[#allocation2 + $0x114] sm:$0xf] }
 0x1ba   :  { %3586 = vrot.lane.b32.xlu1 %v18737_v46, %s16710_s16  ;;  %v3514_v45 = vrot.slane %v18902_v55, 1  ;;  %v2130_v21 = vshll.u32 %v18956_v58, 16  ;;  %v5113_v33 = vsel %vm5095_vm10, %v5048_v52, %v4593_v23  ;;  %v3146_v6 = vor.u32 %v3145_v10, %v3141_v49  ;;  %v18991_v4 = vld [vmem:[#allocation2 + $0x11c] ss:$0 sps:$4 sm:$0x11]  }
 0x1bb   :  { %v4534_v16 = vrot.slane %v14229_v24, 1  ;;  %v18989_v15 = vcombine.low %v1287_v61, %v18979_v56  ;;  %3584 = vrot.lane.b32.xlu0 %v18707_v1, %s16710_s16  ;;  %15544 = vmatprep.mubr.msk.bf16.mxu0 %vm22157_vm5, %v5113_v33  ;;  %v4158_v63 = vor.u32 %v4157_v54, %v4153_v48  ;;  %v4162_v55 = vrot.slane %v4160_v59, 1  ;;  %v1617_v49 = vld [vmem:[#allocation2 + $0x114] sm:$0xe] }
 0x1bc   :  { %v18996_v46 = vpop.permute.xlu1 %2293  ;;  %v2128_v36 = vshrl.u32 %v18956_v58, 16  ;;  %v18999_v39 = vrot.slane %v2135_v26, 1  ;;  %v4165_v10 = vshrl.u32 %v18977_v5, 16  ;;  %v4167_v24 = vshll.u32 %v18977_v5, 16  ;;  %v1362_v26 = vld [vmem:[#allocation2 + $0x114] sm:$0xe] }
 0x1bd   :  { %22241 = vst [vmem:[#allocation35_spill] sm:$0xff] %v18989_v15  ;;  %v4172_v61 = vshll.u32 %v18972_v37, 16  ;;  %v4535_v19 = vrot.slane %v18922_v30, 1  ;;  %v5050_v1 = vsel %vm22176_vm4, %v4985_v18, %v4339_v50  ;;  %v4595_v52 = vpop.permute.xlu0 %4594  ;;  %v19010_v48 = vsel %vm22171_vm6, %v3134_v51, %v18863_v53  ;;  %v1361_v18 = vld [vmem:[#allocation2 + $0x108] sm:$0xe] }
 0x1be   :  { %3810 = vrot.lane.b32.xlu1 %v18692_v28, %s16709_s7  ;;  %v19013_v59 = vsel %vm22170_vm2, %v3513_v11, %v3514_v45  ;;  %v2132_v54 = vrot.slane %v2130_v21, 1  ;;  %v5115_v23 = vsel %vm5095_vm10, %v5050_v1, %v4595_v52  ;;  %v2142_v33 = vshll.u32 %v18989_v15, 16  ;;  %v22242_v28 = vld [vmem:[#allocation31_spill] sm:$0xff]  ;;  %v1172_v52 = vld [vmem:[#allocation2 + $0x128] sm:$0x1] }
 0x1bf   :  { %v2147_v30 = vshll.u32 %v18991_v4, 16  ;;  %v14230_v50 = vcombine.low %v1617_v49, %v18964_v29  ;;  %v19021_v9 = vsel %vm22174_vm11, %v22242_v28, %v2292_v12  ;;  %3808 = vrot.lane.b32.xlu0 %v18664_v57, %s16709_s7  ;;  %15545 = vmatmul.mubr.msk.bf16.gmra.mxu0 %vm22157_vm5, %v5115_v23  ;;  %v19029_v51 = vsel %vm22171_vm6, %v3146_v6, %v3150_v35  ;;  %v19034_v29 = vld [vmem:[#allocation2 + $0x118] sm:$0xf]  ;;  %v19036_v45 = vld [vmem:[#allocation2 + $0x11c] ss:$0 sps:$4 sm:$0x11]  }
 0x1c0   :  { %v19026_v53 = vpop.permute.xlu1 %2550  ;;  %v19032_v11 = vsel %vm22171_vm6, %v4158_v63, %v4162_v55  ;;  %v4169_v12 = vrot.slane %v4167_v24, 1  ;;  %v4174_v49 = vrot.slane %v4172_v61, 1  ;;  %v19039_v1 = vsel %vm22170_vm2, %v4534_v16, %v4535_v19  ;;  %v352_v16 = vld [vmem:[%s22122_s0 + $0xb0] sm:$0xf] }
 0x1c1   :  { %v14040_v57 = vcombine.low %v1362_v26, %v18979_v56  ;;  %v19042_v23 = vpop.permute.xlu0 %2548  ;;  %v2133_v35 = vor.u32 %v2132_v54, %v2128_v36  ;;  %v2140_v6 = vshrl.u32 %v18989_v15, 16  ;;  %v14039_v63 = vcombine.low %v1361_v18, %v18935_v8 }
 0x1c2   :  { %4354 = vrot.lane.b32.xlu1 %v18898_v43, %s16713_s13  ;;  %v743_v55 = vrot.slane %v741_v25, 7  ;;  %v19053_v24 = vrot.slane %v2147_v30, 1  ;;  %v4537_v56 = vrot.slane %v14230_v50, 1  ;;  %v4538_v61 = vrot.slane %v18972_v37, 1  ;;  %v353_v43 = vld [vmem:[%s22122_s0 + $0xb4] sm:$0xf] }
 0x1c3   :  { %v19057_v19 = vcombine.low %v1413_v2, %v19034_v29  ;;  %4352 = vrot.lane.b32.xlu0 %v18795_v38, %s16713_s13  ;;  %v2144_v25 = vrot.slane %v2142_v33, 1  ;;  %v22243_v36 = vshll.u32 %v18872_v44, 16  ;;  %v3160_v30 = vshll.u32 %v19036_v45, 16  ;;  %v1489_v37 = vld [vmem:[#allocation2 + $0x114] sm:$0xe] }
 0x1c4   :  { %v19064_v8 = vpop.permute.xlu1 %2774  ;;  %v748_v26 = vrot.slane %v743_v55, 4  ;;  %v4170_v50 = vor.u32 %v4169_v12, %v4165_v10  ;;  %v19069_v2 = vrot.slane %v14040_v57, 1  ;;  %v2496_v18 = vrot.slane %v18991_v4, 1 }
 0x1c5   :  { %v746_v54 = vor.u32 %v22243_v36, %v743_v55  ;;  %v19073_v21 = vpop.permute.xlu0 %2772  ;;  %v19077_v38 = vrot.slane %v14039_v63, 1  ;;  %v22244_v44 = vrot.slane %v18847_v47, 4  ;;  %v750_v12 = vshrl.u32 %v352_v16, 16  ;;  %v1175_v63 = vld [vmem:[#allocation2 + $0x12c] sm:$0xf] }
 0x1c6   :  { %2307 = vrot.lane.b32.xlu1 %v18881_v34, %s16707_s30  ;;  %v1173_v10 = vsel %vm17095_vm9, %v748_v26, %v1172_v52  ;;  %v3155_v57 = vshll.u32 %v19057_v19, 16  ;;  %v14135_v55 = vcombine.low %v1489_v37, %v19034_v29  ;;  %v753_v36 = vshll.u32 %v352_v16, 16 }
 0x1c7   :  { %v747_v33 = vsel %vm17070_vm8, %v22244_v44, %v746_v54  ;;  %1174 = vst [vmem:[#allocation2 + $0x128] sm:$0x1] %v1173_v10  ;;  %v758_v34 = vshrl.u32 %v353_v43, 16  ;;  %4608 = vrot.lane.b32.xlu0 %v18811_v40, %s16711_s8  ;;  %v19093_v44 = vrot.slane %v3160_v30, 1  ;;  %v752_v52 = vrot.slane %v750_v12, 7  ;;  %v22245_v10 = vld [vmem:[#allocation32_spill] sm:$0xff] }
 0x1c8   :  { %1171 = vst.msk [vmem:[#allocation2 + $0x124] sm:$0xf] %vm22169_vm0, %v747_v33  ;;  %v19090_v47 = vpop.permute.xlu1 %3318  ;;  %v761_v26 = vshll.u32 %v353_v43, 16  ;;  %v1179_v33 = vld [vmem:[#allocation2 + $0x134] sm:$0x1]  ;;  %v4664_v28 = vsel %vm22174_vm11, %v22245_v10, %v18996_v46  ;;  %v19099_v29 = vsel %vm22171_vm6, %v4170_v50, %v4174_v49  ;;  %v19103_v16 = vsel %vm22171_vm6, %v2133_v35, %v18999_v39 }
 0x1c9   :  { %v760_v40 = vrot.slane %v758_v34, 7  ;;  %v19105_v37 = vpop.permute.xlu0 %3316  ;;  %v2145_v30 = vor.u32 %v2144_v25, %v2140_v6  ;;  %v19109_v43 = vld [vmem:[#allocation2 + $0x120] sm:$0xf]  ;;  %v755_v54 = vor.u32 %v753_v36, %v752_v52  ;;  %v756_v46 = vrot.slane %v752_v52, 4 }
 0x1ca   :  { %2309 = vrot.lane.b32.xlu1 %v18914_v14, %s16707_s30  ;;  %v19111_v12 = vld [vmem:[#allocation2 + $0x120] sm:$0xe]  ;;  %v19115_v49 = vrot.slane %v3155_v57, 1  ;;  %v19117_v50 = vrot.slane %v14135_v55, 1  ;;  %v19124_v14 = vsel %vm22170_vm2, %v4537_v56, %v4538_v61  ;;  %v3517_v6 = vrot.slane %v19036_v45, 1 }
 0x1cb   :  { %v19113_v10 = vld [vmem:[#allocation2 + $0x120] sm:$0xf]  ;;  %v763_v39 = vor.u32 %v761_v26, %v760_v40  ;;  %v765_v35 = vrot.slane %v760_v40, 4  ;;  %4610 = vrot.lane.b32.xlu0 %v18887_v31, %s16711_s8  ;;  %v1176_v25 = vsel %vm17060_vm7, %v755_v54, %v1175_v63  ;;  %v16714_v36 = vmov 1983009808  }
 0x1cc   :  { %v19121_v34 = vpop.permute.xlu1 %3574  ;;  %1177 = vst [vmem:[#allocation2 + $0x12c] sm:$0xf] %v1176_v25  ;;  %v19133_v31 = vunpack.c.l.s4 %v16714_v36  ;;  %vm256_vm5 = vcmask 516096   ;;  %v22246_v52 = vmov 0   ;;  %v4729_v56 = vsel %vm22168_vm12, %v4664_v28, %v19026_v53 }
 0x1cd   :  { %v764_v57 = vsel %vm17070_vm8, %v756_v46, %v763_v39  ;;  %v1180_v55 = vsel %vm17095_vm9, %v765_v35, %v1179_v33  ;;  %258 = vst.msk [vmem:[#allocation3 + $0x8] sm:$0xf] %vm22162_vm3, %v22246_v52  ;;  %255 = vst.msk [vmem:[#allocation3] sm:$0xf] %vm22162_vm3, %v22246_v52  ;;  %v4727_v61 = vsel %vm22168_vm12, %v19021_v9, %v19042_v23  ;;  %v19180_v63 = vpop.permute.xlu0 %3572  ;;  %v22247_v4 = vshrl.u32 %v19057_v19, 16 }
 0x1ce   :  { %260 = vst.msk [vmem:[#allocation3 + $0x10] sm:$0xf] %vm22162_vm3, %v22246_v52  ;;  %262 = vst.msk [vmem:[#allocation3 + $0x18] sm:$0xf] %vm22162_vm3, %v22246_v52  ;;  %2566 = vrot.lane.b32.xlu1 %v18920_v62, %s16699_s23  ;;  %v19186_v54 = vsel %vm22171_vm6, %v2145_v30, %v19053_v24  ;;  %v19192_v26 = vsel %vm22170_vm2, %v19069_v2, %v2496_v18  ;;  %v4794_v18 = vsel %vm22166_vm13, %v4729_v56, %v19064_v8 }
 0x1cf   :  { %264 = vst.msk [vmem:[#allocation3 + $0x20] sm:$0xf] %vm22162_vm3, %v22246_v52  ;;  %266 = vst.msk [vmem:[#allocation3 + $0x28] sm:$0xf] %vm22162_vm3, %v22246_v52  ;;  %v1416_v53 = vld [vmem:[#allocation2 + $0x124] sm:$0xf]  ;;  %v3158_v23 = vor.u32 %v19115_v49, %v22247_v4  ;;  %v4792_v33 = vsel %vm22166_vm13, %v4727_v61, %v19073_v21  ;;  %2564 = vrot.lane.b32.xlu0 %v18932_v17, %s16699_s23  ;;  %v4859_v8 = vsel %vm22165_vm14, %v4794_v18, %v19090_v47 }
 0x1d0   :  { %268 = vst.msk [vmem:[#allocation3 + $0x30] sm:$0xf] %vm22162_vm3, %v22246_v52  ;;  %270 = vst.msk [vmem:[#allocation3 + $0x38] sm:$0xf] %vm22162_vm3, %v22246_v52  ;;  %v19195_v28 = vld [vmem:[#allocation2 + $0x124] sm:$0xf]  ;;  %v19238_v62 = vcombine.low %v19109_v43, %v1416_v53  ;;  %v14136_v24 = vcombine.low %v19111_v12, %v1416_v53  ;;  %v3799_v40 = vpop.permute.xlu1 %3798  ;;  %v22249_v12 = vlaneseq  ;;  %v19272_v17 = vsel %vm22170_vm2, %v19117_v50, %v3517_v6 }
 0x1d1   :  { %272 = vst.msk [vmem:[#allocation3 + $0x40] sm:$0xf] %vm22162_vm3, %v22246_v52  ;;  %274 = vst.msk [vmem:[#allocation3 + $0x48] sm:$0xf] %vm22162_vm3, %v22246_v52  ;;  %v19246_v2 = vcombine.low %v19113_v10, %v19195_v28  ;;  %v22248_v30 = vrot.slane %v18948_v42, 1  ;;  %v5811_v42 = vunpack.c.0.s8 %v19133_v31  ;;  %v4857_v39 = vsel %vm22165_vm14, %v4792_v33, %v19105_v37  ;;  %v3797_v35 = vpop.permute.xlu0 %3796 }
 0x1d2   :  { %276 = vst.msk [vmem:[#allocation3 + $0x50] sm:$0xf] %vm22162_vm3, %v22246_v52  ;;  %278 = vst.msk [vmem:[#allocation3 + $0x58] sm:$0xf] %vm22162_vm3, %v22246_v52  ;;  %v19261_v46 = vshrl.u32 %v22249_v12, 7  ;;  %v3167_v21 = vshll.u32 %v19238_v62, 16  ;;  %2790 = vrot.lane.b32.xlu1 %v18900_v0, %s16708_s6  ;;  %v19285_v50 = vsel %vm22171_vm6, %v3158_v23, %v19093_v44  ;;  %v4924_v44 = vsel %vm22167_vm15, %v4859_v8, %v19121_v34 }
 0x1d3   :  { %280 = vst.msk [vmem:[#allocation3 + $0x60] sm:$0xf] %vm22162_vm3, %v22246_v52  ;;  %282 = vst.msk [vmem:[#allocation3 + $0x68] sm:$0xf] %vm22162_vm3, %v22246_v52  ;;  %v19258_v43 = vsel %vm22170_vm2, %v19077_v38, %v22248_v30  ;;  %v1289_v49 = vld [vmem:[#allocation2 + $0x120] sm:$0xf]  ;;  %2788 = vrot.lane.b32.xlu0 %v18831_v41, %s16708_s6  ;;  %v4989_v18 = vsel %vm22177_vm1, %v4924_v44, %v3799_v40 }
 0x1d4   :  { %284 = vst.msk [vmem:[#allocation3 + $0x70] sm:$0xf] %vm22162_vm3, %v22246_v52  ;;  %286 = vst.msk [vmem:[#allocation3 + $0x78] sm:$0xf] %vm22162_vm3, %v22246_v52  ;;  %v19275_v38 = vld [vmem:[#allocation2 + $0x124] sm:$0xf]  ;;  %v4343_v37 = vpop.permute.xlu1 %4342  ;;  %v19303_v41 = vsub.s32 %v5811_v42, %v19261_v46 }
 0x1d5   :  { %288 = vst.msk [vmem:[#allocation3 + $0x80] sm:$0xf] %vm22162_vm3, %v22246_v52  ;;  %290 = vst.msk [vmem:[#allocation3 + $0x88] sm:$0xf] %vm22162_vm3, %v22246_v52  ;;  %v3165_v47 = vshrl.u32 %v19238_v62, 16  ;;  %v4179_v45 = vshll.u32 %v19246_v2, 16  ;;  %v19294_v4 = vcombine.low %v1289_v49, %v19275_v38  ;;  %v4341_v33 = vpop.permute.xlu0 %4340 }
 0x1d6   :  { %292 = vst.msk [vmem:[#allocation3 + $0x90] sm:$0xf] %vm22162_vm3, %v22246_v52  ;;  %294 = vst.msk [vmem:[#allocation3 + $0x98] sm:$0xf] %vm22162_vm3, %v22246_v52  ;;  %v3519_v6 = vrot.slane %v14136_v24, 1  ;;  %v4177_v56 = vshrl.u32 %v19246_v2, 16  ;;  %3334 = vrot.lane.b32.xlu1 %v19029_v51, %s16712_s18 }
 0x1d7   :  { %1178 = vst.msk [vmem:[#allocation2 + $0x130] sm:$0xf] %vm22169_vm0, %v764_v57  ;;  %1181 = vst [vmem:[#allocation2 + $0x134] sm:$0x1] %v1180_v55  ;;  %v1618_v57 = vld [vmem:[#allocation2 + $0x120] sm:$0xe]  ;;  %3332 = vrot.lane.b32.xlu0 %v19010_v48, %s16712_s18 }
 0x1d8   :  { %259 = vst.msk [vmem:[#allocation3 + $0xc] sm:$0x1] %vm256_vm5, %v22246_v52  ;;  %257 = vst.msk [vmem:[#allocation3 + $0x4] sm:$0x1] %vm256_vm5, %v22246_v52  ;;  %v3169_v55 = vrot.slane %v3167_v21, 1  ;;  %v4181_v61 = vrot.slane %v4179_v45, 1  ;;  %v14231_v12 = vcombine.low %v1618_v57, %v19195_v28  ;;  %v2296_v51 = vpop.permute.xlu1 %2295 }
 0x1d9   :  { %261 = vst.msk [vmem:[#allocation3 + $0x14] sm:$0x1] %vm256_vm5, %v22246_v52  ;;  %263 = vst.msk [vmem:[#allocation3 + $0x1c] sm:$0x1] %vm256_vm5, %v22246_v52  ;;  %v1544_v0 = vld [vmem:[#allocation2 + $0x12c] sm:$0xf] }
 0x1da   :  { %265 = vst.msk [vmem:[#allocation3 + $0x24] sm:$0x1] %vm256_vm5, %v22246_v52  ;;  %267 = vst.msk [vmem:[#allocation3 + $0x2c] sm:$0x1] %vm256_vm5, %v22246_v52  ;;  %v3170_v8 = vor.u32 %v3169_v55, %v3165_v47  ;;  %v1291_v40 = vld [vmem:[#allocation2 + $0x12c] sm:$0xf]  ;;  %v4597_v55 = vpop.permute.xlu0 %4596  ;;  %3590 = vrot.lane.b32.xlu1 %v19013_v59, %s16710_s16 }
 0x1db   :  { %269 = vst.msk [vmem:[#allocation3 + $0x34] sm:$0x1] %vm256_vm5, %v22246_v52  ;;  %271 = vst.msk [vmem:[#allocation3 + $0x3c] sm:$0x1] %vm256_vm5, %v22246_v52  ;;  %v1363_v28 = vld [vmem:[#allocation2 + $0x120] sm:$0xe]  ;;  %3588 = vrot.lane.b32.xlu0 %v18942_v20, %s16710_s16 }
 0x1dc   :  { %273 = vst.msk [vmem:[#allocation3 + $0x44] sm:$0x1] %vm256_vm5, %v22246_v52  ;;  %275 = vst.msk [vmem:[#allocation3 + $0x4c] sm:$0x1] %vm256_vm5, %v22246_v52  ;;  %vm22255_vm3 = vcmask 293888  }
 0x1dd   :  { %277 = vst.msk [vmem:[#allocation3 + $0x54] sm:$0x1] %vm256_vm5, %v22246_v52  ;;  %279 = vst.msk [vmem:[#allocation3 + $0x5c] sm:$0x1] %vm256_vm5, %v22246_v52  ;;  %v354_v20 = vld [vmem:[%s22122_s0 + $0xb8] sm:$0xf] }
 0x1de   :  { %281 = vst.msk [vmem:[#allocation3 + $0x64] sm:$0x1] %vm256_vm5, %v22246_v52  ;;  %283 = vst.msk [vmem:[#allocation3 + $0x6c] sm:$0x1] %vm256_vm5, %v22246_v52  ;;  %v19300_v23 = vld [vmem:[#allocation2 + $0x130] sm:$0xf]  ;;  %3814 = vrot.lane.b32.xlu1 %v18977_v5, %s16709_s7 }
 0x1df   :  { %285 = vst.msk [vmem:[#allocation3 + $0x74] sm:$0x1] %vm256_vm5, %v22246_v52  ;;  %287 = vst.msk [vmem:[#allocation3 + $0x7c] sm:$0x1] %vm256_vm5, %v22246_v52  ;;  %v19310_v30 = vcombine.low %v1544_v0, %v19300_v23  ;;  %v4182_v0 = vor.u32 %v4181_v61, %v4177_v56  ;;  %v5054_v61 = vsel %vm22176_vm4, %v4989_v18, %v4343_v37  ;;  %v19369_v5 = vld [vmem:[#allocation2 + $0x130] sm:$0xf]  ;;  %3812 = vrot.lane.b32.xlu0 %v18905_v32, %s16709_s7 }
 0x1e0   :  { %289 = vst.msk [vmem:[#allocation3 + $0x84] sm:$0x1] %vm256_vm5, %v22246_v52  ;;  %291 = vst.msk [vmem:[#allocation3 + $0x8c] sm:$0x1] %vm256_vm5, %v22246_v52 }
 0x1e1   :  { %293 = vst.msk [vmem:[#allocation3 + $0x94] sm:$0x1] %vm256_vm5, %v22246_v52  ;;  %295 = vst.msk [vmem:[#allocation3 + $0x9c] sm:$0x1] %vm256_vm5, %v22246_v52  ;;  %v4189_v47 = vshrl.u32 %v19310_v30, 16 }
 0x1e2   :  { %v15824_v9 = vld [vmem:[#allocation2 + $0x128] ss:$0 sps:$4 sm:$0x11]   ;;  %22250 = vst [vmem:[#allocation33_spill] sm:$0xff] %v19261_v46  ;;  %22251 = vst [vmem:[#allocation27_spill] sm:$0xff] %v19294_v4  ;;  %4358 = vrot.lane.b32.xlu1 %v19099_v29, %s16713_s13 }
 0x1e3   :  { %v19263_v10 = vld [vmem:[#allocation2 + $0x128] ss:$0 sps:$4 sm:$0x11]   ;;  %v3172_v25 = vshll.u32 %v15824_v9, 16  ;;  %v3520_v36 = vrot.slane %v15824_v9, 1  ;;  %v4922_v9 = vsel %vm22167_vm15, %v4857_v39, %v19180_v63  ;;  %22252 = vst [vmem:[#allocation28_spill] sm:$0xff] %v19303_v41  ;;  %4356 = vrot.lane.b32.xlu0 %v19032_v11, %s16713_s13 }
 0x1e4   :  { %v19287_v31 = vld [vmem:[#allocation2 + $0x128] ss:$0 sps:$4 sm:$0x11]   ;;  %v4184_v53 = vshll.u32 %v19263_v10, 16  ;;  %v2154_v63 = vshll.u32 %v19294_v4, 16  ;;  %v4987_v49 = vsel %vm22177_vm1, %v4922_v9, %v3797_v35  ;;  %v4191_v39 = vshll.u32 %v19310_v30, 16 }
 0x1e5   :  { %v2159_v24 = vshll.u32 %v19287_v31, 16  ;;  %v19312_v34 = vld [vmem:[#allocation2 + $0x134] ss:$0 sps:$4 sm:$0x11]   ;;  %v3174_v21 = vrot.slane %v3172_v25, 1  ;;  %v19318_v42 = vsel %vm22170_vm2, %v3519_v6, %v3520_v36  ;;  %v5052_v35 = vsel %vm22176_vm4, %v4987_v49, %v4341_v33 }
 0x1e6   :  { %v4196_v45 = vshll.u32 %v19312_v34, 16  ;;  %v4186_v44 = vrot.slane %v4184_v53, 1  ;;  %v1292_v46 = vld [vmem:[#allocation2 + $0x130] sm:$0xf]  ;;  %v2152_v25 = vshrl.u32 %v19294_v4, 16  ;;  %v4193_v48 = vrot.slane %v4191_v39, 1  ;;  %2311 = vrot.lane.b32.xlu1 %v19103_v16, %s16707_s30 }
 0x1e7   :  { %v2161_v57 = vrot.slane %v2159_v24, 1  ;;  %v2156_v6 = vrot.slane %v2154_v63, 1  ;;  %v4540_v36 = vrot.slane %v14231_v12, 1  ;;  %v19329_v9 = vcombine.low %v1291_v40, %v1292_v46  ;;  %v19331_v56 = vld [vmem:[#allocation2 + $0x134] ss:$0 sps:$4 sm:$0x11]   ;;  %v2298_v63 = vpop.permute.xlu1 %2297  ;;  %v4599_v40 = vpop.permute.xlu0 %4598  ;;  %4612 = vrot.lane.b32.xlu0 %v19039_v1, %s16711_s8 }
 0x1e8   :  { %v5117_v53 = vsel %vm5095_vm10, %v5052_v35, %v4597_v55  ;;  %v19336_v33 = vsel %vm22171_vm6, %v3170_v8, %v3174_v21  ;;  %v4541_v24 = vrot.slane %v19263_v10, 1  ;;  %v1619_v49 = vld [vmem:[#allocation2 + $0x12c] sm:$0xe]  ;;  %v4198_v37 = vrot.slane %v4196_v45, 1  ;;  %v22256_v35 = vld [vmem:[#allocation38_spill] sm:$0xff] }
 0x1e9   :  { %22253 = vst [vmem:[#allocation29_spill] sm:$0xff] %v19329_v9  ;;  %v1364_v52 = vld [vmem:[#allocation2 + $0x12c] sm:$0xe]  ;;  %15548 = vmatprep.mubr.msk.bf16.mxu0 %vm22255_vm3, %v5117_v53  ;;  %v19347_v18 = vsel %vm22171_vm6, %v4182_v0, %v4186_v44  ;;  %v2166_v12 = vshll.u32 %v19329_v9, 16  ;;  %v2164_v10 = vshrl.u32 %v19329_v9, 16  ;;  %v2171_v8 = vshll.u32 %v19331_v56, 16 }
 0x1ea   :  { %v22254_v4 = vld [vmem:[#allocation37_spill] sm:$0xff]  ;;  %v14232_v21 = vcombine.low %v1619_v49, %v19300_v23  ;;  %v4544_v45 = vrot.slane %v19312_v34, 1  ;;  %v14042_v0 = vcombine.low %v1364_v52, %v1292_v46  ;;  %v355_v44 = vld [vmem:[%s22122_s0 + $0xbc] sm:$0xf]  ;;  %v4194_v55 = vor.u32 %v4193_v48, %v4189_v47  ;;  %v356_v29 = vld [vmem:[%s22122_s0 + $0xc0] sm:$0xf]  ;;  %2313 = vrot.lane.b32.xlu1 %v19186_v54, %s16707_s30 }
 0x1eb   :  { %v19341_v59 = vsel %vm22174_vm11, %v22254_v4, %v2296_v51  ;;  %v14041_v4 = vcombine.low %v1363_v28, %v19275_v38  ;;  %v2157_v51 = vor.u32 %v2156_v6, %v2152_v25  ;;  %v2168_v39 = vrot.slane %v2166_v12, 1  ;;  %v1417_v23 = vld [vmem:[#allocation2 + $0x12c] sm:$0xf]  ;;  %v19371_v25 = vld [vmem:[#allocation2 + $0x134] ss:$0 sps:$4 sm:$0x11]   ;;  %v2555_v52 = vpop.permute.xlu1 %2554  ;;  %v2553_v12 = vpop.permute.xlu0 %2552  ;;  %4614 = vrot.lane.b32.xlu0 %v19124_v14, %s16711_s8 }
 0x1ec   :  { %v4668_v38 = vsel %vm22174_vm11, %v22256_v35, %v2298_v63  ;;  %v5119_v28 = vsel %vm5095_vm10, %v5054_v61, %v4599_v40  ;;  %v19367_v53 = vsel %vm22170_vm2, %v4540_v36, %v4541_v24  ;;  %v2173_v46 = vrot.slane %v2171_v8, 1  ;;  %v1182_v24 = vld [vmem:[#allocation2 + $0x138] sm:$0xf]  ;;  %v1491_v63 = vld [vmem:[#allocation2 + $0x12c] sm:$0xe] }
 0x1ed   :  { %15549 = vmatmul.mubr.msk.bf16.gmra.mxu0 %vm22255_vm3, %v5119_v28  ;;  %v4543_v34 = vrot.slane %v14232_v21, 1  ;;  %v2502_v6 = vrot.slane %v19331_v56, 1  ;;  %v767_v49 = vshrl.u32 %v354_v20, 16  ;;  %v2169_v61 = vor.u32 %v2168_v39, %v2164_v10  ;;  %v1186_v35 = vld [vmem:[#allocation2 + $0x140] sm:$0x1] }
 0x1ee   :  { %v2498_v47 = vrot.slane %v14041_v4, 1  ;;  %v770_v48 = vshll.u32 %v354_v20, 16  ;;  %v775_v36 = vshrl.u32 %v355_v44, 16  ;;  %v19380_v32 = vsel %vm22171_vm6, %v2157_v51, %v2161_v57  ;;  %v357_v57 = vld [vmem:[%s22122_s0 + $0xc4] sm:$0xf]  ;;  %2570 = vrot.lane.b32.xlu1 %v19192_v26, %s16699_s23 }
 0x1ef   :  { %v2501_v40 = vrot.slane %v14042_v0, 1  ;;  %v2499_v8 = vrot.slane %v19287_v31, 1  ;;  %v769_v21 = vrot.slane %v767_v49, 7  ;;  %v19384_v56 = vsel %vm22171_vm6, %v4194_v55, %v4198_v37  ;;  %v2779_v37 = vpop.permute.xlu1 %2778  ;;  %2568 = vrot.lane.b32.xlu0 %v19258_v43, %s16699_s23 }
 0x1f0   :  { %v777_v10 = vrot.slane %v775_v36, 7  ;;  %v778_v4 = vshll.u32 %v355_v44, 16  ;;  %v19387_v20 = vcombine.low %v1417_v23, %v19369_v5  ;;  %v4733_v31 = vsel %vm22168_vm12, %v4668_v38, %v2555_v52  ;;  %v358_v44 = vld [vmem:[%s22122_s0 + $0xc8] sm:$0xf]  ;;  %v2777_v52 = vpop.permute.xlu0 %2776 }
 0x1f1   :  { %v772_v51 = vor.u32 %v770_v48, %v769_v21  ;;  %v773_v39 = vrot.slane %v769_v21, 4  ;;  %v3184_v0 = vshll.u32 %v19371_v25, 16  ;;  %v19403_v23 = vsel %vm22171_vm6, %v2169_v61, %v2173_v46 }
 0x1f2   :  { %v19406_v28 = vsel %vm22170_vm2, %v4543_v34, %v4544_v45  ;;  %v780_v55 = vor.u32 %v778_v4, %v777_v10  ;;  %v782_v38 = vrot.slane %v777_v10, 4  ;;  %v19411_v11 = vsel %vm22170_vm2, %v2501_v40, %v2502_v6  ;;  %v19430_v40 = vld [vmem:[%s22122_s0 + $0xcc] sm:$0xf]  ;;  %v1189_v10 = vld [vmem:[#allocation2 + $0x144] sm:$0xf]  ;;  %2794 = vrot.lane.b32.xlu1 %v19238_v62, %s16708_s6 }
 0x1f3   :  { %v1183_v49 = vsel %vm17060_vm7, %v772_v51, %v1182_v24  ;;  %v3179_v48 = vshll.u32 %v19387_v20, 16  ;;  %v14137_v46 = vcombine.low %v1491_v63, %v19369_v5  ;;  %v3177_v61 = vshrl.u32 %v19387_v20, 16  ;;  %v3323_v6 = vpop.permute.xlu1 %3322  ;;  %2792 = vrot.lane.b32.xlu0 %v19057_v19, %s16708_s6 }
 0x1f4   :  { %v781_v45 = vsel %vm17070_vm8, %v773_v39, %v780_v55  ;;  %1184 = vst [vmem:[#allocation2 + $0x138] sm:$0xf] %v1183_v49  ;;  %v1187_v34 = vsel %vm17095_vm9, %v782_v38, %v1186_v35  ;;  %v19422_v16 = vrot.slane %v3184_v0, 1  ;;  %v784_v5 = vshrl.u32 %v356_v29, 16  ;;  %v3321_v39 = vpop.permute.xlu0 %3320  ;;  %v1193_v55 = vld [vmem:[#allocation2 + $0x14c] sm:$0x1] }
 0x1f5   :  { %1185 = vst.msk [vmem:[#allocation2 + $0x13c] sm:$0xf] %vm22169_vm0, %v781_v45  ;;  %1188 = vst [vmem:[#allocation2 + $0x140] sm:$0x1] %v1187_v34  ;;  %v3181_v36 = vrot.slane %v3179_v48, 1  ;;  %v787_v24 = vshll.u32 %v356_v29, 16  ;;  %v4731_v21 = vsel %vm22168_vm12, %v19341_v59, %v2553_v12  ;;  %v19435_v35 = vsel %vm22170_vm2, %v2498_v47, %v2499_v8 }
 0x1f6   :  { %v792_v63 = vshrl.u32 %v357_v57, 16  ;;  %v795_v1 = vshll.u32 %v357_v57, 16  ;;  %v801_v4 = vshrl.u32 %v358_v44, 16  ;;  %v4798_v51 = vsel %vm22166_vm13, %v4733_v31, %v2779_v37  ;;  %v1196_v47 = vld [vmem:[#allocation2 + $0x150] sm:$0xf]  ;;  %3338 = vrot.lane.b32.xlu1 %v19336_v33, %s16712_s18 }
 0x1f7   :  { %v786_v29 = vrot.slane %v784_v5, 7  ;;  %v804_v38 = vshll.u32 %v358_v44, 16  ;;  %v3182_v49 = vor.u32 %v3181_v36, %v3177_v61  ;;  %v3522_v48 = vrot.slane %v14137_v46, 1  ;;  %v3579_v8 = vpop.permute.xlu1 %3578  ;;  %v19449_v44 = vld [vmem:[%s22122_s0 + $0xd0] sm:$0xf]  ;;  %3336 = vrot.lane.b32.xlu0 %v19285_v50, %s16712_s18 }
 0x1f8   :  { %v794_v0 = vrot.slane %v792_v63, 7  ;;  %v3523_v59 = vrot.slane %v19371_v25, 1  ;;  %v19441_v12 = vrot.slane %v801_v4, 7  ;;  %v809_v54 = vshrl.u32 %v19430_v40, 16  ;;  %v3577_v36 = vpop.permute.xlu0 %3576 }
 0x1f9   :  { %v789_v57 = vor.u32 %v787_v24, %v786_v29  ;;  %v790_v31 = vrot.slane %v786_v29, 4  ;;  %v4796_v14 = vsel %vm22166_vm13, %v4731_v21, %v2777_v52  ;;  %v4863_v61 = vsel %vm22165_vm14, %v4798_v51, %v3323_v6 }
 0x1fa   :  { %v797_v37 = vor.u32 %v795_v1, %v794_v0  ;;  %v799_v46 = vrot.slane %v794_v0, 4  ;;  %v806_v25 = vor.u32 %v804_v38, %v19441_v12  ;;  %v4861_v29 = vsel %vm22165_vm14, %v4796_v14, %v3321_v39  ;;  %3594 = vrot.lane.b32.xlu1 %v19318_v42, %s16710_s16 }
 0x1fb   :  { %v1419_v5 = vld [vmem:[#allocation2 + $0x138] sm:$0xf]  ;;  %v1190_v1 = vsel %vm17060_vm7, %v789_v57, %v1189_v10  ;;  %v19464_v52 = vsel %vm22170_vm2, %v3522_v48, %v3523_v59  ;;  %v3803_v10 = vpop.permute.xlu1 %3802  ;;  %v19477_v59 = vrot.slane %v809_v54, 7  ;;  %v4928_v57 = vsel %vm22167_vm15, %v4863_v61, %v3579_v8  ;;  %3592 = vrot.lane.b32.xlu0 %v19272_v17, %s16710_s16 }
 0x1fc   :  { %v1492_v24 = vld [vmem:[#allocation2 + $0x138] sm:$0xe]  ;;  %v798_v63 = vsel %vm17070_vm8, %v790_v31, %v797_v37  ;;  %v1420_v0 = vld [vmem:[#allocation2 + $0x13c] sm:$0xf]  ;;  %1191 = vst [vmem:[#allocation2 + $0x144] sm:$0xf] %v1190_v1  ;;  %v1194_v26 = vsel %vm17095_vm9, %v799_v46, %v1193_v55  ;;  %v1197_v21 = vsel %vm17060_vm7, %v806_v25, %v1196_v47  ;;  %v4926_v55 = vsel %vm22167_vm15, %v4861_v29, %v3577_v36  ;;  %v3801_v46 = vpop.permute.xlu0 %3800 }
 0x1fd   :  { %v1546_v4 = vld [vmem:[#allocation2 + $0x138] sm:$0xf]  ;;  %1192 = vst.msk [vmem:[#allocation2 + $0x148] sm:$0xf] %vm22169_vm0, %v798_v63  ;;  %v1547_v6 = vld [vmem:[#allocation2 + $0x13c] sm:$0xf]  ;;  %v19473_v51 = vcombine.low %v1419_v5, %v1420_v0  ;;  %v14138_v38 = vcombine.low %v1492_v24, %v1420_v0  ;;  %v19483_v47 = vsel %vm22171_vm6, %v3182_v49, %v19422_v16  ;;  %v4993_v16 = vsel %vm22177_vm1, %v4928_v57, %v3803_v10 }
 0x1fe   :  { %v15839_v39 = vld [vmem:[#allocation2 + $0x140] ss:$0 sps:$4 sm:$0x11]   ;;  %v19475_v48 = vcombine.low %v1546_v4, %v1547_v6  ;;  %1195 = vst [vmem:[#allocation2 + $0x14c] sm:$0x1] %v1194_v26  ;;  %v4991_v0 = vsel %vm22177_vm1, %v4926_v55, %v3801_v46  ;;  %3818 = vrot.lane.b32.xlu1 %v19310_v30, %s16709_s7 }
 0x1ff   :  { %1198 = vst [vmem:[#allocation2 + $0x150] sm:$0xf] %v1197_v21  ;;  %v19485_v43 = vld [vmem:[#allocation2 + $0x140] ss:$0 sps:$4 sm:$0x11]   ;;  %v3189_v54 = vshrl.u32 %v19473_v51, 16  ;;  %v4347_v24 = vpop.permute.xlu1 %4346  ;;  %3816 = vrot.lane.b32.xlu0 %v19246_v2, %s16709_s7 }
 0x200   :  { %v1293_v31 = vld [vmem:[#allocation2 + $0x138] sm:$0xf]  ;;  %v3191_v25 = vshll.u32 %v19473_v51, 16  ;;  %v3196_v8 = vshll.u32 %v15839_v39, 16  ;;  %v3525_v14 = vrot.slane %v14138_v38, 1  ;;  %v3526_v49 = vrot.slane %v15839_v39, 1  ;;  %v4345_v38 = vpop.permute.xlu0 %4344 }
 0x201   :  { %v19492_v61 = vld [vmem:[#allocation2 + $0x13c] sm:$0xf]  ;;  %v4201_v36 = vshrl.u32 %v19475_v48, 16  ;;  %v4203_v5 = vshll.u32 %v19475_v48, 16  ;;  %v4208_v1 = vshll.u32 %v19485_v43, 16  ;;  %v19507_v26 = vsel %vm22176_vm4, %v4993_v16, %v4347_v24 }
 0x202   :  { %v3193_v62 = vrot.slane %v3191_v25, 1  ;;  %v3198_v63 = vrot.slane %v3196_v8, 1  ;;  %v19501_v4 = vcombine.low %v1293_v31, %v19492_v61  ;;  %v19503_v29 = vld [vmem:[#allocation2 + $0x140] ss:$0 sps:$4 sm:$0x11]   ;;  %v4547_v39 = vrot.slane %v19485_v43, 1  ;;  %4362 = vrot.lane.b32.xlu1 %v19384_v56, %s16713_s13 }
 0x203   :  { %v4205_v21 = vrot.slane %v4203_v5, 1  ;;  %v1620_v10 = vld [vmem:[#allocation2 + $0x138] sm:$0xe]  ;;  %v1548_v31 = vld [vmem:[#allocation2 + $0x144] sm:$0xf]  ;;  %v4210_v8 = vrot.slane %v4208_v1, 1  ;;  %v19516_v46 = vsel %vm22170_vm2, %v3525_v14, %v3526_v49  ;;  %v5056_v45 = vsel %vm22176_vm4, %v4991_v0, %v4345_v38  ;;  %v2300_v33 = vpop.permute.xlu1 %2299  ;;  %4360 = vrot.lane.b32.xlu0 %v19347_v18, %s16713_s13 }
 0x204   :  { %22257 = vst [vmem:[#allocation30_spill] sm:$0xff] %v19501_v4  ;;  %v19510_v19 = vld [vmem:[#allocation2 + $0x138] sm:$0xe]  ;;  %v3194_v57 = vor.u32 %v3193_v62, %v3189_v54  ;;  %v1549_v25 = vld [vmem:[#allocation2 + $0x148] sm:$0xf]  ;;  %v2176_v37 = vshrl.u32 %v19501_v4, 16  ;;  %v14233_v55 = vcombine.low %v1620_v10, %v1547_v6  ;;  %v4670_v50 = vsel %vm22174_vm11, %v18146_v7, %v2300_v33  ;;  %v4601_v10 = vpop.permute.xlu0 %4600 }
 0x205   :  { %v19518_v16 = vcombine.low %v1548_v31, %v1549_v25  ;;  %v19520_v5 = vld [vmem:[#allocation2 + $0x14c] ss:$0 sps:$4 sm:$0x11]   ;;  %v4206_v43 = vor.u32 %v4205_v21, %v4201_v36  ;;  %v2178_v24 = vshll.u32 %v19501_v4, 16  ;;  %v2183_v6 = vshll.u32 %v19503_v29, 16 }
 0x206   :  { %v19527_v54 = vsel %vm22171_vm6, %v3194_v57, %v3198_v63  ;;  %v4546_v14 = vrot.slane %v14233_v55, 1  ;;  %v1295_v49 = vld [vmem:[#allocation2 + $0x144] sm:$0xf]  ;;  %v1296_v62 = vld [vmem:[#allocation2 + $0x148] sm:$0xf]  ;;  %v4220_v21 = vshll.u32 %v19520_v5, 16  ;;  %v14043_v0 = vcombine.low %v19510_v19, %v19492_v61  ;;  %2315 = vrot.lane.b32.xlu1 %v19380_v32, %s16707_s30 }
 0x207   :  { %v4213_v1 = vshrl.u32 %v19518_v16, 16  ;;  %v4215_v36 = vshll.u32 %v19518_v16, 16  ;;  %v19540_v63 = vsel %vm22171_vm6, %v4206_v43, %v4210_v8  ;;  %v2180_v38 = vrot.slane %v2178_v24, 1  ;;  %v15851_v31 = vld [vmem:[#allocation2 + $0x14c] ss:$0 sps:$4 sm:$0x11]   ;;  %v2302_v7 = vpop.permute.xlu1 %2301  ;;  %4616 = vrot.lane.b32.xlu0 %v19367_v53, %s16711_s8 }
 0x208   :  { %v2185_v57 = vrot.slane %v2183_v6, 1  ;;  %v5121_v55 = vsel %vm5095_vm10, %v5056_v45, %v4601_v10  ;;  %v4222_v4 = vrot.slane %v4220_v21, 1  ;;  %v19543_v9 = vcombine.low %v1295_v49, %v1296_v62  ;;  %v1621_v61 = vld [vmem:[#allocation2 + $0x144] sm:$0xe]  ;;  %v19554_v21 = vld [vmem:[#allocation2 + $0x148] sm:$0xf]  ;;  %v4603_v10 = vpop.permute.xlu0 %4602 }
 0x209   :  { %v4217_v34 = vrot.slane %v4215_v36, 1  ;;  %v1366_v19 = vld [vmem:[#allocation2 + $0x144] sm:$0xe]  ;;  %15552 = vmatprep.mubr.msk.bf16.mxu0 %vm22255_vm3, %v5121_v55  ;;  %v2181_v42 = vor.u32 %v2180_v38, %v2176_v37  ;;  %v2195_v8 = vshll.u32 %v15851_v31, 16  ;;  %v14234_v43 = vcombine.low %v1621_v61, %v1549_v25  ;;  %v19573_v30 = vld [vmem:[%s22124_s2] ss:$0 sm:$0xff] }
 0x20a   :  { %22258 = vst [vmem:[#allocation31_spill] sm:$0xff] %v19543_v9  ;;  %v4550_v24 = vrot.slane %v19520_v5, 1  ;;  %v1421_v33 = vld [vmem:[#allocation2 + $0x144] sm:$0xf]  ;;  %v19550_v45 = vsel %vm22170_vm2, %v4546_v14, %v4547_v39  ;;  %v2188_v49 = vshrl.u32 %v19543_v9, 16  ;;  %v2190_v36 = vshll.u32 %v19543_v9, 16  ;;  %2317 = vrot.lane.b32.xlu1 %v19403_v23, %s16707_s30 }
 0x20b   :  { %v4218_v6 = vor.u32 %v4217_v34, %v4213_v1  ;;  %v4672_v17 = vsel %vm22174_vm11, %v18246_v3, %v2302_v7  ;;  %v19561_v37 = vsel %vm22171_vm6, %v2181_v42, %v2185_v57  ;;  %v4549_v34 = vrot.slane %v14234_v43, 1  ;;  %v19563_v39 = vld [vmem:[#allocation2 + $0x14c] ss:$0 sps:$4 sm:$0x11]   ;;  %v2559_v3 = vpop.permute.xlu1 %2558  ;;  %v1200_v42 = vld [vmem:[#allocation2 + $0x158] sm:$0x1]  ;;  %4618 = vrot.lane.b32.xlu0 %v19406_v28, %s16711_s8 }
 0x20c   :  { %v14044_v25 = vcombine.low %v1366_v19, %v1296_v62  ;;  %v5123_v5 = vsel %vm5095_vm10, %v19507_v26, %v4603_v10  ;;  %v2192_v14 = vrot.slane %v2190_v36, 1  ;;  %v2197_v1 = vrot.slane %v2195_v8, 1  ;;  %v19589_v43 = vld [vmem:[#allocation5] ss:$0 sm:$0xff]  ;;  %v7918_v9 = vld [vmem:[#allocation3 + $0xc] sm:$0x1] }
 0x20d   :  { %v2508_v38 = vrot.slane %v15851_v31, 1  ;;  %15553 = vmatmul.mubr.msk.bf16.gmra.mxu0 %vm22255_vm3, %v5123_v5  ;;  %v19576_v62 = vsel %vm22171_vm6, %v4218_v6, %v4222_v4  ;;  %v2504_v55 = vrot.slane %v14043_v0, 1  ;;  %v2505_v26 = vrot.slane %v19503_v29, 1  ;;  %v15530_v4 = vpop.f32.mrf.mxu0  ;;  %v2557_v0 = vpop.permute.xlu0 %2556  ;;  %v1493_v6 = vld [vmem:[#allocation2 + $0x144] sm:$0xe] }
 0x20e   :  { %v2507_v57 = vrot.slane %v14044_v25, 1  ;;  %v2193_v61 = vor.u32 %v2192_v14, %v2188_v49  ;;  %v19580_v31 = vsel %vm22170_vm2, %v4549_v34, %v4550_v24  ;;  %v22259_v2 = vshll.u32 %v19430_v40, 16  ;;  %2574 = vrot.lane.b32.xlu1 %v19411_v11, %s16699_s23 }
 0x20f   :  { %v19586_v7 = vcombine.low %v1421_v33, %v19554_v21  ;;  %v4737_v8 = vsel %vm22168_vm12, %v4672_v17, %v2559_v3  ;;  %v816_v24 = vrot.slane %v19477_v59, 4  ;;  %v3208_v40 = vshll.u32 %v19563_v39, 16  ;;  %v5283_v10 = vpop.f32.mrf.mxu0  ;;  %2572 = vrot.lane.b32.xlu0 %v19435_v35, %s16699_s23 }
 0x210   :  { %v814_v19 = vor.u32 %v22259_v2, %v19477_v59  ;;  %v19594_v29 = vsel %vm22170_vm2, %v2507_v57, %v2508_v38  ;;  %v5547_v33 = vmul.f32 %v15530_v4, %v19573_v30  ;;  %v4735_v49 = vsel %vm22168_vm12, %v4670_v50, %v2557_v0  ;;  %v2783_v59 = vpop.permute.xlu1 %2782 }
 0x211   :  { %v19601_v36 = vsel %vm22170_vm2, %v2504_v55, %v2505_v26  ;;  %v22260_v17 = vrot.slane %v19441_v12, 4  ;;  %v19610_v34 = vsel %vm22171_vm6, %v2193_v61, %v2197_v1  ;;  %v1201_v50 = vsel %vm17095_vm9, %v816_v24, %v1200_v42  ;;  %v19623_v1 = vld [vmem:[%s22122_s0 + $0xd4] sm:$0xf]  ;;  %v15531_v3 = vpop.f32.mrf.mxu0  ;;  %v2781_v57 = vpop.permute.xlu0 %2780  ;;  %v1423_v24 = vld [vmem:[#allocation2 + $0x150] sm:$0xf] }
 0x212   :  { %v3201_v25 = vshrl.u32 %v19586_v7, 16  ;;  %v3203_v12 = vshll.u32 %v19586_v7, 16  ;;  %v5618_v5 = vadd.f32 %v19589_v43, %v5547_v33  ;;  %v5545_v14 = vmul.f32 %v19573_v30, %v5283_v10  ;;  %1202 = vst [vmem:[#allocation2 + $0x158] sm:$0x1] %v1201_v50  ;;  %2798 = vrot.lane.b32.xlu1 %v19473_v51, %s16708_s6 }
 0x213   :  { %v815_v56 = vsel %vm17070_vm8, %v22260_v17, %v814_v19  ;;  %v3210_v38 = vrot.slane %v3208_v40, 1  ;;  %v14139_v18 = vcombine.low %v1493_v6, %v19554_v21  ;;  %v3529_v26 = vrot.slane %v19563_v39, 1  ;;  %v1494_v40 = vld [vmem:[#allocation2 + $0x150] sm:$0xe]  ;;  %v1203_v6 = vld [vmem:[#allocation2 + $0x15c] sm:$0xf]  ;;  %v5286_v33 = vpop.f32.mrf.mxu0  ;;  %2796 = vrot.lane.b32.xlu0 %v19387_v20, %s16708_s6 }
 0x214   :  { %1199 = vst.msk [vmem:[#allocation2 + $0x154] sm:$0xf] %vm22169_vm0, %v815_v56  ;;  %v3205_v55 = vrot.slane %v3203_v12, 1  ;;  %v22261_v61 = vshrl.u32 %v19449_v44, 16  ;;  %v821_v19 = vshll.u32 %v19449_v44, 16  ;;  %v5682_v21 = vmax.f32 %v5618_v5, 0.0  ;;  %v3327_v39 = vpop.permute.xlu1 %3326 }
 0x215   :  { %v5616_v42 = vadd.f32 %v19589_v43, %v5545_v14  ;;  %v4802_v4 = vsel %vm22166_vm13, %v4737_v8, %v2783_v59  ;;  %v5548_v0 = vmul.f32 %v15531_v3, %v19573_v30  ;;  %v4800_v32 = vsel %vm22166_vm13, %v4735_v49, %v2781_v57  ;;  %v3325_v5 = vpop.permute.xlu0 %3324 }
 0x216   :  { %v19630_v2 = vrot.slane %v22261_v61, 7  ;;  %v3206_v17 = vor.u32 %v3205_v55, %v3201_v25  ;;  %v3528_v56 = vrot.slane %v14139_v18, 1  ;;  %v5546_v8 = vmul.f32 %v19573_v30, %v5286_v33  ;;  %3342 = vrot.lane.b32.xlu1 %v19527_v54, %s16712_s18 }
 0x217   :  { %v5680_v10 = vmax.f32 %v5616_v42, 0.0  ;;  %v5619_v50 = vadd.f32 %v19589_v43, %v5548_v0  ;;  %v4867_v12 = vsel %vm22165_vm14, %v4802_v4, %v3327_v39  ;;  %v826_v25 = vshrl.u32 %v19623_v1, 16  ;;  %3340 = vrot.lane.b32.xlu0 %v19483_v47, %s16712_s18 }
 0x218   :  { %v823_v44 = vor.u32 %v821_v19, %v19630_v2  ;;  %v19647_v53 = vsel %vm22171_vm6, %v3206_v17, %v3210_v38  ;;  %v19650_v49 = vsel %vm22170_vm2, %v3528_v56, %v3529_v26  ;;  %v5617_v3 = vadd.f32 %v19589_v43, %v5546_v8  ;;  %v3583_v23 = vpop.permute.xlu1 %3582 }
 0x219   :  { %v5744_v14 = vmax.f32 %v5680_v10, %v5682_v21  ;;  %v5683_v18 = vmax.f32 %v5619_v50, 0.0  ;;  %v4865_v61 = vsel %vm22165_vm14, %v4800_v32, %v3325_v5  ;;  %v19660_v19 = vld [vmem:[#allocation2 + $0x158] ss:$0 sps:$4 sm:$0x11]   ;;  %v19665_v33 = vrot.slane %v826_v25, 7  ;;  %v3581_v39 = vpop.permute.xlu0 %3580 }
 0x21a   :  { %v1204_v21 = vsel %vm17060_vm7, %v823_v44, %v1203_v6  ;;  %v5681_v0 = vmax.f32 %v5617_v3, 0.0  ;;  %v4932_v32 = vsel %vm22167_vm15, %v4867_v12, %v3583_v23  ;;  %vm7634_vm3 = vcmask 1042434   ;;  %3598 = vrot.lane.b32.xlu1 %v19516_v46, %s16710_s16 }
 0x21b   :  { %v1424_v57 = vld [vmem:[#allocation2 + $0x154] sm:$0xf]  ;;  %v5808_v42 = vcombine.high %v5744_v14, %v5744_v14  ;;  %v5815_v4 = vrot.slane %v5744_v14, %v19303_v41  ;;  %1205 = vst [vmem:[#allocation2 + $0x15c] sm:$0xf] %v1204_v21  ;;  %v4930_v10 = vsel %vm22167_vm15, %v4865_v61, %v3581_v39  ;;  %vm7637_vm14 = vcmask 1043459   ;;  %3596 = vrot.lane.b32.xlu0 %v19464_v52, %s16710_s16 }
 0x21c   :  { %v19658_v38 = vcombine.low %v1423_v24, %v1424_v57  ;;  %v14140_v26 = vcombine.low %v1494_v40, %v1424_v57  ;;  %v3220_v40 = vshll.u32 %v19660_v19, 16  ;;  %v5745_v44 = vmax.f32 %v5681_v0, %v5683_v18  ;;  %v3807_v50 = vpop.permute.xlu1 %3806 }
 0x21d   :  { %v5822_v6 = vrot.slane %v5808_v42, %v19303_v41  ;;  %v5823_v17 = vcombine.high %v5815_v4, %v5815_v4  ;;  %v14280_v56 = vrot.slane %v5815_v4, 9  ;;  %vm7640_vm13 = vcmask 1044484   ;;  %v3805_v23 = vpop.permute.xlu0 %3804 }
 0x21e   :  { %v3213_v28 = vshrl.u32 %v19658_v38, 16  ;;  %v3215_v24 = vshll.u32 %v19658_v38, 16  ;;  %v19677_v11 = vrot.slane %v3220_v40, 1  ;;  %v19679_v12 = vrot.slane %v14140_v26, 1  ;;  %3822 = vrot.lane.b32.xlu1 %v19518_v16, %s16709_s7 }
 0x21f   :  { %v5824_v5 = vcombine.high %v5822_v6, %v5822_v6  ;;  %v14281_v25 = vrot.slane %v5823_v17, 9  ;;  %v14282_v14 = vrot.slane %v5822_v6, 9  ;;  %v6864_v3 = vmax.f32 %v5815_v4, %v14280_v56  ;;  %3820 = vrot.lane.b32.xlu0 %v19475_v48, %s16709_s7 }
 0x220   :  { %v3217_v8 = vrot.slane %v3215_v24, 1  ;;  %v5825_v57 = vcombine.high %v5745_v44, %v5745_v44  ;;  %v5832_v18 = vrot.slane %v5745_v44, %v19303_v41  ;;  %v4997_v61 = vsel %vm22177_vm1, %v4932_v32, %v3807_v50  ;;  %v4351_v40 = vpop.permute.xlu1 %4350 }
 0x221   :  { %v14283_v21 = vrot.slane %v5824_v5, 9  ;;  %v6865_v26 = vmax.f32 %v5823_v17, %v14281_v25  ;;  %v6866_v42 = vmax.f32 %v5822_v6, %v14282_v14  ;;  %v15127_v0 = vpack.c.bf16 %v6864_v3, %v6864_v3  ;;  %v4349_v14 = vpop.permute.xlu0 %4348 }
 0x222   :  { %vm22175_vm15 = vcmask 1045509   ;;  %v5839_v4 = vrot.slane %v5825_v57, %v19303_v41  ;;  %v5840_v39 = vcombine.high %v5832_v18, %v5832_v18  ;;  %v14284_v24 = vrot.slane %v5832_v18, 9  ;;  %4366 = vrot.lane.b32.xlu1 %v19576_v62, %s16713_s13 }
 0x223   :  { %v19689_v32 = vor.u32 %v3217_v8, %v3213_v28  ;;  %v6867_v56 = vmax.f32 %v5824_v5, %v14283_v21  ;;  %v15128_v44 = vpack.c.bf16 %v6865_v26, %v6865_v26  ;;  %v15129_v51 = vpack.c.bf16 %v6866_v42, %v6866_v42  ;;  %4364 = vrot.lane.b32.xlu0 %v19540_v63, %s16713_s13 }
 0x224   :  { %v7504_v50 = vunpack.c.l.b16 %v15127_v0  ;;  %vm7646_vm12 = vcmask 1046534   ;;  %v5841_v59 = vcombine.high %v5839_v4, %v5839_v4  ;;  %v14285_v17 = vrot.slane %v5840_v39, 9  ;;  %v2304_v42 = vpop.permute.xlu1 %2303 }
 0x225   :  { %v14286_v6 = vrot.slane %v5839_v4, 9  ;;  %v6868_v25 = vmax.f32 %v5832_v18, %v14284_v24  ;;  %vm7649_vm0 = vcmask 1047559   ;;  %v15130_v3 = vpack.c.bf16 %v6867_v56, %v6867_v56  ;;  %v4605_v15 = vpop.permute.xlu0 %4604 }
 0x226   :  { %v7505_v57 = vunpack.c.l.b16 %v15128_v44  ;;  %v7506_v20 = vunpack.c.l.b16 %v15129_v51  ;;  %vm22262_vm2 = vsmask.f32 256  ;;  %v4995_v8 = vsel %vm22177_vm1, %v4930_v10, %v3805_v23  ;;  %v19704_v10 = vld [vmem:[#allocation2 + $0x158] ss:$0 sps:$4 sm:$0x11]   ;;  %2319 = vrot.lane.b32.xlu1 %v19561_v37, %s16707_s30 }
 0x227   :  { %vm19695_vm6 = vmand %vm256_vm5, %vm22262_vm2  ;;  %v14287_v5 = vrot.slane %v5841_v59, 9  ;;  %v6869_v21 = vmax.f32 %v5840_v39, %v14285_v17  ;;  %v6870_v26 = vmax.f32 %v5839_v4, %v14286_v6  ;;  %v15131_v18 = vpack.c.bf16 %v6868_v25, %v6868_v25  ;;  %v19709_v17 = vld [vmem:[#allocation2 + $0x154] sm:$0xf]  ;;  %4620 = vrot.lane.b32.xlu0 %v19550_v45, %s16711_s8 }
 0x228   :  { %v7507_v54 = vunpack.c.l.b16 %v15130_v3  ;;  %v7632_v0 = vrot.slane %v7504_v50, 7  ;;  %v7633_v24 = vrot.slane %v7505_v57, 6  ;;  %v7636_v56 = vrot.slane %v7506_v20, 5  ;;  %v1550_v50 = vld [vmem:[#allocation2 + $0x150] sm:$0xf]  ;;  %v2306_v46 = vpop.permute.xlu1 %2305 }
 0x229   :  { %v6871_v44 = vmax.f32 %v5841_v59, %v14287_v5  ;;  %v15132_v51 = vpack.c.bf16 %v6869_v21, %v6869_v21  ;;  %v15133_v35 = vpack.c.bf16 %v6870_v26, %v6870_v26  ;;  %v7508_v55 = vunpack.c.l.b16 %v15131_v18  ;;  %v22265_v5 = vld [vmem:[#allocation36_spill] sm:$0xff]  ;;  %v4607_v52 = vpop.permute.xlu0 %4606  ;;  %v19724_v18 = vld [vmem:[#allocation2 + $0x158] ss:$0 sps:$4 sm:$0x11]  }
 0x22a   :  { %v7635_v23 = vsel %vm7634_vm3, %v7633_v24, %v7632_v0  ;;  %v7639_v4 = vrot.slane %v7507_v54, 4  ;;  %v5062_v47 = vsel %vm22176_vm4, %v4997_v61, %v4351_v40  ;;  %v5060_v39 = vsel %vm22176_vm4, %v4995_v8, %v4349_v14  ;;  %v1207_v14 = vld [vmem:[#allocation2 + $0x164] sm:$0x1]  ;;  %v7913_v54 = vld [vmem:[#allocation3 + $0x8] sm:$0xf]  ;;  %2321 = vrot.lane.b32.xlu1 %v19610_v34, %s16707_s30 }
 0x22b   :  { %v7638_v59 = vsel %vm7637_vm14, %v7636_v56, %v7635_v23  ;;  %v7509_v6 = vunpack.c.l.b16 %v15132_v51  ;;  %v7510_v25 = vunpack.c.l.b16 %v15133_v35  ;;  %v7642_v3 = vrot.slane %v7508_v55, 3  ;;  %v22267_v55 = vld [vmem:[#allocation26_spill] sm:$0xff]  ;;  %v15534_v23 = vpop.f32.mrf.mxu0  ;;  %4622 = vrot.lane.b32.xlu0 %v19580_v31, %s16711_s8 }
 0x22c   :  { %v7641_v57 = vsel %vm7640_vm13, %v7639_v4, %v7638_v59  ;;  %v15255_v20 = vpack.c.bf16 %v6871_v44, %v6871_v44  ;;  %v4674_v61 = vsel %vm22174_vm11, %v22265_v5, %v2304_v42  ;;  %v5125_v40 = vsel %vm5095_vm10, %v5060_v39, %v4605_v15  ;;  %v1297_v44 = vld [vmem:[#allocation2 + $0x150] sm:$0xf]  ;;  %v19737_v51 = vld [vmem:[#allocation2 + $0x154] sm:$0xf] }
 0x22d   :  { %v7644_v8 = vsel %vm22175_vm15, %v7642_v3, %v7641_v57  ;;  %v7645_v21 = vrot.slane %v7509_v6, 2  ;;  %v7648_v26 = vrot.slane %v7510_v25, 1  ;;  %vm22266_vm2 = vcmask 293888   ;;  %v5299_v3 = vpop.f32.mrf.mxu0 }
 0x22e   :  { %15556 = vmatprep.mubr.msk.bf16.mxu0 %vm22266_vm2, %v5125_v40  ;;  %v4676_v35 = vsel %vm22174_vm11, %v22267_v55, %v2306_v46  ;;  %v7919_v15 = vsel %vm19695_vm6, %v15255_v20, %v7918_v9  ;;  %v5127_v42 = vsel %vm5095_vm10, %v5062_v47, %v4607_v52  ;;  %vm22268_vm5 = vsmask.f32 7424  ;;  %v1622_v40 = vld [vmem:[#allocation2 + $0x150] sm:$0xe]  ;;  %2578 = vrot.lane.b32.xlu1 %v19594_v29, %s16699_s23 }
 0x22f   :  { %v19732_v0 = vsel %vm22268_vm5, %v19689_v32, %v19677_v11  ;;  %v22269_v24 = vshll.u32 %v19623_v1, 16  ;;  %v7647_v16 = vsel %vm7646_vm12, %v7645_v21, %v7644_v8  ;;  %vm22270_vm2 = vsmask.f32 7938  ;;  %7920 = vst [vmem:[#allocation3 + $0xc] sm:$0x1] %v7919_v15  ;;  %v2563_v1 = vpop.permute.xlu1 %2562  ;;  %v15535_v8 = vpop.f32.mrf.mxu0  ;;  %2576 = vrot.lane.b32.xlu0 %v19601_v36, %s16699_s23 }
 0x230   :  { %vm22271_vm11 = vcmask 519168   ;;  %vm22274_vm5 = vcmask 293888   ;;  %v19750_v11 = vcombine.low %v1550_v50, %v19709_v17  ;;  %v833_v32 = vrot.slane %v19665_v33, 4 }
 0x231   :  { %v831_v56 = vor.u32 %v22269_v24, %v19665_v33  ;;  %vm19742_vm15 = vmand %vm22271_vm11, %vm22270_vm2  ;;  %15557 = vmatmul.mubr.msk.bf16.gmra.mxu0 %vm22274_vm5, %v5127_v42  ;;  %v4232_v4 = vshll.u32 %v19704_v10, 16  ;;  %v7650_v47 = vsel %vm7649_vm0, %v7648_v26, %v7647_v16  ;;  %v5551_v39 = vmul.f32 %v15534_v23, %v19573_v30  ;;  %v2561_v33 = vpop.permute.xlu0 %2560 }
 0x232   :  { %v22275_v59 = vrot.slane %v19660_v19, 1  ;;  %vm22276_vm11 = vcmask 1046528   ;;  %v22277_v48 = vrot.slane %v19630_v2, 4  ;;  %v7846_v25 = vpack.c.b16 %v7650_v47, %v7650_v47  ;;  %2802 = vrot.lane.b32.xlu1 %v19658_v38, %s16708_s6 }
 0x233   :  { %vm22278_vm2 = vcmask 27648   ;;  %v1208_v19 = vsel %vm17095_vm9, %v833_v32, %v1207_v14  ;;  %v4225_v46 = vshrl.u32 %v19750_v11, 16  ;;  %v5622_v2 = vadd.f32 %v19589_v43, %v5551_v39  ;;  %v2787_v14 = vpop.permute.xlu1 %2786  ;;  %2800 = vrot.lane.b32.xlu0 %v19586_v7, %s16708_s6 }
 0x234   :  { %v19760_v6 = vsel %vm22276_vm11, %v19679_v12, %v22275_v59  ;;  %v832_v50 = vsel %vm17070_vm8, %v22277_v48, %v831_v56  ;;  %v4227_v12 = vshll.u32 %v19750_v11, 16  ;;  %vm22279_vm5 = vcmask 64512   ;;  %1209 = vst [vmem:[#allocation2 + $0x164] sm:$0x1] %v1208_v19  ;;  %v5302_v56 = vpop.f32.mrf.mxu0 }
 0x235   :  { %1206 = vst.msk [vmem:[#allocation2 + $0x160] sm:$0xf] %vm22278_vm2, %v832_v50  ;;  %v4741_v57 = vsel %vm22279_vm5, %v4676_v35, %v2563_v1  ;;  %v5549_v20 = vmul.f32 %v19573_v30, %v5299_v3  ;;  %v4234_v5 = vrot.slane %v4232_v4, 1  ;;  %v7914_v62 = vsel %vm19742_vm15, %v7846_v25, %v7913_v54  ;;  %vm22280_vm11 = vmmov %vm22279_vm5  ;;  %v1552_v54 = vld [vmem:[#allocation2 + $0x15c] sm:$0xf]  ;;  %v2785_v63 = vpop.permute.xlu0 %2784 }
 0x236   :  { %v4229_v21 = vrot.slane %v4227_v12, 1  ;;  %v19781_v26 = vcombine.low %v1297_v44, %v19737_v51  ;;  %v2207_v55 = vshll.u32 %v19724_v18, 16  ;;  %7915 = vst [vmem:[#allocation3 + $0x8] sm:$0xf] %v7914_v62  ;;  %v5686_v35 = vmax.f32 %v5622_v2, 0.0  ;;  %3346 = vrot.lane.b32.xlu1 %v19732_v0, %s16712_s18 }
 0x237   :  { %v5620_v52 = vadd.f32 %v19589_v43, %v5549_v20  ;;  %v4739_v15 = vsel %vm22280_vm11, %v4674_v61, %v2561_v33  ;;  %v5552_v42 = vmul.f32 %v15535_v8, %v19573_v30  ;;  %vm22281_vm2 = vcmask 97280   ;;  %v1299_v1 = vld [vmem:[#allocation2 + $0x15c] sm:$0xf]  ;;  %v3331_v59 = vpop.permute.xlu1 %3330  ;;  %3344 = vrot.lane.b32.xlu0 %v19647_v53, %s16712_s18 }
 0x238   :  { %v4806_v24 = vsel %vm22281_vm2, %v4741_v57, %v2787_v14  ;;  %v4230_v44 = vor.u32 %v4229_v21, %v4225_v46  ;;  %v2200_v16 = vshrl.u32 %v19781_v26, 16  ;;  %v2202_v23 = vshll.u32 %v19781_v26, 16  ;;  %vm22282_vm5 = vmmov %vm22281_vm2 }
 0x239   :  { %v5684_v32 = vmax.f32 %v5620_v52, 0.0  ;;  %v5623_v4 = vadd.f32 %v19589_v43, %v5552_v42  ;;  %v5550_v61 = vmul.f32 %v19573_v30, %v5302_v56  ;;  %v2209_v47 = vrot.slane %v2207_v55, 1  ;;  %v3329_v45 = vpop.permute.xlu0 %3328 }
 0x23a   :  { %v4804_v39 = vsel %vm22282_vm5, %v4739_v15, %v2785_v63  ;;  %vm22283_vm11 = vsmask.f32 7424  ;;  %v2204_v48 = vrot.slane %v2202_v23, 1  ;;  %v14235_v50 = vcombine.low %v1622_v40, %v19709_v17  ;;  %3602 = vrot.lane.b32.xlu1 %v19760_v6, %s16710_s16 }
 0x23b   :  { %v19798_v37 = vsel %vm22283_vm11, %v4230_v44, %v4234_v5  ;;  %v5746_v25 = vmax.f32 %v5684_v32, %v5686_v35  ;;  %v5687_v3 = vmax.f32 %v5623_v4, 0.0  ;;  %v5621_v33 = vadd.f32 %v19589_v43, %v5550_v61  ;;  %v19813_v17 = vld [vmem:[#allocation2 + $0x164] ss:$0 sps:$4 sm:$0x11]   ;;  %v3587_v34 = vpop.permute.xlu1 %3586  ;;  %3600 = vrot.lane.b32.xlu0 %v19650_v49, %s16710_s16 }
 0x23c   :  { %v19802_v19 = vld [vmem:[#allocation2 + $0x160] sm:$0xf]  ;;  %v4553_v46 = vrot.slane %v19704_v10, 1  ;;  %vm22284_vm2 = vcmask 130048   ;;  %v2205_v20 = vor.u32 %v2204_v48, %v2200_v16  ;;  %v4552_v5 = vrot.slane %v14235_v50, 1 }
 0x23d   :  { %v19805_v12 = vld [vmem:[#allocation2 + $0x160] sm:$0xf]  ;;  %v4871_v2 = vsel %vm22284_vm2, %v4806_v24, %v3331_v59  ;;  %v19811_v57 = vcombine.low %v1552_v54, %v19802_v19  ;;  %v5842_v40 = vcombine.high %v5746_v25, %v5746_v25  ;;  %v5849_v62 = vrot.slane %v5746_v25, %v19303_v41  ;;  %vm22285_vm5 = vmmov %vm22284_vm2  ;;  %v3585_v56 = vpop.permute.xlu0 %3584 }
 0x23e   :  { %v5685_v8 = vmax.f32 %v5621_v33, 0.0  ;;  %v19817_v10 = vcombine.low %v1299_v1, %v19805_v12  ;;  %v4869_v14 = vsel %vm22285_vm5, %v4804_v39, %v3329_v45  ;;  %v4244_v35 = vshll.u32 %v19813_v17, 16 }
 0x23f   :  { %v4237_v21 = vshrl.u32 %v19811_v57, 16  ;;  %v4239_v55 = vshll.u32 %v19811_v57, 16  ;;  %v5856_v52 = vrot.slane %v5842_v40, %v19303_v41  ;;  %v5857_v15 = vcombine.high %v5849_v62, %v5849_v62  ;;  %v3811_v59 = vpop.permute.xlu1 %3810  ;;  %3826 = vrot.lane.b32.xlu1 %v19811_v57, %s16709_s7  ;;  %3824 = vrot.lane.b32.xlu0 %v19750_v11, %s16709_s7 }
 0x240   :  { %v14288_v42 = vrot.slane %v5849_v62, 9  ;;  %v5747_v54 = vmax.f32 %v5685_v8, %v5687_v3  ;;  %vm22286_vm11 = vcmask 162816   ;;  %v19829_v31 = vrot.slane %v4244_v35, 1 }
 0x241   :  { %v4936_v24 = vsel %vm22286_vm11, %v4871_v2, %v3587_v34  ;;  %v4241_v63 = vrot.slane %v4239_v55, 1  ;;  %vm22287_vm2 = vsmask.f32 7424  ;;  %v5858_v16 = vcombine.high %v5856_v52, %v5856_v52  ;;  %vm22288_vm5 = vmmov %vm22286_vm11  ;;  %v3809_v45 = vpop.permute.xlu0 %3808 }
 0x242   :  { %v19832_v44 = vsel %vm22287_vm2, %v2205_v20, %v2209_v47  ;;  %v14289_v23 = vrot.slane %v5857_v15, 9  ;;  %v14290_v1 = vrot.slane %v5856_v52, 9  ;;  %v6872_v32 = vmax.f32 %v5849_v62, %v14288_v42 }
 0x243   :  { %v5859_v4 = vcombine.high %v5747_v54, %v5747_v54  ;;  %v5866_v61 = vrot.slane %v5747_v54, %v19303_v41  ;;  %v4934_v39 = vsel %vm22288_vm5, %v4869_v14, %v3585_v56  ;;  %vm22289_vm11 = vcmask 1046528   ;;  %v4355_v55 = vpop.permute.xlu1 %4354  ;;  %4368 = vrot.lane.b32.xlu0 %v19798_v37, %s16713_s13 }
 0x244   :  { %v19839_v29 = vsel %vm22289_vm11, %v4552_v5, %v4553_v46  ;;  %v14291_v48 = vrot.slane %v5858_v16, 9  ;;  %v6873_v50 = vmax.f32 %v5857_v15, %v14289_v23  ;;  %v6874_v47 = vmax.f32 %v5856_v52, %v14290_v1 }
 0x245   :  { %v15135_v25 = vpack.c.bf16 %v6872_v32, %v6872_v32  ;;  %v5873_v3 = vrot.slane %v5859_v4, %v19303_v41  ;;  %v5874_v33 = vcombine.high %v5866_v61, %v5866_v61  ;;  %v14292_v2 = vrot.slane %v5866_v61, 9 }
 0x246   :  { %v4242_v20 = vor.u32 %v4241_v63, %v4237_v21  ;;  %v6875_v40 = vmax.f32 %v5858_v16, %v14291_v48  ;;  %v15136_v62 = vpack.c.bf16 %v6873_v50, %v6873_v50  ;;  %v15137_v36 = vpack.c.bf16 %v6874_v47, %v6874_v47  ;;  %v4353_v63 = vpop.permute.xlu0 %4352  ;;  %v7924_v50 = vld [vmem:[#allocation3 + $0x14] sm:$0x1] }
 0x247   :  { %v7512_v8 = vunpack.c.l.b16 %v15135_v25  ;;  %v5875_v14 = vcombine.high %v5873_v3, %v5873_v3  ;;  %v14293_v46 = vrot.slane %v5874_v33, 9  ;;  %v14294_v5 = vrot.slane %v5873_v3, 9  ;;  %v2308_v47 = vpop.permute.xlu1 %2307  ;;  %4624 = vrot.lane.b32.xlu0 %v19839_v29, %s16711_s8 }
 0x248   :  { %v6876_v34 = vmax.f32 %v5866_v61, %v14292_v2  ;;  %v15138_v35 = vpack.c.bf16 %v6875_v40, %v6875_v40  ;;  %v7513_v52 = vunpack.c.l.b16 %v15136_v62  ;;  %v7514_v15 = vunpack.c.l.b16 %v15137_v36  ;;  %v19854_v2 = vld [vmem:[#allocation2 + $0x164] ss:$0 sps:$4 sm:$0x11]  }
 0x249   :  { %v7651_v42 = vrot.slane %v7512_v8, 7  ;;  %v14295_v54 = vrot.slane %v5875_v14, 9  ;;  %v6877_v56 = vmax.f32 %v5874_v33, %v14293_v46  ;;  %v6878_v38 = vmax.f32 %v5873_v3, %v14294_v5 }
 0x24a   :  { %v15139_v21 = vpack.c.bf16 %v6876_v34, %v6876_v34  ;;  %v7515_v16 = vunpack.c.l.b16 %v15138_v35  ;;  %v7652_v23 = vrot.slane %v7513_v52, 6  ;;  %v7654_v1 = vrot.slane %v7514_v15, 5  ;;  %v4609_v36 = vpop.permute.xlu0 %4608  ;;  %v22291_v35 = vld [vmem:[#allocation34_spill] sm:$0xff]  ;;  %v1368_v15 = vld [vmem:[#allocation2 + $0x15c] sm:$0xe] }
 0x24b   :  { %v4999_v32 = vsel %vm22177_vm1, %v4934_v39, %v3809_v45  ;;  %v6879_v4 = vmax.f32 %v5875_v14, %v14295_v54  ;;  %v15140_v7 = vpack.c.bf16 %v6877_v56, %v6877_v56  ;;  %v15141_v61 = vpack.c.bf16 %v6878_v38, %v6878_v38  ;;  %v2310_v6 = vpop.permute.xlu1 %2309 }
 0x24c   :  { %v7516_v48 = vunpack.c.l.b16 %v15139_v21  ;;  %v7653_v25 = vsel %vm7634_vm3, %v7652_v23, %v7651_v42  ;;  %v7656_v3 = vrot.slane %v7515_v16, 4  ;;  %v5001_v33 = vsel %vm22177_vm1, %v4936_v24, %v3811_v59  ;;  %v1623_v59 = vld [vmem:[#allocation2 + $0x15c] sm:$0xe]  ;;  %v7921_v42 = vld [vmem:[#allocation3 + $0x10] sm:$0xf] }
 0x24d   :  { %v5064_v0 = vsel %vm22176_vm4, %v4999_v32, %v4353_v63  ;;  %v7655_v39 = vsel %vm7637_vm14, %v7654_v1, %v7653_v25  ;;  %v7517_v45 = vunpack.c.l.b16 %v15140_v7  ;;  %v7518_v40 = vunpack.c.l.b16 %v15141_v61  ;;  %v1367_v21 = vld [vmem:[#allocation2 + $0x150] sm:$0xe] }
 0x24e   :  { %v7658_v62 = vrot.slane %v7516_v48, 3  ;;  %v7657_v53 = vsel %vm7640_vm13, %v7656_v3, %v7655_v39  ;;  %v15256_v8 = vpack.c.bf16 %v6879_v4, %v6879_v4  ;;  %v5066_v14 = vsel %vm22176_vm4, %v5001_v33, %v4355_v55  ;;  %v4611_v49 = vpop.permute.xlu0 %4610  ;;  %v15538_v48 = vpop.f32.mrf.mxu0 }
 0x24f   :  { %v5129_v24 = vsel %vm5095_vm10, %v5064_v0, %v4609_v36  ;;  %vm22290_vm2 = vcmask 1045509   ;;  %v7660_v5 = vrot.slane %v7517_v45, 2  ;;  %v7662_v34 = vrot.slane %v7518_v40, 1  ;;  %v19906_v40 = vld [vmem:[%s22124_s2] ss:$0 sm:$0xff] }
 0x250   :  { %v7659_v46 = vsel %vm22290_vm2, %v7658_v62, %v7657_v53  ;;  %vm22292_vm5 = vcmask 31744   ;;  %vm22293_vm11 = vcmask 293888   ;;  %v7925_v55 = vsel %vm19695_vm6, %v15256_v8, %v7924_v50  ;;  %v362_v50 = vld [vmem:[%s22122_s0 + $0xd8] sm:$0xf]  ;;  %v5315_v0 = vpop.f32.mrf.mxu0 }
 0x251   :  { %v4678_v52 = vsel %vm22292_vm5, %v22291_v35, %v2308_v47  ;;  %15560 = vmatprep.mubr.msk.bf16.mxu0 %vm22293_vm11, %v5129_v24  ;;  %vm22294_vm4 = vsmask.f32 7424  ;;  %v2212_v56 = vshrl.u32 %v19817_v10, 16  ;;  %v2214_v38 = vshll.u32 %v19817_v10, 16  ;;  %7926 = vst [vmem:[#allocation3 + $0x14] sm:$0x1] %v7925_v55  ;;  %vm22296_vm2 = vmmov %vm22293_vm11 }
 0x252   :  { %v4247_v54 = vsel %vm22294_vm4, %v4242_v20, %v19829_v31  ;;  %v7661_v63 = vsel %vm7646_vm12, %v7660_v5, %v7659_v46  ;;  %v2219_v16 = vshll.u32 %v19854_v2, 16  ;;  %v14236_v23 = vcombine.low %v1623_v59, %v19802_v19  ;;  %vm22295_vm4 = vmmov %vm22292_vm5  ;;  %v2567_v19 = vpop.permute.xlu1 %2566  ;;  %v2565_v39 = vpop.permute.xlu0 %2564  ;;  %v19914_v46 = vld [vmem:[#allocation5] ss:$0 sm:$0xff] }
 0x253   :  { %v4556_v1 = vrot.slane %v19813_v17, 1  ;;  %v7663_v31 = vsel %vm7649_vm0, %v7662_v34, %v7661_v63  ;;  %v5131_v20 = vsel %vm5095_vm10, %v5066_v14, %v4611_v49  ;;  %v2216_v32 = vrot.slane %v2214_v38, 1  ;;  %4370 = vrot.lane.b32.xlu1 %v4247_v54, %s16713_s13  ;;  %v15539_v8 = vpop.f32.mrf.mxu0 }
 0x254   :  { %v14046_v4 = vcombine.low %v1368_v15, %v19805_v12  ;;  %v7848_v7 = vpack.c.b16 %v7663_v31, %v7663_v31  ;;  %v4680_v61 = vsel %vm22295_vm4, %v18732_v13, %v2310_v6  ;;  %15561 = vmatmul.mubr.msk.bf16.gmra.mxu0 %vm22296_vm2, %v5131_v20  ;;  %v2221_v57 = vrot.slane %v2219_v16, 1  ;;  %v363_v13 = vld [vmem:[%s22122_s0 + $0xdc] sm:$0xf]  ;;  %v19919_v6 = vld [vmem:[#allocation2 + $0x160] sm:$0xf] }
 0x255   :  { %v4555_v17 = vrot.slane %v14236_v23, 1  ;;  %v5555_v47 = vmul.f32 %v15538_v48, %v19573_v30  ;;  %v2217_v12 = vor.u32 %v2216_v32, %v2212_v56  ;;  %v2514_v3 = vrot.slane %v19854_v2, 1  ;;  %v5318_v15 = vpop.f32.mrf.mxu0  ;;  %v1210_v16 = vld [vmem:[#allocation2 + $0x168] sm:$0xf] }
 0x256   :  { %v2513_v25 = vrot.slane %v14046_v4, 1  ;;  %v7922_v11 = vsel %vm19742_vm15, %v7848_v7, %v7921_v42  ;;  %vm22297_vm5 = vcmask 64512   ;;  %v14045_v45 = vcombine.low %v1367_v21, %v19737_v51  ;;  %v2791_v51 = vpop.permute.xlu1 %2790  ;;  %v2789_v42 = vpop.permute.xlu0 %2788  ;;  %v19932_v32 = vld [vmem:[#allocation2 + $0x164] ss:$0 sps:$4 sm:$0x11]  }
 0x257   :  { %v4745_v33 = vsel %vm22297_vm5, %v4680_v61, %v2567_v19  ;;  %v2511_v30 = vrot.slane %v19724_v18, 1  ;;  %7923 = vst [vmem:[#allocation3 + $0x10] sm:$0xf] %v7922_v11  ;;  %v5626_v2 = vadd.f32 %v19589_v43, %v5555_v47  ;;  %v5553_v62 = vmul.f32 %v19906_v40, %v5315_v0  ;;  %vm22298_vm11 = vmmov %vm22297_vm5  ;;  %2323 = vrot.lane.b32.xlu1 %v19832_v44, %s16707_s30  ;;  %v1214_v19 = vld [vmem:[#allocation2 + $0x170] sm:$0x1] }
 0x258   :  { %v4743_v36 = vsel %vm22298_vm11, %v4678_v52, %v2565_v39  ;;  %vm22299_vm4 = vcmask 1046528   ;;  %vm22300_vm2 = vsmask.f32 7424  ;;  %v2510_v14 = vrot.slane %v14045_v45, 1  ;;  %v1425_v52 = vld [vmem:[#allocation2 + $0x15c] sm:$0xf] }
 0x259   :  { %v4557_v53 = vsel %vm22299_vm4, %v4555_v17, %v4556_v1  ;;  %v2222_v18 = vsel %vm22300_vm2, %v2217_v12, %v2221_v57  ;;  %v835_v43 = vshrl.u32 %v362_v50, 16  ;;  %v838_v24 = vshll.u32 %v362_v50, 16  ;;  %vm22301_vm5 = vmmov %vm22299_vm4 }
 0x25a   :  { %v5690_v59 = vmax.f32 %v5626_v2, 0.0  ;;  %v5624_v5 = vadd.f32 %v19914_v46, %v5553_v62  ;;  %v5556_v34 = vmul.f32 %v19906_v40, %v15539_v8  ;;  %v2515_v35 = vsel %vm22301_vm5, %v2513_v25, %v2514_v3  ;;  %v3335_v23 = vpop.permute.xlu1 %3334  ;;  %v3333_v17 = vpop.permute.xlu0 %3332  ;;  %4626 = vrot.lane.b32.xlu0 %v4557_v53, %s16711_s8  ;;  %v19951_v53 = vld [vmem:[#allocation2 + $0x15c] sm:$0xe] }
 0x25b   :  { %vm22302_vm11 = vcmask 97280   ;;  %v837_v55 = vrot.slane %v835_v43, 7  ;;  %v843_v54 = vshrl.u32 %v363_v13, 16  ;;  %v846_v56 = vshll.u32 %v363_v13, 16  ;;  %2325 = vrot.lane.b32.xlu1 %v2222_v18, %s16707_s30 }
 0x25c   :  { %v4810_v37 = vsel %vm22302_vm11, %v4745_v33, %v2791_v51  ;;  %v5688_v38 = vmax.f32 %v5624_v5, 0.0  ;;  %v5627_v21 = vadd.f32 %v19914_v46, %v5556_v34  ;;  %v5554_v63 = vmul.f32 %v19906_v40, %v5318_v15  ;;  %vm22303_vm2 = vmmov %vm22302_vm11 }
 0x25d   :  { %v2512_v49 = vsel %vm22299_vm4, %v2510_v14, %v2511_v30  ;;  %v840_v1 = vor.u32 %v838_v24, %v837_v55  ;;  %v841_v31 = vrot.slane %v837_v55, 4  ;;  %v845_v20 = vrot.slane %v843_v54, 7 }
 0x25e   :  { %v19930_v44 = vcombine.low %v1425_v52, %v19919_v6  ;;  %v5748_v4 = vmax.f32 %v5688_v38, %v5690_v59  ;;  %v5691_v7 = vmax.f32 %v5627_v21, 0.0  ;;  %v5625_v61 = vadd.f32 %v19914_v46, %v5554_v63  ;;  %v3591_v11 = vpop.permute.xlu1 %3590  ;;  %v3589_v18 = vpop.permute.xlu0 %3588  ;;  %2580 = vrot.lane.b32.xlu0 %v2512_v49, %s16699_s23 }
 0x25f   :  { %v4808_v48 = vsel %vm22303_vm2, %v4743_v36, %v2789_v42  ;;  %vm22304_vm5 = vcmask 130048   ;;  %v848_v29 = vor.u32 %v846_v56, %v845_v20  ;;  %v1211_v50 = vsel %vm17060_vm7, %v840_v1, %v1210_v16  ;;  %2582 = vrot.lane.b32.xlu1 %v2515_v35, %s16699_s23 }
 0x260   :  { %v4875_v57 = vsel %vm22304_vm5, %v4810_v37, %v3335_v23  ;;  %v850_v47 = vrot.slane %v845_v20, 4  ;;  %v5876_v12 = vcombine.high %v5748_v4, %v5748_v4  ;;  %v5883_v25 = vrot.slane %v5748_v4, %v19303_v41  ;;  %1212 = vst [vmem:[#allocation2 + $0x168] sm:$0xf] %v1211_v50  ;;  %vm22306_vm4 = vmmov %vm22304_vm5 }
 0x261   :  { %v5689_v3 = vmax.f32 %v5625_v61, 0.0  ;;  %v3225_v13 = vshrl.u32 %v19930_v44, 16  ;;  %v849_v33 = vsel %vm17070_vm8, %v841_v31, %v848_v29  ;;  %v3227_v39 = vshll.u32 %v19930_v44, 16 }
 0x262   :  { %v1215_v0 = vsel %vm17095_vm9, %v850_v47, %v1214_v19  ;;  %v3232_v45 = vshll.u32 %v19932_v32, 16  ;;  %v5890_v30 = vrot.slane %v5876_v12, %v19303_v41  ;;  %v5891_v2 = vcombine.high %v5883_v25, %v5883_v25  ;;  %v3815_v42 = vpop.permute.xlu1 %3814  ;;  %v3813_v23 = vpop.permute.xlu0 %3812  ;;  %2804 = vrot.lane.b32.xlu0 %v19930_v44, %s16708_s6 }
 0x263   :  { %v14296_v62 = vrot.slane %v5883_v25, 9  ;;  %v5749_v36 = vmax.f32 %v5689_v3, %v5691_v7  ;;  %vm22305_vm11 = vcmask 27648   ;;  %1216 = vst [vmem:[#allocation2 + $0x170] sm:$0x1] %v1215_v0  ;;  %v4873_v8 = vsel %vm22306_vm4, %v4808_v48, %v3333_v17 }
 0x264   :  { %1213 = vst.msk [vmem:[#allocation2 + $0x16c] sm:$0xf] %vm22305_vm11, %v849_v33  ;;  %vm22307_vm2 = vcmask 162816   ;;  %v3229_v14 = vrot.slane %v3227_v39, 1  ;;  %v19956_v43 = vrot.slane %v3232_v45, 1  ;;  %v5892_v24 = vcombine.high %v5890_v30, %v5890_v30 }
 0x265   :  { %v4940_v51 = vsel %vm22307_vm2, %v4875_v57, %v3591_v11  ;;  %v14297_v59 = vrot.slane %v5891_v2, 9  ;;  %v14298_v5 = vrot.slane %v5890_v30, 9  ;;  %v6880_v34 = vmax.f32 %v5883_v25, %v14296_v62  ;;  %vm22308_vm5 = vmmov %vm22307_vm2 }
 0x266   :  { %v5893_v52 = vcombine.high %v5749_v36, %v5749_v36  ;;  %v5900_v37 = vrot.slane %v5749_v36, %v19303_v41  ;;  %v4938_v15 = vsel %vm22308_vm5, %v4873_v8, %v3589_v18  ;;  %v14141_v55 = vcombine.low %v19951_v53, %v19919_v6  ;;  %v4359_v57 = vpop.permute.xlu1 %4358  ;;  %v4357_v0 = vpop.permute.xlu0 %4356 }
 0x267   :  { %v14299_v54 = vrot.slane %v5892_v24, 9  ;;  %v6881_v35 = vmax.f32 %v5891_v2, %v14297_v59  ;;  %v6882_v56 = vmax.f32 %v5890_v30, %v14298_v5  ;;  %v15143_v38 = vpack.c.bf16 %v6880_v34, %v6880_v34  ;;  %v1427_v12 = vld [vmem:[#allocation2 + $0x168] sm:$0xf] }
 0x268   :  { %v5907_v21 = vrot.slane %v5893_v52, %v19303_v41  ;;  %v5908_v63 = vcombine.high %v5900_v37, %v5900_v37  ;;  %v14300_v16 = vrot.slane %v5900_v37, 9  ;;  %v3230_v1 = vor.u32 %v3229_v14, %v3225_v13 }
 0x269   :  { %v6883_v31 = vmax.f32 %v5892_v24, %v14299_v54  ;;  %v15144_v20 = vpack.c.bf16 %v6881_v35, %v6881_v35  ;;  %v15145_v4 = vpack.c.bf16 %v6882_v56, %v6882_v56  ;;  %v7520_v7 = vunpack.c.l.b16 %v15143_v38  ;;  %v7930_v54 = vld [vmem:[#allocation3 + $0x1c] sm:$0x1] }
 0x26a   :  { %v5909_v61 = vcombine.high %v5907_v21, %v5907_v21  ;;  %v14301_v49 = vrot.slane %v5908_v63, 9  ;;  %v14302_v48 = vrot.slane %v5907_v21, 9  ;;  %v6884_v19 = vmax.f32 %v5900_v37, %v14300_v16  ;;  %v2312_v18 = vpop.permute.xlu1 %2311  ;;  %v19969_v5 = vld [vmem:[#allocation2 + $0x170] ss:$0 sps:$4 sm:$0x11]   ;;  %v4613_v35 = vpop.permute.xlu0 %4612 }
 0x26b   :  { %v15146_v17 = vpack.c.bf16 %v6883_v31, %v6883_v31  ;;  %v7521_v29 = vunpack.c.l.b16 %v15144_v20  ;;  %v7522_v50 = vunpack.c.l.b16 %v15145_v4  ;;  %v5005_v47 = vsel %vm22177_vm1, %v4940_v51, %v3815_v42  ;;  %v1428_v33 = vld [vmem:[#allocation2 + $0x16c] sm:$0xf]  ;;  %v1496_v16 = vld [vmem:[#allocation2 + $0x168] sm:$0xe] }
 0x26c   :  { %v14303_v25 = vrot.slane %v5909_v61, 9  ;;  %v6885_v3 = vmax.f32 %v5908_v63, %v14301_v49  ;;  %v6886_v13 = vmax.f32 %v5907_v21, %v14302_v48  ;;  %v15147_v11 = vpack.c.bf16 %v6884_v19, %v6884_v19 }
 0x26d   :  { %v7523_v39 = vunpack.c.l.b16 %v15146_v17  ;;  %v7664_v45 = vrot.slane %v7520_v7, 7  ;;  %v7665_v30 = vrot.slane %v7521_v29, 6  ;;  %v7667_v2 = vrot.slane %v7522_v50, 5 }
 0x26e   :  { %v6887_v62 = vmax.f32 %v5909_v61, %v14303_v25  ;;  %v15148_v36 = vpack.c.bf16 %v6885_v3, %v6885_v3  ;;  %v15149_v44 = vpack.c.bf16 %v6886_v13, %v6886_v13  ;;  %v7524_v8 = vunpack.c.l.b16 %v15147_v11  ;;  %v2314_v4 = vpop.permute.xlu1 %2313  ;;  %v4615_v50 = vpop.permute.xlu0 %4614  ;;  %v7927_v25 = vld [vmem:[#allocation3 + $0x18] sm:$0xf] }
 0x26f   :  { %v7666_v14 = vsel %vm7634_vm3, %v7665_v30, %v7664_v45  ;;  %v7669_v24 = vrot.slane %v7523_v39, 4  ;;  %v5003_v51 = vsel %vm22177_vm1, %v4938_v15, %v3813_v23  ;;  %v14078_v59 = vcombine.low %v1427_v12, %v1428_v33  ;;  %v365_v39 = vld [vmem:[%s22122_s0 + $0xe4] sm:$0xf]  ;;  %v15542_v45 = vpop.f32.mrf.mxu0 }
 0x270   :  { %v7668_v34 = vsel %vm7637_vm14, %v7667_v2, %v7666_v14  ;;  %v7525_v52 = vunpack.c.l.b16 %v15148_v36  ;;  %v7526_v37 = vunpack.c.l.b16 %v15149_v44  ;;  %v7671_v42 = vrot.slane %v7524_v8, 3  ;;  %v20001_v36 = vld [vmem:[#allocation2 + $0x16c] sm:$0xf]  ;;  %v22317_v14 = vld [vmem:[#allocation35_spill] sm:$0xff] }
 0x271   :  { %v7670_v56 = vsel %vm7640_vm13, %v7669_v24, %v7668_v34  ;;  %v15257_v38 = vpack.c.bf16 %v6887_v62, %v6887_v62  ;;  %2806 = vrot.lane.b32.xlu1 %v14078_v59, %s16708_s6  ;;  %vm22309_vm11 = vcmask 228352   ;;  %v3237_v63 = vshrl.u32 %v14078_v59, 16 }
 0x272   :  { %v5070_v21 = vsel %vm22309_vm11, %v5005_v47, %v4359_v57  ;;  %vm22310_vm4 = vcmask 1045509   ;;  %v7673_v23 = vrot.slane %v7525_v52, 2  ;;  %v7675_v31 = vrot.slane %v7526_v37, 1  ;;  %vm22311_vm2 = vmmov %vm22309_vm11  ;;  %v364_v47 = vld [vmem:[%s22122_s0 + $0xe0] sm:$0xf]  ;;  %v2571_v30 = vpop.permute.xlu1 %2570 }
 0x273   :  { %v7672_v15 = vsel %vm22310_vm4, %v7671_v42, %v7670_v56  ;;  %v3239_v20 = vshll.u32 %v14078_v59, 16  ;;  %v7931_v7 = vsel %vm19695_vm6, %v15257_v38, %v7930_v54  ;;  %v5068_v61 = vsel %vm22311_vm2, %v5003_v51, %v4357_v0  ;;  %v1217_v37 = vld [vmem:[#allocation2 + $0x174] sm:$0xf]  ;;  %v20017_v38 = vld [vmem:[#allocation2 + $0x170] ss:$0 sps:$4 sm:$0x11]  }
 0x274   :  { %v3244_v49 = vshll.u32 %v19969_v5, 16  ;;  %vm22312_vm5 = vsmask.f32 7424  ;;  %v7674_v19 = vsel %vm7646_vm12, %v7673_v23, %v7672_v15  ;;  %7932 = vst [vmem:[#allocation3 + $0x1c] sm:$0x1] %v7931_v7  ;;  %v5133_v17 = vsel %vm5095_vm10, %v5068_v61, %v4613_v35 }
 0x275   :  { %v3235_v48 = vsel %vm22312_vm5, %v3230_v1, %v19956_v43  ;;  %v3241_v57 = vrot.slane %v3239_v20, 1  ;;  %v14142_v29 = vcombine.low %v1496_v16, %v1428_v33  ;;  %v7676_v12 = vsel %vm7649_vm0, %v7675_v31, %v7674_v19  ;;  %vm22315_vm2 = vmmov %vm22312_vm5  ;;  %v1221_v20 = vld [vmem:[#allocation2 + $0x17c] sm:$0x1]  ;;  %v1301_v19 = vld [vmem:[#allocation2 + $0x168] sm:$0xf] }
 0x276   :  { %3348 = vrot.lane.b32.xlu0 %v3235_v48, %s16712_s18  ;;  %v3246_v3 = vrot.slane %v3244_v49, 1  ;;  %v3538_v43 = vrot.slane %v19969_v5, 1  ;;  %v3534_v1 = vrot.slane %v14141_v55, 1  ;;  %vm22313_vm11 = vcmask 293888   ;;  %v1554_v55 = vld [vmem:[#allocation2 + $0x168] sm:$0xf] }
 0x277   :  { %15564 = vmatprep.mubr.msk.bf16.mxu0 %vm22313_vm11, %v5133_v17  ;;  %v7850_v13 = vpack.c.b16 %v7676_v12, %v7676_v12  ;;  %v3242_v11 = vor.u32 %v3241_v57, %v3237_v63  ;;  %v3537_v33 = vrot.slane %v14142_v29, 1  ;;  %v3535_v0 = vrot.slane %v19932_v32, 1 }
 0x278   :  { %vm22314_vm4 = vcmask 31744   ;;  %v5135_v62 = vsel %vm5095_vm10, %v5070_v21, %v4615_v50  ;;  %v852_v6 = vshrl.u32 %v364_v47, 16  ;;  %v855_v53 = vshll.u32 %v364_v47, 16  ;;  %v2795_v21 = vpop.permute.xlu1 %2794  ;;  %v20026_v47 = vld [vmem:[#allocation2 + $0x170] ss:$0 sps:$4 sm:$0x11]  }
 0x279   :  { %v4682_v2 = vsel %vm22314_vm4, %v18956_v58, %v2312_v18  ;;  %v7928_v44 = vsel %vm19742_vm15, %v7850_v13, %v7927_v25  ;;  %v3247_v32 = vsel %vm22315_vm2, %v3242_v11, %v3246_v3  ;;  %vm22316_vm5 = vcmask 1046528   ;;  %vm22318_vm11 = vmmov %vm22314_vm4  ;;  %v5331_v58 = vpop.f32.mrf.mxu0  ;;  %v2569_v18 = vpop.permute.xlu0 %2568 }
 0x27a   :  { %v3536_v8 = vsel %vm22316_vm5, %v3534_v1, %v3535_v0  ;;  %v4684_v24 = vsel %vm22318_vm11, %v22317_v14, %v2314_v4  ;;  %vm22319_vm1 = vcmask 293888   ;;  %7929 = vst [vmem:[#allocation3 + $0x18] sm:$0xf] %v7928_v44  ;;  %3350 = vrot.lane.b32.xlu1 %v3247_v32, %s16712_s18  ;;  %v854_v51 = vrot.slane %v852_v6, 7  ;;  %vm22320_vm4 = vmmov %vm22316_vm5  ;;  %v20030_v1 = vld [vmem:[#allocation2 + $0x16c] sm:$0xf] }
 0x27b   :  { %15565 = vmatmul.mubr.msk.bf16.gmra.mxu0 %vm22319_vm1, %v5135_v62  ;;  %3604 = vrot.lane.b32.xlu0 %v3536_v8, %s16710_s16  ;;  %v860_v59 = vshrl.u32 %v365_v39, 16  ;;  %v863_v5 = vshll.u32 %v365_v39, 16  ;;  %v5559_v34 = vmul.f32 %v19906_v40, %v15542_v45  ;;  %v3539_v52 = vsel %vm22320_vm4, %v3537_v33, %v3538_v43  ;;  %v15543_v56 = vpop.f32.mrf.mxu0  ;;  %v1624_v45 = vld [vmem:[#allocation2 + $0x168] sm:$0xe] }
 0x27c   :  { %v14173_v42 = vcombine.low %v1554_v55, %v20001_v36  ;;  %vm22321_vm2 = vcmask 64512   ;;  %v5557_v35 = vmul.f32 %v19906_v40, %v5331_v58  ;;  %v857_v63 = vor.u32 %v855_v53, %v854_v51  ;;  %v20032_v13 = vpop.permute.xlu1 %3338 }
 0x27d   :  { %v4749_v54 = vsel %vm22321_vm2, %v4684_v24, %v2571_v30  ;;  %v858_v16 = vrot.slane %v854_v51, 4  ;;  %v862_v15 = vrot.slane %v860_v59, 7  ;;  %v5630_v23 = vadd.f32 %v19914_v46, %v5559_v34  ;;  %v5334_v49 = vpop.f32.mrf.mxu0  ;;  %v2793_v48 = vpop.permute.xlu0 %2792  ;;  %vm22322_vm1 = vmmov %vm22321_vm2 }
 0x27e   :  { %v5628_v31 = vadd.f32 %v19914_v46, %v5557_v35  ;;  %v5560_v4 = vmul.f32 %v19906_v40, %v15543_v56  ;;  %v4249_v7 = vshrl.u32 %v14173_v42, 16  ;;  %v4251_v61 = vshll.u32 %v14173_v42, 16  ;;  %3606 = vrot.lane.b32.xlu1 %v3539_v52, %s16710_s16 }
 0x27f   :  { %v865_v57 = vor.u32 %v863_v5, %v862_v15  ;;  %v1218_v17 = vsel %vm17060_vm7, %v857_v63, %v1217_v37  ;;  %v5694_v29 = vmax.f32 %v5630_v23, 0.0  ;;  %3828 = vrot.lane.b32.xlu0 %v14173_v42, %s16709_s7  ;;  %v867_v50 = vrot.slane %v862_v15, 4 }
 0x280   :  { %1219 = vst [vmem:[#allocation2 + $0x174] sm:$0xf] %v1218_v17  ;;  %v5692_v12 = vmax.f32 %v5628_v31, 0.0  ;;  %v5631_v25 = vadd.f32 %v19914_v46, %v5560_v4  ;;  %v4253_v3 = vrot.slane %v4251_v61, 1  ;;  %v4256_v43 = vshll.u32 %v20017_v38, 16  ;;  %v20054_v51 = vpop.permute.xlu1 %3594 }
 0x281   :  { %v866_v11 = vsel %vm17070_vm8, %v858_v16, %v865_v57  ;;  %v4747_v33 = vsel %vm22322_vm1, %v4682_v2, %v2569_v18  ;;  %v1222_v0 = vsel %vm17095_vm9, %v867_v50, %v1221_v20  ;;  %v5558_v39 = vmul.f32 %v19906_v40, %v5334_v49  ;;  %v20044_v55 = vpop.permute.xlu0 %3336 }
 0x282   :  { %vm22323_vm5 = vcmask 27648   ;;  %v5750_v30 = vmax.f32 %v5692_v12, %v5694_v29  ;;  %1223 = vst [vmem:[#allocation2 + $0x17c] sm:$0x1] %v1222_v0  ;;  %v4254_v62 = vor.u32 %v4253_v3, %v4249_v7  ;;  %v4258_v6 = vrot.slane %v4256_v43, 1 }
 0x283   :  { %1220 = vst.msk [vmem:[#allocation2 + $0x178] sm:$0xf] %vm22323_vm5, %v866_v11  ;;  %vm22324_vm11 = vcmask 97280   ;;  %v5695_v44 = vmax.f32 %v5631_v25, 0.0  ;;  %v5629_v2 = vadd.f32 %v19914_v46, %v5558_v39  ;;  %v20048_v32 = vcombine.low %v1301_v19, %v20030_v1 }
 0x284   :  { %v20042_v53 = vsel %vm22324_vm11, %v4749_v54, %v2795_v21  ;;  %v2231_v8 = vshll.u32 %v20026_v47, 16  ;;  %v5910_v14 = vcombine.high %v5750_v30, %v5750_v30  ;;  %v5917_v24 = vrot.slane %v5750_v30, %v19303_v41  ;;  %vm22326_vm2 = vmmov %vm22324_vm11  ;;  %v20068_v7 = vpop.permute.xlu1 %3818 }
 0x285   :  { %vm22325_vm4 = vsmask.f32 7424  ;;  %v14237_v18 = vcombine.low %v1624_v45, %v20001_v36  ;;  %v5693_v59 = vmax.f32 %v5629_v2, 0.0  ;;  %v20058_v5 = vsel %vm22326_vm2, %v4747_v33, %v2793_v48  ;;  %v20063_v56 = vpop.permute.xlu0 %3592 }
 0x286   :  { %v4259_v58 = vsel %vm22325_vm4, %v4254_v62, %v4258_v6  ;;  %v2224_v34 = vshrl.u32 %v20048_v32, 16  ;;  %v2226_v52 = vshll.u32 %v20048_v32, 16  ;;  %v5924_v37 = vrot.slane %v5910_v14, %v19303_v41  ;;  %vm22329_vm11 = vmmov %vm22325_vm4 }
 0x287   :  { %4372 = vrot.lane.b32.xlu0 %v4259_v58, %s16713_s13  ;;  %v5925_v42 = vcombine.high %v5917_v24, %v5917_v24  ;;  %v14304_v54 = vrot.slane %v5917_v24, 9  ;;  %v4558_v35 = vrot.slane %v14237_v18, 1  ;;  %v1556_v36 = vld [vmem:[#allocation2 + $0x174] sm:$0xf]  ;;  %v5751_v21 = vmax.f32 %v5693_v59, %v5695_v44 }
 0x288   :  { %v2228_v63 = vrot.slane %v2226_v52, 1  ;;  %v20065_v16 = vrot.slane %v2231_v8, 1  ;;  %v4559_v15 = vrot.slane %v20017_v38, 1  ;;  %v5926_v23 = vcombine.high %v5924_v37, %v5924_v37  ;;  %v20082_v62 = vpop.permute.xlu1 %4362 }
 0x289   :  { %v14305_v31 = vrot.slane %v5925_v42, 9  ;;  %v14306_v20 = vrot.slane %v5924_v37, 9  ;;  %v6888_v4 = vmax.f32 %v5917_v24, %v14304_v54  ;;  %v5927_v49 = vcombine.high %v5751_v21, %v5751_v21  ;;  %v20075_v38 = vld [vmem:[#allocation2 + $0x17c] ss:$0 sps:$4 sm:$0x11]   ;;  %v20078_v25 = vpop.permute.xlu0 %3816 }
 0x28a   :  { %v20070_v61 = vld [vmem:[#allocation2 + $0x178] sm:$0xf]  ;;  %v5934_v48 = vrot.slane %v5751_v21, %v19303_v41  ;;  %v2229_v19 = vor.u32 %v2228_v63, %v2224_v34  ;;  %vm22327_vm1 = vcmask 1046528   ;;  %v14307_v29 = vrot.slane %v5926_v23, 9 }
 0x28b   :  { %v4560_v57 = vsel %vm22327_vm1, %v4558_v35, %v4559_v15  ;;  %v14174_v17 = vcombine.low %v1556_v36, %v20070_v61  ;;  %v6889_v50 = vmax.f32 %v5925_v42, %v14305_v31  ;;  %v6890_v12 = vmax.f32 %v5924_v37, %v14306_v20 }
 0x28c   :  { %4628 = vrot.lane.b32.xlu0 %v4560_v57, %s16711_s8  ;;  %v15151_v3 = vpack.c.bf16 %v6888_v4, %v6888_v4  ;;  %v5941_v43 = vrot.slane %v5927_v49, %v19303_v41  ;;  %v5942_v11 = vcombine.high %v5934_v48, %v5934_v48  ;;  %v14308_v33 = vrot.slane %v5934_v48, 9  ;;  %v20087_v63 = vpop.permute.xlu1 %2315  ;;  %v20089_v4 = vld [vmem:[#allocation2 + $0x17c] ss:$0 sps:$4 sm:$0x11]  }
 0x28d   :  { %3830 = vrot.lane.b32.xlu1 %v14174_v17, %s16709_s7  ;;  %v6891_v0 = vmax.f32 %v5926_v23, %v14307_v29  ;;  %v15152_v39 = vpack.c.bf16 %v6889_v50, %v6889_v50  ;;  %v15153_v45 = vpack.c.bf16 %v6890_v12, %v6890_v12  ;;  %v4261_v30 = vshrl.u32 %v14174_v17, 16  ;;  %v20085_v59 = vpop.permute.xlu0 %4360  ;;  %v1303_v50 = vld [vmem:[#allocation2 + $0x174] sm:$0xf]  ;;  %v1304_v12 = vld [vmem:[#allocation2 + $0x178] sm:$0xf] }
 0x28e   :  { %v7528_v6 = vunpack.c.l.b16 %v15151_v3  ;;  %v4263_v44 = vshll.u32 %v14174_v17, 16  ;;  %v4268_v2 = vshll.u32 %v20075_v38, 16  ;;  %v5943_v8 = vcombine.high %v5941_v43, %v5941_v43 }
 0x28f   :  { %v15154_v14 = vpack.c.bf16 %v6891_v0, %v6891_v0  ;;  %v7529_v24 = vunpack.c.l.b16 %v15152_v39  ;;  %v7530_v58 = vunpack.c.l.b16 %v15153_v45  ;;  %v14309_v18 = vrot.slane %v5942_v11, 9  ;;  %v1625_v39 = vld [vmem:[#allocation2 + $0x174] sm:$0xe] }
 0x290   :  { %v7677_v34 = vrot.slane %v7528_v6, 7  ;;  %v4265_v52 = vrot.slane %v4263_v44, 1  ;;  %v4270_v37 = vrot.slane %v4268_v2, 1  ;;  %v14310_v42 = vrot.slane %v5941_v43, 9 }
 0x291   :  { %v7531_v54 = vunpack.c.l.b16 %v15154_v14  ;;  %v7678_v35 = vrot.slane %v7529_v24, 6  ;;  %v7680_v36 = vrot.slane %v7530_v58, 5  ;;  %v14311_v21 = vrot.slane %v5943_v8, 9  ;;  %v20095_v3 = vpop.permute.xlu0 %4616 }
 0x292   :  { %v4266_v15 = vor.u32 %v4265_v52, %v4261_v30  ;;  %v6892_v23 = vmax.f32 %v5934_v48, %v14308_v33  ;;  %v6893_v31 = vmax.f32 %v5942_v11, %v14309_v18  ;;  %v6894_v20 = vmax.f32 %v5941_v43, %v14310_v42  ;;  %v7936_v33 = vld [vmem:[#allocation3 + $0x24] sm:$0x1]  ;;  %v1370_v52 = vld [vmem:[#allocation2 + $0x174] sm:$0xe] }
 0x293   :  { %v7679_v49 = vsel %vm7634_vm3, %v7678_v35, %v7677_v34  ;;  %v7682_v57 = vrot.slane %v7531_v54, 4  ;;  %v6895_v17 = vmax.f32 %v5943_v8, %v14311_v21  ;;  %vm22328_vm5 = vcmask 130048   ;;  %v1369_v35 = vld [vmem:[#allocation2 + $0x168] sm:$0xe] }
 0x294   :  { %v4879_v29 = vsel %vm22328_vm5, %v20042_v53, %v20032_v13  ;;  %v7681_v0 = vsel %vm7637_vm14, %v7680_v36, %v7679_v49  ;;  %v4271_v48 = vsel %vm22329_vm11, %v4266_v15, %v4270_v37  ;;  %v15155_v11 = vpack.c.bf16 %v6892_v23, %v6892_v23  ;;  %v20103_v53 = vpop.permute.xlu1 %2317  ;;  %vm22330_vm2 = vmmov %vm22328_vm5 }
 0x295   :  { %v15156_v43 = vpack.c.bf16 %v6893_v31, %v6893_v31  ;;  %4374 = vrot.lane.b32.xlu1 %v4271_v48, %s16713_s13  ;;  %v15157_v45 = vpack.c.bf16 %v6894_v20, %v6894_v20  ;;  %v7683_v30 = vsel %vm7640_vm13, %v7682_v57, %v7681_v0  ;;  %v15258_v6 = vpack.c.bf16 %v6895_v17, %v6895_v17  ;;  %v20112_v37 = vpop.permute.xlu0 %4618 }
 0x296   :  { %v2234_v13 = vsel %vm22325_vm4, %v2229_v19, %v20065_v16  ;;  %v7532_v44 = vunpack.c.l.b16 %v15155_v11  ;;  %v20105_v8 = vcombine.low %v1303_v50, %v1304_v12  ;;  %v2243_v14 = vshll.u32 %v20089_v4, 16 }
 0x297   :  { %v7533_v2 = vunpack.c.l.b16 %v15156_v43  ;;  %v7534_v24 = vunpack.c.l.b16 %v15157_v45  ;;  %v7937_v58 = vsel %vm19695_vm6, %v15258_v6, %v7936_v33  ;;  %v14238_v18 = vcombine.low %v1625_v39, %v20070_v61  ;;  %v20140_v43 = vpop.f32.mrf.mxu0  ;;  %v1430_v6 = vld [vmem:[#allocation2 + $0x178] sm:$0xf] }
 0x298   :  { %v4562_v34 = vrot.slane %v20075_v38, 1  ;;  %v7684_v16 = vrot.slane %v7532_v44, 3  ;;  %7938 = vst [vmem:[#allocation3 + $0x24] sm:$0x1] %v7937_v58  ;;  %v2236_v42 = vshrl.u32 %v20105_v8, 16  ;;  %v2238_v54 = vshll.u32 %v20105_v8, 16  ;;  %v20120_v15 = vpop.permute.xlu1 %2574 }
 0x299   :  { %v7686_v19 = vrot.slane %v7533_v2, 2  ;;  %v7688_v36 = vrot.slane %v7534_v24, 1  ;;  %2327 = vrot.lane.b32.xlu1 %v2234_v13, %s16707_s30  ;;  %v4877_v61 = vsel %vm22330_vm2, %v20058_v5, %v20044_v55  ;;  %v2245_v21 = vrot.slane %v2243_v14, 1  ;;  %v366_v55 = vld [vmem:[%s22122_s0 + $0xe8] sm:$0xf]  ;;  %v20135_v48 = vpop.permute.xlu0 %2572 }
 0x29a   :  { %v4561_v38 = vrot.slane %v14238_v18, 1  ;;  %vm22331_vm1 = vcmask 1045509   ;;  %v2240_v31 = vrot.slane %v2238_v54, 1  ;;  %vm22332_vm5 = vcmask 162816   ;;  %v367_v5 = vld [vmem:[%s22122_s0 + $0xec] sm:$0xf]  ;;  %v5347_v54 = vpop.f32.mrf.mxu0 }
 0x29b   :  { %v7685_v23 = vsel %vm22331_vm1, %v7684_v16, %v7683_v30  ;;  %v4944_v20 = vsel %vm22332_vm5, %v4879_v29, %v20054_v51  ;;  %v14048_v49 = vcombine.low %v1370_v52, %v1304_v12  ;;  %vm22333_vm11 = vcmask 1046528   ;;  %v7933_v29 = vld [vmem:[#allocation3 + $0x20] sm:$0xf]  ;;  %vm22334_vm4 = vmmov %vm22332_vm5  ;;  %v15891_v13 = vld [vmem:[#allocation2 + $0x17c] ss:$0 sps:$4 sm:$0x11]  }
 0x29c   :  { %v7687_v57 = vsel %vm7646_vm12, %v7686_v19, %v7685_v23  ;;  %v4563_v17 = vsel %vm22333_vm11, %v4561_v38, %v4562_v34  ;;  %v2520_v50 = vrot.slane %v20089_v4, 1  ;;  %v14047_v0 = vcombine.low %v1369_v35, %v20030_v1  ;;  %v1429_v1 = vld [vmem:[#allocation2 + $0x174] sm:$0xf]  ;;  %v20146_v44 = vpop.permute.xlu1 %2798 }
 0x29d   :  { %v7689_v51 = vsel %vm7649_vm0, %v7688_v36, %v7687_v57  ;;  %v2241_v12 = vor.u32 %v2240_v31, %v2236_v42  ;;  %4630 = vrot.lane.b32.xlu0 %v4563_v17, %s16711_s8  ;;  %v2519_v11 = vrot.slane %v14048_v49, 1  ;;  %v2517_v4 = vrot.slane %v20026_v47, 1  ;;  %v20155_v34 = vpop.permute.xlu0 %2796  ;;  %v1497_v42 = vld [vmem:[#allocation2 + $0x174] sm:$0xe]  ;;  %v1224_v36 = vld [vmem:[#allocation2 + $0x180] sm:$0xf] }
 0x29e   :  { %v7852_v33 = vpack.c.b16 %v7689_v51, %v7689_v51  ;;  %v4942_v39 = vsel %vm22334_vm4, %v4877_v61, %v20063_v56  ;;  %v2516_v45 = vrot.slane %v14047_v0, 1  ;;  %vm22335_vm2 = vcmask 195584   ;;  %vm22338_vm4 = vmmov %vm22333_vm11  ;;  %v1228_v49 = vld [vmem:[#allocation2 + $0x188] sm:$0x1]  ;;  %v22342_v0 = vld [vmem:[#allocation27_spill] sm:$0xff] }
 0x29f   :  { %v5009_v30 = vsel %vm22335_vm2, %v4944_v20, %v20068_v7  ;;  %vm22336_vm1 = vsmask.f32 7424  ;;  %vm22337_vm5 = vmmov %vm22335_vm2  ;;  %v869_v14 = vshrl.u32 %v366_v55, 16  ;;  %v872_v24 = vshll.u32 %v366_v55, 16 }
 0x2a0   :  { %v2246_v2 = vsel %vm22336_vm1, %v2241_v12, %v2245_v21  ;;  %v5007_v47 = vsel %vm22337_vm5, %v4942_v39, %v20078_v25  ;;  %v7934_v58 = vsel %vm19742_vm15, %v7852_v33, %v7933_v29  ;;  %v2518_v56 = vsel %vm22333_vm11, %v2516_v45, %v2517_v4  ;;  %v20165_v23 = vpop.permute.xlu1 %3342 }
 0x2a1   :  { %2329 = vrot.lane.b32.xlu1 %v2246_v2, %s16707_s30  ;;  %v877_v18 = vshrl.u32 %v367_v5, 16  ;;  %v880_v7 = vshll.u32 %v367_v5, 16  ;;  %7935 = vst [vmem:[#allocation3 + $0x20] sm:$0xf] %v7934_v58  ;;  %v2521_v52 = vsel %vm22338_vm4, %v2519_v11, %v2520_v50  ;;  %2584 = vrot.lane.b32.xlu0 %v2518_v56, %s16699_s23  ;;  %v871_v16 = vrot.slane %v869_v14, 7  ;;  %v20178_v51 = vpop.permute.xlu0 %3340 }
 0x2a2   :  { %v14079_v25 = vcombine.low %v1429_v1, %v1430_v6  ;;  %vm22339_vm2 = vcmask 228352   ;;  %v3256_v21 = vshll.u32 %v15891_v13, 16  ;;  %vm22341_vm5 = vcmask 293888   ;;  %v369_v5 = vld [vmem:[%s22122_s0 + $0xf4] sm:$0xf] }
 0x2a3   :  { %v5072_v19 = vsel %vm22339_vm2, %v5007_v47, %v20085_v59  ;;  %v879_v35 = vrot.slane %v877_v18, 7  ;;  %vm22340_vm1 = vmmov %vm22339_vm2  ;;  %v874_v31 = vor.u32 %v872_v24, %v871_v16  ;;  %v875_v20 = vrot.slane %v871_v16, 4  ;;  %v22347_v24 = vld [vmem:[#allocation29_spill] sm:$0xff] }
 0x2a4   :  { %v5074_v61 = vsel %vm22340_vm1, %v5009_v30, %v20082_v62  ;;  %v5137_v38 = vsel %vm5095_vm10, %v5072_v19, %v20095_v3  ;;  %v3249_v57 = vshrl.u32 %v14079_v25, 16  ;;  %v3251_v17 = vshll.u32 %v14079_v25, 16  ;;  %v368_v3 = vld [vmem:[%s22122_s0 + $0xf0] sm:$0xf]  ;;  %v3599_v30 = vpop.permute.xlu1 %3598  ;;  %vm22345_vm2 = vmmov %vm22341_vm5 }
 0x2a5   :  { %15568 = vmatprep.mubr.msk.bf16.mxu0 %vm22341_vm5, %v5137_v38  ;;  %2586 = vrot.lane.b32.xlu1 %v2521_v52, %s16699_s23  ;;  %v882_v59 = vor.u32 %v880_v7, %v879_v35  ;;  %v884_v50 = vrot.slane %v879_v35, 4  ;;  %vm22343_vm11 = vcmask 31744   ;;  %v14143_v55 = vcombine.low %v1497_v42, %v1430_v6  ;;  %v3597_v18 = vpop.permute.xlu0 %3596  ;;  %v1231_v42 = vld [vmem:[#allocation2 + $0x18c] sm:$0xf] }
 0x2a6   :  { %v4686_v62 = vsel %vm22343_vm11, %v22342_v0, %v20087_v63  ;;  %v1225_v29 = vsel %vm17060_vm7, %v874_v31, %v1224_v36  ;;  %2808 = vrot.lane.b32.xlu0 %v14079_v25, %s16708_s6  ;;  %v3253_v12 = vrot.slane %v3251_v17, 1  ;;  %v3258_v11 = vrot.slane %v3256_v21, 1  ;;  %v15547_v63 = vpop.f32.mrf.mxu0  ;;  %vm22348_vm5 = vmmov %vm22343_vm11 }
 0x2a7   :  { %v3541_v4 = vrot.slane %v15891_v13, 1  ;;  %v883_v1 = vsel %vm17070_vm8, %v875_v20, %v882_v59  ;;  %1226 = vst [vmem:[#allocation2 + $0x180] sm:$0xf] %v1225_v29  ;;  %v1229_v33 = vsel %vm17095_vm9, %v884_v50, %v1228_v49  ;;  %v3540_v39 = vrot.slane %v14143_v55, 1  ;;  %v1235_v20 = vld [vmem:[#allocation2 + $0x194] sm:$0x1] }
 0x2a8   :  { %v5139_v45 = vsel %vm5095_vm10, %v5074_v61, %v20112_v37  ;;  %vm22344_vm4 = vcmask 27648   ;;  %1230 = vst [vmem:[#allocation2 + $0x188] sm:$0x1] %v1229_v33  ;;  %v3254_v6 = vor.u32 %v3253_v12, %v3249_v57  ;;  %v886_v2 = vshrl.u32 %v368_v3, 16  ;;  %v5350_v19 = vpop.f32.mrf.mxu0  ;;  %v20206_v61 = vpop.permute.xlu1 %3822 }
 0x2a9   :  { %1227 = vst.msk [vmem:[#allocation2 + $0x184] sm:$0xf] %vm22344_vm4, %v883_v1  ;;  %v889_v47 = vshll.u32 %v368_v3, 16  ;;  %v894_v13 = vshrl.u32 %v369_v5, 16  ;;  %15569 = vmatmul.mubr.msk.bf16.gmra.mxu0 %vm22345_vm2, %v5139_v45  ;;  %vm22346_vm1 = vcmask 1046528   ;;  %v4688_v58 = vsel %vm22348_vm5, %v22347_v24, %v20103_v53 }
 0x2aa   :  { %v3542_v14 = vsel %vm22346_vm1, %v3540_v39, %v3541_v4  ;;  %v897_v56 = vshll.u32 %v369_v5, 16  ;;  %v5563_v37 = vmul.f32 %v19906_v40, %v20140_v43  ;;  %vm22349_vm11 = vsmask.f32 7424 }
 0x2ab   :  { %v3259_v7 = vsel %vm22349_vm11, %v3254_v6, %v3258_v11  ;;  %v888_v52 = vrot.slane %v886_v2, 7  ;;  %v896_v16 = vrot.slane %v894_v13, 7  ;;  %v5561_v25 = vmul.f32 %v19906_v40, %v5347_v54 }
 0x2ac   :  { %3352 = vrot.lane.b32.xlu0 %v3259_v7, %s16712_s18  ;;  %v5634_v35 = vadd.f32 %v19914_v46, %v5563_v37  ;;  %vm22350_vm4 = vcmask 64512   ;;  %v5564_v43 = vmul.f32 %v19906_v40, %v15547_v63  ;;  %v5562_v59 = vmul.f32 %v19906_v40, %v5350_v19 }
 0x2ad   :  { %v4753_v53 = vsel %vm22350_vm4, %v4688_v58, %v20120_v15  ;;  %vm22351_vm2 = vmmov %vm22350_vm4  ;;  %v891_v21 = vor.u32 %v889_v47, %v888_v52  ;;  %v892_v38 = vrot.slane %v888_v52, 4  ;;  %v899_v31 = vor.u32 %v897_v56, %v896_v16  ;;  %v20211_v15 = vpop.permute.xlu0 %3820 }
 0x2ae   :  { %v4751_v36 = vsel %vm22351_vm2, %v4686_v62, %v20135_v48  ;;  %v5632_v54 = vadd.f32 %v19914_v46, %v5561_v25  ;;  %v5698_v49 = vmax.f32 %v5634_v35, 0.0  ;;  %v901_v57 = vrot.slane %v896_v16, 4  ;;  %v1431_v50 = vld [vmem:[#allocation2 + $0x180] sm:$0xf] }
 0x2af   :  { %v5635_v17 = vadd.f32 %v19914_v46, %v5564_v43  ;;  %v1498_v48 = vld [vmem:[#allocation2 + $0x180] sm:$0xe]  ;;  %v900_v0 = vsel %vm17070_vm8, %v892_v38, %v899_v31  ;;  %v1232_v62 = vsel %vm17060_vm7, %v891_v21, %v1231_v42  ;;  %vm22352_vm1 = vcmask 97280   ;;  %v15890_v1 = vld [vmem:[#allocation2 + $0x188] ss:$0 sps:$4 sm:$0x11]  }
 0x2b0   :  { %v1558_v55 = vld [vmem:[#allocation2 + $0x180] sm:$0xf]  ;;  %v4818_v3 = vsel %vm22352_vm1, %v4753_v53, %v20146_v44  ;;  %vm22353_vm5 = vmmov %vm22352_vm1  ;;  %v1432_v29 = vld [vmem:[#allocation2 + $0x184] sm:$0xf]  ;;  %3608 = vrot.lane.b32.xlu0 %v3542_v14, %s16710_s16  ;;  %1233 = vst [vmem:[#allocation2 + $0x18c] sm:$0xf] %v1232_v62  ;;  %v1236_v12 = vsel %vm17095_vm9, %v901_v57, %v1235_v20  ;;  %v5633_v11 = vadd.f32 %v19914_v46, %v5562_v59 }
 0x2b1   :  { %v4816_v5 = vsel %vm22353_vm5, %v4751_v36, %v20155_v34  ;;  %vm22354_vm11 = vcmask 27648   ;;  %v20223_v40 = vld [vmem:[#allocation2 + $0x184] sm:$0xf]  ;;  %vm22355_vm4 = vcmask 130048   ;;  %v20232_v34 = vpop.permute.xlu1 %4366  ;;  %v14080_v63 = vcombine.low %v1431_v50, %v1432_v29  ;;  %1237 = vst [vmem:[#allocation2 + $0x194] sm:$0x1] %v1236_v12 }
 0x2b2   :  { %1234 = vst.msk [vmem:[#allocation2 + $0x190] sm:$0xf] %vm22354_vm11, %v900_v0  ;;  %v4883_v4 = vsel %vm22355_vm4, %v4818_v3, %v20165_v23  ;;  %vm22356_vm2 = vmmov %vm22355_vm4  ;;  %v14144_v33 = vcombine.low %v1498_v48, %v1432_v29  ;;  %v14175_v39 = vcombine.low %v1558_v55, %v20223_v40  ;;  %v5696_v45 = vmax.f32 %v5632_v54, 0.0  ;;  %v20235_v2 = vld [vmem:[#allocation2 + $0x188] ss:$0 sps:$4 sm:$0x11]  }
 0x2b3   :  { %v4881_v44 = vsel %vm22356_vm2, %v4816_v5, %v20178_v51  ;;  %v5699_v6 = vmax.f32 %v5635_v17, 0.0  ;;  %v5697_v47 = vmax.f32 %v5633_v11, 0.0  ;;  %vm22357_vm1 = vcmask 162816   ;;  %v20243_v51 = vpop.permute.xlu0 %4364  ;;  %2810 = vrot.lane.b32.xlu1 %v14080_v63, %s16708_s6 }
 0x2b4   :  { %v20238_v46 = vsel %vm22357_vm1, %v4883_v4, %v3599_v30  ;;  %vm22358_vm5 = vmmov %vm22357_vm1  ;;  %v3261_v13 = vshrl.u32 %v14080_v63, 16  ;;  %v3263_v14 = vshll.u32 %v14080_v63, 16  ;;  %v3268_v24 = vshll.u32 %v15890_v1, 16  ;;  %3832 = vrot.lane.b32.xlu0 %v14175_v39, %s16709_s7 }
 0x2b5   :  { %v20241_v23 = vsel %vm22358_vm5, %v4881_v44, %v3597_v18  ;;  %v3543_v58 = vrot.slane %v14144_v33, 1  ;;  %v3544_v56 = vrot.slane %v15890_v1, 1  ;;  %v5752_v37 = vmax.f32 %v5696_v45, %v5698_v49  ;;  %v20247_v16 = vpop.permute.xlu1 %2319 }
 0x2b6   :  { %v4273_v7 = vshrl.u32 %v14175_v39, 16  ;;  %v4275_v52 = vshll.u32 %v14175_v39, 16  ;;  %v3265_v30 = vrot.slane %v3263_v14, 1  ;;  %v3270_v25 = vrot.slane %v3268_v24, 1 }
 0x2b7   :  { %v4280_v18 = vshll.u32 %v20235_v2, 16  ;;  %v5753_v19 = vmax.f32 %v5697_v47, %v5699_v6  ;;  %vm22359_vm11 = vcmask 1046528   ;;  %v5944_v35 = vcombine.high %v5752_v37, %v5752_v37  ;;  %v20252_v43 = vpop.permute.xlu0 %4620  ;;  %v1560_v38 = vld [vmem:[#allocation2 + $0x18c] sm:$0xf] }
 0x2b8   :  { %v3545_v42 = vsel %vm22359_vm11, %v3543_v58, %v3544_v56  ;;  %v5951_v53 = vrot.slane %v5752_v37, %v19303_v41  ;;  %v4277_v36 = vrot.slane %v4275_v52, 1  ;;  %v3266_v21 = vor.u32 %v3265_v30, %v3261_v13  ;;  %v20259_v48 = vld [vmem:[#allocation2 + $0x194] ss:$0 sps:$4 sm:$0x11]  }
 0x2b9   :  { %v20254_v31 = vld [vmem:[#allocation2 + $0x190] sm:$0xf]  ;;  %v4282_v54 = vrot.slane %v4280_v18, 1  ;;  %v5961_v20 = vcombine.high %v5753_v19, %v5753_v19  ;;  %v5968_v49 = vrot.slane %v5753_v19, %v19303_v41  ;;  %v5958_v17 = vrot.slane %v5944_v35, %v19303_v41  ;;  %v20261_v0 = vpop.permute.xlu1 %2321 }
 0x2ba   :  { %v14176_v57 = vcombine.low %v1560_v38, %v20254_v31  ;;  %v5959_v59 = vcombine.high %v5951_v53, %v5951_v53  ;;  %v14312_v50 = vrot.slane %v5951_v53, 9  ;;  %vm22360_vm4 = vsmask.f32 7424 }
 0x2bb   :  { %v3271_v62 = vsel %vm22360_vm4, %v3266_v21, %v3270_v25  ;;  %v4278_v55 = vor.u32 %v4277_v36, %v4273_v7  ;;  %v5975_v3 = vrot.slane %v5961_v20, %v19303_v41  ;;  %v5976_v5 = vcombine.high %v5968_v49, %v5968_v49  ;;  %v20266_v44 = vpop.permute.xlu0 %4622  ;;  %vm22361_vm2 = vmmov %vm22360_vm4  ;;  %v1305_v21 = vld [vmem:[#allocation2 + $0x180] sm:$0xf] }
 0x2bc   :  { %3354 = vrot.lane.b32.xlu1 %v3271_v62, %s16712_s18  ;;  %v5960_v29 = vcombine.high %v5958_v17, %v5958_v17  ;;  %v14313_v12 = vrot.slane %v5959_v59, 9  ;;  %v14314_v11 = vrot.slane %v5958_v17, 9  ;;  %v6896_v4 = vmax.f32 %v5951_v53, %v14312_v50  ;;  %v20278_v50 = vld [vmem:[#allocation2 + $0x188] ss:$0 sps:$4 sm:$0x11]   ;;  %vm22362_vm1 = vmmov %vm22361_vm2 }
 0x2bd   :  { %v4285_v63 = vshrl.u32 %v14176_v57, 16  ;;  %v4287_v1 = vshll.u32 %v14176_v57, 16  ;;  %v4292_v33 = vshll.u32 %v20259_v48, 16  ;;  %v4283_v39 = vsel %vm22361_vm2, %v4278_v55, %v4282_v54  ;;  %v20271_v14 = vpop.permute.xlu1 %2578  ;;  %vm22365_vm4 = vmmov %vm22362_vm1 }
 0x2be   :  { %v14315_v45 = vrot.slane %v5960_v29, 9  ;;  %v6897_v6 = vmax.f32 %v5959_v59, %v14313_v12  ;;  %v6898_v47 = vmax.f32 %v5958_v17, %v14314_v11  ;;  %v15159_v13 = vpack.c.bf16 %v6896_v4, %v6896_v4  ;;  %4376 = vrot.lane.b32.xlu0 %v4283_v39, %s16713_s13  ;;  %v20276_v59 = vld [vmem:[#allocation2 + $0x184] sm:$0xf] }
 0x2bf   :  { %v4289_v24 = vrot.slane %v4287_v1, 1  ;;  %v4294_v58 = vrot.slane %v4292_v33, 1  ;;  %v5977_v56 = vcombine.high %v5975_v3, %v5975_v3  ;;  %v14316_v37 = vrot.slane %v5968_v49, 9  ;;  %v20274_v18 = vpop.permute.xlu0 %2576 }
 0x2c0   :  { %3610 = vrot.lane.b32.xlu1 %v3545_v42, %s16710_s16  ;;  %v6899_v7 = vmax.f32 %v5960_v29, %v14315_v45  ;;  %v15160_v52 = vpack.c.bf16 %v6897_v6, %v6897_v6  ;;  %v15161_v30 = vpack.c.bf16 %v6898_v47, %v6898_v47  ;;  %v7536_v25 = vunpack.c.l.b16 %v15159_v13  ;;  %v7942_v47 = vld [vmem:[#allocation3 + $0x2c] sm:$0x1] }
 0x2c1   :  { %v4290_v19 = vor.u32 %v4289_v24, %v4285_v63  ;;  %v14317_v35 = vrot.slane %v5976_v5, 9  ;;  %v14318_v53 = vrot.slane %v5975_v3, 9  ;;  %v14319_v36 = vrot.slane %v5977_v56, 9  ;;  %v20280_v42 = vpop.permute.xlu1 %2802 }
 0x2c2   :  { %v15162_v38 = vpack.c.bf16 %v6899_v7, %v6899_v7  ;;  %v7537_v54 = vunpack.c.l.b16 %v15160_v52  ;;  %v7538_v20 = vunpack.c.l.b16 %v15161_v30  ;;  %v7690_v17 = vrot.slane %v7536_v25, 7  ;;  %v1308_v30 = vld [vmem:[#allocation2 + $0x190] sm:$0xf]  ;;  %v20292_v25 = vld [vmem:[#allocation2 + $0x194] ss:$0 sps:$4 sm:$0x11]  }
 0x2c3   :  { %v4295_v62 = vsel %vm22362_vm1, %v4290_v19, %v4294_v58  ;;  %v6900_v55 = vmax.f32 %v5968_v49, %v14316_v37  ;;  %v6901_v29 = vmax.f32 %v5976_v5, %v14317_v35  ;;  %v6902_v12 = vmax.f32 %v5975_v3, %v14318_v53  ;;  %v20284_v33 = vpop.permute.xlu0 %2800  ;;  %v1307_v58 = vld [vmem:[#allocation2 + $0x18c] sm:$0xf] }
 0x2c4   :  { %3834 = vrot.lane.b32.xlu1 %v14176_v57, %s16709_s7  ;;  %v7539_v11 = vunpack.c.l.b16 %v15162_v38  ;;  %v7691_v4 = vrot.slane %v7537_v54, 6  ;;  %v7693_v63 = vrot.slane %v7538_v20, 5  ;;  %v6903_v1 = vmax.f32 %v5977_v56, %v14319_v36  ;;  %v1626_v57 = vld [vmem:[#allocation2 + $0x180] sm:$0xe] }
 0x2c5   :  { %v15163_v39 = vpack.c.bf16 %v6900_v55, %v6900_v55  ;;  %v15164_v45 = vpack.c.bf16 %v6901_v29, %v6901_v29  ;;  %v15165_v6 = vpack.c.bf16 %v6902_v12, %v6902_v12  ;;  %v20287_v13 = vcombine.low %v1305_v21, %v20276_v59  ;;  %v1627_v21 = vld [vmem:[#allocation2 + $0x18c] sm:$0xe]  ;;  %v20300_v38 = vpop.permute.xlu1 %3346 }
 0x2c6   :  { %v7692_v24 = vsel %vm7634_vm3, %v7691_v4, %v7690_v17  ;;  %v7695_v49 = vrot.slane %v7539_v11, 4  ;;  %v15259_v5 = vpack.c.bf16 %v6903_v1, %v6903_v1  ;;  %v2255_v3 = vshll.u32 %v20278_v50, 16 }
 0x2c7   :  { %v7694_v37 = vsel %vm7637_vm14, %v7693_v63, %v7692_v24  ;;  %v7540_v56 = vunpack.c.l.b16 %v15163_v39  ;;  %v7541_v7 = vunpack.c.l.b16 %v15164_v45  ;;  %v7542_v52 = vunpack.c.l.b16 %v15165_v6  ;;  %v20302_v54 = vpop.permute.xlu0 %3344  ;;  %v1372_v45 = vld [vmem:[#allocation2 + $0x18c] sm:$0xe] }
 0x2c8   :  { %4378 = vrot.lane.b32.xlu1 %v4295_v62, %s16713_s13  ;;  %v7696_v19 = vsel %vm7640_vm13, %v7695_v49, %v7694_v37  ;;  %v7943_v35 = vsel %vm19695_vm6, %v15259_v5, %v7942_v47  ;;  %v2248_v53 = vshrl.u32 %v20287_v13, 16  ;;  %v2250_v36 = vshll.u32 %v20287_v13, 16  ;;  %v15931_v47 = vld [vmem:[%s22126_s4 + $0x78] sm:$0xff]   ;;  %v1371_v5 = vld [vmem:[#allocation2 + $0x180] sm:$0xe] }
 0x2c9   :  { %v7697_v20 = vrot.slane %v7540_v56, 3  ;;  %v7699_v17 = vrot.slane %v7541_v7, 2  ;;  %v7701_v55 = vrot.slane %v7542_v52, 1  ;;  %7944 = vst [vmem:[#allocation3 + $0x2c] sm:$0x1] %v7943_v35  ;;  %v2257_v29 = vrot.slane %v2255_v3, 1  ;;  %15338 = vmatprep.subr.bf16.mxu1 %v15931_v47 }
 0x2ca   :  { %v2252_v62 = vrot.slane %v2250_v36, 1  ;;  %v14239_v12 = vcombine.low %v1626_v57, %v20223_v40  ;;  %v4565_v11 = vrot.slane %v20235_v2, 1  ;;  %v20306_v4 = vcombine.low %v1307_v58, %v1308_v30  ;;  %v7939_v57 = vld [vmem:[#allocation3 + $0x28] sm:$0xf]  ;;  %v1433_v35 = vld [vmem:[#allocation2 + $0x18c] sm:$0xf]  ;;  %v20334_v36 = vpop.permute.xlu1 %3602 }
 0x2cb   :  { %vm22363_vm5 = vcmask 1045509   ;;  %v2267_v1 = vshll.u32 %v20292_v25, 16  ;;  %v14240_v39 = vcombine.low %v1627_v21, %v20254_v31  ;;  %vm22364_vm11 = vcmask 195584   ;;  %v20319_v3 = vpop.permute.xlu0 %3600 }
 0x2cc   :  { %v7698_v63 = vsel %vm22363_vm5, %v7697_v20, %v7696_v19  ;;  %v5013_v6 = vsel %vm22364_vm11, %v20238_v46, %v20206_v61  ;;  %v2253_v2 = vor.u32 %v2252_v62, %v2248_v53  ;;  %v4564_v24 = vrot.slane %v14239_v12, 1  ;;  %v371_v19 = vld [vmem:[%s22122_s0 + $0xfc] sm:$0xf]  ;;  %v20332_v53 = vpop.f32.mrf.mxu0  ;;  %vm22368_vm5 = vmmov %vm22364_vm11 }
 0x2cd   :  { %v7700_v40 = vsel %vm7646_vm12, %v7699_v17, %v7698_v63  ;;  %v4568_v49 = vrot.slane %v20259_v48, 1  ;;  %v2260_v58 = vshrl.u32 %v20306_v4, 16  ;;  %v2262_v61 = vshll.u32 %v20306_v4, 16  ;;  %v370_v48 = vld [vmem:[%s22122_s0 + $0xf8] sm:$0xf]  ;;  %vm22369_vm11 = vmmov %vm22365_vm4 }
 0x2ce   :  { %v7702_v31 = vsel %vm7649_vm0, %v7701_v55, %v7700_v40  ;;  %v4567_v46 = vrot.slane %v14240_v39, 1  ;;  %v2258_v56 = vsel %vm22365_vm4, %v2253_v2, %v2257_v29  ;;  %vm22366_vm2 = vcmask 1046528   ;;  %v1434_v55 = vld [vmem:[#allocation2 + $0x190] sm:$0xf] }
 0x2cf   :  { %v7854_v37 = vpack.c.b16 %v7702_v31, %v7702_v31  ;;  %v4566_v7 = vsel %vm22366_vm2, %v4564_v24, %v4565_v11  ;;  %v14050_v52 = vcombine.low %v1372_v45, %v1308_v30  ;;  %2331 = vrot.lane.b32.xlu1 %v2258_v56, %s16707_s30  ;;  %v2264_v21 = vrot.slane %v2262_v61, 1  ;;  %vm22367_vm1 = vmmov %vm22366_vm2  ;;  %v20344_v63 = vpop.permute.xlu0 %3824  ;;  %v20346_v40 = vld [vmem:[#allocation2 + $0x194] ss:$0 sps:$4 sm:$0x11]   ;;  %v20358_v56 = vpop.permute.xlu1 %3826 }
 0x2d0   :  { %4632 = vrot.lane.b32.xlu0 %v4566_v7, %s16711_s8  ;;  %v2269_v20 = vrot.slane %v2267_v1, 1  ;;  %v2526_v30 = vrot.slane %v20292_v25, 1  ;;  %v14049_v17 = vcombine.low %v1371_v5, %v20276_v59  ;;  %v4569_v62 = vsel %vm22367_vm1, %v4567_v46, %v4568_v49  ;;  %v5363_v49 = vpop.f32.mrf.mxu0  ;;  %vm22370_vm4 = vmmov %vm22367_vm1 }
 0x2d1   :  { %v7940_v29 = vsel %vm19742_vm15, %v7854_v37, %v7939_v57  ;;  %v2525_v12 = vrot.slane %v14050_v52, 1  ;;  %v2523_v11 = vrot.slane %v20278_v50, 1  ;;  %v2265_v39 = vor.u32 %v2264_v21, %v2260_v58  ;;  %vm22371_vm2 = vmmov %vm22367_vm1  ;;  %v1238_v58 = vld [vmem:[#allocation2 + $0x198] sm:$0xf]  ;;  %v1499_v37 = vld [vmem:[#allocation2 + $0x18c] sm:$0xe] }
 0x2d2   :  { %7941 = vst [vmem:[#allocation3 + $0x28] sm:$0xf] %v7940_v29  ;;  %v2522_v45 = vrot.slane %v14049_v17, 1  ;;  %v903_v47 = vshrl.u32 %v370_v48, 16  ;;  %v906_v1 = vshll.u32 %v370_v48, 16  ;;  %v5011_v59 = vsel %vm22368_vm5, %v20241_v23, %v20211_v15 }
 0x2d3   :  { %v911_v25 = vshrl.u32 %v371_v19, 16  ;;  %v914_v2 = vshll.u32 %v371_v19, 16  ;;  %v14081_v24 = vcombine.low %v1433_v35, %v1434_v55  ;;  %v2270_v5 = vsel %vm22369_vm11, %v2265_v39, %v2269_v20  ;;  %v20360_v7 = vpop.permute.xlu0 %4368  ;;  %v1242_v35 = vld [vmem:[#allocation2 + $0x1a0] sm:$0x1]  ;;  %v20367_v29 = vld [vmem:[#allocation2 + $0x1a8] sm:$0xf] }
 0x2d4   :  { %4634 = vrot.lane.b32.xlu0 %v4569_v62, %s16711_s8  ;;  %v2527_v50 = vsel %vm22370_vm4, %v2525_v12, %v2526_v30  ;;  %v2524_v31 = vsel %vm22371_vm2, %v2522_v45, %v2523_v11  ;;  %v905_v57 = vrot.slane %v903_v47, 7  ;;  %2333 = vrot.lane.b32.xlu1 %v2270_v5, %s16707_s30  ;;  %vm22372_vm1 = vcmask 228352   ;;  %v15551_v62 = vpop.f32.mrf.mxu0  ;;  %v15932_v45 = vld [vmem:[%s22126_s4 + $0x38] sm:$0xff]  }
 0x2d5   :  { %v913_v61 = vrot.slane %v911_v25, 7  ;;  %v5078_v15 = vsel %vm22372_vm1, %v5013_v6, %v20232_v34  ;;  %v3273_v23 = vshrl.u32 %v14081_v24, 16  ;;  %v3275_v46 = vshll.u32 %v14081_v24, 16  ;;  %vm22373_vm5 = vmmov %vm22372_vm1  ;;  %v1564_v6 = vld [vmem:[#allocation2 + $0x1a4] sm:$0xf]  ;;  %15339 = vmatpush3.bf16.msra.mxu1 %v15932_v45 }
 0x2d6   :  { %v908_v52 = vor.u32 %v906_v1, %v905_v57  ;;  %v909_v48 = vrot.slane %v905_v57, 4  ;;  %v5076_v19 = vsel %vm22373_vm5, %v5011_v59, %v20243_v51  ;;  %v3280_v21 = vshll.u32 %v20346_v40, 16  ;;  %v22375_v1 = vld [vmem:[#allocation31_spill] sm:$0xff]  ;;  %v20388_v59 = vld [vmem:[#allocation2 + $0x1ac] ss:$0 sps:$4 sm:$0x11]  }
 0x2d7   :  { %v916_v20 = vor.u32 %v914_v2, %v913_v61  ;;  %v918_v30 = vrot.slane %v913_v61, 4  ;;  %v3277_v17 = vrot.slane %v3275_v46, 1  ;;  %v5141_v34 = vsel %vm5095_vm10, %v5076_v19, %v20252_v43  ;;  %v15933_v43 = vld [vmem:[%s22126_s4 + $0x70] sm:$0xff]   ;;  %v20390_v25 = vpop.permute.xlu0 %4624  ;;  %v5366_v61 = vpop.f32.mrf.mxu0  ;;  %v20429_v19 = vld [vmem:[#allocation3 + $0x8] sm:$0xf] }
 0x2d8   :  { %2588 = vrot.lane.b32.xlu0 %v2524_v31, %s16699_s23  ;;  %v1239_v12 = vsel %vm17060_vm7, %v908_v52, %v1238_v58  ;;  %v3282_v11 = vrot.slane %v3280_v21, 1  ;;  %v14145_v51 = vcombine.low %v1499_v37, %v1434_v55  ;;  %v3547_v39 = vrot.slane %v20346_v40, 1  ;;  %2590 = vrot.lane.b32.xlu1 %v2527_v50, %s16699_s23  ;;  %v22379_v31 = vld [vmem:[#allocation30_spill] sm:$0xff] }
 0x2d9   :  { %vm22374_vm11 = vcmask 293888   ;;  %v917_v22 = vsel %vm17070_vm8, %v909_v48, %v916_v20  ;;  %1240 = vst [vmem:[#allocation2 + $0x198] sm:$0xf] %v1239_v12  ;;  %v1243_v55 = vsel %vm17095_vm9, %v918_v30, %v1242_v35  ;;  %v3278_v47 = vor.u32 %v3277_v17, %v3273_v23  ;;  %15340 = vmatprep.subr.bf16.mxu1 %v15933_v43  ;;  %v20427_v48 = vld [vmem:[#allocation2 + $0x1a4] sm:$0xe] }
 0x2da   :  { %15572 = vmatprep.mubr.msk.bf16.mxu0 %vm22374_vm11, %v5141_v34  ;;  %vm22376_vm7 = vcmask 31744   ;;  %vm22377_vm4 = vcmask 27648   ;;  %1244 = vst [vmem:[#allocation2 + $0x1a0] sm:$0x1] %v1243_v55  ;;  %v3546_v2 = vrot.slane %v14145_v51, 1  ;;  %v5143_v27 = vsel %vm5095_vm10, %v5078_v15, %v20266_v44  ;;  %vm22381_vm2 = vmmov %vm22374_vm11  ;;  %v20413_v15 = vpop.permute.xlu1 %4370  ;;  %v15934_v34 = vld [vmem:[%s22126_s4 + $0x30] sm:$0xff]  }
 0x2db   :  { %v4692_v40 = vsel %vm22376_vm7, %v22375_v1, %v20261_v0  ;;  %1241 = vst.msk [vmem:[#allocation2 + $0x19c] sm:$0xf] %vm22377_vm4, %v917_v22  ;;  %v20396_v5 = vcombine.low %v1564_v6, %v20367_v29  ;;  %v5567_v0 = vmul.f32 %v20401_v60, %v20332_v53  ;;  %vm22378_vm8 = vsmask.f32 7424  ;;  %vm22380_vm9 = vmmov %vm22376_vm7  ;;  %15573 = vmatmul.mubr.msk.bf16.gmra.mxu0 %vm22381_vm2, %v5143_v27  ;;  %v20416_v53 = vld [vmem:[#allocation5] ss:$0 sm:$0xff]  ;;  %v20431_v35 = vpop.permute.xlu0 %4626 }
 0x2dc   :  { %v3283_v50 = vsel %vm22378_vm8, %v3278_v47, %v3282_v11  ;;  %v4690_v57 = vsel %vm22380_vm9, %v22379_v31, %v20247_v16  ;;  %vm22382_vm1 = vcmask 64512   ;;  %v5565_v58 = vmul.f32 %v20401_v60, %v5363_v49  ;;  %2812 = vrot.lane.b32.xlu0 %v14081_v24, %s16708_s6  ;;  %v20436_v17 = vld [vmem:[#allocation3 + $0x10] sm:$0xf]  ;;  %v15936_v6 = vld [vmem:[%s22126_s4 + $0x68] sm:$0xff]   ;;  %15341 = vmatpush3.bf16.msra.mxu1 %v15934_v34 }
 0x2dd   :  { %v4757_v44 = vsel %vm22382_vm1, %v4692_v40, %v20271_v14  ;;  %v5638_v23 = vadd.f32 %v20416_v53, %v5567_v0  ;;  %vm22383_vm5 = vmmov %vm22382_vm1  ;;  %v4309_v16 = vshrl.u32 %v20396_v5, 16  ;;  %v4311_v37 = vshll.u32 %v20396_v5, 16  ;;  %15342 = vmatprep.subr.bf16.mxu1 %v15936_v6 }
 0x2de   :  { %v4755_v46 = vsel %vm22383_vm5, %v4690_v57, %v20274_v18  ;;  %vm22384_vm11 = vcmask 1046528   ;;  %v5636_v49 = vadd.f32 %v20416_v53, %v5565_v58  ;;  %v4316_v52 = vshll.u32 %v20388_v59, 16 }
 0x2df   :  { %v3548_v14 = vsel %vm22384_vm11, %v3546_v2, %v3547_v39  ;;  %v5568_v24 = vmul.f32 %v20401_v60, %v15551_v62  ;;  %v5702_v18 = vmax.f32 %v5638_v23, 0.0  ;;  %v4313_v21 = vrot.slane %v4311_v37, 1  ;;  %vm22390_vm1 = vmmov %vm22384_vm11 }
 0x2e0   :  { %vm22385_vm7 = vcmask 97280   ;;  %v5566_v30 = vmul.f32 %v20401_v60, %v5366_v61  ;;  %v5700_v62 = vmax.f32 %v5636_v49, 0.0  ;;  %v20444_v12 = vrot.slane %v4316_v52, 1  ;;  %v1435_v51 = vld [vmem:[#allocation2 + $0x198] sm:$0xf]  ;;  %3356 = vrot.lane.b32.xlu0 %v3283_v50, %s16712_s18  ;;  %v20469_v50 = vpop.permute.xlu1 %2323  ;;  %v20483_v49 = vpop.permute.xlu0 %2580 }
 0x2e1   :  { %v4822_v20 = vsel %vm22385_vm7, %v4757_v44, %v20280_v42  ;;  %v20447_v11 = vadd.f32 %v20416_v53, %v5568_v24  ;;  %vm22386_vm4 = vmmov %vm22385_vm7  ;;  %v1500_v39 = vld [vmem:[#allocation2 + $0x198] sm:$0xe]  ;;  %v20452_v43 = vor.u32 %v4313_v21, %v4309_v16  ;;  %vm22387_vm8 = vcmask 130048   ;;  %v15907_v57 = vld [vmem:[#allocation2 + $0x1a0] ss:$0 sps:$4 sm:$0x11]  }
 0x2e2   :  { %v4820_v42 = vsel %vm22386_vm4, %v4755_v46, %v20284_v33  ;;  %v1562_v45 = vld [vmem:[#allocation2 + $0x198] sm:$0xf]  ;;  %v5637_v22 = vadd.f32 %v20416_v53, %v5566_v30  ;;  %v4887_v47 = vsel %vm22387_vm8, %v4822_v20, %v20300_v38  ;;  %v1436_v1 = vld [vmem:[#allocation2 + $0x19c] sm:$0xf]  ;;  %v5754_v2 = vmax.f32 %v5700_v62, %v5702_v18  ;;  %vm22388_vm9 = vmmov %vm22387_vm8 }
 0x2e3   :  { %v20459_v40 = vld [vmem:[#allocation2 + $0x19c] sm:$0xf]  ;;  %v20463_v33 = vsel %vm22388_vm9, %v4820_v42, %v20302_v54  ;;  %v14082_v31 = vcombine.low %v1435_v51, %v1436_v1  ;;  %v14146_v38 = vcombine.low %v1500_v39, %v1436_v1  ;;  %vm22389_vm2 = vcmask 162816   ;;  %v15937_v54 = vld [vmem:[%s22126_s4 + $0x28] sm:$0xff]   ;;  %v15940_v39 = vld [vmem:[%s22126_s4 + $0x20] sm:$0xff]  }
 0x2e4   :  { %v14177_v44 = vcombine.low %v1562_v45, %v20459_v40  ;;  %v20474_v58 = vsel %vm22389_vm2, %v4887_v47, %v20334_v36  ;;  %v5978_v61 = vcombine.high %v5754_v2, %v5754_v2  ;;  %v5985_v23 = vrot.slane %v5754_v2, %v19303_v41  ;;  %v20481_v16 = vld [vmem:[#allocation2 + $0x1a0] ss:$0 sps:$4 sm:$0x11]   ;;  %3612 = vrot.lane.b32.xlu0 %v3548_v14, %s16710_s16  ;;  %v15941_v45 = vld [vmem:[%s22126_s4 + $0x118] sm:$0xff]   ;;  %v20498_v2 = vpop.permute.xlu1 %2325  ;;  %vm22395_vm4 = vmmov %vm22390_vm1 }
 0x2e5   :  { %v5703_v46 = vmax.f32 %v20447_v11, 0.0  ;;  %v5701_v37 = vmax.f32 %v5637_v22, 0.0  ;;  %v15939_v36 = vld [vmem:[%s22126_s4 + $0x60] sm:$0xff]   ;;  %2814 = vrot.lane.b32.xlu1 %v14082_v31, %s16708_s6  ;;  %v3285_v52 = vshrl.u32 %v14082_v31, 16  ;;  %v3287_v24 = vshll.u32 %v14082_v31, 16  ;;  %15343 = vmatpush3.bf16.msra.mxu1 %v15937_v54  ;;  %v15942_v31 = vld [vmem:[%s22126_s4 + $0x58] sm:$0xff]   ;;  %vm22396_vm8 = vmmov %vm22390_vm1 }
 0x2e6   :  { %v3292_v18 = vshll.u32 %v15907_v57, 16  ;;  %v3549_v21 = vrot.slane %v14146_v38, 1  ;;  %v3550_v20 = vrot.slane %v15907_v57, 1  ;;  %v5992_v30 = vrot.slane %v5978_v61, %v19303_v41  ;;  %15344 = vmatprep.subr.bf16.mxu1 %v15939_v36  ;;  %15592 = vmatprep.subr.bf16.mxu0 %v15941_v45  ;;  %vm22397_vm9 = vmmov %vm22389_vm2 }
 0x2e7   :  { %v5993_v34 = vcombine.high %v5985_v23, %v5985_v23  ;;  %v14320_v6 = vrot.slane %v5985_v23, 9  ;;  %v3289_v62 = vrot.slane %v3287_v24, 1  ;;  %v4297_v42 = vshrl.u32 %v14177_v44, 16  ;;  %15593 = vmatpush3.bf16.msra.mxu0 %v15941_v45 }
 0x2e8   :  { %v3294_v11 = vrot.slane %v3292_v18, 1  ;;  %v4299_v51 = vshll.u32 %v14177_v44, 16  ;;  %v3551_v14 = vsel %vm22390_vm1, %v3549_v21, %v3550_v20  ;;  %v5994_v22 = vcombine.high %v5992_v30, %v5992_v30  ;;  %3836 = vrot.lane.b32.xlu0 %v14177_v44, %s16709_s7  ;;  %v20505_v20 = vpop.permute.xlu0 %2804  ;;  %v15943_v44 = vld [vmem:[%s22126_s4 + $0x18] sm:$0xff]  }
 0x2e9   :  { %v14321_v47 = vrot.slane %v5993_v34, 9  ;;  %v14322_v1 = vrot.slane %v5992_v30, 9  ;;  %v3290_v57 = vor.u32 %v3289_v62, %v3285_v52  ;;  %v6904_v38 = vmax.f32 %v5985_v23, %v14320_v6  ;;  %15345 = vmatpush3.bf16.msra.mxu1 %v15940_v39  ;;  %v15944_v23 = vld [vmem:[%s22126_s4 + $0x110] sm:$0xff]  }
 0x2ea   :  { %v4301_v54 = vrot.slane %v4299_v51, 1  ;;  %v4304_v61 = vshll.u32 %v20481_v16, 16  ;;  %v14323_v36 = vrot.slane %v5994_v22, 9  ;;  %v5755_v21 = vmax.f32 %v5701_v37, %v5703_v46  ;;  %15346 = vmatprep.subr.bf16.mxu1 %v15942_v31  ;;  %v15945_v46 = vld [vmem:[%s22126_s4 + $0x50] sm:$0xff]   ;;  %15594 = vmatprep.subr.bf16.mxu0 %v15944_v23 }
 0x2eb   :  { %v6905_v24 = vmax.f32 %v5993_v34, %v14321_v47  ;;  %v6906_v18 = vmax.f32 %v5992_v30, %v14322_v1  ;;  %vm22391_vm5 = vsmask.f32 7424  ;;  %v15167_v0 = vpack.c.bf16 %v6904_v38, %v6904_v38  ;;  %v1628_v38 = vld [vmem:[#allocation2 + $0x198] sm:$0xe]  ;;  %15595 = vmatpush3.bf16.msra.mxu0 %v15944_v23 }
 0x2ec   :  { %v3295_v27 = vsel %vm22391_vm5, %v3290_v57, %v3294_v11  ;;  %v4302_v55 = vor.u32 %v4301_v54, %v4297_v42  ;;  %v4306_v52 = vrot.slane %v4304_v61, 1  ;;  %v6907_v37 = vmax.f32 %v5994_v22, %v14323_v36  ;;  %vm22392_vm11 = vmmov %vm22391_vm5  ;;  %v20525_v22 = vpop.permute.xlu1 %2582 }
 0x2ed   :  { %3358 = vrot.lane.b32.xlu1 %v3295_v27, %s16712_s18  ;;  %v15168_v30 = vpack.c.bf16 %v6905_v24, %v6905_v24  ;;  %v15169_v34 = vpack.c.bf16 %v6906_v18, %v6906_v18  ;;  %v5995_v6 = vcombine.high %v5755_v21, %v5755_v21  ;;  %v7544_v62 = vunpack.c.l.b16 %v15167_v0  ;;  %15347 = vmatpush3.bf16.msra.mxu1 %v15943_v44  ;;  %v20532_v24 = vpop.permute.xlu0 %3348  ;;  %v15947_v18 = vld [vmem:[%s22126_s4 + $0x108] sm:$0xff]   ;;  %vm22394_vm7 = vmmov %vm22391_vm5 }
 0x2ee   :  { %v4307_v11 = vsel %vm22392_vm11, %v4302_v55, %v4306_v52  ;;  %v6002_v42 = vrot.slane %v5755_v21, %v19303_v41  ;;  %v22393_v51 = vcombine.low %v20427_v48, %v20367_v29  ;;  %v15170_v45 = vpack.c.bf16 %v6907_v37, %v6907_v37  ;;  %15348 = vmatprep.subr.bf16.mxu1 %v15945_v46  ;;  %v15946_v29 = vld [vmem:[%s22126_s4 + $0x10] sm:$0xff]  }
 0x2ef   :  { %v7545_v47 = vunpack.c.l.b16 %v15168_v30  ;;  %v7546_v1 = vunpack.c.l.b16 %v15169_v34  ;;  %4380 = vrot.lane.b32.xlu0 %v4307_v11, %s16713_s13  ;;  %v6009_v27 = vrot.slane %v5995_v6, %v19303_v41  ;;  %v7703_v0 = vrot.slane %v7544_v62, 7  ;;  %v8012_v34 = vld [vmem:[#allocation3 + $0x8] sm:$0xf]  ;;  %15596 = vmatprep.subr.bf16.mxu0 %v15947_v18  ;;  %v15951_v6 = vld [vmem:[%s22126_s4 + $0x8] sm:$0xff]  }
 0x2f0   :  { %v4573_v39 = vrot.slane %v22393_v51, 1  ;;  %v6010_v31 = vcombine.high %v6002_v42, %v6002_v42  ;;  %v14324_v55 = vrot.slane %v6002_v42, 9  ;;  %v4574_v57 = vrot.slane %v20388_v59, 1  ;;  %v15948_v59 = vld [vmem:[%s22126_s4 + $0x48] sm:$0xff]   ;;  %v8011_v51 = vld [vmem:[#allocation3] sm:$0xf]  ;;  %15597 = vmatpush3.bf16.msra.mxu0 %v15947_v18 }
 0x2f1   :  { %3614 = vrot.lane.b32.xlu1 %v3551_v14, %s16710_s16  ;;  %v7547_v48 = vunpack.c.l.b16 %v15170_v45  ;;  %v7704_v54 = vrot.slane %v7545_v47, 6  ;;  %v7706_v61 = vrot.slane %v7546_v1, 5  ;;  %v6011_v36 = vcombine.high %v6009_v27, %v6009_v27  ;;  %15349 = vmatpush3.bf16.msra.mxu1 %v15946_v29  ;;  %v8027_v45 = vld [vmem:[#allocation3 + $0x4] sm:$0x1] }
 0x2f2   :  { %v4319_v21 = vsel %vm22394_vm7, %v20452_v43, %v20444_v12  ;;  %v14325_v52 = vrot.slane %v6010_v31, 9  ;;  %v14326_v14 = vrot.slane %v6009_v27, 9  ;;  %v6908_v44 = vmax.f32 %v6002_v42, %v14324_v55  ;;  %v15952_v12 = vld [vmem:[%s22126_s4 + $0x100] sm:$0xff]   ;;  %15350 = vmatprep.subr.bf16.mxu1 %v15948_v59  ;;  %v20562_v59 = vpop.f32.mrf.mxu0 }
 0x2f3   :  { %v7705_v23 = vsel %vm7634_vm3, %v7704_v54, %v7703_v0  ;;  %v7708_v46 = vrot.slane %v7547_v48, 4  ;;  %v14327_v37 = vrot.slane %v6011_v36, 9  ;;  %v14241_v30 = vcombine.low %v1628_v38, %v20459_v40  ;;  %v15953_v40 = vld [vmem:[%s22126_s4 + $0x40] sm:$0xff]   ;;  %v20559_v38 = vpop.permute.xlu1 %2806  ;;  %15598 = vmatprep.subr.bf16.mxu0 %v15952_v12 }
 0x2f4   :  { %v7707_v43 = vsel %vm7637_vm14, %v7706_v61, %v7705_v23  ;;  %v6909_v62 = vmax.f32 %v6010_v31, %v14325_v52  ;;  %v6910_v11 = vmax.f32 %v6009_v27, %v14326_v14  ;;  %v15171_v42 = vpack.c.bf16 %v6908_v44, %v6908_v44  ;;  %v7948_v54 = vld [vmem:[#allocation3 + $0x34] sm:$0x1]  ;;  %v8028_v61 = vld [vmem:[#allocation3 + $0xc] sm:$0x1]  ;;  %v20564_v52 = vpop.permute.xlu0 %3604  ;;  %v20571_v23 = vld [vmem:[#allocation3 + $0x20] sm:$0xf]  ;;  %15599 = vmatpush3.bf16.msra.mxu0 %v15952_v12 }
 0x2f5   :  { %3838 = vrot.lane.b32.xlu1 %v20396_v5, %s16709_s7  ;;  %v6911_v47 = vmax.f32 %v6011_v36, %v14327_v37  ;;  %v4575_v1 = vsel %vm22395_vm4, %v4573_v39, %v4574_v57  ;;  %v4570_v0 = vrot.slane %v14241_v30, 1  ;;  %v4571_v55 = vrot.slane %v20481_v16, 1  ;;  %15351 = vmatpush3.bf16.msra.mxu1 %v15951_v6 }
 0x2f6   :  { %v15172_v27 = vpack.c.bf16 %v6909_v62, %v6909_v62  ;;  %v15173_v31 = vpack.c.bf16 %v6910_v11, %v6910_v11  ;;  %v7548_v29 = vunpack.c.l.b16 %v15171_v42  ;;  %v7709_v48 = vsel %vm7640_vm13, %v7708_v46, %v7707_v43  ;;  %v20573_v46 = vld [vmem:[#allocation3 + $0x18] sm:$0xf]  ;;  %15352 = vmatprep.subr.bf16.mxu1 %v15953_v40  ;;  %v8013_v42 = vld [vmem:[#allocation3 + $0x10] sm:$0xf] }
 0x2f7   :  { %v15260_v5 = vpack.c.bf16 %v6911_v47, %v6911_v47  ;;  %v4572_v39 = vsel %vm22396_vm8, %v4570_v0, %v4571_v55  ;;  %v14553_v57 = vcombine.low %v8012_v34, %v8028_v61  ;;  %v14552_v16 = vcombine.low %v8011_v51, %v8027_v45  ;;  %v8014_v43 = vld [vmem:[#allocation3 + $0x18] sm:$0xf]  ;;  %v5379_v51 = vpop.f32.mrf.mxu0  ;;  %v7945_v61 = vld [vmem:[#allocation3 + $0x30] sm:$0xf] }
 0x2f8   :  { %v7549_v36 = vunpack.c.l.b16 %v15172_v27  ;;  %v7550_v18 = vunpack.c.l.b16 %v15173_v31  ;;  %v7710_v14 = vrot.slane %v7548_v29, 3  ;;  %4636 = vrot.lane.b32.xlu0 %v4572_v39, %s16711_s8  ;;  %v4950_v44 = vsel %vm22397_vm9, %v20463_v33, %v20319_v3  ;;  %v15956_v3 = vld [vmem:[%s22126_s4] sm:$0xff]   ;;  %v8030_v31 = vld [vmem:[#allocation3 + $0x1c] sm:$0x1] }
 0x2f9   :  { %4382 = vrot.lane.b32.xlu1 %v4319_v21, %s16713_s13  ;;  %v7949_v37 = vsel %vm19695_vm6, %v15260_v5, %v7948_v54  ;;  %v8246_v30 = vshll.u32 %v14553_v57, 16  ;;  %v8237_v34 = vshrl.u32 %v14552_v16, 16  ;;  %vm22398_vm2 = vcmask 195584   ;;  %15353 = vmatpush3.bf16.msra.mxu1 %v15956_v3  ;;  %s16715_s13 = smov 64   ;;  %v8029_v29 = vld [vmem:[#allocation3 + $0x14] sm:$0x1] }
 0x2fa   :  { %v5017_v6 = vsel %vm22398_vm2, %v20474_v58, %v20358_v56  ;;  %vm22399_vm1 = vcmask 1045509   ;;  %v7712_v62 = vrot.slane %v7549_v36, 2  ;;  %v7714_v11 = vrot.slane %v7550_v18, 1  ;;  %7950 = vst [vmem:[#allocation3 + $0x34] sm:$0x1] %v7949_v37  ;;  %vm22400_vm5 = vmmov %vm22398_vm2  ;;  %v20589_v58 = vpop.permute.xlu1 %3350 }
 0x2fb   :  { %v7711_v33 = vsel %vm22399_vm1, %v7710_v14, %v7709_v48  ;;  %v8239_v21 = vshll.u32 %v14552_v16, 16  ;;  %v8244_v45 = vshrl.u32 %v14553_v57, 16  ;;  %v8248_v40 = vrot.slane %v8246_v30, 1  ;;  %v20600_v48 = vpop.permute.xlu0 %3828  ;;  %v8015_v18 = vld [vmem:[#allocation3 + $0x20] sm:$0xf]  ;;  %v15555_v14 = vpop.f32.mrf.mxu0 }
 0x2fc   :  { %v5015_v47 = vsel %vm22400_vm5, %v4950_v44, %v20344_v63  ;;  %v14587_v56 = vcombine.low %v20571_v23, %v20571_v23  ;;  %v7713_v12 = vsel %vm7646_vm12, %v7712_v62, %v7711_v33  ;;  %v22401_v0 = vcombine.low %v20429_v19, %v20429_v19  ;;  %v20611_v30 = vld [vmem:[#allocation3 + $0x28] sm:$0xf] }
 0x2fd   :  { %v8241_v55 = vrot.slane %v8239_v21, 1  ;;  %v14586_v27 = vcombine.low %v20573_v46, %v20573_v46  ;;  %vm22402_vm11 = vcmask 228352   ;;  %v7715_v54 = vsel %vm7649_vm0, %v7714_v11, %v7713_v12  ;;  %4638 = vrot.lane.b32.xlu1 %v4575_v1, %s16711_s8  ;;  %v5382_v21 = vpop.f32.mrf.mxu0 }
 0x2fe   :  { %8492 = vrot.lane.b32.xlu0 %v22401_v0, %s16715_s13  ;;  %v5082_v63 = vsel %vm22402_vm11, %v5017_v6, %v20413_v15  ;;  %vm22403_vm7 = vmmov %vm22402_vm11  ;;  %v14555_v5 = vcombine.low %v8014_v43, %v8030_v31  ;;  %v14554_v39 = vcombine.low %v8013_v42, %v8029_v29  ;;  %v7856_v57 = vpack.c.b16 %v7715_v54, %v7715_v54  ;;  %v8031_v43 = vld [vmem:[#allocation3 + $0x24] sm:$0x1]  ;;  %v3607_v11 = vpop.permute.xlu1 %3606 }
 0x2ff   :  { %v5080_v19 = vsel %vm22403_vm7, %v5015_v47, %v20360_v7  ;;  %v8249_v16 = vor.u32 %v8248_v40, %v8244_v45  ;;  %v8242_v36 = vor.u32 %v8241_v55, %v8237_v34  ;;  %vm22404_vm4 = vcmask 31744   ;;  %v4373_v42 = vpop.permute.xlu0 %4372 }
 0x300   :  { %v5145_v15 = vsel %vm5095_vm10, %v5080_v19, %v20390_v25  ;;  %v8258_v44 = vshrl.u32 %v14555_v5, 16  ;;  %v8260_v46 = vshll.u32 %v14555_v5, 16  ;;  %v8253_v37 = vshll.u32 %v14554_v39, 16  ;;  %vm22406_vm9 = vmmov %vm22404_vm4 }
 0x301   :  { %v4694_v1 = vsel %vm22404_vm4, %v19781_v26, %v20469_v50  ;;  %vm22405_vm8 = vcmask 293888   ;;  %v7946_v7 = vsel %vm19742_vm15, %v7856_v57, %v7945_v61  ;;  %v8251_v34 = vshrl.u32 %v14554_v39, 16  ;;  %v8032_v39 = vld [vmem:[#allocation3 + $0x2c] sm:$0x1] }
 0x302   :  { %15576 = vmatprep.mubr.msk.bf16.mxu0 %vm22405_vm8, %v5145_v15  ;;  %8348 = vrot.lane.b32.xlu0 %v8242_v36, %s16715_s13  ;;  %v4696_v25 = vsel %vm22406_vm9, %v19817_v10, %v20498_v2  ;;  %v5147_v6 = vsel %vm5095_vm10, %v5082_v63, %v20431_v35  ;;  %7947 = vst [vmem:[#allocation3 + $0x30] sm:$0xf] %v7946_v7  ;;  %v8262_v50 = vrot.slane %v8260_v46, 1  ;;  %v8255_v3 = vrot.slane %v8253_v37, 1  ;;  %vm22408_vm2 = vmmov %vm22405_vm8  ;;  %v15558_v63 = vpop.f32.mrf.mxu0  ;;  %v3831_v15 = vpop.permute.xlu1 %3830 }
 0x303   :  { %v22407_v26 = vcombine.low %v20436_v17, %v20436_v17  ;;  %v5571_v33 = vmul.f32 %v20401_v60, %v20562_v59  ;;  %v14556_v62 = vcombine.low %v8015_v18, %v8031_v43  ;;  %15577 = vmatmul.mubr.msk.bf16.gmra.mxu0 %vm22408_vm2, %v5147_v6  ;;  %v14588_v10 = vcombine.low %v20611_v30, %v20611_v30 }
 0x304   :  { %vm22409_vm1 = vcmask 64512   ;;  %v5569_v2 = vmul.f32 %v20401_v60, %v5379_v51  ;;  %v5572_v17 = vmul.f32 %v20401_v60, %v15555_v14  ;;  %v8263_v45 = vor.u32 %v8262_v50, %v8258_v44  ;;  %v8016_v51 = vld [vmem:[#allocation3 + $0x28] sm:$0xf]  ;;  %v5395_v46 = vpop.f32.mrf.mxu0 }
 0x305   :  { %8494 = vrot.lane.b32.xlu1 %v22407_v26, %s16715_s13  ;;  %v4761_v35 = vsel %vm22409_vm1, %v4696_v25, %v20525_v22  ;;  %v8256_v40 = vor.u32 %v8255_v3, %v8251_v34  ;;  %v5642_v59 = vadd.f32 %v20416_v53, %v5571_v33  ;;  %vm22410_vm5 = vmmov %vm22409_vm1  ;;  %v8265_v12 = vshrl.u32 %v14556_v62, 16 }
 0x306   :  { %v4759_v47 = vsel %vm22410_vm5, %v4694_v1, %v20483_v49  ;;  %8496 = vrot.lane.b32.xlu0 %v14586_v27, %s16715_s13  ;;  %v8267_v0 = vshll.u32 %v14556_v62, 16  ;;  %v5640_v55 = vadd.f32 %v20416_v53, %v5569_v2  ;;  %v5643_v22 = vadd.f32 %v20416_v53, %v5572_v17 }
 0x307   :  { %v5706_v31 = vmax.f32 %v5642_v59, 0.0  ;;  %vm22411_vm11 = vcmask 97280   ;;  %v5570_v54 = vmul.f32 %v20401_v60, %v5382_v21  ;;  %vm22413_vm4 = vcmask 130048  }
 0x308   :  { %v4826_v29 = vsel %vm22411_vm11, %v4761_v35, %v20559_v38  ;;  %vm22412_vm7 = vmmov %vm22411_vm11  ;;  %v8269_v27 = vrot.slane %v8267_v0, 1  ;;  %v5704_v61 = vmax.f32 %v5640_v55, 0.0  ;;  %v5707_v19 = vmax.f32 %v5643_v22, 0.0 }
 0x309   :  { %8350 = vrot.lane.b32.xlu1 %v8249_v16, %s16715_s13  ;;  %v4824_v49 = vsel %vm22412_vm7, %v4759_v47, %v20505_v20  ;;  %v4891_v5 = vsel %vm22413_vm4, %v4826_v29, %v20589_v58  ;;  %v5641_v57 = vadd.f32 %v20416_v53, %v5570_v54  ;;  %vm22414_vm8 = vmmov %vm22413_vm4  ;;  %vm22415_vm9 = vcmask 162816   ;;  %v4629_v58 = vpop.permute.xlu0 %4628  ;;  %v8064_v37 = vld [vmem:[#allocation3 + $0x30] sm:$0xf] }
 0x30a   :  { %v4889_v16 = vsel %vm22414_vm8, %v4824_v49, %v20532_v24  ;;  %v4956_v36 = vsel %vm22415_vm9, %v4891_v5, %v3607_v11  ;;  %v14557_v38 = vcombine.low %v8016_v51, %v8032_v39  ;;  %8352 = vrot.lane.b32.xlu0 %v8256_v40, %s16715_s13  ;;  %v8270_v18 = vor.u32 %v8269_v27, %v8265_v12  ;;  %vm22416_vm2 = vmmov %vm22415_vm9 }
 0x30b   :  { %v5756_v20 = vmax.f32 %v5704_v61, %v5706_v31  ;;  %v4954_v14 = vsel %vm22416_vm2, %v4889_v16, %v20564_v52  ;;  %vm22417_vm1 = vcmask 195584   ;;  %v5705_v24 = vmax.f32 %v5641_v57, 0.0  ;;  %v4375_v16 = vpop.permute.xlu1 %4374 }
 0x30c   :  { %v20657_v44 = vsel %vm22417_vm1, %v4956_v36, %v3831_v15  ;;  %v8272_v1 = vshrl.u32 %v14557_v38, 16  ;;  %v8274_v30 = vshll.u32 %v14557_v38, 16  ;;  %vm22418_vm5 = vmmov %vm22417_vm1  ;;  %vm22419_vm11 = vcmask 228352  }
 0x30d   :  { %8498 = vrot.lane.b32.xlu1 %v14587_v56, %s16715_s13  ;;  %v5019_v7 = vsel %vm22418_vm5, %v4954_v14, %v20600_v48  ;;  %v6012_v34 = vcombine.high %v5756_v20, %v5756_v20  ;;  %v6019_v52 = vrot.slane %v5756_v20, %v19303_v41  ;;  %v5575_v6 = vmul.f32 %v20401_v60, %v15558_v63  ;;  %v15559_v20 = vpop.f32.mrf.mxu0  ;;  %vm22421_vm4 = vmmov %vm22419_vm11 }
 0x30e   :  { %v5084_v25 = vsel %vm22419_vm11, %v5019_v7, %v4373_v42  ;;  %v5757_v43 = vmax.f32 %v5705_v24, %v5707_v19  ;;  %v8276_v26 = vrot.slane %v8274_v30, 1  ;;  %v5573_v23 = vmul.f32 %v20401_v60, %v5395_v46  ;;  %8500 = vrot.lane.b32.xlu0 %v14588_v10, %s16715_s13  ;;  %v7954_v7 = vld [vmem:[#allocation3 + $0x3c] sm:$0x1] }
 0x30f   :  { %v5149_v50 = vsel %vm5095_vm10, %v5084_v25, %v4629_v58  ;;  %v6026_v56 = vrot.slane %v6012_v34, %v19303_v41  ;;  %v6027_v3 = vcombine.high %v6019_v52, %v6019_v52  ;;  %v14328_v33 = vrot.slane %v6019_v52, 9 }
 0x310   :  { %v14589_v48 = vcombine.low %v8064_v37, %v8064_v37  ;;  %vm22420_vm7 = vcmask 293888   ;;  %v6029_v62 = vcombine.high %v5757_v43, %v5757_v43  ;;  %v6036_v11 = vrot.slane %v5757_v43, %v19303_v41 }
 0x311   :  { %15580 = vmatprep.mubr.msk.bf16.mxu0 %vm22420_vm7, %v5149_v50  ;;  %8354 = vrot.lane.b32.xlu1 %v8263_v45, %s16715_s13  ;;  %v8277_v35 = vor.u32 %v8276_v26, %v8272_v1  ;;  %v20676_v2 = vadd.f32 %v20416_v53, %v5575_v6  ;;  %v6028_v17 = vcombine.high %v6026_v56, %v6026_v56  ;;  %v14329_v21 = vrot.slane %v6027_v3, 9  ;;  %vm22422_vm8 = vmmov %vm22420_vm7 }
 0x312   :  { %v14330_v42 = vrot.slane %v6026_v56, 9  ;;  %v6912_v10 = vmax.f32 %v6019_v52, %v14328_v33  ;;  %v6043_v40 = vrot.slane %v6029_v62, %v19303_v41  ;;  %v6044_v59 = vcombine.high %v6036_v11, %v6036_v11  ;;  %8356 = vrot.lane.b32.xlu0 %v8270_v18, %s16715_s13  ;;  %v4631_v52 = vpop.permute.xlu0 %4630  ;;  %v8017_v33 = vld [vmem:[#allocation3 + $0x30] sm:$0xf] }
 0x313   :  { %v14332_v47 = vrot.slane %v6036_v11, 9  ;;  %v5644_v12 = vadd.f32 %v20416_v53, %v5573_v23  ;;  %v14331_v45 = vrot.slane %v6028_v17, 9  ;;  %v6913_v0 = vmax.f32 %v6027_v3, %v14329_v21  ;;  %v5398_v3 = vpop.f32.mrf.mxu0 }
 0x314   :  { %v6914_v55 = vmax.f32 %v6026_v56, %v14330_v42  ;;  %v15175_v22 = vpack.c.bf16 %v6912_v10, %v6912_v10  ;;  %v6045_v51 = vcombine.high %v6043_v40, %v6043_v40  ;;  %v14333_v63 = vrot.slane %v6044_v59, 9 }
 0x315   :  { %v14334_v31 = vrot.slane %v6043_v40, 9  ;;  %v6916_v29 = vmax.f32 %v6036_v11, %v14332_v47  ;;  %8502 = vrot.lane.b32.xlu1 %v14589_v48, %s16715_s13  ;;  %v6915_v54 = vmax.f32 %v6028_v17, %v14331_v45  ;;  %v15176_v49 = vpack.c.bf16 %v6913_v0, %v6913_v0 }
 0x316   :  { %v15177_v27 = vpack.c.bf16 %v6914_v55, %v6914_v55  ;;  %v7552_v61 = vunpack.c.l.b16 %v15175_v22  ;;  %v14335_v19 = vrot.slane %v6045_v51, 9  ;;  %v6917_v5 = vmax.f32 %v6044_v59, %v14333_v63  ;;  %v7951_v63 = vld [vmem:[#allocation3 + $0x38] sm:$0xf] }
 0x317   :  { %v6918_v39 = vmax.f32 %v6043_v40, %v14334_v31  ;;  %v15179_v57 = vpack.c.bf16 %v6916_v29, %v6916_v29  ;;  %v15178_v36 = vpack.c.bf16 %v6915_v54, %v6915_v54  ;;  %v7553_v38 = vunpack.c.l.b16 %v15176_v49  ;;  %v8033_v40 = vld [vmem:[#allocation3 + $0x34] sm:$0x1]  ;;  %v20703_v31 = vpop.permute.xlu0 %2584 }
 0x318   :  { %v7554_v15 = vunpack.c.l.b16 %v15177_v27  ;;  %v7716_v18 = vrot.slane %v7552_v61, 7  ;;  %v6919_v14 = vmax.f32 %v6045_v51, %v14335_v19  ;;  %v15180_v58 = vpack.c.bf16 %v6917_v5, %v6917_v5 }
 0x319   :  { %v15181_v46 = vpack.c.bf16 %v6918_v39, %v6918_v39  ;;  %v7556_v24 = vunpack.c.l.b16 %v15179_v57  ;;  %8358 = vrot.lane.b32.xlu1 %v8277_v35, %s16715_s13  ;;  %v7555_v37 = vunpack.c.l.b16 %v15178_v36  ;;  %v7717_v1 = vrot.slane %v7553_v38, 6  ;;  %v15562_v38 = vpop.f32.mrf.mxu0 }
 0x31a   :  { %v7719_v30 = vrot.slane %v7554_v15, 5  ;;  %v5086_v34 = vsel %vm22421_vm4, %v20657_v44, %v4375_v16  ;;  %v7557_v25 = vunpack.c.l.b16 %v15180_v58  ;;  %v15261_v26 = vpack.c.bf16 %v6919_v14, %v6919_v14  ;;  %v20690_v44 = vpop.permute.xlu1 %2327 }
 0x31b   :  { %v7558_v6 = vunpack.c.l.b16 %v15181_v46  ;;  %v7723_v43 = vrot.slane %v7556_v24, 3  ;;  %v7718_v50 = vsel %vm7634_vm3, %v7717_v1, %v7716_v18  ;;  %v7721_v23 = vrot.slane %v7555_v37, 4  ;;  %v20714_v24 = vpop.permute.xlu0 %2808 }
 0x31c   :  { %v5151_v56 = vsel %vm5095_vm10, %v5086_v34, %v4631_v52  ;;  %v7720_v48 = vsel %vm7637_vm14, %v7719_v30, %v7718_v50  ;;  %v7725_v62 = vrot.slane %v7557_v25, 2  ;;  %v7955_v35 = vsel %vm19695_vm6, %v15261_v26, %v7954_v7  ;;  %v5411_v50 = vpop.f32.mrf.mxu0 }
 0x31d   :  { %v7727_v11 = vrot.slane %v7558_v6, 1  ;;  %15581 = vmatmul.mubr.msk.bf16.gmra.mxu0 %vm22422_vm8, %v5151_v56  ;;  %v7722_v17 = vsel %vm7640_vm13, %v7721_v23, %v7720_v48  ;;  %7956 = vst [vmem:[#allocation3 + $0x3c] sm:$0x1] %v7955_v35  ;;  %v5710_v21 = vmax.f32 %v20676_v2, 0.0  ;;  %v5708_v42 = vmax.f32 %v5644_v12, 0.0 }
 0x31e   :  { %v5576_v10 = vmul.f32 %v20401_v60, %v15559_v20  ;;  %vm22423_vm9 = vcmask 1045509   ;;  %v5574_v47 = vmul.f32 %v20401_v60, %v5398_v3  ;;  %v20698_v45 = vcombine.low %v8017_v33, %v8033_v40  ;;  %v20707_v49 = vpop.permute.xlu1 %2329 }
 0x31f   :  { %v7724_v59 = vsel %vm22423_vm9, %v7723_v43, %v7722_v17  ;;  %v5758_v55 = vmax.f32 %v5708_v42, %v5710_v21  ;;  %v5579_v26 = vmul.f32 %v20401_v60, %v15562_v38  ;;  %vm22424_vm2 = vmmov %vm22423_vm9  ;;  %vm22425_vm1 = vcmask 31744  }
 0x320   :  { %v7726_v0 = vsel %vm7646_vm12, %v7725_v62, %v7724_v59  ;;  %v5647_v22 = vadd.f32 %v20416_v53, %v5576_v10  ;;  %v5645_v2 = vadd.f32 %v20416_v53, %v5574_v47  ;;  %v8281_v19 = vshll.u32 %v20698_v45, 16  ;;  %vm22427_vm11 = vmmov %vm22425_vm1 }
 0x321   :  { %v7728_v51 = vsel %vm7649_vm0, %v7727_v11, %v7726_v0  ;;  %v6046_v29 = vcombine.high %v5758_v55, %v5758_v55  ;;  %v6053_v54 = vrot.slane %v5758_v55, %v19303_v41  ;;  %vm22426_vm5 = vcmask 64512  }
 0x322   :  { %v7858_v12 = vpack.c.b16 %v7728_v51, %v7728_v51  ;;  %v5711_v27 = vmax.f32 %v5647_v22, 0.0  ;;  %v5709_v61 = vmax.f32 %v5645_v2, 0.0  ;;  %v8283_v37 = vrot.slane %v8281_v19, 1  ;;  %v20716_v52 = vpop.permute.xlu1 %2586  ;;  %v3353_v22 = vpop.permute.xlu0 %3352  ;;  %vm22429_vm4 = vmmov %vm22426_vm5 }
 0x323   :  { %v6060_v39 = vrot.slane %v6046_v29, %v19303_v41  ;;  %v6061_v57 = vcombine.high %v6053_v54, %v6053_v54  ;;  %v14336_v16 = vrot.slane %v6053_v54, 9  ;;  %v15563_v51 = vpop.f32.mrf.mxu0  ;;  %vm22428_vm7 = vcmask 97280  }
 0x324   :  { %v7952_v5 = vsel %vm19742_vm15, %v7858_v12, %v7951_v63  ;;  %v5759_v36 = vmax.f32 %v5709_v61, %v5711_v27  ;;  %vm22430_vm8 = vcmask 130048   ;;  %vm22431_vm9 = vmmov %vm22428_vm7 }
 0x325   :  { %7953 = vst [vmem:[#allocation3 + $0x38] sm:$0xf] %v7952_v5  ;;  %v6062_v15 = vcombine.high %v6060_v39, %v6060_v39  ;;  %v14337_v18 = vrot.slane %v6061_v57, 9  ;;  %v14338_v20 = vrot.slane %v6060_v39, 9  ;;  %v6920_v14 = vmax.f32 %v6053_v54, %v14336_v16  ;;  %v7960_v16 = vld [vmem:[#allocation3 + $0x44] sm:$0x1] }
 0x326   :  { %v6063_v58 = vcombine.high %v5759_v36, %v5759_v36  ;;  %v6070_v46 = vrot.slane %v5759_v36, %v19303_v41  ;;  %v2811_v54 = vpop.permute.xlu1 %2810  ;;  %v8279_v36 = vshrl.u32 %v20698_v45, 16  ;;  %v5577_v45 = vmul.f32 %v20401_v60, %v5411_v50  ;;  %v7957_v50 = vld [vmem:[#allocation3 + $0x40] sm:$0xf] }
 0x327   :  { %v14339_v1 = vrot.slane %v6062_v15, 9  ;;  %v6921_v30 = vmax.f32 %v6061_v57, %v14337_v18  ;;  %v6922_v7 = vmax.f32 %v6060_v39, %v14338_v20  ;;  %v15183_v34 = vpack.c.bf16 %v6920_v14, %v6920_v14  ;;  %v5414_v14 = vpop.f32.mrf.mxu0 }
 0x328   :  { %v6077_v25 = vrot.slane %v6063_v58, %v19303_v41  ;;  %v6078_v6 = vcombine.high %v6070_v46, %v6070_v46  ;;  %v14340_v43 = vrot.slane %v6070_v46, 9 }
 0x329   :  { %v6923_v23 = vmax.f32 %v6062_v15, %v14339_v1  ;;  %v15184_v56 = vpack.c.bf16 %v6921_v30, %v6921_v30  ;;  %v15185_v3 = vpack.c.bf16 %v6922_v7, %v6922_v7  ;;  %v7560_v33 = vunpack.c.l.b16 %v15183_v34 }
 0x32a   :  { %v6079_v48 = vcombine.high %v6077_v25, %v6077_v25  ;;  %v14341_v62 = vrot.slane %v6078_v6, 9  ;;  %v14342_v11 = vrot.slane %v6077_v25, 9  ;;  %v6924_v35 = vmax.f32 %v6070_v46, %v14340_v43 }
 0x32b   :  { %v15186_v17 = vpack.c.bf16 %v6923_v23, %v6923_v23  ;;  %v7561_v21 = vunpack.c.l.b16 %v15184_v56  ;;  %v7562_v42 = vunpack.c.l.b16 %v15185_v3  ;;  %v7729_v10 = vrot.slane %v7560_v33, 7 }
 0x32c   :  { %v8065_v40 = vld [vmem:[#allocation3 + $0x38] sm:$0xf]  ;;  %v14343_v59 = vrot.slane %v6079_v48, 9  ;;  %v6925_v47 = vmax.f32 %v6078_v6, %v14341_v62  ;;  %v6926_v0 = vmax.f32 %v6077_v25, %v14342_v11  ;;  %v15187_v55 = vpack.c.bf16 %v6924_v35, %v6924_v35  ;;  %v3609_v6 = vpop.permute.xlu0 %3608 }
 0x32d   :  { %v7563_v63 = vunpack.c.l.b16 %v15186_v17  ;;  %v7730_v2 = vrot.slane %v7561_v21, 6  ;;  %v7732_v12 = vrot.slane %v7562_v42, 5  ;;  %v14590_v29 = vcombine.low %v8065_v40, %v8065_v40  ;;  %v8018_v43 = vld [vmem:[#allocation3 + $0x38] sm:$0xf] }
 0x32e   :  { %v6927_v27 = vmax.f32 %v6079_v48, %v14343_v59  ;;  %v15188_v61 = vpack.c.bf16 %v6925_v47, %v6925_v47  ;;  %v15189_v19 = vpack.c.bf16 %v6926_v0, %v6926_v0  ;;  %v7564_v57 = vunpack.c.l.b16 %v15187_v55  ;;  %v3355_v3 = vpop.permute.xlu1 %3354  ;;  %v20735_v48 = vld [vmem:[#allocation3 + $0x3c] sm:$0x1] }
 0x32f   :  { %v7731_v5 = vsel %vm7634_vm3, %v7730_v2, %v7729_v10  ;;  %v7734_v39 = vrot.slane %v7563_v63, 4  ;;  %8504 = vrot.lane.b32.xlu0 %v14590_v29, %s16715_s13  ;;  %v8284_v1 = vor.u32 %v8283_v37, %v8279_v36  ;;  %v5650_v30 = vadd.f32 %v20416_v53, %v5579_v26 }
 0x330   :  { %v7733_v38 = vsel %vm7637_vm14, %v7732_v12, %v7731_v5  ;;  %v7565_v15 = vunpack.c.l.b16 %v15188_v61  ;;  %v7566_v18 = vunpack.c.l.b16 %v15189_v19  ;;  %v15262_v20 = vpack.c.bf16 %v6927_v27, %v6927_v27 }
 0x331   :  { %v7735_v58 = vsel %vm7640_vm13, %v7734_v39, %v7733_v38  ;;  %v7736_v46 = vrot.slane %v7564_v57, 3  ;;  %v5580_v56 = vmul.f32 %v20401_v60, %v15563_v51  ;;  %v5578_v37 = vmul.f32 %v20401_v60, %v5414_v14 }
 0x332   :  { %v7738_v7 = vrot.slane %v7565_v15, 2  ;;  %v7740_v34 = vrot.slane %v7566_v18, 1  ;;  %v7961_v25 = vsel %vm19695_vm6, %v15262_v20, %v7960_v16  ;;  %v5648_v33 = vadd.f32 %v20416_v53, %v5577_v45  ;;  %v3611_v51 = vpop.permute.xlu1 %3610 }
 0x333   :  { %v7737_v23 = vsel %vm22424_vm2, %v7736_v46, %v7735_v58  ;;  %7962 = vst [vmem:[#allocation3 + $0x44] sm:$0x1] %v7961_v25  ;;  %8360 = vrot.lane.b32.xlu0 %v8284_v1, %s16715_s13  ;;  %v5651_v11 = vadd.f32 %v20416_v53, %v5580_v56  ;;  %v5649_v35 = vadd.f32 %v20416_v53, %v5578_v37  ;;  %v5714_v42 = vmax.f32 %v5650_v30, 0.0 }
 0x334   :  { %v7739_v26 = vsel %vm7646_vm12, %v7738_v7, %v7737_v23  ;;  %v20741_v17 = vcombine.low %v8018_v43, %v20735_v48  ;;  %v4698_v60 = vsel %vm22425_vm1, %v20048_v32, %v20690_v44  ;;  %v5712_v10 = vmax.f32 %v5648_v33, 0.0  ;;  %v3833_v32 = vpop.permute.xlu0 %3832  ;;  %vm22433_vm1 = vmmov %vm22430_vm8 }
 0x335   :  { %v7741_v62 = vsel %vm7649_vm0, %v7740_v34, %v7739_v26  ;;  %v4763_v40 = vsel %vm22426_vm5, %v4698_v60, %v20703_v31  ;;  %v5715_v59 = vmax.f32 %v5651_v11, 0.0  ;;  %v5713_v47 = vmax.f32 %v5649_v35, 0.0 }
 0x336   :  { %v7860_v21 = vpack.c.b16 %v7741_v62, %v7741_v62  ;;  %v4700_v0 = vsel %vm22427_vm11, %v20105_v8, %v20707_v49  ;;  %v4828_v55 = vsel %vm22428_vm7, %v4763_v40, %v20714_v24  ;;  %v5760_v44 = vmax.f32 %v5712_v10, %v5714_v42  ;;  %v3835_v15 = vpop.permute.xlu1 %3834 }
 0x337   :  { %v4765_v63 = vsel %vm22429_vm4, %v4700_v0, %v20716_v52  ;;  %v4893_v31 = vsel %vm22430_vm8, %v4828_v55, %v3353_v22  ;;  %v5761_v2 = vmax.f32 %v5713_v47, %v5715_v59  ;;  %v8288_v12 = vshll.u32 %v20741_v17, 16 }
 0x338   :  { %v7958_v53 = vsel %vm19742_vm15, %v7860_v21, %v7957_v50  ;;  %v4830_v8 = vsel %vm22431_vm9, %v4765_v63, %v2811_v54  ;;  %vm22432_vm2 = vcmask 162816   ;;  %v6080_v29 = vcombine.high %v5760_v44, %v5760_v44  ;;  %v4377_v23 = vpop.permute.xlu0 %4376 }
 0x339   :  { %7959 = vst [vmem:[#allocation3 + $0x40] sm:$0xf] %v7958_v53  ;;  %v4958_v49 = vsel %vm22432_vm2, %v4893_v31, %v3609_v6  ;;  %v6087_v27 = vrot.slane %v5760_v44, %v19303_v41  ;;  %v4895_v24 = vsel %vm22433_vm1, %v4830_v8, %v3355_v3  ;;  %vm22434_vm5 = vcmask 195584   ;;  %vm22435_vm11 = vmmov %vm22432_vm2  ;;  %v7966_v53 = vld [vmem:[#allocation3 + $0x5c] sm:$0x1] }
 0x33a   :  { %v5023_v61 = vsel %vm22434_vm5, %v4958_v49, %v3833_v32  ;;  %v6097_v19 = vcombine.high %v5761_v2, %v5761_v2  ;;  %v6104_v52 = vrot.slane %v5761_v2, %v19303_v41  ;;  %v6094_v5 = vrot.slane %v6080_v29, %v19303_v41  ;;  %v4379_v10 = vpop.permute.xlu1 %4378  ;;  %vm22436_vm7 = vmmov %vm22434_vm5 }
 0x33b   :  { %v6095_v22 = vcombine.high %v6087_v27, %v6087_v27  ;;  %v14344_v39 = vrot.slane %v6087_v27, 9  ;;  %v8286_v57 = vshrl.u32 %v20741_v17, 16  ;;  %v20768_v38 = vrot.slane %v8288_v12, 1  ;;  %v15566_v8 = vpop.f32.mrf.mxu0 }
 0x33c   :  { %v6111_v54 = vrot.slane %v6097_v19, %v19303_v41  ;;  %v6112_v16 = vcombine.high %v6104_v52, %v6104_v52  ;;  %v14348_v36 = vrot.slane %v6104_v52, 9  ;;  %v6096_v18 = vcombine.high %v6094_v5, %v6094_v5 }
 0x33d   :  { %v14345_v20 = vrot.slane %v6095_v22, 9  ;;  %v14346_v14 = vrot.slane %v6094_v5, 9  ;;  %v6928_v58 = vmax.f32 %v6087_v27, %v14344_v39  ;;  %v4960_v43 = vsel %vm22435_vm11, %v4895_v24, %v3611_v51 }
 0x33e   :  { %v6113_v46 = vcombine.high %v6111_v54, %v6111_v54  ;;  %v14349_v1 = vrot.slane %v6112_v16, 9  ;;  %v14350_v30 = vrot.slane %v6111_v54, 9  ;;  %v6932_v7 = vmax.f32 %v6104_v52, %v14348_v36  ;;  %v20783_v36 = vld [vmem:[%s22124_s2] ss:$0 sm:$0xff] }
 0x33f   :  { %v14347_v34 = vrot.slane %v6096_v18, 9  ;;  %v6929_v25 = vmax.f32 %v6095_v22, %v14345_v20  ;;  %v6930_v6 = vmax.f32 %v6094_v5, %v14346_v14  ;;  %v15191_v45 = vpack.c.bf16 %v6928_v58, %v6928_v58 }
 0x340   :  { %v14351_v56 = vrot.slane %v6113_v46, 9  ;;  %v6933_v37 = vmax.f32 %v6112_v16, %v14349_v1  ;;  %v6934_v26 = vmax.f32 %v6111_v54, %v14350_v30  ;;  %v15195_v35 = vpack.c.bf16 %v6932_v7, %v6932_v7  ;;  %v8066_v42 = vld [vmem:[#allocation3 + $0x40] sm:$0xf]  ;;  %v5427_v54 = vpop.f32.mrf.mxu0 }
 0x341   :  { %v6931_v3 = vmax.f32 %v6096_v18, %v14347_v34  ;;  %v15192_v33 = vpack.c.bf16 %v6929_v25, %v6929_v25  ;;  %v15193_v62 = vpack.c.bf16 %v6930_v6, %v6930_v6  ;;  %v7568_v50 = vunpack.c.l.b16 %v15191_v45  ;;  %v20788_v14 = vpop.permute.xlu1 %2331  ;;  %v20795_v34 = vld [vmem:[#allocation5] ss:$0 sm:$0xff] }
 0x342   :  { %v6935_v11 = vmax.f32 %v6113_v46, %v14351_v56  ;;  %v15196_v60 = vpack.c.bf16 %v6933_v37, %v6933_v37  ;;  %v15197_v21 = vpack.c.bf16 %v6934_v26, %v6934_v26  ;;  %v7572_v55 = vunpack.c.l.b16 %v15195_v35  ;;  %v4633_v27 = vpop.permute.xlu0 %4632  ;;  %v15567_v1 = vpop.f32.mrf.mxu0 }
 0x343   :  { %v15194_v40 = vpack.c.bf16 %v6931_v3, %v6931_v3  ;;  %v7569_v59 = vunpack.c.l.b16 %v15192_v33  ;;  %v7570_v47 = vunpack.c.l.b16 %v15193_v62  ;;  %v7742_v0 = vrot.slane %v7568_v50, 7 }
 0x344   :  { %v7573_v51 = vunpack.c.l.b16 %v15196_v60  ;;  %v7574_v32 = vunpack.c.l.b16 %v15197_v21  ;;  %v15263_v44 = vpack.c.bf16 %v6935_v11, %v6935_v11  ;;  %v14591_v12 = vcombine.low %v8066_v42, %v8066_v42  ;;  %v5430_v17 = vpop.f32.mrf.mxu0 }
 0x345   :  { %v7571_v63 = vunpack.c.l.b16 %v15194_v40  ;;  %v7743_v31 = vrot.slane %v7569_v59, 6  ;;  %v7745_v2 = vrot.slane %v7570_v47, 5  ;;  %v5025_v49 = vsel %vm22436_vm7, %v4960_v43, %v3835_v15 }
 0x346   :  { %vm22437_vm4 = vcmask 228352   ;;  %v7749_v24 = vrot.slane %v7572_v55, 3  ;;  %v7967_v19 = vsel %vm19695_vm6, %v15263_v44, %v7966_v53  ;;  %v7751_v39 = vrot.slane %v7573_v51, 2  ;;  %8506 = vrot.lane.b32.xlu1 %v14591_v12, %s16715_s13  ;;  %v4635_v30 = vpop.permute.xlu0 %4634  ;;  %v20809_v11 = vpop.permute.xlu1 %2333 }
 0x347   :  { %v5088_v29 = vsel %vm22437_vm4, %v5023_v61, %v4377_v23  ;;  %v7744_v5 = vsel %vm7634_vm3, %v7743_v31, %v7742_v0  ;;  %v7747_v22 = vrot.slane %v7571_v63, 4  ;;  %7968 = vst [vmem:[#allocation3 + $0x5c] sm:$0x1] %v7967_v19  ;;  %vm22438_vm8 = vcmask 293888   ;;  %vm22439_vm9 = vmmov %vm22437_vm4 }
 0x348   :  { %v5153_v52 = vsel %vm5095_vm10, %v5088_v29, %v4633_v27  ;;  %v7746_v16 = vsel %vm7637_vm14, %v7745_v2, %v7744_v5  ;;  %v7753_v61 = vrot.slane %v7574_v32, 1  ;;  %v5583_v15 = vmul.f32 %v20783_v36, %v15566_v8  ;;  %vm22441_vm1 = vmmov %vm22438_vm8 }
 0x349   :  { %15584 = vmatprep.mubr.msk.bf16.mxu0 %vm22438_vm8, %v5153_v52  ;;  %v5581_v18 = vmul.f32 %v20783_v36, %v5427_v54  ;;  %v5090_v20 = vsel %vm22439_vm9, %v5025_v49, %v4379_v10  ;;  %v7748_v58 = vsel %vm7640_vm13, %v7747_v22, %v7746_v16  ;;  %v8291_v46 = vor.u32 %v20768_v38, %v8286_v57  ;;  %v7963_v38 = vld [vmem:[#allocation3 + $0x58] sm:$0xf] }
 0x34a   :  { %vm22440_vm2 = vcmask 1045509   ;;  %v5654_v25 = vadd.f32 %v20795_v34, %v5583_v15  ;;  %v5584_v45 = vmul.f32 %v20783_v36, %v15567_v1  ;;  %v5155_v43 = vsel %vm5095_vm10, %v5090_v20, %v4635_v30  ;;  %v20807_v62 = vpop.permute.xlu0 %2588  ;;  %v20818_v31 = vpop.permute.xlu1 %2590 }
 0x34b   :  { %v7750_v7 = vsel %vm22440_vm2, %v7749_v24, %v7748_v58  ;;  %v5652_v6 = vadd.f32 %v20795_v34, %v5581_v18  ;;  %8362 = vrot.lane.b32.xlu1 %v8291_v46, %s16715_s13  ;;  %15585 = vmatmul.mubr.msk.bf16.gmra.mxu0 %vm22441_vm1, %v5155_v43  ;;  %v5582_v33 = vmul.f32 %v20783_v36, %v5430_v17  ;;  %vm22442_vm5 = vmmov %vm22440_vm2  ;;  %vm22443_vm11 = vcmask 31744  }
 0x34c   :  { %v7752_v23 = vsel %vm7646_vm12, %v7751_v39, %v7750_v7  ;;  %v5718_v56 = vmax.f32 %v5654_v25, 0.0  ;;  %v5655_v3 = vadd.f32 %v20795_v34, %v5584_v45  ;;  %vm22444_vm7 = vcmask 64512   ;;  %vm22448_vm2 = vmmov %vm22443_vm11 }
 0x34d   :  { %v7754_v57 = vsel %vm7649_vm0, %v7753_v61, %v7752_v23  ;;  %v5716_v37 = vmax.f32 %v5652_v6, 0.0  ;;  %v5653_v60 = vadd.f32 %v20795_v34, %v5582_v33  ;;  %vm22445_vm4 = vcmask 97280  }
 0x34e   :  { %v7862_v26 = vpack.c.b16 %v7754_v57, %v7754_v57  ;;  %v5719_v10 = vmax.f32 %v5655_v3, 0.0  ;;  %v20815_v59 = vpop.permute.xlu0 %2812  ;;  %vm22446_vm8 = vcmask 130048   ;;  %vm22447_vm9 = vcmask 162816  }
 0x34f   :  { %v5762_v50 = vmax.f32 %v5716_v37, %v5718_v56  ;;  %v5717_v40 = vmax.f32 %v5653_v60, 0.0  ;;  %v20829_v60 = vld [vmem:[#allocation3 + $0x50] sm:$0xf]  ;;  %vm22449_vm1 = vcmask 195584  }
 0x350   :  { %v7964_v35 = vsel %vm19742_vm15, %v7862_v26, %v7963_v38 }
 0x351   :  { %7965 = vst [vmem:[#allocation3 + $0x58] sm:$0xf] %v7964_v35  ;;  %v6114_v21 = vcombine.high %v5762_v50, %v5762_v50  ;;  %v6121_v42 = vrot.slane %v5762_v50, %v19303_v41  ;;  %v5763_v55 = vmax.f32 %v5717_v40, %v5719_v10 }
 0x352   :  { %v20821_v8 = vpop.permute.xlu0 %3356 }
 0x353   :  { %v6128_v47 = vrot.slane %v6114_v21, %v19303_v41  ;;  %v6129_v0 = vcombine.high %v6121_v42, %v6121_v42  ;;  %v14352_v53 = vrot.slane %v6121_v42, 9  ;;  %v6131_v2 = vcombine.high %v5763_v55, %v5763_v55  ;;  %v20831_v21 = vld [vmem:[#allocation3 + $0x54] sm:$0x1] }
 0x354   :  { %v6138_v12 = vrot.slane %v5763_v55, %v19303_v41 }
 0x355   :  { %v6130_v51 = vcombine.high %v6128_v47, %v6128_v47  ;;  %v14353_v32 = vrot.slane %v6129_v0, 9  ;;  %v14354_v44 = vrot.slane %v6128_v47, 9  ;;  %v6936_v63 = vmax.f32 %v6121_v42, %v14352_v53 }
 0x356   :  { %v6145_v19 = vrot.slane %v6131_v2, %v19303_v41  ;;  %v6146_v52 = vcombine.high %v6138_v12, %v6138_v12  ;;  %v14356_v5 = vrot.slane %v6138_v12, 9  ;;  %v20824_v58 = vpop.permute.xlu0 %3612  ;;  %v14560_v2 = vcombine.low %v20829_v60, %v20831_v21 }
 0x357   :  { %v14355_v49 = vrot.slane %v6130_v51, 9  ;;  %v6937_v29 = vmax.f32 %v6129_v0, %v14353_v32  ;;  %v6938_v27 = vmax.f32 %v6128_v47, %v14354_v44  ;;  %v15199_v24 = vpack.c.bf16 %v6936_v63, %v6936_v63  ;;  %v20826_v25 = vpop.permute.xlu1 %2814  ;;  %v7972_v47 = vld [vmem:[#allocation3 + $0x64] sm:$0x1] }
 0x358   :  { %v6147_v61 = vcombine.high %v6145_v19, %v6145_v19  ;;  %v14357_v15 = vrot.slane %v6146_v52, 9  ;;  %v14358_v18 = vrot.slane %v6145_v19, 9  ;;  %v6940_v20 = vmax.f32 %v6138_v12, %v14356_v5  ;;  %v8067_v7 = vld [vmem:[#allocation3 + $0x58] sm:$0xf] }
 0x359   :  { %v6939_v22 = vmax.f32 %v6130_v51, %v14355_v49  ;;  %v15200_v39 = vpack.c.bf16 %v6937_v29, %v6937_v29  ;;  %v15201_v54 = vpack.c.bf16 %v6938_v27, %v6938_v27  ;;  %v7576_v16 = vunpack.c.l.b16 %v15199_v24 }
 0x35a   :  { %v14359_v45 = vrot.slane %v6147_v61, 9  ;;  %v6941_v43 = vmax.f32 %v6146_v52, %v14357_v15  ;;  %v6942_v38 = vmax.f32 %v6145_v19, %v14358_v18  ;;  %v15203_v37 = vpack.c.bf16 %v6940_v20, %v6940_v20  ;;  %v3837_v0 = vpop.permute.xlu0 %3836  ;;  %v20846_v15 = vld [vmem:[#allocation3 + $0x58] sm:$0xf]  ;;  %v8140_v20 = vld [vmem:[#allocation3 + $0x10] sm:$0xe] }
 0x35b   :  { %v15202_v46 = vpack.c.bf16 %v6939_v22, %v6939_v22  ;;  %v7577_v1 = vunpack.c.l.b16 %v15200_v39  ;;  %v7578_v30 = vunpack.c.l.b16 %v15201_v54  ;;  %v7755_v6 = vrot.slane %v7576_v16, 7  ;;  %v7969_v22 = vld [vmem:[#allocation3 + $0x60] sm:$0xf] }
 0x35c   :  { %v6943_v56 = vmax.f32 %v6147_v61, %v14359_v45  ;;  %v15204_v26 = vpack.c.bf16 %v6941_v43, %v6941_v43  ;;  %v14592_v3 = vcombine.low %v8067_v7, %v8067_v7  ;;  %v15205_v35 = vpack.c.bf16 %v6942_v38, %v6942_v38  ;;  %v8124_v45 = vld [vmem:[#allocation3 + $0x14] sm:$0x1]  ;;  %v8125_v43 = vld [vmem:[#allocation3 + $0x1c] sm:$0x1] }
 0x35d   :  { %v7579_v23 = vunpack.c.l.b16 %v15202_v46  ;;  %v7756_v17 = vrot.slane %v7577_v1, 6  ;;  %v7758_v57 = vrot.slane %v7578_v30, 5  ;;  %v7580_v10 = vunpack.c.l.b16 %v15203_v37  ;;  %v8141_v46 = vld [vmem:[#allocation3 + $0x18] sm:$0xe] }
 0x35e   :  { %v7581_v40 = vunpack.c.l.b16 %v15204_v26  ;;  %8508 = vrot.lane.b32.xlu0 %v14592_v3, %s16715_s13  ;;  %v7582_v53 = vunpack.c.l.b16 %v15205_v35  ;;  %v15264_v51 = vpack.c.bf16 %v6943_v56, %v6943_v56  ;;  %v8293_v27 = vshrl.u32 %v14560_v2, 16  ;;  %v8044_v3 = vld [vmem:[#allocation3 + $0x8] sm:$0xe]  ;;  %v8142_v35 = vld [vmem:[#allocation3 + $0x20] sm:$0xe] }
 0x35f   :  { %v7757_v33 = vsel %vm7634_vm3, %v7756_v17, %v7755_v6  ;;  %v7760_v50 = vrot.slane %v7579_v23, 4  ;;  %v3359_v32 = vpop.permute.xlu1 %3358  ;;  %v7762_v44 = vrot.slane %v7580_v10, 3  ;;  %v8295_v24 = vshll.u32 %v14560_v2, 16  ;;  %v20854_v6 = vld [vmem:[#allocation3 + $0x5c] sm:$0x1] }
 0x360   :  { %v7759_v42 = vsel %vm7637_vm14, %v7758_v57, %v7757_v33  ;;  %v7764_v63 = vrot.slane %v7581_v40, 2  ;;  %v7766_v12 = vrot.slane %v7582_v53, 1  ;;  %v7973_v49 = vsel %vm19695_vm6, %v15264_v51, %v7972_v47  ;;  %v8043_v23 = vld [vmem:[#allocation3] sm:$0xe]  ;;  %v16463_v33 = vld [vmem:[#allocation3 + $0x4] sm:$0x1] }
 0x361   :  { %v7761_v55 = vsel %vm7640_vm13, %v7760_v50, %v7759_v42  ;;  %7974 = vst [vmem:[#allocation3 + $0x64] sm:$0x1] %v7973_v49  ;;  %v8297_v39 = vrot.slane %v8295_v24, 1  ;;  %v4702_v54 = vsel %vm22443_vm11, %v20287_v13, %v20788_v14  ;;  %v4381_v16 = vpop.permute.xlu0 %4380  ;;  %v14648_v17 = vcombine.low %v8140_v20, %v8124_v45  ;;  %v8143_v40 = vld [vmem:[#allocation3 + $0x28] sm:$0xe] }
 0x362   :  { %v7763_v29 = vsel %vm22442_vm5, %v7762_v44, %v7761_v55  ;;  %v4767_v18 = vsel %vm22444_vm7, %v4702_v54, %v20807_v62  ;;  %v20860_v62 = vcombine.low %v20846_v15, %v20854_v6  ;;  %v14649_v57 = vcombine.low %v8141_v46, %v8125_v43  ;;  %vm22450_vm5 = vmmov %vm22444_vm7  ;;  %v8126_v53 = vld [vmem:[#allocation3 + $0x24] sm:$0x1]  ;;  %v8127_v55 = vld [vmem:[#allocation3 + $0x2c] sm:$0x1] }
 0x363   :  { %v7765_v19 = vsel %vm7646_vm12, %v7764_v63, %v7763_v29  ;;  %v3615_v52 = vpop.permute.xlu1 %3614  ;;  %v8298_v1 = vor.u32 %v8297_v39, %v8293_v27  ;;  %v4832_v30 = vsel %vm22445_vm4, %v4767_v18, %v20815_v59  ;;  %vm22451_vm11 = vcmask 228352   ;;  %vm22452_vm7 = vmmov %vm22445_vm4  ;;  %v16464_v44 = vld [vmem:[#allocation3 + $0xc] sm:$0x1]  ;;  %v8129_v2 = vld [vmem:[#allocation3 + $0x3c] sm:$0x1] }
 0x364   :  { %v7767_v5 = vsel %vm7649_vm0, %v7766_v12, %v7765_v19  ;;  %v4897_v13 = vsel %vm22446_vm8, %v4832_v30, %v20821_v8  ;;  %v4704_v8 = vsel %vm22448_vm2, %v20306_v4, %v20809_v11  ;;  %v14568_v50 = vcombine.low %v8043_v23, %v16463_v33  ;;  %v8145_v4 = vld [vmem:[#allocation3 + $0x38] sm:$0xe]  ;;  %vm22453_vm4 = vmmov %vm22446_vm8  ;;  %v8144_v12 = vld [vmem:[#allocation3 + $0x30] sm:$0xe] }
 0x365   :  { %v7864_v61 = vpack.c.b16 %v7767_v5, %v7767_v5  ;;  %8364 = vrot.lane.b32.xlu0 %v8298_v1, %s16715_s13  ;;  %v4962_v59 = vsel %vm22447_vm9, %v4897_v13, %v20824_v58  ;;  %v4769_v56 = vsel %vm22450_vm5, %v4704_v8, %v20818_v31  ;;  %v8302_v11 = vshll.u32 %v20860_v62, 16  ;;  %vm22455_vm5 = vmmov %vm22451_vm11  ;;  %v8128_v54 = vld [vmem:[#allocation3 + $0x34] sm:$0x1]  ;;  %v8045_v1 = vld [vmem:[#allocation3 + $0x10] sm:$0xe] }
 0x366   :  { %v5027_v38 = vsel %vm22449_vm1, %v4962_v59, %v3837_v0  ;;  %v4834_v58 = vsel %vm22452_vm7, %v4769_v56, %v20826_v25  ;;  %vm22454_vm8 = vcmask 293888   ;;  %v9052_v31 = vrot.slane %v14648_v17, 1  ;;  %v8131_v30 = vld [vmem:[#allocation3 + $0x4c] sm:$0x1]  ;;  %v8147_v45 = vld [vmem:[#allocation3 + $0x48] sm:$0xe] }
 0x367   :  { %v7970_v7 = vsel %vm19742_vm15, %v7864_v61, %v7969_v22  ;;  %v3839_v14 = vpop.permute.xlu1 %3838  ;;  %v5092_v37 = vsel %vm22451_vm11, %v5027_v38, %v4381_v16  ;;  %v4899_v47 = vsel %vm22453_vm4, %v4834_v58, %v3359_v32  ;;  %v9053_v0 = vrot.slane %v14649_v57, 1  ;;  %vm22456_vm11 = vmmov %vm22454_vm8  ;;  %v16465_v33 = vld [vmem:[#allocation3 + $0x14] sm:$0x1] }
 0x368   :  { %7971 = vst [vmem:[#allocation3 + $0x60] sm:$0xf] %v7970_v7  ;;  %v4964_v51 = vsel %vm22447_vm9, %v4899_v47, %v3615_v52  ;;  %vm9068_vm2 = vcmask 523264   ;;  %v14569_v25 = vcombine.low %v8044_v3, %v16464_v44  ;;  %v14650_v63 = vcombine.low %v8142_v35, %v8126_v53  ;;  %v8046_v3 = vld [vmem:[#allocation3 + $0x18] sm:$0xe] }
 0x369   :  { %v5029_v49 = vsel %vm22449_vm1, %v4964_v51, %v3839_v14  ;;  %v8428_v27 = vrot.slane %v14568_v50, 1  ;;  %v14651_v24 = vcombine.low %v8143_v40, %v8127_v55  ;;  %v14653_v32 = vcombine.low %v8145_v4, %v8129_v2  ;;  %v15570_v19 = vpop.f32.mrf.mxu0  ;;  %v8146_v14 = vld [vmem:[#allocation3 + $0x40] sm:$0xe]  ;;  %v8130_v35 = vld [vmem:[#allocation3 + $0x44] sm:$0x1] }
 0x36a   :  { %v4637_v26 = vpop.permute.xlu0 %4636  ;;  %v5587_v52 = vmul.f32 %v20783_v36, %v15570_v19  ;;  %v8304_v61 = vrot.slane %v8302_v11, 1  ;;  %v14668_v20 = vcombine.low %v9052_v31, %v9053_v0  ;;  %v14652_v46 = vcombine.low %v8144_v12, %v8128_v54  ;;  %v8047_v0 = vld [vmem:[#allocation3 + $0x20] sm:$0xe]  ;;  %v16467_v2 = vld [vmem:[#allocation3 + $0x1c] sm:$0x1] }
 0x36b   :  { %v4383_v42 = vpop.permute.xlu1 %4382  ;;  %v5157_v10 = vsel %vm5095_vm10, %v5092_v37, %v4637_v26  ;;  %v5443_v7 = vpop.f32.mrf.mxu0  ;;  %v8429_v13 = vrot.slane %v14569_v25, 1  ;;  %v8300_v59 = vshrl.u32 %v20860_v62, 16  ;;  %v9054_v8 = vrot.slane %v14650_v63, 1  ;;  %v16466_v44 = vld [vmem:[#allocation3] sm:$0xf] }
 0x36c   :  { %15588 = vmatprep.mubr.msk.bf16.mxu0 %vm22454_vm8, %v5157_v10  ;;  %v5094_v22 = vsel %vm22455_vm5, %v5029_v49, %v4383_v42  ;;  %v5658_v43 = vadd.f32 %v20795_v34, %v5587_v52  ;;  %v5585_v23 = vmul.f32 %v20783_v36, %v5443_v7  ;;  %v9055_v38 = vrot.slane %v14651_v24, 1  ;;  %v16485_v28 = vld [vmem:[#allocation3 + $0x64] sm:$0x1] }
 0x36d   :  { %v9057_v56 = vrot.slane %v14653_v32, 1  ;;  %v15571_v37 = vpop.f32.mrf.mxu0  ;;  %v14570_v50 = vcombine.low %v8045_v1, %v16465_v33  ;;  %v8305_v10 = vor.u32 %v8304_v61, %v8300_v59  ;;  %v9056_v40 = vrot.slane %v14652_v46, 1 }
 0x36e   :  { %v5656_v58 = vadd.f32 %v20795_v34, %v5585_v23  ;;  %v5588_v42 = vmul.f32 %v20783_v36, %v15571_v37  ;;  %v14654_v4 = vcombine.low %v8146_v14, %v8130_v35  ;;  %v14655_v11 = vcombine.low %v8147_v45, %v8131_v30  ;;  %v16470_v23 = vld [vmem:[#allocation3 + $0x2c] sm:$0x1] }
 0x36f   :  { %v8068_v5 = vld [vmem:[#allocation3 + $0x60] sm:$0xf]  ;;  %v4639_v39 = vpop.permute.xlu1 %4638  ;;  %v5446_v47 = vpop.f32.mrf.mxu0  ;;  %v5722_v53 = vmax.f32 %v5658_v43, 0.0  ;;  %v14673_v63 = vcombine.low %v9054_v8, %v9055_v38  ;;  %v14571_v12 = vcombine.low %v8046_v3, %v16467_v2  ;;  %v14678_v24 = vcombine.low %v9056_v40, %v9057_v56 }
 0x370   :  { %v8493_v29 = vpop.permute.xlu0 %8492  ;;  %v14593_v16 = vcombine.low %v8068_v5, %v8068_v5  ;;  %v5159_v18 = vsel %vm5095_vm10, %v5094_v22, %v4639_v39  ;;  %v5720_v55 = vmax.f32 %v5656_v58, 0.0  ;;  %v5586_v51 = vmul.f32 %v20783_v36, %v5446_v47  ;;  %v16468_v22 = vld [vmem:[#allocation3 + $0x8] sm:$0xf]  ;;  %v16471_v58 = vld [vmem:[#allocation3 + $0x10] sm:$0xf] }
 0x371   :  { %15589 = vmatmul.mubr.msk.bf16.gmra.mxu0 %vm22456_vm11, %v5159_v18  ;;  %v9119_v17 = vsel %vm9068_vm2, %v8428_v27, %v8493_v29  ;;  %v5659_v29 = vadd.f32 %v20795_v34, %v5588_v42  ;;  %v8430_v32 = vrot.slane %v14570_v50, 1  ;;  %v9058_v54 = vrot.slane %v14654_v4, 1  ;;  %v8048_v18 = vld [vmem:[#allocation3 + $0x28] sm:$0xe] }
 0x372   :  { %8510 = vrot.lane.b32.xlu1 %v14593_v16, %s16715_s13  ;;  %15600 = vmatprep.mubr.msk.bf16.mxu0 %vm9068_vm2, %v14668_v20  ;;  %v5764_v19 = vmax.f32 %v5720_v55, %v5722_v53  ;;  %v5657_v5 = vadd.f32 %v20795_v34, %v5586_v51  ;;  %v9059_v52 = vrot.slane %v14655_v11, 1  ;;  %v16469_v16 = vld [vmem:[#allocation3 + $0x24] sm:$0x1]  ;;  %v8431_v7 = vrot.slane %v14571_v12, 1  ;;  %v16472_v55 = vld [vmem:[#allocation3 + $0x18] sm:$0xf] }
 0x373   :  { %v14572_v61 = vcombine.low %v8047_v0, %v16469_v16  ;;  %v5723_v45 = vmax.f32 %v5659_v29, 0.0  ;;  %v14573_v59 = vcombine.low %v8048_v18, %v16470_v23  ;;  %vm22457_vm10 = vcmask 1045509  }
 0x374   :  { %v8349_v57 = vpop.permute.xlu0 %8348  ;;  %v6148_v46 = vcombine.high %v5764_v19, %v5764_v19  ;;  %v6155_v1 = vrot.slane %v5764_v19, %v19303_v41  ;;  %v5721_v30 = vmax.f32 %v5657_v5, 0.0  ;;  %v14683_v56 = vcombine.low %v9058_v54, %v9059_v52  ;;  %vm22458_vm7 = vmmov %vm22457_vm10 }
 0x375   :  { %v9071_v25 = vsel %vm9068_vm2, %v16466_v44, %v8349_v57  ;;  %v8432_v37 = vrot.slane %v14572_v61, 1  ;;  %v8433_v47 = vrot.slane %v14573_v59, 1  ;;  %v16473_v59 = vld [vmem:[#allocation3 + $0x20] sm:$0xf]  ;;  %vm22459_vm4 = vmmov %vm22458_vm7 }
 0x376   :  { %8366 = vrot.lane.b32.xlu1 %v8305_v10, %s16715_s13  ;;  %v6163_v57 = vcombine.high %v6155_v1, %v6155_v1  ;;  %v14360_v8 = vrot.slane %v6155_v1, 9  ;;  %vm22460_vm8 = vmmov %vm22459_vm4 }
 0x377   :  { %v8495_v26 = vpop.permute.xlu1 %8494  ;;  %vm22461_vm9 = vmmov %vm22459_vm4 }
 0x378   :  { %v9122_v62 = vsel %vm9068_vm2, %v8429_v13, %v8495_v26  ;;  %v8497_v49 = vpop.permute.xlu0 %8496  ;;  %v5765_v26 = vmax.f32 %v5721_v30, %v5723_v45  ;;  %v14361_v50 = vrot.slane %v6163_v57, 9  ;;  %vm22462_vm1 = vmmov %vm22459_vm4 }
 0x379   :  { %v14665_v31 = vcombine.low %v9119_v17, %v9122_v62  ;;  %15601 = vmatmul.mubr.msk.bf16.vlgmr.msra.gmra.mxu0 %vm9068_vm2, %v14673_v63  ;;  %v9125_v13 = vsel %vm9068_vm2, %v8430_v32, %v8497_v49  ;;  %v6162_v17 = vrot.slane %v6148_v46, %v19303_v41  ;;  %v6944_v62 = vmax.f32 %v6155_v1, %v14360_v8 }
 0x37a   :  { %15604 = vmatprep.mubr.msk.bf16.mxu0 %vm9068_vm2, %v14678_v24  ;;  %v6165_v40 = vcombine.high %v5765_v26, %v5765_v26  ;;  %v6172_v4 = vrot.slane %v5765_v26, %v19303_v41  ;;  %v6945_v0 = vmax.f32 %v6163_v57, %v14361_v50  ;;  %v7978_v50 = vld [vmem:[#allocation3 + $0x6c] sm:$0x1] }
 0x37b   :  { %v8351_v27 = vpop.permute.xlu1 %8350  ;;  %9821 = vmatprep.mubr.bf16.mxu1 %v14665_v31  ;;  %v6164_v33 = vcombine.high %v6162_v17, %v6162_v17  ;;  %v14362_v35 = vrot.slane %v6162_v17, 9  ;;  %v15207_v44 = vpack.c.bf16 %v6944_v62, %v6944_v62 }
 0x37c   :  { %v9074_v39 = vsel %vm9068_vm2, %v16468_v22, %v8351_v27  ;;  %v8353_v14 = vpop.permute.xlu0 %8352  ;;  %v6180_v63 = vcombine.high %v6172_v4, %v6172_v4  ;;  %v15208_v49 = vpack.c.bf16 %v6945_v0, %v6945_v0  ;;  %v14364_v32 = vrot.slane %v6172_v4, 9 }
 0x37d   :  { %v14664_v20 = vcombine.low %v9071_v25, %v9074_v39  ;;  %v9077_v42 = vsel %vm9068_vm2, %v16471_v58, %v8353_v14  ;;  %v14363_v31 = vrot.slane %v6164_v33, 9  ;;  %v6946_v53 = vmax.f32 %v6162_v17, %v14362_v35 }
 0x37e   :  { %v6179_v25 = vrot.slane %v6165_v40, %v19303_v41  ;;  %v7584_v27 = vunpack.c.l.b16 %v15207_v44  ;;  %v14365_v19 = vrot.slane %v6180_v63, 9  ;;  %v7585_v54 = vunpack.c.l.b16 %v15208_v49  ;;  %v7975_v44 = vld [vmem:[#allocation3 + $0x68] sm:$0xf] }
 0x37f   :  { %v8499_v43 = vpop.permute.xlu1 %8498  ;;  %9822 = vmatmul.mubr.bf16.vlgmr.msra.gmra.mxu1 %v14664_v20  ;;  %v6947_v12 = vmax.f32 %v6164_v33, %v14363_v31  ;;  %v15209_v29 = vpack.c.bf16 %v6946_v53, %v6946_v53  ;;  %v6948_v14 = vmax.f32 %v6172_v4, %v14364_v32 }
 0x380   :  { %v9128_v38 = vsel %vm9068_vm2, %v8431_v7, %v8499_v43  ;;  %v8501_v10 = vpop.permute.xlu0 %8500  ;;  %v6181_v24 = vcombine.high %v6179_v25, %v6179_v25  ;;  %v7768_v18 = vrot.slane %v7584_v27, 7  ;;  %v14366_v20 = vrot.slane %v6179_v25, 9 }
 0x381   :  { %v14670_v3 = vcombine.low %v9125_v13, %v9128_v38  ;;  %15605 = vmatmul.mubr.msk.bf16.gmra.mxu0 %vm9068_vm2, %v14683_v56  ;;  %v9131_v5 = vsel %vm9068_vm2, %v8432_v37, %v8501_v10  ;;  %v15210_v39 = vpack.c.bf16 %v6947_v12, %v6947_v12  ;;  %v7586_v52 = vunpack.c.l.b16 %v15209_v29  ;;  %v16474_v56 = vld [vmem:[#allocation3 + $0x28] sm:$0xf]  ;;  %v20924_v12 = vld [vmem:[#allocation3 + $0x64] sm:$0x1]  ;;  %v8148_v29 = vld [vmem:[#allocation3 + $0x60] sm:$0xe] }
 0x382   :  { %v14367_v46 = vrot.slane %v6181_v24, 9  ;;  %v7769_v7 = vrot.slane %v7585_v54, 6  ;;  %v6949_v45 = vmax.f32 %v6180_v63, %v14365_v19  ;;  %v6950_v43 = vmax.f32 %v6179_v25, %v14366_v20  ;;  %v8021_v63 = vld [vmem:[#allocation3 + $0x60] sm:$0xf] }
 0x383   :  { %v8355_v11 = vpop.permute.xlu1 %8354  ;;  %9829 = vmatprep.mubr.bf16.mxu1 %v14670_v3  ;;  %v7587_v30 = vunpack.c.l.b16 %v15210_v39  ;;  %v7771_v13 = vrot.slane %v7586_v52, 5  ;;  %v15211_v3 = vpack.c.bf16 %v6948_v14, %v6948_v14  ;;  %v14562_v49 = vcombine.low %v8021_v63, %v20924_v12 }
 0x384   :  { %v9080_v51 = vsel %vm9068_vm2, %v16472_v55, %v8355_v11  ;;  %v8357_v16 = vpop.permute.xlu0 %8356  ;;  %v6951_v23 = vmax.f32 %v6181_v24, %v14367_v46  ;;  %v7770_v8 = vsel %vm7634_vm3, %v7769_v7, %v7768_v18  ;;  %v15212_v33 = vpack.c.bf16 %v6949_v45, %v6949_v45  ;;  %v8132_v24 = vld [vmem:[#allocation3 + $0x64] sm:$0x1] }
 0x385   :  { %v14669_v2 = vcombine.low %v9077_v42, %v9080_v51  ;;  %v9083_v17 = vsel %vm9068_vm2, %v16473_v59, %v8357_v16  ;;  %v7773_v38 = vrot.slane %v7587_v30, 4  ;;  %v7772_v26 = vsel %vm7637_vm14, %v7771_v13, %v7770_v8 }
 0x386   :  { %v15213_v58 = vpack.c.bf16 %v6950_v43, %v6950_v43  ;;  %v15265_v42 = vpack.c.bf16 %v6951_v23, %v6951_v23  ;;  %v7588_v10 = vunpack.c.l.b16 %v15211_v3  ;;  %v7589_v62 = vunpack.c.l.b16 %v15212_v33 }
 0x387   :  { %9830 = vmatmul.mubr.bf16.gmra.mxu1 %v14669_v2  ;;  %v8503_v22 = vpop.permute.xlu1 %8502  ;;  %v7774_v4 = vsel %vm7640_vm13, %v7773_v38, %v7772_v26  ;;  %v8309_v27 = vshll.u32 %v14562_v49, 16  ;;  %v14656_v32 = vcombine.low %v8148_v29, %v8132_v24  ;;  %v8307_v18 = vshrl.u32 %v14562_v49, 16 }
 0x388   :  { %v9134_v61 = vsel %vm9068_vm2, %v8433_v47, %v8503_v22  ;;  %v7590_v40 = vunpack.c.l.b16 %v15213_v58  ;;  %v7979_v11 = vsel %vm19695_vm6, %v15265_v42, %v7978_v50  ;;  %v7775_v47 = vrot.slane %v7588_v10, 3 }
 0x389   :  { %v14675_v1 = vcombine.low %v9131_v5, %v9134_v61  ;;  %v7777_v31 = vrot.slane %v7589_v62, 2  ;;  %7980 = vst [vmem:[#allocation3 + $0x6c] sm:$0x1] %v7979_v11  ;;  %v8311_v54 = vrot.slane %v8309_v27, 1  ;;  %v9060_v20 = vrot.slane %v14656_v32, 1 }
 0x38a   :  { %v7779_v0 = vrot.slane %v7590_v40, 1  ;;  %v7776_v53 = vsel %vm22457_vm10, %v7775_v47, %v7774_v4  ;;  %v8049_v62 = vld [vmem:[#allocation3 + $0x30] sm:$0xe]  ;;  %v8050_v27 = vld [vmem:[#allocation3 + $0x38] sm:$0xe] }
 0x38b   :  { %v8359_v57 = vpop.permute.xlu1 %8358  ;;  %9837 = vmatprep.mubr.bf16.mxu1 %v14675_v1  ;;  %v7778_v55 = vsel %vm7646_vm12, %v7777_v31, %v7776_v53  ;;  %v8312_v13 = vor.u32 %v8311_v54, %v8307_v18 }
 0x38c   :  { %v9086_v37 = vsel %vm9068_vm2, %v16474_v56, %v8359_v57  ;;  %v7780_v51 = vsel %vm7649_vm0, %v7779_v0, %v7778_v55 }
 0x38d   :  { %v14674_v35 = vcombine.low %v9083_v17, %v9086_v37  ;;  %v7866_v25 = vpack.c.b16 %v7780_v51, %v7780_v51 }
 0x38f   :  { %9838 = vmatmul.mubr.bf16.gmra.mxu1 %v14674_v35  ;;  %v7976_v2 = vsel %vm19742_vm15, %v7866_v25, %v7975_v44  ;;  %v16475_v25 = vld [vmem:[#allocation3 + $0x34] sm:$0x1] }
 0x390   :  { %7977 = vst [vmem:[#allocation3 + $0x68] sm:$0xf] %v7976_v2  ;;  %v8133_v5 = vld [vmem:[#allocation3 + $0x6c] sm:$0x1]  ;;  %v14574_v63 = vcombine.low %v8049_v62, %v16475_v25 }
 0x397   :  { %v8069_v19 = vld [vmem:[#allocation3 + $0x68] sm:$0xf] }
 0x398   :  { %v8149_v22 = vld [vmem:[#allocation3 + $0x68] sm:$0xe]  ;;  %v14594_v39 = vcombine.low %v8069_v19, %v8069_v19 }
 0x399   :  { %v14657_v52 = vcombine.low %v8149_v22, %v8133_v5 }
 0x39a   :  { %8512 = vrot.lane.b32.xlu0 %v14594_v39, %s16715_s13 }
 0x39b   :  { %v15574_v16 = vpop.f32.mrf.mxu0  ;;  %v9061_v46 = vrot.slane %v14657_v52, 1 }
 0x39c   :  { %v5591_v61 = vmul.f32 %v20783_v36, %v15574_v16 }
 0x39d   :  { %v5459_v1 = vpop.f32.mrf.mxu0  ;;  %v14688_v14 = vcombine.low %v9060_v20, %v9061_v46  ;;  %v14575_v20 = vcombine.low %v8050_v27, %v20735_v48  ;;  %v20955_v27 = vld [vmem:[#allocation3 + $0x68] sm:$0xf] }
 0x39e   :  { %v5662_v30 = vadd.f32 %v20795_v34, %v5591_v61  ;;  %v5589_v7 = vmul.f32 %v20783_v36, %v5459_v1  ;;  %8368 = vrot.lane.b32.xlu0 %v8312_v13, %s16715_s13 }
 0x39f   :  { %v15575_v45 = vpop.f32.mrf.mxu0  ;;  %15608 = vmatprep.mubr.msk.bf16.mxu0 %vm9068_vm2, %v14688_v14 }
 0x3a0   :  { %v5660_v43 = vadd.f32 %v20795_v34, %v5589_v7  ;;  %v5592_v23 = vmul.f32 %v20783_v36, %v15575_v45  ;;  %v5726_v17 = vmax.f32 %v5662_v30, 0.0 }
 0x3a1   :  { %v5462_v59 = vpop.f32.mrf.mxu0  ;;  %v8505_v46 = vpop.permute.xlu0 %8504 }
 0x3a2   :  { %v5724_v57 = vmax.f32 %v5660_v43, 0.0  ;;  %v5663_v8 = vadd.f32 %v20795_v34, %v5592_v23  ;;  %v5590_v38 = vmul.f32 %v20783_v36, %v5462_v59 }
 0x3a4   :  { %v5766_v56 = vmax.f32 %v5724_v57, %v5726_v17  ;;  %v5661_v37 = vadd.f32 %v20795_v34, %v5590_v38  ;;  %v5727_v33 = vmax.f32 %v5663_v8, 0.0  ;;  %v8434_v38 = vrot.slane %v14574_v63, 1 }
 0x3a6   :  { %v6182_v26 = vcombine.high %v5766_v56, %v5766_v56  ;;  %v6189_v3 = vrot.slane %v5766_v56, %v19303_v41  ;;  %v5725_v50 = vmax.f32 %v5661_v37, 0.0 }
 0x3a8   :  { %v6196_v35 = vrot.slane %v6182_v26, %v19303_v41  ;;  %v6197_v58 = vcombine.high %v6189_v3, %v6189_v3  ;;  %v14368_v42 = vrot.slane %v6189_v3, 9  ;;  %v5767_v10 = vmax.f32 %v5725_v50, %v5727_v33 }
 0x3a9   :  { %v8435_v26 = vrot.slane %v14575_v20, 1 }
 0x3aa   :  { %v6198_v40 = vcombine.high %v6196_v35, %v6196_v35  ;;  %v14369_v4 = vrot.slane %v6197_v58, 9  ;;  %v14370_v11 = vrot.slane %v6196_v35, 9  ;;  %v6952_v47 = vmax.f32 %v6189_v3, %v14368_v42 }
 0x3ab   :  { %v6199_v31 = vcombine.high %v5767_v10, %v5767_v10  ;;  %v6206_v0 = vrot.slane %v5767_v10, %v19303_v41  ;;  %v9137_v42 = vsel %vm9068_vm2, %v8434_v38, %v8505_v46 }
 0x3ac   :  { %v14371_v53 = vrot.slane %v6198_v40, 9  ;;  %v6953_v55 = vmax.f32 %v6197_v58, %v14369_v4  ;;  %v6954_v51 = vmax.f32 %v6196_v35, %v14370_v11  ;;  %v15215_v44 = vpack.c.bf16 %v6952_v47, %v6952_v47  ;;  %v7984_v35 = vld [vmem:[#allocation3 + $0x74] sm:$0x1]  ;;  %v8361_v4 = vpop.permute.xlu0 %8360 }
 0x3ad   :  { %v6213_v2 = vrot.slane %v6199_v31, %v19303_v41  ;;  %v6214_v49 = vcombine.high %v6206_v0, %v6206_v0  ;;  %v14372_v29 = vrot.slane %v6206_v0, 9 }
 0x3ae   :  { %v6955_v24 = vmax.f32 %v6198_v40, %v14371_v53  ;;  %v15216_v32 = vpack.c.bf16 %v6953_v55, %v6953_v55  ;;  %v15217_v19 = vpack.c.bf16 %v6954_v51, %v6954_v51  ;;  %v7592_v5 = vunpack.c.l.b16 %v15215_v44  ;;  %v16476_v44 = vld [vmem:[#allocation3 + $0x30] sm:$0xf] }
 0x3af   :  { %v6215_v22 = vcombine.high %v6213_v2, %v6213_v2  ;;  %v14373_v39 = vrot.slane %v6214_v49, 9  ;;  %v14374_v54 = vrot.slane %v6213_v2, 9  ;;  %v6956_v52 = vmax.f32 %v6206_v0, %v14372_v29 }
 0x3b0   :  { %v15218_v16 = vpack.c.bf16 %v6955_v24, %v6955_v24  ;;  %v7593_v61 = vunpack.c.l.b16 %v15216_v32  ;;  %v7594_v18 = vunpack.c.l.b16 %v15217_v19  ;;  %v7781_v45 = vrot.slane %v7592_v5, 7  ;;  %v20957_v19 = vld [vmem:[#allocation3 + $0x6c] sm:$0x1] }
 0x3b1   :  { %v14375_v1 = vrot.slane %v6215_v22, 9  ;;  %v6957_v30 = vmax.f32 %v6214_v49, %v14373_v39  ;;  %v6958_v7 = vmax.f32 %v6213_v2, %v14374_v54  ;;  %v15219_v13 = vpack.c.bf16 %v6956_v52, %v6956_v52  ;;  %v7981_v2 = vld [vmem:[#allocation3 + $0x70] sm:$0xf]  ;;  %v16477_v49 = vld [vmem:[#allocation3 + $0x38] sm:$0xf] }
 0x3b2   :  { %v7595_v14 = vunpack.c.l.b16 %v15218_v16  ;;  %v7782_v43 = vrot.slane %v7593_v61, 6  ;;  %v7784_v23 = vrot.slane %v7594_v18, 5  ;;  %v9089_v25 = vsel %vm9068_vm2, %v16476_v44, %v8361_v4 }
 0x3b3   :  { %v6959_v59 = vmax.f32 %v6215_v22, %v14375_v1  ;;  %v15220_v17 = vpack.c.bf16 %v6957_v30, %v6957_v30  ;;  %v15221_v57 = vpack.c.bf16 %v6958_v7, %v6958_v7  ;;  %v7596_v8 = vunpack.c.l.b16 %v15219_v13 }
 0x3b4   :  { %v7783_v56 = vsel %vm7634_vm3, %v7782_v43, %v7781_v45  ;;  %v7786_v37 = vrot.slane %v7595_v14, 4  ;;  %v14563_v22 = vcombine.low %v20955_v27, %v20957_v19 }
 0x3b5   :  { %v7785_v48 = vsel %vm7637_vm14, %v7784_v23, %v7783_v56  ;;  %v7597_v3 = vunpack.c.l.b16 %v15220_v17  ;;  %v7598_v33 = vunpack.c.l.b16 %v15221_v57  ;;  %v7788_v50 = vrot.slane %v7596_v8, 3 }
 0x3b6   :  { %v7787_v10 = vsel %vm7640_vm13, %v7786_v37, %v7785_v48  ;;  %v15266_v62 = vpack.c.bf16 %v6959_v59, %v6959_v59  ;;  %v8316_v16 = vshll.u32 %v14563_v22, 16  ;;  %v8314_v17 = vshrl.u32 %v14563_v22, 16 }
 0x3b7   :  { %v7789_v11 = vsel %vm22458_vm7, %v7788_v50, %v7787_v10  ;;  %v7790_v47 = vrot.slane %v7597_v3, 2  ;;  %v7792_v31 = vrot.slane %v7598_v33, 1 }
 0x3b8   :  { %v8507_v58 = vpop.permute.xlu1 %8506  ;;  %v7985_v53 = vsel %vm19695_vm6, %v15266_v62, %v7984_v35  ;;  %v8318_v14 = vrot.slane %v8316_v16, 1  ;;  %v8051_v16 = vld [vmem:[#allocation3 + $0x50] sm:$0xe] }
 0x3b9   :  { %v9140_v40 = vsel %vm9068_vm2, %v8435_v26, %v8507_v58  ;;  %v7791_v55 = vsel %vm7646_vm12, %v7790_v47, %v7789_v11  ;;  %7986 = vst [vmem:[#allocation3 + $0x74] sm:$0x1] %v7985_v53 }
 0x3ba   :  { %v14680_v0 = vcombine.low %v9137_v42, %v9140_v40  ;;  %v7793_v63 = vsel %vm7649_vm0, %v7792_v31, %v7791_v55  ;;  %v8319_v38 = vor.u32 %v8318_v14, %v8314_v17 }
 0x3bb   :  { %v7868_v24 = vpack.c.b16 %v7793_v63, %v7793_v63 }
 0x3bc   :  { %9845 = vmatprep.mubr.bf16.mxu1 %v14680_v0 }
 0x3bd   :  { %v8363_v51 = vpop.permute.xlu1 %8362  ;;  %v7982_v5 = vsel %vm19742_vm15, %v7868_v24, %v7981_v2 }
 0x3be   :  { %v9092_v29 = vsel %vm9068_vm2, %v16477_v49, %v8363_v51  ;;  %7983 = vst [vmem:[#allocation3 + $0x70] sm:$0xf] %v7982_v5 }
 0x3bf   :  { %v14679_v32 = vcombine.low %v9089_v25, %v9092_v29 }
 0x3c1   :  { %9846 = vmatmul.mubr.bf16.gmra.mxu1 %v14679_v32 }
 0x3c3   :  { %v15578_v39 = vpop.f32.mrf.mxu0 }
 0x3c4   :  { %v5595_v54 = vmul.f32 %v20783_v36, %v15578_v39 }
 0x3c5   :  { %v5475_v52 = vpop.f32.mrf.mxu0  ;;  %v8070_v13 = vld [vmem:[#allocation3 + $0x70] sm:$0xf] }
 0x3c6   :  { %v5666_v61 = vadd.f32 %v20795_v34, %v5595_v54  ;;  %v5593_v18 = vmul.f32 %v20783_v36, %v5475_v52  ;;  %v14595_v59 = vcombine.low %v8070_v13, %v8070_v13 }
 0x3c7   :  { %v15579_v20 = vpop.f32.mrf.mxu0 }
 0x3c8   :  { %v5664_v46 = vadd.f32 %v20795_v34, %v5593_v18  ;;  %v5596_v1 = vmul.f32 %v20783_v36, %v15579_v20  ;;  %v5730_v30 = vmax.f32 %v5666_v61, 0.0  ;;  %8514 = vrot.lane.b32.xlu1 %v14595_v59, %s16715_s13  ;;  %v20982_v59 = vld [vmem:[%s22124_s2] ss:$0 sm:$0xff] }
 0x3c9   :  { %v5478_v7 = vpop.f32.mrf.mxu0 }
 0x3ca   :  { %v5728_v45 = vmax.f32 %v5664_v46, 0.0  ;;  %v5667_v43 = vadd.f32 %v20795_v34, %v5596_v1  ;;  %v5594_v23 = vmul.f32 %v20783_v36, %v5478_v7 }
 0x3cc   :  { %v5768_v57 = vmax.f32 %v5728_v45, %v5730_v30  ;;  %v5665_v8 = vadd.f32 %v20795_v34, %v5594_v23  ;;  %v5731_v26 = vmax.f32 %v5667_v43, 0.0  ;;  %8370 = vrot.lane.b32.xlu1 %v8319_v38, %s16715_s13  ;;  %v14576_v23 = vcombine.low %v8051_v16, %v20831_v21 }
 0x3ce   :  { %v6216_v56 = vcombine.high %v5768_v57, %v5768_v57  ;;  %v6223_v37 = vrot.slane %v5768_v57, %v19303_v41  ;;  %v5729_v48 = vmax.f32 %v5665_v8, 0.0 }
 0x3d0   :  { %v6230_v3 = vrot.slane %v6216_v56, %v19303_v41  ;;  %v6231_v33 = vcombine.high %v6223_v37, %v6223_v37  ;;  %v14376_v50 = vrot.slane %v6223_v37, 9  ;;  %v5769_v35 = vmax.f32 %v5729_v48, %v5731_v26  ;;  %v8052_v48 = vld [vmem:[#allocation3 + $0x58] sm:$0xe] }
 0x3d2   :  { %v6232_v36 = vcombine.high %v6230_v3, %v6230_v3  ;;  %v14377_v58 = vrot.slane %v6231_v33, 9  ;;  %v14378_v42 = vrot.slane %v6230_v3, 9  ;;  %v6960_v10 = vmax.f32 %v6223_v37, %v14376_v50  ;;  %v7990_v37 = vld [vmem:[#allocation3 + $0x7c] sm:$0x1]  ;;  %v20987_v50 = vld [vmem:[#allocation5] ss:$0 sm:$0xff] }
 0x3d3   :  { %v6233_v34 = vcombine.high %v5769_v35, %v5769_v35  ;;  %v6240_v62 = vrot.slane %v5769_v35, %v19303_v41 }
 0x3d4   :  { %v14379_v40 = vrot.slane %v6232_v36, 9  ;;  %v6961_v4 = vmax.f32 %v6231_v33, %v14377_v58  ;;  %v6962_v11 = vmax.f32 %v6230_v3, %v14378_v42  ;;  %v15223_v47 = vpack.c.bf16 %v6960_v10, %v6960_v10 }
 0x3d5   :  { %v6247_v31 = vrot.slane %v6233_v34, %v19303_v41  ;;  %v6248_v0 = vcombine.high %v6240_v62, %v6240_v62  ;;  %v14380_v53 = vrot.slane %v6240_v62, 9 }
 0x3d6   :  { %v6963_v55 = vmax.f32 %v6232_v36, %v14379_v40  ;;  %v15224_v51 = vpack.c.bf16 %v6961_v4, %v6961_v4  ;;  %v15225_v44 = vpack.c.bf16 %v6962_v11, %v6962_v11  ;;  %v7600_v25 = vunpack.c.l.b16 %v15223_v47  ;;  %v8023_v4 = vld [vmem:[#allocation3 + $0x70] sm:$0xf] }
 0x3d7   :  { %v6249_v63 = vcombine.high %v6247_v31, %v6247_v31  ;;  %v14381_v2 = vrot.slane %v6248_v0, 9  ;;  %v14382_v49 = vrot.slane %v6247_v31, 9  ;;  %v6964_v29 = vmax.f32 %v6240_v62, %v14380_v53 }
 0x3d8   :  { %v15226_v24 = vpack.c.bf16 %v6963_v55, %v6963_v55  ;;  %v7601_v32 = vunpack.c.l.b16 %v15224_v51  ;;  %v7602_v5 = vunpack.c.l.b16 %v15225_v44  ;;  %v7794_v18 = vrot.slane %v7600_v25, 7  ;;  %v7987_v51 = vld [vmem:[#allocation3 + $0x78] sm:$0xf]  ;;  %v8509_v44 = vpop.permute.xlu0 %8508 }
 0x3d9   :  { %v14383_v22 = vrot.slane %v6249_v63, 9  ;;  %v6965_v39 = vmax.f32 %v6248_v0, %v14381_v2  ;;  %v6966_v54 = vmax.f32 %v6247_v31, %v14382_v49  ;;  %v15227_v52 = vpack.c.bf16 %v6964_v29, %v6964_v29  ;;  %v21001_v49 = vld [vmem:[#allocation3 + $0x74] sm:$0x1] }
 0x3da   :  { %v7603_v61 = vunpack.c.l.b16 %v15226_v24  ;;  %v7795_v20 = vrot.slane %v7601_v32, 6  ;;  %v7797_v46 = vrot.slane %v7602_v5, 5  ;;  %v14577_v11 = vcombine.low %v8052_v48, %v20854_v6 }
 0x3db   :  { %v6967_v1 = vmax.f32 %v6249_v63, %v14383_v22  ;;  %v15228_v30 = vpack.c.bf16 %v6965_v39, %v6965_v39  ;;  %v15229_v7 = vpack.c.bf16 %v6966_v54, %v6966_v54  ;;  %v7604_v13 = vunpack.c.l.b16 %v15227_v52 }
 0x3dc   :  { %v7796_v45 = vsel %vm7634_vm3, %v7795_v20, %v7794_v18  ;;  %v7799_v43 = vrot.slane %v7603_v61, 4  ;;  %v8436_v31 = vrot.slane %v14576_v23, 1  ;;  %v21004_v6 = vcombine.low %v8023_v4, %v21001_v49  ;;  %v21011_v20 = vld [vmem:[#allocation3 + $0x70] sm:$0xe]  ;;  %v21016_v23 = vld [vmem:[#allocation3 + $0x74] sm:$0x1] }
 0x3dd   :  { %v15582_v14 = vpop.f32.mrf.mxu0  ;;  %v7798_v57 = vsel %vm7637_vm14, %v7797_v46, %v7796_v45  ;;  %v7605_v8 = vunpack.c.l.b16 %v15228_v30  ;;  %v7606_v38 = vunpack.c.l.b16 %v15229_v7  ;;  %v7801_v56 = vrot.slane %v7604_v13, 3 }
 0x3de   :  { %v5599_v17 = vmul.f32 %v20982_v59, %v15582_v14  ;;  %v7800_v3 = vsel %vm7640_vm13, %v7799_v43, %v7798_v57  ;;  %v15267_v33 = vpack.c.bf16 %v6967_v1, %v6967_v1  ;;  %v8437_v5 = vrot.slane %v14577_v11, 1  ;;  %v8365_v1 = vpop.permute.xlu0 %8364 }
 0x3df   :  { %v5491_v26 = vpop.f32.mrf.mxu0  ;;  %v7802_v36 = vsel %vm22459_vm4, %v7801_v56, %v7800_v3  ;;  %v7803_v58 = vrot.slane %v7605_v8, 2  ;;  %v7805_v42 = vrot.slane %v7606_v38, 1  ;;  %v9143_v39 = vsel %vm9068_vm2, %v8436_v31, %v8509_v44 }
 0x3e0   :  { %v5670_v21 = vadd.f32 %v20987_v50, %v5599_v17  ;;  %v5597_v35 = vmul.f32 %v20982_v59, %v5491_v26  ;;  %v7991_v34 = vsel %vm19695_vm6, %v15267_v33, %v7990_v37  ;;  %v8323_v30 = vshll.u32 %v21004_v6, 16 }
 0x3e1   :  { %v15583_v10 = vpop.f32.mrf.mxu0  ;;  %v7804_v47 = vsel %vm7646_vm12, %v7803_v58, %v7802_v36  ;;  %7992 = vst [vmem:[#allocation3 + $0x7c] sm:$0x1] %v7991_v34  ;;  %v8321_v17 = vshrl.u32 %v21004_v6, 16  ;;  %v14658_v57 = vcombine.low %v21011_v20, %v21016_v23  ;;  %v9095_v38 = vsel %vm9068_vm2, %v20829_v60, %v8365_v1 }
 0x3e2   :  { %v5668_v62 = vadd.f32 %v20987_v50, %v5597_v35  ;;  %v5600_v40 = vmul.f32 %v20982_v59, %v15583_v10  ;;  %v5734_v0 = vmax.f32 %v5670_v21, 0.0  ;;  %v7806_v55 = vsel %vm7649_vm0, %v7805_v42, %v7804_v47 }
 0x3e3   :  { %v5494_v53 = vpop.f32.mrf.mxu0  ;;  %v7870_v29 = vpack.c.b16 %v7806_v55, %v7806_v55  ;;  %v8325_v21 = vrot.slane %v8323_v30, 1 }
 0x3e4   :  { %v5732_v25 = vmax.f32 %v5668_v62, 0.0  ;;  %v5671_v63 = vadd.f32 %v20987_v50, %v5600_v40  ;;  %v5598_v2 = vmul.f32 %v20982_v59, %v5494_v53  ;;  %v8511_v52 = vpop.permute.xlu1 %8510 }
 0x3e5   :  { %v7988_v22 = vsel %vm19742_vm15, %v7870_v29, %v7987_v51  ;;  %v9146_v46 = vsel %vm9068_vm2, %v8437_v5, %v8511_v52 }
 0x3e6   :  { %v5770_v24 = vmax.f32 %v5732_v25, %v5734_v0  ;;  %v5669_v32 = vadd.f32 %v20987_v50, %v5598_v2  ;;  %v5735_v54 = vmax.f32 %v5671_v63, 0.0  ;;  %7989 = vst [vmem:[#allocation3 + $0x78] sm:$0xf] %v7988_v22  ;;  %v14685_v7 = vcombine.low %v9143_v39, %v9146_v46 }
 0x3e8   :  { %v6250_v16 = vcombine.high %v5770_v24, %v5770_v24  ;;  %v6257_v61 = vrot.slane %v5770_v24, %v19303_v41  ;;  %v5733_v18 = vmax.f32 %v5669_v32, 0.0  ;;  %v8367_v8 = vpop.permute.xlu1 %8366  ;;  %9853 = vmatprep.mubr.bf16.mxu1 %v14685_v7  ;;  %v21027_v46 = vld [vmem:[#allocation3 + $0x7c] sm:$0x1] }
 0x3e9   :  { %v9098_v35 = vsel %vm9068_vm2, %v20846_v15, %v8367_v8 }
 0x3ea   :  { %v6264_v13 = vrot.slane %v6250_v16, %v19303_v41  ;;  %v6265_v14 = vcombine.high %v6257_v61, %v6257_v61  ;;  %v14384_v45 = vrot.slane %v6257_v61, 9  ;;  %v5771_v43 = vmax.f32 %v5733_v18, %v5735_v54 }
 0x3eb   :  { %v14684_v60 = vcombine.low %v9095_v38, %v9098_v35  ;;  %v7996_v38 = vld [vmem:[#allocation3 + $0x84] sm:$0x1] }
 0x3ec   :  { %v6266_v56 = vcombine.high %v6264_v13, %v6264_v13  ;;  %v14385_v37 = vrot.slane %v6265_v14, 9  ;;  %v14386_v26 = vrot.slane %v6264_v13, 9  ;;  %v6968_v48 = vmax.f32 %v6257_v61, %v14384_v45 }
 0x3ed   :  { %v6267_v3 = vcombine.high %v5771_v43, %v5771_v43  ;;  %v6274_v33 = vrot.slane %v5771_v43, %v19303_v41  ;;  %v8071_v44 = vld [vmem:[#allocation3 + $0x78] sm:$0xf]  ;;  %9854 = vmatmul.mubr.bf16.gmra.mxu1 %v14684_v60 }
 0x3ee   :  { %v14387_v36 = vrot.slane %v6266_v56, 9  ;;  %v6969_v58 = vmax.f32 %v6265_v14, %v14385_v37  ;;  %v6970_v42 = vmax.f32 %v6264_v13, %v14386_v26  ;;  %v15231_v10 = vpack.c.bf16 %v6968_v48, %v6968_v48  ;;  %v8151_v5 = vld [vmem:[#allocation3 + $0x78] sm:$0xe] }
 0x3ef   :  { %v6281_v34 = vrot.slane %v6267_v3, %v19303_v41  ;;  %v6282_v62 = vcombine.high %v6274_v33, %v6274_v33  ;;  %v14388_v40 = vrot.slane %v6274_v33, 9  ;;  %v14596_v52 = vcombine.low %v8071_v44, %v8071_v44 }
 0x3f0   :  { %v6971_v4 = vmax.f32 %v6266_v56, %v14387_v36  ;;  %v15232_v11 = vpack.c.bf16 %v6969_v58, %v6969_v58  ;;  %v15233_v47 = vpack.c.bf16 %v6970_v42, %v6970_v42  ;;  %v7608_v31 = vunpack.c.l.b16 %v15231_v10  ;;  %v7993_v10 = vld [vmem:[#allocation3 + $0x80] sm:$0xf] }
 0x3f1   :  { %v6283_v0 = vcombine.high %v6281_v34, %v6281_v34  ;;  %v14389_v53 = vrot.slane %v6282_v62, 9  ;;  %v14390_v55 = vrot.slane %v6281_v34, 9  ;;  %v6972_v51 = vmax.f32 %v6274_v33, %v14388_v40  ;;  %8516 = vrot.lane.b32.xlu0 %v14596_v52, %s16715_s13  ;;  %v21047_v40 = vld [vmem:[#allocation3 + $0x7c] sm:$0x1] }
 0x3f2   :  { %v15234_v15 = vpack.c.bf16 %v6971_v4, %v6971_v4  ;;  %v7609_v25 = vunpack.c.l.b16 %v15232_v11  ;;  %v7610_v63 = vunpack.c.l.b16 %v15233_v47  ;;  %v7807_v2 = vrot.slane %v7608_v31, 7 }
 0x3f3   :  { %v14391_v29 = vrot.slane %v6283_v0, 9  ;;  %v6973_v6 = vmax.f32 %v6282_v62, %v14389_v53  ;;  %v6974_v24 = vmax.f32 %v6281_v34, %v14390_v55  ;;  %v15235_v32 = vpack.c.bf16 %v6972_v51, %v6972_v51  ;;  %v21043_v34 = vld [vmem:[#allocation3 + $0x7c] sm:$0x1] }
 0x3f4   :  { %v7611_v22 = vunpack.c.l.b16 %v15234_v15  ;;  %v7808_v39 = vrot.slane %v7609_v25, 6  ;;  %v7810_v54 = vrot.slane %v7610_v63, 5  ;;  %v14659_v7 = vcombine.low %v8151_v5, %v21027_v46 }
 0x3f5   :  { %v6975_v16 = vmax.f32 %v6283_v0, %v14391_v29  ;;  %v15236_v61 = vpack.c.bf16 %v6973_v6, %v6973_v6  ;;  %v15237_v18 = vpack.c.bf16 %v6974_v24, %v6974_v24  ;;  %v7612_v20 = vunpack.c.l.b16 %v15235_v32 }
 0x3f6   :  { %v7809_v1 = vsel %vm7634_vm3, %v7808_v39, %v7807_v2  ;;  %v7812_v30 = vrot.slane %v7611_v22, 4  ;;  %v9062_v13 = vrot.slane %v14658_v57, 1  ;;  %v8326_v26 = vor.u32 %v8325_v21, %v8321_v17  ;;  %v21041_v21 = vld [vmem:[#allocation3 + $0x78] sm:$0xf] }
 0x3f7   :  { %v7811_v14 = vsel %vm7637_vm14, %v7810_v54, %v7809_v1  ;;  %v7613_v45 = vunpack.c.l.b16 %v15236_v61  ;;  %v7614_v43 = vunpack.c.l.b16 %v15237_v18  ;;  %v7814_v8 = vrot.slane %v7612_v20, 3 }
 0x3f8   :  { %v7813_v56 = vsel %vm7640_vm13, %v7812_v30, %v7811_v14  ;;  %v15268_v37 = vpack.c.bf16 %v6975_v16, %v6975_v16  ;;  %v9063_v48 = vrot.slane %v14659_v7, 1  ;;  %8372 = vrot.lane.b32.xlu0 %v8326_v26, %s16715_s13  ;;  %v21050_v60 = vcombine.low %v8071_v44, %v21043_v34 }
 0x3f9   :  { %v7815_v3 = vsel %vm22460_vm8, %v7814_v8, %v7813_v56  ;;  %v7816_v33 = vrot.slane %v7613_v45, 2  ;;  %v7818_v35 = vrot.slane %v7614_v43, 1  ;;  %v14565_v4 = vcombine.low %v21041_v21, %v21047_v40 }
 0x3fa   :  { %v7997_v36 = vsel %vm19695_vm6, %v15268_v37, %v7996_v38  ;;  %v14693_v57 = vcombine.low %v9062_v13, %v9063_v48 }
 0x3fb   :  { %v7817_v58 = vsel %vm7646_vm12, %v7816_v33, %v7815_v3  ;;  %7998 = vst [vmem:[#allocation3 + $0x84] sm:$0x1] %v7997_v36  ;;  %v8330_v11 = vshll.u32 %v14565_v4, 16  ;;  %v8328_v53 = vshrl.u32 %v14565_v4, 16 }
 0x3fc   :  { %v7819_v42 = vsel %vm7649_vm0, %v7818_v35, %v7817_v58  ;;  %15609 = vmatmul.mubr.msk.bf16.gmra.mxu0 %vm9068_vm2, %v14693_v57 }
 0x3fd   :  { %v7872_v17 = vpack.c.b16 %v7819_v42, %v7819_v42  ;;  %v8332_v0 = vrot.slane %v8330_v11, 1 }
 0x3ff   :  { %v7994_v62 = vsel %vm19742_vm15, %v7872_v17, %v7993_v10  ;;  %v8333_v55 = vor.u32 %v8332_v0, %v8328_v53  ;;  %v16045_v0 = vld [vmem:[%s22126_s4 + $0xf8] sm:$0xff]  }
 0x400   :  { %7995 = vst [vmem:[#allocation3 + $0x80] sm:$0xf] %v7994_v62  ;;  %v16046_v53 = vld [vmem:[%s22126_s4 + $0xb8] sm:$0xff]   ;;  %15402 = vmatprep.subr.bf16.mxu1 %v16045_v0 }
 0x401   :  { %15403 = vmatpush3.bf16.msra.mxu1 %v16046_v53  ;;  %v16481_v53 = vld [vmem:[#allocation3 + $0x24] sm:$0x1] }
 0x402   :  { %v21066_v14 = vld [vmem:[#allocation3 + $0x84] sm:$0x1] }
 0x407   :  { %v8072_v47 = vld [vmem:[#allocation3 + $0x80] sm:$0xf] }
 0x408   :  { %v14597_v31 = vcombine.low %v8072_v47, %v8072_v47  ;;  %v21069_v45 = vcombine.low %v8072_v47, %v21066_v14 }
 0x40a   :  { %8518 = vrot.lane.b32.xlu1 %v14597_v31, %s16715_s13 }
 0x40b   :  { %v15586_v51 = vpop.f32.mrf.mxu0 }
 0x40c   :  { %v5603_v15 = vmul.f32 %v20982_v59, %v15586_v51 }
 0x40d   :  { %v5507_v25 = vpop.f32.mrf.mxu0 }
 0x40e   :  { %8374 = vrot.lane.b32.xlu1 %v8333_v55, %s16715_s13  ;;  %v5674_v44 = vadd.f32 %v20987_v50, %v5603_v15  ;;  %v5601_v63 = vmul.f32 %v20982_v59, %v5507_v25 }
 0x40f   :  { %v15587_v2 = vpop.f32.mrf.mxu0 }
 0x410   :  { %v5672_v29 = vadd.f32 %v20987_v50, %v5601_v63  ;;  %v5604_v6 = vmul.f32 %v20982_v59, %v15587_v2  ;;  %v5738_v32 = vmax.f32 %v5674_v44, 0.0 }
 0x411   :  { %v5510_v24 = vpop.f32.mrf.mxu0 }
 0x412   :  { %v5736_v5 = vmax.f32 %v5672_v29, 0.0  ;;  %v5675_v22 = vadd.f32 %v20987_v50, %v5604_v6  ;;  %v5602_v39 = vmul.f32 %v20982_v59, %v5510_v24 }
 0x414   :  { %v5772_v54 = vmax.f32 %v5736_v5, %v5738_v32  ;;  %v5673_v52 = vadd.f32 %v20987_v50, %v5602_v39  ;;  %v5739_v18 = vmax.f32 %v5675_v22, 0.0 }
 0x416   :  { %v6284_v16 = vcombine.high %v5772_v54, %v5772_v54  ;;  %v6291_v61 = vrot.slane %v5772_v54, %v19303_v41  ;;  %v5737_v20 = vmax.f32 %v5673_v52, 0.0  ;;  %v16049_v52 = vld [vmem:[%s22126_s4 + $0xf0] sm:$0xff]  }
 0x417   :  { %15404 = vmatprep.subr.bf16.mxu1 %v16049_v52  ;;  %v16056_v52 = vld [vmem:[%s22126_s4 + $0xd8] sm:$0xff]  }
 0x418   :  { %v6298_v1 = vrot.slane %v6284_v16, %v19303_v41  ;;  %v6299_v30 = vcombine.high %v6291_v61, %v6291_v61  ;;  %v14392_v7 = vrot.slane %v6291_v61, 9  ;;  %v5773_v13 = vmax.f32 %v5737_v20, %v5739_v18  ;;  %v16050_v16 = vld [vmem:[%s22126_s4 + $0xb0] sm:$0xff]  }
 0x419   :  { %15405 = vmatpush3.bf16.msra.mxu1 %v16050_v16  ;;  %v8053_v16 = vld [vmem:[#allocation3 + $0x60] sm:$0xe] }
 0x41a   :  { %v6300_v43 = vcombine.high %v6298_v1, %v6298_v1  ;;  %v14393_v8 = vrot.slane %v6299_v30, 9  ;;  %v14394_v38 = vrot.slane %v6298_v1, 9  ;;  %v6976_v56 = vmax.f32 %v6291_v61, %v14392_v7  ;;  %v16051_v61 = vld [vmem:[%s22126_s4 + $0xe8] sm:$0xff]  }
 0x41b   :  { %v6301_v37 = vcombine.high %v5773_v13, %v5773_v13  ;;  %v6308_v26 = vrot.slane %v5773_v13, %v19303_v41  ;;  %15406 = vmatprep.subr.bf16.mxu1 %v16051_v61 }
 0x41c   :  { %v14395_v48 = vrot.slane %v6300_v43, 9  ;;  %v6977_v3 = vmax.f32 %v6299_v30, %v14393_v8  ;;  %v6978_v33 = vmax.f32 %v6298_v1, %v14394_v38  ;;  %v15239_v35 = vpack.c.bf16 %v6976_v56, %v6976_v56  ;;  %v16052_v56 = vld [vmem:[%s22126_s4 + $0xa8] sm:$0xff]  }
 0x41d   :  { %v6315_v36 = vrot.slane %v6301_v37, %v19303_v41  ;;  %v6316_v57 = vcombine.high %v6308_v26, %v6308_v26  ;;  %v14396_v58 = vrot.slane %v6308_v26, 9  ;;  %15407 = vmatpush3.bf16.msra.mxu1 %v16052_v56 }
 0x41e   :  { %v6979_v42 = vmax.f32 %v6300_v43, %v14395_v48  ;;  %v15240_v10 = vpack.c.bf16 %v6977_v3, %v6977_v3  ;;  %v15241_v17 = vpack.c.bf16 %v6978_v33, %v6978_v33  ;;  %v7616_v62 = vunpack.c.l.b16 %v15239_v35  ;;  %v8002_v43 = vld [vmem:[#allocation3 + $0x8c] sm:$0x1]  ;;  %v21095_v3 = vld [vmem:[#allocation3 + $0x10] sm:$0xf] }
 0x41f   :  { %v6317_v4 = vcombine.high %v6315_v36, %v6315_v36  ;;  %v14397_v11 = vrot.slane %v6316_v57, 9  ;;  %v14398_v47 = vrot.slane %v6315_v36, 9  ;;  %v6980_v31 = vmax.f32 %v6308_v26, %v14396_v58  ;;  %v16480_v58 = vld [vmem:[#allocation3 + $0x14] sm:$0x1] }
 0x420   :  { %v15242_v55 = vpack.c.bf16 %v6979_v42, %v6979_v42  ;;  %v7617_v51 = vunpack.c.l.b16 %v15240_v10  ;;  %v7618_v15 = vunpack.c.l.b16 %v15241_v17  ;;  %v7820_v6 = vrot.slane %v7616_v62, 7  ;;  %v21104_v17 = vld [vmem:[#allocation3 + $0x80] sm:$0xf]  ;;  %v16054_v62 = vld [vmem:[%s22126_s4 + $0xe0] sm:$0xff]  }
 0x421   :  { %v14399_v25 = vrot.slane %v6317_v4, 9  ;;  %v6981_v44 = vmax.f32 %v6316_v57, %v14397_v11  ;;  %v6982_v63 = vmax.f32 %v6315_v36, %v14398_v47  ;;  %v15243_v2 = vpack.c.bf16 %v6980_v31, %v6980_v31  ;;  %v7999_v57 = vld [vmem:[#allocation3 + $0x88] sm:$0xf]  ;;  %v21113_v47 = vld [vmem:[#allocation3 + $0x84] sm:$0x1]  ;;  %15408 = vmatprep.subr.bf16.mxu1 %v16054_v62 }
 0x422   :  { %v7619_v29 = vunpack.c.l.b16 %v15242_v55  ;;  %v7821_v24 = vrot.slane %v7617_v51, 6  ;;  %v7823_v32 = vrot.slane %v7618_v15, 5  ;;  %v21102_v42 = vcombine.low %v21095_v3, %v16480_v58  ;;  %v16055_v51 = vld [vmem:[%s22126_s4 + $0xa0] sm:$0xff]   ;;  %v8152_v15 = vld [vmem:[#allocation3 + $0x80] sm:$0xe]  ;;  %v16057_v62 = vld [vmem:[%s22126_s4 + $0x98] sm:$0xff]  }
 0x423   :  { %v6983_v5 = vmax.f32 %v6317_v4, %v14399_v25  ;;  %v15244_v22 = vpack.c.bf16 %v6981_v44, %v6981_v44  ;;  %v15245_v39 = vpack.c.bf16 %v6982_v63, %v6982_v63  ;;  %v7620_v54 = vunpack.c.l.b16 %v15243_v2  ;;  %v21109_v4 = vld [vmem:[#allocation3 + $0x20] sm:$0xf]  ;;  %v8091_v25 = vld [vmem:[#allocation3 + $0x8] sm:$0xe]  ;;  %15409 = vmatpush3.bf16.msra.mxu1 %v16055_v51 }
 0x424   :  { %v7822_v18 = vsel %vm7634_vm3, %v7821_v24, %v7820_v6  ;;  %v7825_v20 = vrot.slane %v7619_v29, 4  ;;  %v14566_v31 = vcombine.low %v21104_v17, %v21113_v47  ;;  %v8863_v0 = vshll.u32 %v21102_v42, 16  ;;  %v21125_v6 = vld [vmem:[#allocation3 + $0xc] sm:$0x1]  ;;  %v21127_v24 = vld [vmem:[#allocation3 + $0x1c] sm:$0x1]  ;;  %15410 = vmatprep.subr.bf16.mxu1 %v16056_v52 }
 0x425   :  { %v7824_v1 = vsel %vm7637_vm14, %v7823_v32, %v7822_v18  ;;  %v7621_v30 = vunpack.c.l.b16 %v15244_v22  ;;  %v7622_v7 = vunpack.c.l.b16 %v15245_v39  ;;  %v7827_v13 = vrot.slane %v7620_v54, 3  ;;  %v8093_v32 = vld [vmem:[#allocation3 + $0x18] sm:$0xe]  ;;  %v21130_v22 = vld [vmem:[#allocation3 + $0x84] sm:$0x1] }
 0x426   :  { %v7826_v8 = vsel %vm7640_vm13, %v7825_v20, %v7824_v1  ;;  %v15269_v38 = vpack.c.bf16 %v6983_v5, %v6983_v5  ;;  %v21119_v55 = vcombine.low %v21109_v4, %v16481_v53  ;;  %v8337_v63 = vshll.u32 %v14566_v31, 16  ;;  %v21133_v54 = vld [vmem:[#allocation3 + $0x30] sm:$0xf]  ;;  %v8054_v1 = vld [vmem:[#allocation3 + $0x68] sm:$0xe] }
 0x427   :  { %v7828_v37 = vsel %vm22461_vm9, %v7827_v13, %v7826_v8  ;;  %v7829_v26 = vrot.slane %v7621_v30, 2  ;;  %v7831_v48 = vrot.slane %v7622_v7, 1  ;;  %v8861_v2 = vshrl.u32 %v21102_v42, 16  ;;  %v16482_v42 = vld [vmem:[#allocation3 + $0x34] sm:$0x1]  ;;  %15411 = vmatpush3.bf16.msra.mxu1 %v16057_v62 }
 0x428   :  { %v8003_v33 = vsel %vm19695_vm6, %v15269_v38, %v8002_v43  ;;  %v8865_v29 = vrot.slane %v8863_v0, 1  ;;  %v8877_v39 = vshll.u32 %v21119_v55, 16  ;;  %v14660_v20 = vcombine.low %v8152_v15, %v21130_v22 }
 0x429   :  { %v7830_v35 = vsel %vm7646_vm12, %v7829_v26, %v7828_v37  ;;  %8004 = vst [vmem:[#allocation3 + $0x8c] sm:$0x1] %v8003_v33  ;;  %v14616_v8 = vcombine.low %v8091_v25, %v21125_v6  ;;  %v14618_v38 = vcombine.low %v8093_v32, %v21127_v24  ;;  %v8335_v0 = vshrl.u32 %v14566_v31, 16  ;;  %v8513_v25 = vpop.permute.xlu0 %8512 }
 0x42a   :  { %v7832_v36 = vsel %vm7649_vm0, %v7831_v48, %v7830_v35  ;;  %v8339_v48 = vrot.slane %v8337_v63, 1  ;;  %v9064_v53 = vrot.slane %v14660_v20, 1  ;;  %v8875_v31 = vshrl.u32 %v21119_v55, 16 }
 0x42b   :  { %v7874_v10 = vpack.c.b16 %v7832_v36, %v7832_v36  ;;  %v14578_v36 = vcombine.low %v8053_v16, %v20924_v12  ;;  %v14579_v12 = vcombine.low %v8054_v1, %v20957_v19  ;;  %v8732_v16 = vrot.slane %v14616_v8, 1  ;;  %v16058_v19 = vld [vmem:[%s22126_s4 + $0xd0] sm:$0xff]  }
 0x42c   :  { %v21166_v20 = vrot.slane %v14618_v38, 1  ;;  %15412 = vmatprep.subr.bf16.mxu1 %v16058_v19 }
 0x42d   :  { %v8000_v11 = vsel %vm19742_vm15, %v7874_v10, %v7999_v57  ;;  %v21155_v10 = vcombine.low %v21133_v54, %v16482_v42  ;;  %v8438_v1 = vrot.slane %v14578_v36, 1  ;;  %v8369_v62 = vpop.permute.xlu0 %8368 }
 0x42e   :  { %8001 = vst [vmem:[#allocation3 + $0x88] sm:$0xf] %v8000_v11 }
 0x430   :  { %v21138_v18 = vld [vmem:[#allocation3 + $0x8c] sm:$0x1] }
 0x431   :  { %v15590_v44 = vpop.f32.mrf.mxu0  ;;  %v21145_v56 = vld [vmem:[#allocation3 + $0x8c] sm:$0x1] }
 0x432   :  { %v5607_v5 = vmul.f32 %v20982_v59, %v15590_v44 }
 0x433   :  { %v5523_v61 = vpop.f32.mrf.mxu0 }
 0x434   :  { %v5678_v30 = vadd.f32 %v20987_v50, %v5607_v5  ;;  %v5605_v7 = vmul.f32 %v20982_v59, %v5523_v61  ;;  %v8340_v5 = vor.u32 %v8339_v48, %v8335_v0  ;;  %v8879_v61 = vrot.slane %v8877_v39, 1  ;;  %v16059_v0 = vld [vmem:[%s22126_s4 + $0x90] sm:$0xff]  }
 0x435   :  { %v8073_v13 = vld [vmem:[#allocation3 + $0x88] sm:$0xf]  ;;  %v15591_v37 = vpop.f32.mrf.mxu0  ;;  %v8891_v39 = vshll.u32 %v21155_v10, 16  ;;  %v9149_v48 = vsel %vm9068_vm2, %v8438_v1, %v8513_v25  ;;  %v16483_v25 = vld [vmem:[#allocation3 + $0x44] sm:$0x1]  ;;  %15413 = vmatpush3.bf16.msra.mxu1 %v16059_v0 }
 0x436   :  { %v8153_v43 = vld [vmem:[#allocation3 + $0x88] sm:$0xe]  ;;  %v14598_v26 = vcombine.low %v8073_v13, %v8073_v13  ;;  %v21149_v35 = vcombine.low %v8073_v13, %v21145_v56  ;;  %v5676_v57 = vadd.f32 %v20987_v50, %v5605_v7  ;;  %v5608_v58 = vmul.f32 %v20982_v59, %v15591_v37 }
 0x437   :  { %v14661_v33 = vcombine.low %v8153_v43, %v21138_v18  ;;  %v5526_v11 = vpop.f32.mrf.mxu0  ;;  %v5742_v15 = vmax.f32 %v5678_v30, 0.0  ;;  %v8439_v43 = vrot.slane %v14579_v12, 1  ;;  %v8880_v36 = vor.u32 %v8879_v61, %v8875_v31 }
 0x438   :  { %8520 = vrot.lane.b32.xlu0 %v14598_v26, %s16715_s13  ;;  %v5740_v44 = vmax.f32 %v5676_v57, 0.0  ;;  %v5679_v63 = vadd.f32 %v20987_v50, %v5608_v58  ;;  %v5606_v32 = vmul.f32 %v20982_v59, %v5526_v11  ;;  %v8866_v59 = vor.u32 %v8865_v29, %v8861_v2  ;;  %v21175_v26 = vld [vmem:[#allocation3 + $0x40] sm:$0xf] }
 0x439   :  { %v9065_v51 = vrot.slane %v14661_v33, 1  ;;  %v8889_v2 = vshrl.u32 %v21155_v10, 16 }
 0x43a   :  { %v5774_v7 = vmax.f32 %v5740_v44, %v5742_v15  ;;  %v5677_v13 = vadd.f32 %v20987_v50, %v5606_v32  ;;  %v5743_v55 = vmax.f32 %v5679_v63, 0.0  ;;  %v8515_v37 = vpop.permute.xlu1 %8514  ;;  %v21187_v15 = vrot.slane %v8891_v39, 1 }
 0x43b   :  { %v14698_v52 = vcombine.low %v9064_v53, %v9065_v51  ;;  %v9152_v57 = vsel %vm9068_vm2, %v8439_v43, %v8515_v37  ;;  %v21190_v44 = vcombine.low %v21175_v26, %v16483_v25 }
 0x43c   :  { %8376 = vrot.lane.b32.xlu0 %v8340_v5, %s16715_s13  ;;  %v6318_v8 = vcombine.high %v5774_v7, %v5774_v7  ;;  %v6325_v50 = vrot.slane %v5774_v7, %v19303_v41  ;;  %v5741_v38 = vmax.f32 %v5677_v13, 0.0  ;;  %v14690_v12 = vcombine.low %v9149_v48, %v9152_v57  ;;  %v16484_v7 = vld [vmem:[#allocation3 + $0x60] sm:$0xf] }
 0x43d   :  { %15612 = vmatprep.mubr.msk.bf16.mxu0 %vm9068_vm2, %v14698_v52  ;;  %v9101_v13 = vsel %vm9068_vm2, %v16484_v7, %v8369_v62 }
 0x43e   :  { %v6332_v29 = vrot.slane %v6318_v8, %v19303_v41  ;;  %v6333_v58 = vcombine.high %v6325_v50, %v6325_v50  ;;  %v14400_v42 = vrot.slane %v6325_v50, 9  ;;  %v5775_v11 = vmax.f32 %v5741_v38, %v5743_v55  ;;  %v8371_v61 = vpop.permute.xlu1 %8370  ;;  %9861 = vmatprep.mubr.bf16.mxu1 %v14690_v12 }
 0x43f   :  { %v15354_v30 = vpop.f32.mrf.mxu1 }
 0x440   :  { %8972 = vrot.lane.b32.xlu0 %v8866_v59, %s16715_s13  ;;  %v6334_v63 = vcombine.high %v6332_v29, %v6332_v29  ;;  %v14401_v32 = vrot.slane %v6333_v58, 9  ;;  %v14402_v5 = vrot.slane %v6332_v29, 9  ;;  %v6984_v52 = vmax.f32 %v6325_v50, %v14400_v42  ;;  %v16060_v50 = vld [vmem:[%s22126_s4 + $0xc8] sm:$0xff]  }
 0x441   :  { %v15355_v33 = vpop.f32.mrf.mxu1  ;;  %v6335_v31 = vcombine.high %v5775_v11, %v5775_v11  ;;  %v6342_v19 = vrot.slane %v5775_v11, %v19303_v41  ;;  %15414 = vmatprep.subr.bf16.mxu1 %v16060_v50 }
 0x442   :  { %v21184_v53 = vadd.f32 %v15355_v33, %v15354_v30  ;;  %v9104_v30 = vsel %vm9068_vm2, %v20955_v27, %v8371_v61  ;;  %v14403_v59 = vrot.slane %v6334_v63, 9  ;;  %v6985_v43 = vmax.f32 %v6333_v58, %v14401_v32 }
 0x443   :  { %v15357_v51 = vpop.f32.mrf.mxu1  ;;  %v6986_v39 = vmax.f32 %v6332_v29, %v14402_v5  ;;  %v15247_v8 = vpack.c.bf16 %v6984_v52, %v6984_v52  ;;  %v6349_v55 = vrot.slane %v6335_v31, %v19303_v41  ;;  %v6350_v38 = vcombine.high %v6342_v19, %v6342_v19  ;;  %v16490_v41 = vld [vmem:[#allocation3 + $0x6c] sm:$0x1] }
 0x444   :  { %v14404_v37 = vrot.slane %v6342_v19, 9  ;;  %8748 = vrot.lane.b32.xlu0 %v8732_v16, %s16715_s13  ;;  %v6987_v57 = vmax.f32 %v6334_v63, %v14403_v59  ;;  %v15248_v27 = vpack.c.bf16 %v6985_v43, %v6985_v43 }
 0x445   :  { %v15358_v1 = vpop.f32.mrf.mxu1  ;;  %v15249_v42 = vpack.c.bf16 %v6986_v39, %v6986_v39  ;;  %v7624_v62 = vunpack.c.l.b16 %v15247_v8  ;;  %v6351_v29 = vcombine.high %v6349_v55, %v6349_v55  ;;  %v14405_v58 = vrot.slane %v6350_v38, 9 }
 0x446   :  { %v21200_v48 = vadd.f32 %v15358_v1, %v15357_v51  ;;  %v14406_v11 = vrot.slane %v6349_v55, 9  ;;  %v6988_v0 = vmax.f32 %v6342_v19, %v14404_v37  ;;  %v15250_v25 = vpack.c.bf16 %v6987_v57, %v6987_v57  ;;  %v8095_v57 = vld [vmem:[#allocation3 + $0x28] sm:$0xe] }
 0x447   :  { %v15360_v33 = vpop.f32.mrf.mxu1  ;;  %v7625_v32 = vunpack.c.l.b16 %v15248_v27  ;;  %v7626_v5 = vunpack.c.l.b16 %v15249_v42  ;;  %v7833_v52 = vrot.slane %v7624_v62, 7  ;;  %v14407_v61 = vrot.slane %v6351_v29, 9 }
 0x448   :  { %v6989_v51 = vmax.f32 %v6350_v38, %v14405_v58  ;;  %v6990_v7 = vmax.f32 %v6349_v55, %v14406_v11  ;;  %v15251_v31 = vpack.c.bf16 %v6988_v0, %v6988_v0  ;;  %8976 = vrot.lane.b32.xlu0 %v8880_v36, %s16715_s13  ;;  %v7627_v16 = vunpack.c.l.b16 %v15250_v25  ;;  %v8008_v0 = vld [vmem:[#allocation3 + $0x94] sm:$0x1] }
 0x449   :  { %v15361_v12 = vpop.f32.mrf.mxu1  ;;  %v7834_v63 = vrot.slane %v7625_v32, 6  ;;  %v7836_v59 = vrot.slane %v7626_v5, 5  ;;  %v6991_v39 = vmax.f32 %v6351_v29, %v14407_v61  ;;  %v14689_v55 = vcombine.low %v9101_v13, %v9104_v30  ;;  %v21212_v29 = vld [vmem:[#allocation3 + $0x2c] sm:$0x1] }
 0x44a   :  { %v21204_v43 = vadd.f32 %v15361_v12, %v15360_v33  ;;  %v15252_v8 = vpack.c.bf16 %v6989_v51, %v6989_v51  ;;  %v15253_v19 = vpack.c.bf16 %v6990_v7, %v6990_v7  ;;  %v7628_v50 = vunpack.c.l.b16 %v15251_v31  ;;  %v21225_v31 = vld [vmem:[#allocation3 + $0x60] sm:$0xf] }
 0x44b   :  { %v15363_v1 = vpop.f32.mrf.mxu1  ;;  %v7835_v27 = vsel %vm7634_vm3, %v7834_v63, %v7833_v52  ;;  %v7838_v42 = vrot.slane %v7627_v16, 4  ;;  %v15270_v25 = vpack.c.bf16 %v6991_v39, %v6991_v39  ;;  %v8894_v32 = vor.u32 %v21187_v15, %v8889_v2  ;;  %9862 = vmatmul.mubr.bf16.gmra.mxu1 %v14689_v55 }
 0x44c   :  { %v7837_v62 = vsel %vm7637_vm14, %v7836_v59, %v7835_v27  ;;  %v7629_v36 = vunpack.c.l.b16 %v15252_v8  ;;  %v7630_v58 = vunpack.c.l.b16 %v15253_v19  ;;  %v7840_v11 = vrot.slane %v7628_v50, 3  ;;  %8752 = vrot.lane.b32.xlu0 %v21166_v20, %s16715_s13  ;;  %v21230_v8 = vld [vmem:[#allocation3 + $0x88] sm:$0xf]  ;;  %v21236_v27 = vld [vmem:[#allocation3 + $0x18] sm:$0xf] }
 0x44d   :  { %v15364_v37 = vpop.f32.mrf.mxu1  ;;  %v7839_v12 = vsel %vm7640_vm13, %v7838_v42, %v7837_v62  ;;  %v14620_v13 = vcombine.low %v8095_v57, %v21212_v29  ;;  %v8905_v20 = vshll.u32 %v21190_v44, 16  ;;  %v8009_v51 = vsel %vm19695_vm6, %v15270_v25, %v8008_v0  ;;  %v8097_v57 = vld [vmem:[#allocation3 + $0x38] sm:$0xe]  ;;  %v21244_v62 = vld [vmem:[#allocation3 + $0x8c] sm:$0x1] }
 0x44e   :  { %v21207_v38 = vadd.f32 %v15364_v37, %v15363_v1  ;;  %v7841_v30 = vsel %vm22462_vm1, %v7840_v11, %v7839_v12  ;;  %v7842_v5 = vrot.slane %v7629_v36, 2  ;;  %v7844_v52 = vrot.slane %v7630_v58, 1  ;;  %8010 = vst [vmem:[#allocation3 + $0x94] sm:$0x1] %v8009_v51  ;;  %v8005_v1 = vld [vmem:[#allocation3 + $0x90] sm:$0xf] }
 0x44f   :  { %v15366_v33 = vpop.f32.mrf.mxu1  ;;  %v8736_v63 = vrot.slane %v14620_v13, 1  ;;  %v8907_v59 = vrot.slane %v8905_v20, 1  ;;  %v14640_v19 = vcombine.low %v21225_v31, %v16485_v28  ;;  %v8903_v50 = vshrl.u32 %v21190_v44, 16  ;;  %v16062_v42 = vld [vmem:[%s22126_s4 + $0x88] sm:$0xff]   ;;  %v21255_v13 = vld [vmem:[#allocation3 + $0x70] sm:$0xf] }
 0x450   :  { %v7843_v10 = vsel %vm7646_vm12, %v7842_v5, %v7841_v30  ;;  %8980 = vrot.lane.b32.xlu0 %v8894_v32, %s16715_s13  ;;  %v21246_v36 = vld [vmem:[#allocation3 + $0x9c] sm:$0x1]  ;;  %v8155_v58 = vld [vmem:[#allocation3 + $0x98] sm:$0xe]  ;;  %v14567_v44 = vcombine.low %v21230_v8, %v21244_v62  ;;  %15415 = vmatpush3.bf16.msra.mxu1 %v16062_v42  ;;  %v16063_v30 = vld [vmem:[%s22126_s4 + $0xc0] sm:$0xff]   ;;  %v14642_v51 = vcombine.low %v21255_v13, %v21016_v23 }
 0x451   :  { %v15367_v61 = vpop.f32.mrf.mxu1  ;;  %v7845_v15 = vsel %vm7649_vm0, %v7844_v52, %v7843_v10  ;;  %v21250_v11 = vld [vmem:[#allocation3 + $0x3c] sm:$0x1]  ;;  %v8908_v0 = vor.u32 %v8907_v59, %v8903_v50  ;;  %v8919_v12 = vshll.u32 %v14640_v19, 16  ;;  %v14663_v9 = vcombine.low %v8155_v58, %v21246_v36  ;;  %15416 = vmatprep.subr.bf16.mxu1 %v16063_v30  ;;  %v8099_v20 = vld [vmem:[#allocation3 + $0x58] sm:$0xe] }
 0x452   :  { %v21223_v7 = vadd.f32 %v15367_v61, %v15366_v33  ;;  %v7876_v16 = vpack.c.b16 %v7845_v15, %v7845_v15  ;;  %v14622_v33 = vcombine.low %v8097_v57, %v21250_v11  ;;  %v16486_v25 = vld [vmem:[#allocation3 + $0x1c] sm:$0x1]  ;;  %v8344_v5 = vshll.u32 %v14567_v44, 16  ;;  %v21275_v58 = vld [vmem:[#allocation3 + $0x28] sm:$0xf] }
 0x453   :  { %v15369_v2 = vpop.f32.mrf.mxu1  ;;  %v14633_v32 = vcombine.low %v21236_v27, %v16486_v25  ;;  %v8921_v61 = vrot.slane %v8919_v12, 1  ;;  %v21269_v42 = vld [vmem:[#allocation3 + $0x5c] sm:$0x1]  ;;  %vm10687_vm0 = vcmask 1042432   ;;  %vm10688_vm6 = vsmask.f32 2306 }
 0x454   :  { %22463 = vst [vmem:[#allocation32_spill] sm:$0xff] %v21223_v7  ;;  %v8006_v55 = vsel %vm19742_vm15, %v7876_v16, %v8005_v1  ;;  %8756 = vrot.lane.b32.xlu0 %v8736_v63, %s16715_s13  ;;  %v8738_v52 = vrot.slane %v14622_v33, 1  ;;  %v8917_v1 = vshrl.u32 %v14640_v19, 16  ;;  %v16064_v16 = vld [vmem:[%s22126_s4 + $0x80] sm:$0xff]   ;;  %v8346_v50 = vrot.slane %v8344_v5, 1  ;;  %vm21540_vm12 = vmand %vm10687_vm0, %vm10688_vm6 }
 0x455   :  { %v15370_v39 = vpop.f32.mrf.mxu1  ;;  %8007 = vst [vmem:[#allocation3 + $0x90] sm:$0xf] %v8006_v55  ;;  %v8138_v10 = vld [vmem:[#allocation3 + $0x94] sm:$0x1]  ;;  %v8870_v15 = vshll.u32 %v14633_v32, 16  ;;  %15417 = vmatpush3.bf16.msra.mxu1 %v16064_v16  ;;  %v14624_v55 = vcombine.low %v8099_v20, %v21269_v42  ;;  %v8342_v33 = vshrl.u32 %v14567_v44, 16 }
 0x456   :  { %v21234_v37 = vadd.f32 %v15370_v39, %v15369_v2  ;;  %v9067_v2 = vrot.slane %v14663_v9, 1  ;;  %v21267_v39 = vld [vmem:[#allocation3 + $0x94] sm:$0x1]  ;;  %v8922_v19 = vor.u32 %v8921_v61, %v8917_v1  ;;  %v21278_v9 = vld [vmem:[#allocation3 + $0x80] sm:$0xf]  ;;  %v8868_v44 = vshrl.u32 %v14633_v32, 16 }
 0x457   :  { %v8347_v25 = vor.u32 %v8346_v50, %v8342_v33  ;;  %v8872_v5 = vrot.slane %v8870_v15, 1  ;;  %v8092_v61 = vld [vmem:[#allocation3 + $0x10] sm:$0xe]  ;;  %v8740_v1 = vrot.slane %v14624_v55, 1  ;;  %vm13041_vm15 = vcmask 1043456  }
 0x458   :  { %22464 = vst [vmem:[#allocation37_spill] sm:$0xff] %v21234_v37  ;;  %8984 = vrot.lane.b32.xlu0 %v8908_v0, %s16715_s13  ;;  %v8933_v0 = vshll.u32 %v14642_v51, 16  ;;  %v8056_v37 = vld [vmem:[#allocation3 + $0x78] sm:$0xe]  ;;  %v8096_v7 = vld [vmem:[#allocation3 + $0x30] sm:$0xe] }
 0x459   :  { %v8873_v15 = vor.u32 %v8872_v5, %v8868_v44  ;;  %v8094_v5 = vld [vmem:[#allocation3 + $0x20] sm:$0xe]  ;;  %v8103_v44 = vld [vmem:[#allocation3 + $0x78] sm:$0xe] }
 0x45a   :  { %v8935_v20 = vrot.slane %v8933_v0, 1  ;;  %v21293_v0 = vld [vmem:[#allocation3 + $0x38] sm:$0xf] }
 0x45c   :  { %v8074_v63 = vld [vmem:[#allocation3 + $0x90] sm:$0xf]  ;;  %8760 = vrot.lane.b32.xlu0 %v8738_v52, %s16715_s13  ;;  %v16487_v52 = vld [vmem:[#allocation3 + $0x2c] sm:$0x1] }
 0x45d   :  { %v8154_v59 = vld [vmem:[#allocation3 + $0x90] sm:$0xe]  ;;  %v14599_v28 = vcombine.low %v8074_v63, %v8074_v63  ;;  %v21272_v23 = vcombine.low %v8074_v63, %v21267_v39  ;;  %v14635_v16 = vcombine.low %v21275_v58, %v16487_v52  ;;  %v14644_v63 = vcombine.low %v21278_v9, %v21130_v22 }
 0x45e   :  { %v14662_v57 = vcombine.low %v8154_v59, %v8138_v10  ;;  %v8101_v59 = vld [vmem:[#allocation3 + $0x68] sm:$0xe]  ;;  %v21296_v32 = vld [vmem:[#allocation3 + $0x90] sm:$0xf] }
 0x45f   :  { %8522 = vrot.lane.b32.xlu1 %v14599_v28, %s16715_s13  ;;  %v21286_v28 = vld [vmem:[#allocation3 + $0x14] sm:$0x1]  ;;  %v8947_v33 = vshll.u32 %v14644_v63, 16 }
 0x460   :  { %v9066_v12 = vrot.slane %v14662_v57, 1  ;;  %8988 = vrot.lane.b32.xlu0 %v8922_v19, %s16715_s13  ;;  %v14617_v50 = vcombine.low %v8092_v61, %v21286_v28  ;;  %v8884_v57 = vshll.u32 %v14635_v16, 16  ;;  %v21290_v19 = vld [vmem:[#allocation3 + $0x6c] sm:$0x1] }
 0x461   :  { %v14626_v22 = vcombine.low %v8101_v59, %v21290_v19  ;;  %v8949_v61 = vrot.slane %v8947_v33, 1  ;;  %v21302_v59 = vld [vmem:[#allocation3 + $0x24] sm:$0x1] }
 0x462   :  { %v14703_v30 = vcombine.low %v9066_v12, %v9067_v2  ;;  %v8931_v2 = vshrl.u32 %v14642_v51, 16  ;;  %v8733_v12 = vrot.slane %v14617_v50, 1  ;;  %v8886_v51 = vrot.slane %v8884_v57, 1 }
 0x463   :  { %8378 = vrot.lane.b32.xlu1 %v8347_v25, %s16715_s13  ;;  %v16488_v25 = vld [vmem:[#allocation3 + $0x3c] sm:$0x1]  ;;  %v8742_v52 = vrot.slane %v14626_v22, 1  ;;  %v14619_v57 = vcombine.low %v8094_v5, %v21302_v59  ;;  %v14628_v22 = vcombine.low %v8103_v44, %v21043_v34  ;;  %v8105_v34 = vld [vmem:[#allocation3 + $0x88] sm:$0xe] }
 0x464   :  { %15613 = vmatmul.mubr.msk.bf16.gmra.mxu0 %vm9068_vm2, %v14703_v30  ;;  %8764 = vrot.lane.b32.xlu0 %v8740_v1, %s16715_s13  ;;  %v8936_v55 = vor.u32 %v8935_v20, %v8931_v2  ;;  %v14637_v30 = vcombine.low %v21293_v0, %v16488_v25  ;;  %v14646_v1 = vcombine.low %v21296_v32, %v8138_v10  ;;  %v8882_v20 = vshrl.u32 %v14635_v16, 16  ;;  %v16489_v10 = vld [vmem:[#allocation3 + $0x4c] sm:$0x1] }
 0x465   :  { %v8945_v2 = vshrl.u32 %v14644_v63, 16 }
 0x466   :  { %v8887_v50 = vor.u32 %v8886_v51, %v8882_v20  ;;  %v8961_v33 = vshll.u32 %v14646_v1, 16  ;;  %v8744_v51 = vrot.slane %v14628_v22, 1  ;;  %v8896_v5 = vshrl.u32 %v14637_v30, 16 }
 0x467   :  { %8974 = vrot.lane.b32.xlu1 %v8873_v15, %s16715_s13  ;;  %v21305_v15 = vld [vmem:[#allocation3 + $0x48] sm:$0xf]  ;;  %v8950_v25 = vor.u32 %v8949_v61, %v8945_v2  ;;  %v21314_v2 = vld [vmem:[#allocation3 + $0x34] sm:$0x1] }
 0x468   :  { %8992 = vrot.lane.b32.xlu0 %v8936_v55, %s16715_s13  ;;  %v8898_v55 = vshll.u32 %v14637_v30, 16  ;;  %v14639_v16 = vcombine.low %v21305_v15, %v16489_v10  ;;  %v8963_v20 = vrot.slane %v8961_v33, 1  ;;  %v14621_v10 = vcombine.low %v8096_v7, %v21314_v2 }
 0x469   :  { %v14630_v33 = vcombine.low %v8105_v34, %v21145_v56  ;;  %v21328_v34 = vld [vmem:[#allocation3 + $0x44] sm:$0x1] }
 0x46a   :  { %v8900_v63 = vrot.slane %v8898_v55, 1  ;;  %v8912_v61 = vshll.u32 %v14639_v16, 16  ;;  %v8910_v30 = vshrl.u32 %v14639_v16, 16 }
 0x46b   :  { %8750 = vrot.lane.b32.xlu1 %v8733_v12, %s16715_s13  ;;  %v8735_v12 = vrot.slane %v14619_v57, 1  ;;  %v14581_v57 = vcombine.low %v8056_v37, %v21047_v40 }
 0x46c   :  { %8768 = vrot.lane.b32.xlu0 %v8742_v52, %s16715_s13  ;;  %v8055_v52 = vld [vmem:[#allocation3 + $0x70] sm:$0xe]  ;;  %v8901_v55 = vor.u32 %v8900_v63, %v8896_v5  ;;  %v8098_v63 = vld [vmem:[#allocation3 + $0x40] sm:$0xe] }
 0x46d   :  { %v14580_v44 = vcombine.low %v8055_v52, %v21001_v49  ;;  %v8914_v49 = vrot.slane %v8912_v61, 1 }
 0x46f   :  { %8978 = vrot.lane.b32.xlu1 %v8887_v50, %s16715_s13  ;;  %v8959_v50 = vshrl.u32 %v14646_v1, 16  ;;  %v8440_v52 = vrot.slane %v14580_v44, 1  ;;  %v8737_v1 = vrot.slane %v14621_v10, 1  ;;  %v8915_v16 = vor.u32 %v8914_v49, %v8910_v30 }
 0x470   :  { %8996 = vrot.lane.b32.xlu0 %v8950_v25, %s16715_s13  ;;  %v8517_v25 = vpop.permute.xlu0 %8516  ;;  %v14623_v44 = vcombine.low %v8098_v63, %v21328_v34  ;;  %v21343_v63 = vld [vmem:[#allocation3 + $0x64] sm:$0x1] }
 0x471   :  { %v8964_v22 = vor.u32 %v8963_v20, %v8959_v50  ;;  %v9155_v7 = vsel %vm9068_vm2, %v8440_v52, %v8517_v25  ;;  %v8746_v20 = vrot.slane %v14630_v33, 1 }
 0x472   :  { %v8739_v30 = vrot.slane %v14623_v44, 1 }
 0x473   :  { %8754 = vrot.lane.b32.xlu1 %v8735_v12, %s16715_s13  ;;  %v21320_v12 = vld [vmem:[#allocation3 + $0x68] sm:$0xf] }
 0x474   :  { %8772 = vrot.lane.b32.xlu0 %v8744_v51, %s16715_s13  ;;  %v8441_v51 = vrot.slane %v14581_v57, 1  ;;  %v14641_v40 = vcombine.low %v21320_v12, %v16490_v41  ;;  %v8373_v5 = vpop.permute.xlu0 %8372  ;;  %v16491_v57 = vld [vmem:[#allocation3 + $0x70] sm:$0xf] }
 0x475   :  { %v9107_v25 = vsel %vm9068_vm2, %v16491_v57, %v8373_v5 }
 0x476   :  { %v8926_v50 = vshll.u32 %v14641_v40, 16 }
 0x477   :  { %8982 = vrot.lane.b32.xlu1 %v8901_v55, %s16715_s13  ;;  %v21333_v55 = vld [vmem:[#allocation3 + $0x78] sm:$0xf] }
 0x478   :  { %9000 = vrot.lane.b32.xlu0 %v8964_v22, %s16715_s13  ;;  %v8928_v49 = vrot.slane %v8926_v50, 1  ;;  %v14643_v52 = vcombine.low %v21333_v55, %v21027_v46 }
 0x47a   :  { %v8940_v5 = vshll.u32 %v14643_v52, 16  ;;  %v8938_v57 = vshrl.u32 %v14643_v52, 16 }
 0x47b   :  { %8758 = vrot.lane.b32.xlu1 %v8737_v1, %s16715_s13 }
 0x47c   :  { %v8519_v37 = vpop.permute.xlu1 %8518  ;;  %8776 = vrot.lane.b32.xlu0 %v8746_v20, %s16715_s13  ;;  %v8942_v50 = vrot.slane %v8940_v5, 1 }
 0x47d   :  { %v9158_v56 = vsel %vm9068_vm2, %v8441_v51, %v8519_v37  ;;  %v8100_v51 = vld [vmem:[#allocation3 + $0x60] sm:$0xe]  ;;  %v8924_v37 = vshrl.u32 %v14641_v40, 16 }
 0x47e   :  { %v14695_v61 = vcombine.low %v9155_v7, %v9158_v56  ;;  %v14625_v56 = vcombine.low %v8100_v51, %v21343_v63 }
 0x47f   :  { %8986 = vrot.lane.b32.xlu1 %v8915_v16, %s16715_s13  ;;  %v8929_v20 = vor.u32 %v8928_v49, %v8924_v37  ;;  %v21346_v16 = vld [vmem:[#allocation3 + $0x88] sm:$0xf] }
 0x480   :  { %v8375_v41 = vpop.permute.xlu1 %8374  ;;  %9869 = vmatprep.mubr.bf16.mxu1 %v14695_v61  ;;  %v8741_v44 = vrot.slane %v14625_v56, 1  ;;  %v14645_v40 = vcombine.low %v21346_v16, %v21138_v18  ;;  %v8104_v18 = vld [vmem:[#allocation3 + $0x80] sm:$0xe] }
 0x481   :  { %v9110_v10 = vsel %vm9068_vm2, %v21041_v21, %v8375_v41  ;;  %v15372_v33 = vpop.f32.mrf.mxu1  ;;  %v8102_v41 = vld [vmem:[#allocation3 + $0x70] sm:$0xe] }
 0x482   :  { %v14694_v22 = vcombine.low %v9107_v25, %v9110_v10  ;;  %v21354_v25 = vld [vmem:[#allocation3 + $0x74] sm:$0x1]  ;;  %v21356_v10 = vld [vmem:[#allocation3 + $0x98] sm:$0xf]  ;;  %v8952_v37 = vshrl.u32 %v14645_v40, 16 }
 0x483   :  { %v15373_v1 = vpop.f32.mrf.mxu1  ;;  %8762 = vrot.lane.b32.xlu1 %v8739_v30, %s16715_s13  ;;  %v8954_v30 = vshll.u32 %v14645_v40, 16  ;;  %v14647_v49 = vcombine.low %v21356_v10, %v21246_v36 }
 0x484   :  { %9870 = vmatmul.mubr.bf16.gmra.mxu1 %v14694_v22  ;;  %v21341_v7 = vadd.f32 %v15373_v1, %v15372_v33  ;;  %v8943_v22 = vor.u32 %v8942_v50, %v8938_v57  ;;  %v14627_v33 = vcombine.low %v8102_v41, %v21354_v25 }
 0x485   :  { %v15375_v21 = vpop.f32.mrf.mxu1  ;;  %v8956_v1 = vrot.slane %v8954_v30, 1  ;;  %v8968_v52 = vshll.u32 %v14647_v49, 16  ;;  %v8966_v56 = vshrl.u32 %v14647_v49, 16 }
 0x486   :  { %v8743_v51 = vrot.slane %v14627_v33, 1 }
 0x487   :  { %v15376_v61 = vpop.f32.mrf.mxu1  ;;  %8990 = vrot.lane.b32.xlu1 %v8929_v20, %s16715_s13  ;;  %v14629_v20 = vcombine.low %v8104_v18, %v21066_v14  ;;  %v8970_v5 = vrot.slane %v8968_v52, 1  ;;  %v8058_v18 = vld [vmem:[#allocation3 + $0x88] sm:$0xe] }
 0x488   :  { %v21349_v46 = vadd.f32 %v15376_v61, %v15375_v21  ;;  %v8957_v21 = vor.u32 %v8956_v1, %v8952_v37  ;;  %v8057_v1 = vld [vmem:[#allocation3 + $0x80] sm:$0xe]  ;;  %v14583_v52 = vcombine.low %v8058_v18, %v21244_v62 }
 0x489   :  { %v8745_v61 = vrot.slane %v14629_v20, 1  ;;  %v8971_v50 = vor.u32 %v8970_v5, %v8966_v56  ;;  %v16493_v56 = vld [vmem:[#allocation3 + $0x10] sm:$0xf] }
 0x48a   :  { %v14601_v5 = vcombine.low %v16493_v56, %v21286_v28 }
 0x48b   :  { %8766 = vrot.lane.b32.xlu1 %v8741_v44, %s16715_s13  ;;  %v8106_v44 = vld [vmem:[#allocation3 + $0x90] sm:$0xe] }
 0x48c   :  { %v14631_v36 = vcombine.low %v8106_v44, %v21267_v39  ;;  %v14582_v39 = vcombine.low %v8057_v1, %v21113_v47  ;;  %v8582_v47 = vshll.u32 %v14601_v5, 16 }
 0x48e   :  { %v8747_v41 = vrot.slane %v14631_v36, 1 }
 0x48f   :  { %8994 = vrot.lane.b32.xlu1 %v8943_v22, %s16715_s13 }
 0x493   :  { %8770 = vrot.lane.b32.xlu1 %v8743_v51, %s16715_s13 }
 0x497   :  { %8998 = vrot.lane.b32.xlu1 %v8957_v21, %s16715_s13  ;;  %v16492_v21 = vld [vmem:[#allocation3 + $0x8] sm:$0xf] }
 0x498   :  { %v14600_v20 = vcombine.low %v16492_v21, %v21125_v6 }
 0x49b   :  { %8774 = vrot.lane.b32.xlu1 %v8745_v61, %s16715_s13  ;;  %v8442_v61 = vrot.slane %v14582_v39, 1  ;;  %v16494_v39 = vld [vmem:[#allocation3 + $0x18] sm:$0xf] }
 0x49f   :  { %9002 = vrot.lane.b32.xlu1 %v8971_v50, %s16715_s13  ;;  %v8443_v50 = vrot.slane %v14583_v52, 1  ;;  %v14602_v52 = vcombine.low %v16494_v39, %v21127_v24 }
 0x4a3   :  { %8778 = vrot.lane.b32.xlu1 %v8747_v41, %s16715_s13 }
 0x4aa   :  { %v8521_v40 = vpop.permute.xlu0 %8520 }
 0x4ab   :  { %v9161_v41 = vsel %vm9068_vm2, %v8442_v61, %v8521_v40  ;;  %v16495_v40 = vld [vmem:[#allocation3 + $0x20] sm:$0xf]  ;;  %v8584_v61 = vrot.slane %v8582_v47, 1 }
 0x4ac   :  { %v14603_v21 = vcombine.low %v16495_v40, %v21302_v59 }
 0x4ad   :  { %v15378_v57 = vpop.f32.mrf.mxu1 }
 0x4ae   :  { %v8377_v33 = vpop.permute.xlu0 %8376 }
 0x4af   :  { %v15379_v22 = vpop.f32.mrf.mxu1  ;;  %v9113_v6 = vsel %vm9068_vm2, %v21104_v17, %v8377_v33  ;;  %v8573_v17 = vshrl.u32 %v14600_v20, 16 }
 0x4b0   :  { %v21369_v14 = vadd.f32 %v15379_v22, %v15378_v57 }
 0x4b2   :  { %22465 = vst [vmem:[#allocation38_spill] sm:$0xff] %v21369_v14  ;;  %v8973_v30 = vpop.permute.xlu0 %8972  ;;  %v8575_v14 = vshll.u32 %v14600_v20, 16  ;;  %v16497_v20 = vld [vmem:[#allocation3 + $0x30] sm:$0xf] }
 0x4b4   :  { %v8577_v56 = vrot.slane %v8575_v14, 1 }
 0x4b6   :  { %v8749_v49 = vpop.permute.xlu0 %8748 }
 0x4ba   :  { %v8977_v51 = vpop.permute.xlu0 %8976 }
 0x4bb   :  { %v9221_v40 = vsel %vm9068_vm2, %v21109_v4, %v8977_v51  ;;  %v16498_v4 = vld [vmem:[#allocation3 + $0x38] sm:$0xf] }
 0x4bc   :  { %v14606_v51 = vcombine.low %v16498_v4, %v21250_v11 }
 0x4be   :  { %v21371_v37 = vpop.permute.xlu0 %8752  ;;  %v8617_v11 = vshll.u32 %v14606_v51, 16 }
 0x4c2   :  { %v21377_v44 = vpop.permute.xlu0 %8980 }
 0x4c6   :  { %v21383_v62 = vpop.permute.xlu0 %8756 }
 0x4d1   :  { %v8523_v36 = vpop.permute.xlu1 %8522 }
 0x4d2   :  { %v9164_v57 = vsel %vm9068_vm2, %v8443_v50, %v8523_v36  ;;  %v9215_v36 = vsel %vm9068_vm2, %v21095_v3, %v8973_v30  ;;  %v16496_v3 = vld [vmem:[#allocation3 + $0x28] sm:$0xf] }
 0x4d3   :  { %v14700_v22 = vcombine.low %v9161_v41, %v9164_v57  ;;  %v8580_v41 = vshrl.u32 %v14601_v5, 16  ;;  %v8578_v57 = vor.u32 %v8577_v56, %v8573_v17  ;;  %v14604_v30 = vcombine.low %v16496_v3, %v21212_v29 }
 0x4d4   :  { %v8587_v56 = vshrl.u32 %v14602_v52, 16 }
 0x4d5   :  { %v8379_v1 = vpop.permute.xlu1 %8378  ;;  %9877 = vmatprep.mubr.bf16.mxu1 %v14700_v22  ;;  %v8589_v22 = vshll.u32 %v14602_v52, 16  ;;  %v8585_v24 = vor.u32 %v8584_v61, %v8580_v41  ;;  %v9167_v14 = vsel %vm9068_vm2, %v8578_v57, %v8749_v49  ;;  %v16499_v52 = vld [vmem:[#allocation3 + $0x40] sm:$0xf] }
 0x4d6   :  { %v9116_v28 = vsel %vm9068_vm2, %v21230_v8, %v8379_v1  ;;  %v21393_v1 = vpop.permute.xlu0 %8984 }
 0x4d7   :  { %v14699_v18 = vcombine.low %v9113_v6, %v9116_v28  ;;  %v8596_v6 = vshll.u32 %v14603_v21, 16  ;;  %v8591_v5 = vrot.slane %v8589_v22, 1 }
 0x4d9   :  { %v8975_v50 = vpop.permute.xlu1 %8974  ;;  %9878 = vmatmul.mubr.bf16.gmra.mxu1 %v14699_v18  ;;  %v8598_v18 = vrot.slane %v8596_v6, 1  ;;  %v8592_v17 = vor.u32 %v8591_v5, %v8587_v56 }
 0x4da   :  { %v9218_v33 = vsel %vm9068_vm2, %v21236_v27, %v8975_v50  ;;  %v14605_v27 = vcombine.low %v16497_v20, %v21314_v2  ;;  %v8761_v61 = vpop.permute.xlu0 %8760  ;;  %v8594_v50 = vshrl.u32 %v14603_v21, 16 }
 0x4db   :  { %v14667_v8 = vcombine.low %v9215_v36, %v9218_v33  ;;  %v8603_v33 = vshll.u32 %v14604_v30, 16  ;;  %v9173_v2 = vsel %vm9068_vm2, %v8592_v17, %v21371_v37  ;;  %v9233_v17 = vsel %vm9068_vm2, %v21175_v26, %v21393_v1  ;;  %v16503_v1 = vld [vmem:[#allocation3 + $0x70] sm:$0xf] }
 0x4dc   :  { %v8599_v29 = vor.u32 %v8598_v18, %v8594_v50  ;;  %v8610_v41 = vshll.u32 %v14605_v27, 16 }
 0x4dd   :  { %v8751_v59 = vpop.permute.xlu1 %8750  ;;  %9918 = vmatprep.mubr.bf16.mxu1 %v14667_v8  ;;  %v8605_v21 = vrot.slane %v8603_v33, 1  ;;  %v8615_v33 = vshrl.u32 %v14606_v51, 16 }
 0x4de   :  { %v9170_v47 = vsel %vm9068_vm2, %v8585_v24, %v8751_v59  ;;  %v8989_v24 = vpop.permute.xlu0 %8988  ;;  %v8612_v6 = vrot.slane %v8610_v41, 1 }
 0x4df   :  { %v14666_v28 = vcombine.low %v9167_v14, %v9170_v47  ;;  %v9227_v14 = vsel %vm9068_vm2, %v21133_v54, %v21377_v44  ;;  %v8601_v47 = vshrl.u32 %v14604_v30, 16  ;;  %v16500_v54 = vld [vmem:[#allocation3 + $0x58] sm:$0xf]  ;;  %v16501_v30 = vld [vmem:[#allocation3 + $0x60] sm:$0xf] }
 0x4e0   :  { %v14608_v44 = vcombine.low %v16500_v54, %v21269_v42 }
 0x4e1   :  { %v8979_v39 = vpop.permute.xlu1 %8978  ;;  %9919 = vmatmul.mubr.bf16.vlgmr.msra.gmra.mxu1 %v14666_v28  ;;  %v8608_v28 = vshrl.u32 %v14605_v27, 16  ;;  %v8606_v20 = vor.u32 %v8605_v21, %v8601_v47  ;;  %v8619_v27 = vrot.slane %v8617_v11, 1 }
 0x4e2   :  { %v9224_v49 = vsel %vm9068_vm2, %v21275_v58, %v8979_v39  ;;  %v14607_v58 = vcombine.low %v16499_v52, %v21328_v34  ;;  %v8629_v47 = vshrl.u32 %v14608_v44, 16 }
 0x4e3   :  { %v14672_v36 = vcombine.low %v9221_v40, %v9224_v49  ;;  %v8613_v5 = vor.u32 %v8612_v6, %v8608_v28  ;;  %v9179_v39 = vsel %vm9068_vm2, %v8606_v20, %v21383_v62  ;;  %v8765_v40 = vpop.permute.xlu0 %8764  ;;  %v16502_v6 = vld [vmem:[#allocation3 + $0x68] sm:$0xf] }
 0x4e4   :  { %v8624_v18 = vshll.u32 %v14607_v58, 16  ;;  %v14610_v26 = vcombine.low %v16502_v6, %v21290_v19 }
 0x4e5   :  { %v8755_v8 = vpop.permute.xlu1 %8754  ;;  %9926 = vmatprep.mubr.bf16.mxu1 %v14672_v36 }
 0x4e6   :  { %v9176_v57 = vsel %vm9068_vm2, %v8599_v29, %v8755_v8  ;;  %v8626_v50 = vrot.slane %v8624_v18, 1  ;;  %v8622_v29 = vshrl.u32 %v14607_v58, 16  ;;  %v8620_v8 = vor.u32 %v8619_v27, %v8615_v33 }
 0x4e7   :  { %v14671_v22 = vcombine.low %v9173_v2, %v9176_v57  ;;  %v8631_v2 = vshll.u32 %v14608_v44, 16  ;;  %v8993_v42 = vpop.permute.xlu0 %8992  ;;  %v8645_v11 = vshll.u32 %v14610_v26, 16  ;;  %v8643_v54 = vshrl.u32 %v14610_v26, 16 }
 0x4e8   :  { %v8627_v57 = vor.u32 %v8626_v50, %v8622_v29  ;;  %v9185_v4 = vsel %vm9068_vm2, %v8620_v8, %v8761_v61  ;;  %v8673_v26 = vshll.u32 %v21149_v35, 16 }
 0x4e9   :  { %v8983_v59 = vpop.permute.xlu1 %8982  ;;  %9927 = vmatmul.mubr.bf16.gmra.mxu1 %v14671_v22  ;;  %v8633_v51 = vrot.slane %v8631_v2, 1 }
 0x4ea   :  { %v9230_v37 = vsel %vm9068_vm2, %v21293_v0, %v8983_v59  ;;  %v14609_v0 = vcombine.low %v16501_v30, %v21343_v63 }
 0x4eb   :  { %v14677_v3 = vcombine.low %v9227_v14, %v9230_v37  ;;  %v9239_v14 = vsel %vm9068_vm2, %v21225_v31, %v8989_v24  ;;  %v8769_v37 = vpop.permute.xlu0 %8768  ;;  %v8634_v20 = vor.u32 %v8633_v51, %v8629_v47 }
 0x4ec   :  { %v8638_v22 = vshll.u32 %v14609_v0, 16  ;;  %v8636_v28 = vshrl.u32 %v14609_v0, 16 }
 0x4ed   :  { %v8759_v34 = vpop.permute.xlu1 %8758  ;;  %9934 = vmatprep.mubr.bf16.mxu1 %v14677_v3 }
 0x4ee   :  { %v9182_v56 = vsel %vm9068_vm2, %v8613_v5, %v8759_v34  ;;  %v8640_v58 = vrot.slane %v8638_v22, 1 }
 0x4ef   :  { %v14676_v49 = vcombine.low %v9179_v39, %v9182_v56  ;;  %v8647_v56 = vrot.slane %v8645_v11, 1  ;;  %v8997_v31 = vpop.permute.xlu0 %8996  ;;  %v8678_v11 = vshrl.u32 %v21272_v23, 16 }
 0x4f0   :  { %v8641_v19 = vor.u32 %v8640_v58, %v8636_v28 }
 0x4f1   :  { %v8987_v36 = vpop.permute.xlu1 %8986  ;;  %9935 = vmatmul.mubr.bf16.gmra.mxu1 %v14676_v49  ;;  %v8648_v27 = vor.u32 %v8647_v56, %v8643_v54  ;;  %v16068_v54 = vld [vmem:[#allocation11 + $0x170] ss:$8 sps:$4 sm:$0xff]  }
 0x4f2   :  { %v9236_v62 = vsel %vm9068_vm2, %v21305_v15, %v8987_v36  ;;  %v14611_v15 = vcombine.low %v16503_v1, %v21354_v25  ;;  %v9191_v25 = vsel %vm9068_vm2, %v8634_v20, %v8765_v40  ;;  %v8659_v40 = vshll.u32 %v21050_v60, 16 }
 0x4f3   :  { %v14682_v41 = vcombine.low %v9233_v17, %v9236_v62  ;;  %v8666_v36 = vshll.u32 %v21069_v45, 16  ;;  %v9197_v33 = vsel %vm9068_vm2, %v8648_v27, %v8769_v37  ;;  %v8773_v62 = vpop.permute.xlu0 %8772  ;;  %v16074_v27 = vld [vmem:[#allocation11 + $0x160] ss:$8 sps:$4 sm:$0xff]  }
 0x4f4   :  { %v8652_v5 = vshll.u32 %v14611_v15, 16  ;;  %v8650_v30 = vshrl.u32 %v14611_v15, 16  ;;  %v8661_v8 = vrot.slane %v8659_v40, 1  ;;  %v8680_v15 = vshll.u32 %v21272_v23, 16  ;;  %v16065_v23 = vld [vmem:[#allocation11 + $0x70] ss:$8 sps:$4 sm:$0xff]  }
 0x4f5   :  { %v8763_v63 = vpop.permute.xlu1 %8762  ;;  %9942 = vmatprep.mubr.bf16.mxu1 %v14682_v41  ;;  %v16076_v40 = vld [vmem:[#allocation11 + $0x164] ss:$8 sps:$4 sm:$0xff]  }
 0x4f6   :  { %v9188_v52 = vsel %vm9068_vm2, %v8627_v57, %v8763_v63  ;;  %v8654_v24 = vrot.slane %v8652_v5, 1  ;;  %v8657_v57 = vshrl.u32 %v21050_v60, 16  ;;  %v8664_v63 = vshrl.u32 %v21069_v45, 16 }
 0x4f7   :  { %v14681_v21 = vcombine.low %v9185_v4, %v9188_v52  ;;  %v9001_v6 = vpop.permute.xlu0 %9000  ;;  %v8675_v45 = vrot.slane %v8673_v26, 1  ;;  %v16106_v26 = vld [vmem:[#allocation11 + $0x114] ss:$8 sps:$4 sm:$0xff]  }
 0x4f8   :  { %v8655_v50 = vor.u32 %v8654_v24, %v8650_v30  ;;  %v9257_v28 = vsel %vm9068_vm2, %v21296_v32, %v9001_v6  ;;  %v16071_v30 = vld [vmem:[#allocation11 + $0x60] ss:$8 sps:$4 sm:$0xff]   ;;  %v16103_v6 = vld [vmem:[#allocation11 + $0x14] ss:$8 sps:$4 sm:$0xff]  }
 0x4f9   :  { %v8991_v59 = vpop.permute.xlu1 %8990  ;;  %9943 = vmatmul.mubr.bf16.gmra.mxu1 %v14681_v21  ;;  %v8662_v21 = vor.u32 %v8661_v8, %v8657_v57  ;;  %v16088_v8 = vld [vmem:[#allocation11 + $0x144] ss:$8 sps:$4 sm:$0xff]   ;;  %v16092_v57 = vld [vmem:[#allocation11 + $0x130] ss:$8 sps:$4 sm:$0xff]  }
 0x4fa   :  { %v9242_v61 = vsel %vm9068_vm2, %v21320_v12, %v8991_v59  ;;  %v9245_v12 = vsel %vm9068_vm2, %v21255_v13, %v8993_v42  ;;  %v21441_v13 = vpop.f32.mrf.mxu1  ;;  %v9251_v42 = vsel %vm9068_vm2, %v21278_v9, %v8997_v31 }
 0x4fb   :  { %v14687_v3 = vcombine.low %v9239_v14, %v9242_v61  ;;  %v9203_v60 = vsel %vm9068_vm2, %v8662_v21, %v8773_v62  ;;  %v8682_v14 = vrot.slane %v8680_v15, 1  ;;  %v16083_v62 = vld [vmem:[#allocation11 + $0x40] ss:$8 sps:$4 sm:$0xff]   ;;  %v16104_v15 = vld [vmem:[#allocation11 + $0x110] ss:$8 sps:$4 sm:$0xff]  }
 0x4fc   :  { %v21449_v4 = vpop.f32.mrf.mxu1  ;;  %v16098_v21 = vld [vmem:[#allocation11 + $0x120] ss:$8 sps:$4 sm:$0xff]  }
 0x4fd   :  { %v8767_v18 = vpop.permute.xlu1 %8766  ;;  %9950 = vmatprep.mubr.bf16.mxu1 %v14687_v3  ;;  %v8671_v3 = vshrl.u32 %v21149_v35, 16 }
 0x4fe   :  { %v9194_v34 = vsel %vm9068_vm2, %v8641_v19, %v8767_v18  ;;  %v8777_v19 = vpop.permute.xlu0 %8776 }
 0x4ff   :  { %v14686_v39 = vcombine.low %v9191_v25, %v9194_v34  ;;  %v8676_v25 = vor.u32 %v8675_v45, %v8671_v3  ;;  %v8683_v34 = vor.u32 %v8682_v14, %v8678_v11  ;;  %v16113_v45 = vld [vmem:[#allocation11 + $0xf0] ss:$8 sps:$4 sm:$0xff]   ;;  %v16124_v3 = vld [vmem:[#allocation11 + $0x1e4] ss:$8 sps:$4 sm:$0xff]   ;;  %v16130_v11 = vld [vmem:[#allocation11 + $0x1d4] ss:$8 sps:$4 sm:$0xff]  }
 0x500   :  { %v16116_v14 = vld [vmem:[#allocation11 + $0x1f0] ss:$8 sps:$4 sm:$0xff]  }
 0x501   :  { %v8995_v49 = vpop.permute.xlu1 %8994  ;;  %9951 = vmatmul.mubr.bf16.gmra.mxu1 %v14686_v39  ;;  %v9209_v31 = vsel %vm9068_vm2, %v8676_v25, %v8777_v19  ;;  %v16125_v19 = vld [vmem:[#allocation11 + $0xd0] ss:$8 sps:$4 sm:$0xff]   ;;  %v16131_v25 = vld [vmem:[#allocation11 + $0xc0] ss:$8 sps:$4 sm:$0xff]  }
 0x502   :  { %v9248_v44 = vsel %vm9068_vm2, %v21333_v55, %v8995_v49  ;;  %v8668_v55 = vrot.slane %v8666_v36, 1  ;;  %v16082_v36 = vld [vmem:[#allocation11 + $0x154] ss:$8 sps:$4 sm:$0xff]  }
 0x503   :  { %v14692_v0 = vcombine.low %v9245_v12, %v9248_v44  ;;  %v16067_v12 = vld [vmem:[#allocation11 + $0x74] ss:$8 sps:$4 sm:$0xff]  }
 0x504   :  { %v8669_v1 = vor.u32 %v8668_v55, %v8664_v63  ;;  %v16070_v44 = vld [vmem:[#allocation11 + $0x174] ss:$8 sps:$4 sm:$0xff]   ;;  %12535 = vmatprep.subr.bf16.mxu1 %v16067_v12  ;;  %v16100_v63 = vld [vmem:[#allocation11 + $0x124] ss:$8 sps:$4 sm:$0xff]   ;;  %v16140_v12 = vld [vmem:[#allocation11 + $0x1b0] ss:$8 sps:$4 sm:$0xff]  }
 0x505   :  { %v8771_v17 = vpop.permute.xlu1 %8770  ;;  %9958 = vmatprep.mubr.bf16.mxu1 %v14692_v0  ;;  %12588 = vmatprep.subr.bf16.mxu0 %v16070_v44  ;;  %v16073_v0 = vld [vmem:[#allocation11 + $0x64] ss:$8 sps:$4 sm:$0xff]   ;;  %v16091_v55 = vld [vmem:[#allocation11 + $0x34] ss:$8 sps:$4 sm:$0xff]  }
 0x506   :  { %v9200_v29 = vsel %vm9068_vm2, %v8655_v50, %v8771_v17  ;;  %12536 = vmatpush1.bf16.msra.mxu1 %v16065_v23  ;;  %12589 = vmatpush1.bf16.msra.mxu0 %v16068_v54  ;;  %v16079_v50 = vld [vmem:[#allocation11 + $0x54] ss:$8 sps:$4 sm:$0xff]   ;;  %v16077_v17 = vld [vmem:[#allocation11 + $0x50] ss:$8 sps:$4 sm:$0xff]   ;;  %v16145_v54 = vld [vmem:[#allocation11 + $0xa4] ss:$8 sps:$4 sm:$0xff]  }
 0x507   :  { %v14691_v41 = vcombine.low %v9197_v33, %v9200_v29  ;;  %12537 = vmatprep.subr.bf16.mxu1 %v16073_v0  ;;  %12590 = vmatprep.subr.bf16.mxu0 %v16076_v40  ;;  %v16080_v33 = vld [vmem:[#allocation11 + $0x150] ss:$8 sps:$4 sm:$0xff]   ;;  %v16085_v29 = vld [vmem:[#allocation11 + $0x44] ss:$8 sps:$4 sm:$0xff]  }
 0x508   :  { %v16148_v44 = vld [vmem:[#allocation11 + $0x1a4] ss:$8 sps:$4 sm:$0xff]  }
 0x509   :  { %v8999_v2 = vpop.permute.xlu1 %8998  ;;  %9959 = vmatmul.mubr.bf16.gmra.mxu1 %v14691_v41  ;;  %v16086_v41 = vld [vmem:[#allocation11 + $0x140] ss:$8 sps:$4 sm:$0xff]  }
 0x50a   :  { %v9254_v22 = vsel %vm9068_vm2, %v21346_v16, %v8999_v2  ;;  %12538 = vmatpush1.bf16.msra.mxu1 %v16071_v30  ;;  %12591 = vmatpush1.bf16.msra.mxu0 %v16074_v27  ;;  %v16094_v2 = vld [vmem:[#allocation11 + $0x134] ss:$8 sps:$4 sm:$0xff]   ;;  %v16143_v27 = vld [vmem:[#allocation11 + $0xa0] ss:$8 sps:$4 sm:$0xff]  }
 0x50b   :  { %v14697_v52 = vcombine.low %v9251_v42, %v9254_v22  ;;  %v15384_v9 = vpop.f32.mrf.mxu1  ;;  %12539 = vmatprep.subr.bf16.mxu1 %v16079_v50  ;;  %12592 = vmatprep.subr.bf16.mxu0 %v16082_v36  ;;  %v16089_v42 = vld [vmem:[#allocation11 + $0x30] ss:$8 sps:$4 sm:$0xff]   ;;  %v16097_v22 = vld [vmem:[#allocation11 + $0x24] ss:$8 sps:$4 sm:$0xff]   ;;  %v16146_v50 = vld [vmem:[#allocation11 + $0x1a0] ss:$8 sps:$4 sm:$0xff]  }
 0x50c   :  { %v16151_v36 = vld [vmem:[#allocation11 + $0x94] ss:$8 sps:$4 sm:$0xff]  }
 0x50d   :  { %v8775_v51 = vpop.permute.xlu1 %8774  ;;  %9966 = vmatprep.mubr.bf16.mxu1 %v14697_v52  ;;  %v15385_v59 = vpop.f32.mrf.mxu1  ;;  %v16095_v52 = vld [vmem:[#allocation11 + $0x20] ss:$8 sps:$4 sm:$0xff]  }
 0x50e   :  { %v9206_v58 = vsel %vm9068_vm2, %v8669_v1, %v8775_v51  ;;  %v21455_v47 = vadd.f32 %v15385_v59, %v15384_v9  ;;  %12540 = vmatpush1.bf16.msra.mxu1 %v16077_v17  ;;  %12593 = vmatpush1.bf16.msra.mxu0 %v16080_v33  ;;  %v16101_v1 = vld [vmem:[#allocation11 + $0x10] ss:$8 sps:$4 sm:$0xff]   ;;  %v16109_v51 = vld [vmem:[#allocation11 + $0x4] ss:$8 sps:$4 sm:$0xff]   ;;  %v16107_v9 = vld [vmem:[#allocation11] ss:$8 sps:$4 sm:$0xff]   ;;  %v15602_v33 = vpop.f32.mrf.mxu0 }
 0x50f   :  { %v14696_v16 = vcombine.low %v9203_v60, %v9206_v58  ;;  %v15387_v61 = vpop.f32.mrf.mxu1  ;;  %12541 = vmatprep.subr.bf16.mxu1 %v16085_v29  ;;  %12594 = vmatprep.subr.bf16.mxu0 %v16088_v8  ;;  %v16112_v60 = vld [vmem:[#allocation11 + $0x104] ss:$8 sps:$4 sm:$0xff]   ;;  %v16110_v58 = vld [vmem:[#allocation11 + $0x100] ss:$8 sps:$4 sm:$0xff]   ;;  %v16118_v59 = vld [vmem:[#allocation11 + $0x1f4] ss:$8 sps:$4 sm:$0xff]  }
 0x510   :  { %v16154_v17 = vld [vmem:[#allocation11 + $0x194] ss:$8 sps:$4 sm:$0xff]  }
 0x511   :  { %v9003_v37 = vpop.permute.xlu1 %9002  ;;  %9967 = vmatmul.mubr.bf16.gmra.mxu1 %v14696_v16  ;;  %v15388_v18 = vpop.f32.mrf.mxu1  ;;  %v16115_v16 = vld [vmem:[#allocation11 + $0xf4] ss:$8 sps:$4 sm:$0xff]  }
 0x512   :  { %v9260_v20 = vsel %vm9068_vm2, %v21356_v10, %v9003_v37  ;;  %v21463_v39 = vadd.f32 %v15388_v18, %v15387_v61  ;;  %12542 = vmatpush1.bf16.msra.mxu1 %v16083_v62  ;;  %12595 = vmatpush1.bf16.msra.mxu0 %v16086_v41  ;;  %v16119_v37 = vld [vmem:[#allocation11 + $0xe0] ss:$8 sps:$4 sm:$0xff]   ;;  %v16121_v61 = vld [vmem:[#allocation11 + $0xe4] ss:$8 sps:$4 sm:$0xff]   ;;  %v16149_v41 = vld [vmem:[#allocation11 + $0x90] ss:$8 sps:$4 sm:$0xff]  }
 0x513   :  { %v14702_v5 = vcombine.low %v9257_v28, %v9260_v20  ;;  %12543 = vmatprep.subr.bf16.mxu1 %v16091_v55  ;;  %12596 = vmatprep.subr.bf16.mxu0 %v16094_v2  ;;  %v16122_v28 = vld [vmem:[#allocation11 + $0x1e0] ss:$8 sps:$4 sm:$0xff]   ;;  %v16127_v20 = vld [vmem:[#allocation11 + $0xd4] ss:$8 sps:$4 sm:$0xff]   ;;  %v16152_v55 = vld [vmem:[#allocation11 + $0x190] ss:$8 sps:$4 sm:$0xff]  }
 0x514   :  { %v16157_v2 = vld [vmem:[#allocation11 + $0x84] ss:$8 sps:$4 sm:$0xff]  }
 0x515   :  { %v8779_v56 = vpop.permute.xlu1 %8778  ;;  %9974 = vmatprep.mubr.bf16.mxu1 %v14702_v5  ;;  %v16128_v5 = vld [vmem:[#allocation11 + $0x1d0] ss:$8 sps:$4 sm:$0xff]  }
 0x516   :  { %v9212_v32 = vsel %vm9068_vm2, %v8683_v34, %v8779_v56  ;;  %12544 = vmatpush1.bf16.msra.mxu1 %v16089_v42  ;;  %12597 = vmatpush1.bf16.msra.mxu0 %v16092_v57  ;;  %v16133_v34 = vld [vmem:[#allocation11 + $0xc4] ss:$8 sps:$4 sm:$0xff]   ;;  %v16134_v56 = vld [vmem:[#allocation11 + $0x1c0] ss:$8 sps:$4 sm:$0xff]   ;;  %v10017_v57 = vpop.f32.mrf.mxu0 }
 0x517   :  { %v14701_v24 = vcombine.low %v9209_v31, %v9212_v32  ;;  %12545 = vmatprep.subr.bf16.mxu1 %v16097_v22  ;;  %12598 = vmatprep.subr.bf16.mxu0 %v16100_v63  ;;  %v16136_v31 = vld [vmem:[#allocation11 + $0x1c4] ss:$8 sps:$4 sm:$0xff]   ;;  %v16139_v32 = vld [vmem:[#allocation11 + $0xb4] ss:$8 sps:$4 sm:$0xff]  }
 0x518   :  { %v16160_v42 = vld [vmem:[#allocation11 + $0x184] ss:$8 sps:$4 sm:$0xff]   ;;  %v16161_v63 = vld [vmem:[#allocation4] ss:$0 sps:$4 sm:$0x77]  }
 0x519   :  { %9975 = vmatmul.mubr.bf16.gmra.mxu1 %v14701_v24 }
 0x51a   :  { %12546 = vmatpush1.bf16.msra.mxu1 %v16095_v52  ;;  %12599 = vmatpush1.bf16.msra.mxu0 %v16098_v21  ;;  %v16155_v21 = vld [vmem:[#allocation11 + $0x80] ss:$8 sps:$4 sm:$0xff]  }
 0x51b   :  { %12547 = vmatprep.subr.bf16.mxu1 %v16103_v6  ;;  %12600 = vmatprep.subr.bf16.mxu0 %v16106_v26  ;;  %v16158_v26 = vld [vmem:[#allocation11 + $0x180] ss:$8 sps:$4 sm:$0xff]  }
 0x51e   :  { %12548 = vmatpush1.bf16.msra.mxu1 %v16101_v1  ;;  %12601 = vmatpush1.bf16.msra.mxu0 %v16104_v15  ;;  %v16171_v1 = vld [vmem:[#allocation11 + $0x274] ss:$8 sps:$4 sm:$0xff]  }
 0x51f   :  { %12549 = vmatprep.subr.bf16.mxu1 %v16109_v51  ;;  %12602 = vmatprep.subr.bf16.mxu0 %v16112_v60  ;;  %v16174_v51 = vld [vmem:[#allocation11 + $0x374] ss:$8 sps:$4 sm:$0xff]  }
 0x520   :  { %v21478_v60 = vld [vmem:[#allocation8] ss:$0 sm:$0xff] }
 0x522   :  { %12550 = vmatpush1.bf16.msra.mxu1 %v16107_v9  ;;  %12603 = vmatpush1.bf16.msra.mxu0 %v16110_v58  ;;  %v15603_v9 = vpop.f32.mrf.mxu0 }
 0x523   :  { %12551 = vmatprep.subr.bf16.mxu1 %v16115_v16  ;;  %12604 = vmatprep.subr.bf16.mxu0 %v16118_v59  ;;  %v10814_v16 = vshll.u32 %v16161_v63, 16 }
 0x526   :  { %12552 = vmatpush2.bf16.msra.mxu1 %v16113_v45  ;;  %12605 = vmatpush2.bf16.msra.mxu0 %v16116_v14 }
 0x527   :  { %12553 = vmatprep.subr.bf16.mxu1 %v16121_v61  ;;  %12606 = vmatprep.subr.bf16.mxu0 %v16124_v3 }
 0x52a   :  { %12554 = vmatpush2.bf16.msra.mxu1 %v16119_v37  ;;  %12607 = vmatpush2.bf16.msra.mxu0 %v16122_v28  ;;  %v10020_v28 = vpop.f32.mrf.mxu0 }
 0x52b   :  { %12555 = vmatprep.subr.bf16.mxu1 %v16127_v20  ;;  %12608 = vmatprep.subr.bf16.mxu0 %v16130_v11  ;;  %v10812_v20 = vshrl.u32 %v16161_v63, 16  ;;  %v10816_v11 = vrot.slane %v10814_v16, 1 }
 0x52e   :  { %12556 = vmatpush2.bf16.msra.mxu1 %v16125_v19  ;;  %12609 = vmatpush2.bf16.msra.mxu0 %v16128_v5 }
 0x52f   :  { %12557 = vmatprep.subr.bf16.mxu1 %v16133_v34  ;;  %12610 = vmatprep.subr.bf16.mxu0 %v16136_v31 }
 0x532   :  { %12558 = vmatpush2.bf16.msra.mxu1 %v16131_v25  ;;  %12611 = vmatpush2.bf16.msra.mxu0 %v16134_v56 }
 0x533   :  { %12559 = vmatprep.subr.bf16.mxu1 %v16139_v32 }
 0x544   :  { %v15390_v35 = vpop.f32.mrf.mxu1 }
 0x546   :  { %v15391_v49 = vpop.f32.mrf.mxu1 }
 0x547   :  { %v21467_v10 = vadd.f32 %v15391_v49, %v15390_v35  ;;  %v16142_v35 = vld [vmem:[#allocation11 + $0x1b4] ss:$8 sps:$4 sm:$0xff]   ;;  %v16137_v49 = vld [vmem:[#allocation11 + $0xb0] ss:$8 sps:$4 sm:$0xff]  }
 0x548   :  { %v21469_v18 = vpop.f32.mrf.mxu1  ;;  %12612 = vmatprep.subr.bf16.mxu0 %v16142_v35  ;;  %12560 = vmatpush2.bf16.msra.mxu1 %v16137_v49  ;;  %v10817_v35 = vor.u32 %v10816_v11, %v10812_v20  ;;  %v21487_v49 = vpop.f32.mrf.mxu0 }
 0x549   :  { %12613 = vmatpush2.bf16.msra.mxu0 %v16140_v12  ;;  %12561 = vmatprep.subr.bf16.mxu1 %v16145_v54  ;;  %v10714_v54 = vld [vmem:[#allocation4] sm:$0x3] }
 0x54a   :  { %v21471_v24 = vpop.f32.mrf.mxu1  ;;  %12614 = vmatprep.subr.bf16.mxu0 %v16148_v44 }
 0x54c   :  { %12562 = vmatpush2.bf16.msra.mxu1 %v16143_v27 }
 0x54d   :  { %12615 = vmatpush2.bf16.msra.mxu0 %v16146_v50  ;;  %12563 = vmatprep.subr.bf16.mxu1 %v16151_v36 }
 0x54e   :  { %12616 = vmatprep.subr.bf16.mxu0 %v16154_v17  ;;  %v11147_v17 = vcombine.low %v10714_v54, %v10817_v35 }
 0x550   :  { %12564 = vmatpush2.bf16.msra.mxu1 %v16149_v41 }
 0x551   :  { %12617 = vmatpush2.bf16.msra.mxu0 %v16152_v55  ;;  %12565 = vmatprep.subr.bf16.mxu1 %v16157_v2 }
 0x552   :  { %12618 = vmatprep.subr.bf16.mxu0 %v16160_v42 }
 0x554   :  { %12566 = vmatpush2.bf16.msra.mxu1 %v16155_v21  ;;  %v21505_v21 = vld [vmem:[#allocation4 + $0x18] ss:$0 sps:$4 sm:$0x77]  }
 0x555   :  { %12619 = vmatpush2.bf16.msra.mxu0 %v16158_v26  ;;  %12641 = vmatprep.subr.bf16.mxu1 %v16171_v1  ;;  %v22467_v26 = vld [vmem:[#allocation32_spill] sm:$0xff] }
 0x556   :  { %12694 = vmatprep.subr.bf16.mxu0 %v16174_v51 }
 0x599   :  { %v15396_v23 = vpop.f32.mrf.mxu1 }
 0x59b   :  { %v15397_v30 = vpop.f32.mrf.mxu1 }
 0x59c   :  { %v21473_v0 = vadd.f32 %v15397_v30, %v15396_v23 }
 0x59d   :  { %v15399_v40 = vpop.f32.mrf.mxu1 }
 0x59f   :  { %v15400_v62 = vpop.f32.mrf.mxu1 }
 0x5a0   :  { %v21475_v29 = vadd.f32 %v15400_v62, %v15399_v40  ;;  %v21492_v62 = vld [vmem:[#allocation4] ss:$0 sps:$4 sm:$0x66]  }
 0x5a1   :  { %v15418_v8 = vpop.f32.mrf.mxu1 }
 0x5a3   :  { %v15419_v22 = vpop.f32.mrf.mxu1 }
 0x5a4   :  { %v15420_v52 = vadd.f32 %v15419_v22, %v15418_v8  ;;  %v22466_v22 = vld [vmem:[#allocation28_spill] sm:$0xff] }
 0x5a5   :  { %v15421_v6 = vpop.f32.mrf.mxu1  ;;  %v21509_v51 = vrot.slane %v11147_v17, %v22466_v22 }
 0x5a6   :  { %v9921_v15 = vadd.f32 %v15420_v52, %v21184_v53  ;;  %v21482_v53 = vld [vmem:[#allocation10] ss:$0 sm:$0xff] }
 0x5a7   :  { %v15422_v58 = vpop.f32.mrf.mxu1 }
 0x5a8   :  { %v10018_v59 = vadd.f32 %v10017_v57, %v9921_v15  ;;  %v15423_v45 = vadd.f32 %v15422_v58, %v15421_v6  ;;  %v21501_v57 = vadd.f32 %v21471_v24, %v21469_v18 }
 0x5a9   :  { %v15424_v14 = vpop.f32.mrf.mxu1 }
 0x5aa   :  { %v10087_v37 = vmul.f32 %v21478_v60, %v10018_v59  ;;  %v9924_v61 = vadd.f32 %v15423_v45, %v21200_v48 }
 0x5ab   :  { %v15425_v3 = vpop.f32.mrf.mxu1 }
 0x5ac   :  { %v10021_v19 = vadd.f32 %v10020_v28, %v9924_v61  ;;  %v15426_v5 = vadd.f32 %v15425_v3, %v15424_v14  ;;  %v10110_v34 = vadd.f32 %v21482_v53, %v10087_v37  ;;  %v10840_v14 = vshrl.u32 %v21505_v21, 16 }
 0x5ad   :  { %v15427_v25 = vpop.f32.mrf.mxu1  ;;  %v10842_v37 = vshll.u32 %v21505_v21, 16 }
 0x5ae   :  { %v10088_v56 = vmul.f32 %v21478_v60, %v10021_v19  ;;  %v9929_v31 = vadd.f32 %v15426_v5, %v21204_v43  ;;  %v10126_v30 = vmax.f32 %v10110_v34, 0.0  ;;  %v10033_v43 = vpop.f32.mrf.mxu0  ;;  %v22468_v5 = vld [vmem:[#allocation37_spill] sm:$0xff] }
 0x5af   :  { %v15428_v32 = vpop.f32.mrf.mxu1 }
 0x5b0   :  { %v10111_v48 = vadd.f32 %v21482_v53, %v10088_v56  ;;  %v10026_v23 = vadd.f32 %v15602_v33, %v9929_v31  ;;  %v15429_v12 = vadd.f32 %v15428_v32, %v15427_v25  ;;  %v21497_v33 = vadd.f32 %v21449_v4, %v21441_v13  ;;  %v21512_v4 = vpop.f32.mrf.mxu0 }
 0x5b1   :  { %v15430_v44 = vpop.f32.mrf.mxu1  ;;  %v10891_v13 = vrot.slane %v21492_v62, 1  ;;  %v21520_v56 = vrot.slane %v10842_v37, 1  ;;  %v10718_v62 = vld [vmem:[#allocation4 + $0x18] sm:$0x3] }
 0x5b2   :  { %v10127_v27 = vmax.f32 %v10111_v48, 0.0  ;;  %v10089_v40 = vmul.f32 %v21478_v60, %v10026_v23  ;;  %v9932_v50 = vadd.f32 %v15429_v12, %v21207_v38  ;;  %v10036_v31 = vpop.f32.mrf.mxu0 }
 0x5b3   :  { %v15431_v36 = vpop.f32.mrf.mxu1 }
 0x5b4   :  { %v10142_v41 = vmax.f32 %v10126_v30, %v10127_v27  ;;  %v10112_v8 = vadd.f32 %v21482_v53, %v10089_v40  ;;  %v10029_v55 = vadd.f32 %v15603_v9, %v9932_v50  ;;  %v15432_v2 = vadd.f32 %v15431_v36, %v15430_v44 }
 0x5b5   :  { %v15433_v42 = vpop.f32.mrf.mxu1 }
 0x5b6   :  { %v10158_v38 = vcombine.high %v10142_v41, %v10142_v41  ;;  %v10165_v63 = vrot.slane %v10142_v41, %v22466_v22  ;;  %v10090_v52 = vmul.f32 %v21478_v60, %v10029_v55  ;;  %v10128_v6 = vmax.f32 %v10112_v8, 0.0 }
 0x5b7   :  { %v9937_v1 = vadd.f32 %v15432_v2, %v22467_v26  ;;  %v15434_v15 = vpop.f32.mrf.mxu1 }
 0x5b8   :  { %v10172_v18 = vrot.slane %v10158_v38, %v22466_v22  ;;  %v10173_v24 = vcombine.high %v10165_v63, %v10165_v63  ;;  %v14750_v9 = vrot.slane %v10165_v63, 9  ;;  %v10113_v58 = vadd.f32 %v21482_v53, %v10090_v52 }
 0x5b9   :  { %v10034_v16 = vadd.f32 %v10033_v43, %v9937_v1  ;;  %v15435_v59 = vadd.f32 %v15434_v15, %v15433_v42  ;;  %v15436_v45 = vpop.f32.mrf.mxu1 }
 0x5ba   :  { %v10174_v61 = vcombine.high %v10172_v18, %v10172_v18  ;;  %v14751_v28 = vrot.slane %v10173_v24, 9  ;;  %v14752_v3 = vrot.slane %v10172_v18, 9  ;;  %v10422_v20 = vmax.f32 %v10165_v63, %v14750_v9 }
 0x5bb   :  { %v10129_v11 = vmax.f32 %v10113_v58, 0.0  ;;  %v10091_v19 = vmul.f32 %v21478_v60, %v10034_v16  ;;  %v9940_v25 = vadd.f32 %v15435_v59, %v22468_v5  ;;  %v15437_v34 = vpop.f32.mrf.mxu1  ;;  %v21532_v59 = vpop.f32.mrf.mxu0 }
 0x5bc   :  { %v14753_v32 = vrot.slane %v10174_v61, 9  ;;  %v10423_v35 = vmax.f32 %v10173_v24, %v14751_v28  ;;  %v10424_v48 = vmax.f32 %v10172_v18, %v14752_v3  ;;  %v15271_v23 = vpack.c.bf16 %v10422_v20, %v10422_v20 }
 0x5bd   :  { %v10143_v12 = vmax.f32 %v10128_v6, %v10129_v11  ;;  %v10114_v54 = vadd.f32 %v21482_v53, %v10091_v19  ;;  %v10037_v44 = vadd.f32 %v10036_v31, %v9940_v25  ;;  %v15438_v30 = vadd.f32 %v15437_v34, %v15436_v45  ;;  %v21523_v27 = vpop.f32.mrf.mxu1 }
 0x5be   :  { %v10425_v40 = vmax.f32 %v10174_v61, %v14753_v32  ;;  %v15272_v50 = vpack.c.bf16 %v10423_v35, %v10423_v35  ;;  %v15273_v36 = vpack.c.bf16 %v10424_v48, %v10424_v48  ;;  %v10582_v17 = vunpack.c.l.b16 %v15271_v23  ;;  %v10690_v23 = vld [vmem:[#allocation4 + $0x4] sm:$0x7]  ;;  %v16187_v48 = vld [vmem:[#allocation11 + $0x240] ss:$8 sps:$4 sm:$0xff]  }
 0x5bf   :  { %v10175_v43 = vcombine.high %v10143_v12, %v10143_v12  ;;  %v10182_v41 = vrot.slane %v10143_v12, %v22466_v22  ;;  %v10130_v8 = vmax.f32 %v10114_v54, 0.0  ;;  %v10092_v55 = vmul.f32 %v21478_v60, %v10037_v44  ;;  %v21527_v2 = vpop.f32.mrf.mxu1 }
 0x5c0   :  { %v15274_v42 = vpack.c.bf16 %v10425_v40, %v10425_v40  ;;  %v10583_v38 = vunpack.c.l.b16 %v15272_v50  ;;  %v10584_v63 = vunpack.c.l.b16 %v15273_v36  ;;  %v10614_v52 = vrot.slane %v10582_v17, 7 }
 0x5c1   :  { %v10189_v6 = vrot.slane %v10175_v43, %v22466_v22  ;;  %v10190_v26 = vcombine.high %v10182_v41, %v10182_v41  ;;  %v14754_v1 = vrot.slane %v10182_v41, 9  ;;  %v10115_v15 = vadd.f32 %v21482_v53, %v10092_v55  ;;  %v15442_v18 = vpop.f32.mrf.mxu1 }
 0x5c2   :  { %v10585_v24 = vunpack.c.l.b16 %v15274_v42  ;;  %v10615_v9 = vrot.slane %v10583_v38, 6  ;;  %v10617_v58 = vrot.slane %v10584_v63, 5  ;;  %v9945_v16 = vadd.f32 %v15438_v30, %v21341_v7 }
 0x5c3   :  { %v10191_v45 = vcombine.high %v10189_v6, %v10189_v6  ;;  %v14755_v37 = vrot.slane %v10190_v26, 9  ;;  %v14756_v61 = vrot.slane %v10189_v6, 9  ;;  %v10426_v28 = vmax.f32 %v10182_v41, %v14754_v1  ;;  %v15443_v3 = vpop.f32.mrf.mxu1 }
 0x5c4   :  { %v10616_v20 = vsel %vm7634_vm3, %v10615_v9, %v10614_v52  ;;  %v10619_v11 = vrot.slane %v10585_v24, 4  ;;  %v10131_v19 = vmax.f32 %v10115_v15, 0.0  ;;  %v10042_v5 = vadd.f32 %v21487_v49, %v9945_v16  ;;  %v10049_v49 = vpop.f32.mrf.mxu0 }
 0x5c5   :  { %v10618_v25 = vsel %vm7637_vm14, %v10617_v58, %v10616_v20  ;;  %v14757_v34 = vrot.slane %v10191_v45, 9  ;;  %v10427_v31 = vmax.f32 %v10190_v26, %v14755_v37  ;;  %v10428_v32 = vmax.f32 %v10189_v6, %v14756_v61  ;;  %v15445_v35 = vpop.f32.mrf.mxu1 }
 0x5c6   :  { %v10620_v7 = vsel %vm7640_vm13, %v10619_v11, %v10618_v25  ;;  %v15275_v12 = vpack.c.bf16 %v10426_v28, %v10426_v28  ;;  %v10144_v54 = vmax.f32 %v10130_v8, %v10131_v19  ;;  %v10093_v44 = vmul.f32 %v21478_v60, %v10042_v5  ;;  %v21552_v9 = vpop.f32.mrf.mxu0 }
 0x5c7   :  { %v10670_v30 = vpack.c.b16 %v10620_v7, %v10620_v7  ;;  %v10429_v40 = vmax.f32 %v10191_v45, %v14757_v34  ;;  %v15276_v50 = vpack.c.bf16 %v10427_v31, %v10427_v31  ;;  %v15277_v36 = vpack.c.bf16 %v10428_v32, %v10428_v32  ;;  %v15446_v17 = vpop.f32.mrf.mxu1 }
 0x5c8   :  { %v10586_v43 = vunpack.c.l.b16 %v15275_v12  ;;  %v10192_v41 = vcombine.high %v10144_v54, %v10144_v54  ;;  %v10199_v55 = vrot.slane %v10144_v54, %v22466_v22  ;;  %v21547_v42 = vadd.f32 %v21482_v53, %v10093_v44  ;;  %v10052_v44 = vpop.f32.mrf.mxu0 }
 0x5c9   :  { %v10691_v38 = vsel %vm21540_vm12, %v10670_v30, %v10690_v23  ;;  %v15278_v63 = vpack.c.bf16 %v10429_v40, %v10429_v40  ;;  %v10587_v8 = vunpack.c.l.b16 %v15276_v50  ;;  %v10588_v52 = vunpack.c.l.b16 %v15277_v36  ;;  %v15448_v6 = vpop.f32.mrf.mxu1  ;;  %v10693_v40 = vld [vmem:[#allocation4 + $0x8] sm:$0x7] }
 0x5ca   :  { %10692 = vst [vmem:[#allocation4 + $0x4] sm:$0x7] %v10691_v38  ;;  %v10621_v26 = vrot.slane %v10586_v43, 7  ;;  %v10206_v1 = vrot.slane %v10192_v41, %v22466_v22  ;;  %v10207_v15 = vcombine.high %v10199_v55, %v10199_v55  ;;  %v14758_v24 = vrot.slane %v10199_v55, 9  ;;  %v22471_v43 = vld [vmem:[#allocation38_spill] sm:$0xff] }
 0x5cb   :  { %v10589_v58 = vunpack.c.l.b16 %v15278_v63  ;;  %v10622_v16 = vrot.slane %v10587_v8, 6  ;;  %v10624_v45 = vrot.slane %v10588_v52, 5  ;;  %v10132_v37 = vmax.f32 %v21547_v42, 0.0  ;;  %v15449_v61 = vpop.f32.mrf.mxu1 }
 0x5cc   :  { %v10208_v28 = vcombine.high %v10206_v1, %v10206_v1  ;;  %v14759_v20 = vrot.slane %v10207_v15, 9  ;;  %v14760_v11 = vrot.slane %v10206_v1, 9  ;;  %v10430_v19 = vmax.f32 %v10199_v55, %v14758_v24 }
 0x5cd   :  { %v10623_v5 = vsel %vm7634_vm3, %v10622_v16, %v10621_v26  ;;  %v10626_v25 = vrot.slane %v10589_v58, 4  ;;  %v15441_v34 = vadd.f32 %v21527_v2, %v21523_v27  ;;  %v15444_v31 = vadd.f32 %v15443_v3, %v15442_v18  ;;  %v15451_v32 = vpop.f32.mrf.mxu1  ;;  %v21562_v18 = vpop.f32.mrf.mxu0 }
 0x5ce   :  { %v10625_v7 = vsel %vm7637_vm14, %v10624_v45, %v10623_v5  ;;  %v14761_v23 = vrot.slane %v10208_v28, 9  ;;  %v10431_v12 = vmax.f32 %v10207_v15, %v14759_v20  ;;  %v10432_v54 = vmax.f32 %v10206_v1, %v14760_v11 }
 0x5cf   :  { %v10627_v30 = vsel %vm7640_vm13, %v10626_v25, %v10625_v7  ;;  %v15279_v50 = vpack.c.bf16 %v10430_v19, %v10430_v19  ;;  %v9948_v36 = vadd.f32 %v15441_v34, %v21349_v46  ;;  %v9953_v41 = vadd.f32 %v15444_v31, %v22471_v43  ;;  %v15452_v55 = vpop.f32.mrf.mxu1 }
 0x5d0   :  { %v10671_v38 = vpack.c.b16 %v10627_v30, %v10627_v30  ;;  %v10433_v63 = vmax.f32 %v10208_v28, %v14761_v23  ;;  %v15280_v27 = vpack.c.bf16 %v10431_v12, %v10431_v12  ;;  %v15281_v2 = vpack.c.bf16 %v10432_v54, %v10432_v54 }
 0x5d1   :  { %v10590_v3 = vunpack.c.l.b16 %v15279_v50  ;;  %v10045_v8 = vadd.f32 %v21512_v4, %v9948_v36  ;;  %v10050_v52 = vadd.f32 %v10049_v49, %v9953_v41  ;;  %v15447_v26 = vadd.f32 %v15446_v17, %v15445_v35  ;;  %v15454_v1 = vpop.f32.mrf.mxu1  ;;  %v10065_v17 = vpop.f32.mrf.mxu0 }
 0x5d2   :  { %v10694_v15 = vsel %vm21540_vm12, %v10671_v38, %v10693_v40  ;;  %v15282_v24 = vpack.c.bf16 %v10433_v63, %v10433_v63  ;;  %v10591_v46 = vunpack.c.l.b16 %v15280_v27  ;;  %v10592_v58 = vunpack.c.l.b16 %v15281_v2 }
 0x5d3   :  { %10695 = vst [vmem:[#allocation4 + $0x8] sm:$0x7] %v10694_v15  ;;  %v10628_v16 = vrot.slane %v10590_v3, 7  ;;  %v10094_v45 = vmul.f32 %v21478_v60, %v10045_v8  ;;  %v10095_v28 = vmul.f32 %v21478_v60, %v10050_v52  ;;  %v9956_v20 = vadd.f32 %v15447_v26, %v21497_v33  ;;  %v15455_v11 = vpop.f32.mrf.mxu1  ;;  %v21574_v33 = vld [vmem:[#allocation4 + $0x4] ss:$0 sps:$4 sm:$0x77]  }
 0x5d4   :  { %v10593_v19 = vunpack.c.l.b16 %v15282_v24  ;;  %v10629_v4 = vrot.slane %v10591_v46, 6  ;;  %v10631_v49 = vrot.slane %v10592_v58, 5  ;;  %v15450_v35 = vadd.f32 %v15449_v61, %v15448_v6 }
 0x5d5   :  { %v10117_v5 = vadd.f32 %v21482_v53, %v10094_v45  ;;  %v10118_v25 = vadd.f32 %v21482_v53, %v10095_v28  ;;  %v10053_v34 = vadd.f32 %v10052_v44, %v9956_v20  ;;  %v15453_v31 = vadd.f32 %v15452_v55, %v15451_v32  ;;  %v15457_v7 = vpop.f32.mrf.mxu1  ;;  %v10696_v44 = vld [vmem:[#allocation4 + $0xc] sm:$0x7] }
 0x5d6   :  { %v10630_v23 = vsel %vm7634_vm3, %v10629_v4, %v10628_v16  ;;  %v10633_v12 = vrot.slane %v10593_v19, 4  ;;  %v9961_v54 = vadd.f32 %v15450_v35, %v21455_v47  ;;  %v15456_v30 = vadd.f32 %v15455_v11, %v15454_v1  ;;  %v21582_v47 = vpop.f32.mrf.mxu0 }
 0x5d7   :  { %v10632_v40 = vsel %vm7637_vm14, %v10631_v49, %v10630_v23  ;;  %v10133_v50 = vmax.f32 %v10117_v5, 0.0  ;;  %v10134_v6 = vmax.f32 %v10118_v25, 0.0  ;;  %v10096_v61 = vmul.f32 %v21478_v60, %v10053_v34  ;;  %v15458_v36 = vpop.f32.mrf.mxu1 }
 0x5d8   :  { %v10634_v43 = vsel %vm7640_vm13, %v10633_v12, %v10632_v40  ;;  %v10058_v32 = vadd.f32 %v21532_v59, %v9961_v54  ;;  %v9964_v41 = vadd.f32 %v15453_v31, %v21463_v39  ;;  %v9969_v55 = vadd.f32 %v15456_v30, %v21467_v10 }
 0x5d9   :  { %v10672_v38 = vpack.c.b16 %v10634_v43, %v10634_v43  ;;  %v10145_v63 = vmax.f32 %v10132_v37, %v10133_v50  ;;  %v10119_v27 = vadd.f32 %v21482_v53, %v10096_v61  ;;  %v15459_v2 = vadd.f32 %v15458_v36, %v15457_v7 }
 0x5da   :  { %v10097_v3 = vmul.f32 %v21478_v60, %v10058_v32  ;;  %v10061_v8 = vadd.f32 %v21552_v9, %v9964_v41  ;;  %v10066_v52 = vadd.f32 %v10065_v17, %v9969_v55  ;;  %v10819_v59 = vshrl.u32 %v21574_v33, 16  ;;  %v10068_v9 = vpop.f32.mrf.mxu0 }
 0x5db   :  { %v10697_v39 = vsel %vm21540_vm12, %v10672_v38, %v10696_v44  ;;  %v10209_v10 = vcombine.high %v10145_v63, %v10145_v63  ;;  %v10216_v26 = vrot.slane %v10145_v63, %v22466_v22  ;;  %v10135_v1 = vmax.f32 %v10119_v27, 0.0  ;;  %v15460_v44 = vpop.f32.mrf.mxu1 }
 0x5dc   :  { %10698 = vst [vmem:[#allocation4 + $0xc] sm:$0x7] %v10697_v39  ;;  %v10120_v42 = vadd.f32 %v21482_v53, %v10097_v3  ;;  %v10098_v37 = vmul.f32 %v21478_v60, %v10061_v8  ;;  %v10099_v15 = vmul.f32 %v21478_v60, %v10066_v52  ;;  %v9972_v24 = vadd.f32 %v15459_v2, %v21501_v57 }
 0x5dd   :  { %v10223_v46 = vrot.slane %v10209_v10, %v22466_v22  ;;  %v10224_v58 = vcombine.high %v10216_v26, %v10216_v26  ;;  %v14762_v16 = vrot.slane %v10216_v26, 9  ;;  %v10146_v45 = vmax.f32 %v10134_v6, %v10135_v1 }
 0x5de   :  { %v10136_v28 = vmax.f32 %v10120_v42, 0.0  ;;  %v10121_v20 = vadd.f32 %v21482_v53, %v10098_v37  ;;  %v21600_v11 = vadd.f32 %v21482_v53, %v10099_v15  ;;  %v21602_v19 = vadd.f32 %v10068_v9, %v9972_v24  ;;  %v15461_v15 = vpop.f32.mrf.mxu1 }
 0x5df   :  { %v10225_v4 = vcombine.high %v10223_v46, %v10223_v46  ;;  %v14763_v49 = vrot.slane %v10224_v58, 9  ;;  %v14764_v35 = vrot.slane %v10223_v46, 9  ;;  %v10434_v17 = vmax.f32 %v10216_v26, %v14762_v16 }
 0x5e0   :  { %v10226_v5 = vcombine.high %v10146_v45, %v10146_v45  ;;  %v10233_v57 = vrot.slane %v10146_v45, %v22466_v22  ;;  %v10137_v25 = vmax.f32 %v10121_v20, 0.0  ;;  %v10138_v34 = vmax.f32 %v21600_v11, 0.0 }
 0x5e1   :  { %v14765_v31 = vrot.slane %v10225_v4, 9  ;;  %v10435_v7 = vmax.f32 %v10224_v58, %v14763_v49  ;;  %v10436_v23 = vmax.f32 %v10223_v46, %v14764_v35  ;;  %v15283_v12 = vpack.c.bf16 %v10434_v17, %v10434_v17 }
 0x5e2   :  { %v10240_v54 = vrot.slane %v10226_v5, %v22466_v22  ;;  %v10241_v30 = vcombine.high %v10233_v57, %v10233_v57  ;;  %v14766_v40 = vrot.slane %v10233_v57, 9  ;;  %v10147_v50 = vmax.f32 %v10136_v28, %v10137_v25 }
 0x5e3   :  { %v10437_v6 = vmax.f32 %v10225_v4, %v14765_v31  ;;  %v15284_v61 = vpack.c.bf16 %v10435_v7, %v10435_v7  ;;  %v15285_v36 = vpack.c.bf16 %v10436_v23, %v10436_v23  ;;  %v10594_v43 = vunpack.c.l.b16 %v15283_v12  ;;  %v15463_v23 = vpop.f32.mrf.mxu1 }
 0x5e4   :  { %v10242_v32 = vcombine.high %v10240_v54, %v10240_v54  ;;  %v14767_v41 = vrot.slane %v10241_v30, 9  ;;  %v14768_v55 = vrot.slane %v10240_v54, 9  ;;  %v10438_v38 = vmax.f32 %v10233_v57, %v14766_v40  ;;  %v10699_v57 = vld [vmem:[#allocation4 + $0x10] sm:$0x7] }
 0x5e5   :  { %v15286_v63 = vpack.c.bf16 %v10437_v6, %v10437_v6  ;;  %v10595_v27 = vunpack.c.l.b16 %v15284_v61  ;;  %v10596_v2 = vunpack.c.l.b16 %v15285_v36  ;;  %v10635_v3 = vrot.slane %v10594_v43, 7 }
 0x5e6   :  { %v14769_v8 = vrot.slane %v10242_v32, 9  ;;  %v10439_v52 = vmax.f32 %v10241_v30, %v14767_v41  ;;  %v10440_v39 = vmax.f32 %v10240_v54, %v14768_v55  ;;  %v15287_v10 = vpack.c.bf16 %v10438_v38, %v10438_v38 }
 0x5e7   :  { %v10597_v26 = vunpack.c.l.b16 %v15286_v63  ;;  %v10636_v1 = vrot.slane %v10595_v27, 6  ;;  %v10638_v42 = vrot.slane %v10596_v2, 5  ;;  %v10243_v37 = vcombine.high %v10147_v50, %v10147_v50 }
 0x5e8   :  { %v10441_v24 = vmax.f32 %v10242_v32, %v14769_v8  ;;  %v15288_v9 = vpack.c.bf16 %v10439_v52, %v10439_v52  ;;  %v15289_v46 = vpack.c.bf16 %v10440_v39, %v10440_v39  ;;  %v10598_v58 = vunpack.c.l.b16 %v15287_v10  ;;  %v10702_v52 = vld [vmem:[#allocation4 + $0x1c] sm:$0x7] }
 0x5e9   :  { %v10637_v16 = vsel %vm7634_vm3, %v10636_v1, %v10635_v3  ;;  %v10640_v45 = vrot.slane %v10597_v26, 4  ;;  %v10250_v28 = vrot.slane %v10147_v50, %v22466_v22  ;;  %v10257_v20 = vrot.slane %v10243_v37, %v22466_v22  ;;  %v15464_v3 = vpop.f32.mrf.mxu1 }
 0x5ea   :  { %v10639_v4 = vsel %vm7637_vm14, %v10638_v42, %v10637_v16  ;;  %v15290_v49 = vpack.c.bf16 %v10441_v24, %v10441_v24  ;;  %v10599_v35 = vunpack.c.l.b16 %v15288_v9  ;;  %v10600_v17 = vunpack.c.l.b16 %v15289_v46 }
 0x5eb   :  { %v10641_v5 = vsel %vm7640_vm13, %v10640_v45, %v10639_v4  ;;  %v10642_v25 = vrot.slane %v10598_v58, 7  ;;  %v10258_v31 = vcombine.high %v10250_v28, %v10250_v28  ;;  %v10259_v7 = vcombine.high %v10257_v20, %v10257_v20  ;;  %v16163_v4 = vld [vmem:[#allocation4 + $0x8] ss:$0 sps:$4 sm:$0x77]  }
 0x5ec   :  { %v10673_v12 = vpack.c.b16 %v10641_v5, %v10641_v5  ;;  %v10601_v54 = vunpack.c.l.b16 %v15290_v49  ;;  %v10643_v30 = vrot.slane %v10599_v35, 6  ;;  %v10645_v40 = vrot.slane %v10600_v17, 5 }
 0x5ed   :  { %v14770_v6 = vrot.slane %v10250_v28, 9  ;;  %v14771_v50 = vrot.slane %v10258_v31, 9  ;;  %v14772_v61 = vrot.slane %v10257_v20, 9  ;;  %v14773_v36 = vrot.slane %v10259_v7, 9 }
 0x5ee   :  { %v10700_v43 = vsel %vm21540_vm12, %v10673_v12, %v10699_v57  ;;  %v10644_v32 = vsel %vm7634_vm3, %v10643_v30, %v10642_v25  ;;  %v10647_v41 = vrot.slane %v10601_v54, 4  ;;  %v10100_v55 = vmul.f32 %v21478_v60, %v21602_v19 }
 0x5ef   :  { %10701 = vst [vmem:[#allocation4 + $0x10] sm:$0x7] %v10700_v43  ;;  %v10646_v38 = vsel %vm7637_vm14, %v10645_v40, %v10644_v32  ;;  %v10442_v63 = vmax.f32 %v10250_v28, %v14770_v6  ;;  %v10443_v27 = vmax.f32 %v10258_v31, %v14771_v50  ;;  %v10444_v2 = vmax.f32 %v10257_v20, %v14772_v61  ;;  %v10705_v50 = vld [vmem:[#allocation4 + $0x20] sm:$0x7] }
 0x5f0   :  { %v10648_v8 = vsel %vm7640_vm13, %v10647_v41, %v10646_v38  ;;  %v10445_v39 = vmax.f32 %v10259_v7, %v14773_v36  ;;  %v10123_v10 = vadd.f32 %v21482_v53, %v10100_v55  ;;  %v15462_v26 = vadd.f32 %v15461_v15, %v15460_v44  ;;  %v16164_v43 = vld [vmem:[#allocation4 + $0xc] ss:$0 sps:$4 sm:$0x77]  }
 0x5f1   :  { %v10674_v1 = vpack.c.b16 %v10648_v8, %v10648_v8  ;;  %v15291_v42 = vpack.c.bf16 %v10442_v63, %v10442_v63  ;;  %v15292_v37 = vpack.c.bf16 %v10443_v27, %v10443_v27  ;;  %v15293_v24 = vpack.c.bf16 %v10444_v2, %v10444_v2 }
 0x5f2   :  { %v15294_v9 = vpack.c.bf16 %v10445_v39, %v10445_v39  ;;  %v10139_v19 = vmax.f32 %v10123_v10, 0.0  ;;  %v9977_v46 = vadd.f32 %v15462_v26, %v21473_v0  ;;  %v15465_v58 = vadd.f32 %v15464_v3, %v15463_v23 }
 0x5f3   :  { %v10703_v16 = vsel %vm21540_vm12, %v10674_v1, %v10702_v52  ;;  %v10602_v45 = vunpack.c.l.b16 %v15291_v42  ;;  %v10603_v28 = vunpack.c.l.b16 %v15292_v37  ;;  %v10604_v20 = vunpack.c.l.b16 %v15293_v24  ;;  %v10715_v24 = vld [vmem:[#allocation4 + $0x4] sm:$0x3] }
 0x5f4   :  { %10704 = vst [vmem:[#allocation4 + $0x1c] sm:$0x7] %v10703_v16  ;;  %v10605_v49 = vunpack.c.l.b16 %v15294_v9  ;;  %v10148_v44 = vmax.f32 %v10138_v34, %v10139_v19  ;;  %v10074_v15 = vadd.f32 %v21562_v18, %v9977_v46  ;;  %v9980_v35 = vadd.f32 %v15465_v58, %v21475_v29 }
 0x5f5   :  { %v10649_v17 = vrot.slane %v10602_v45, 7  ;;  %v10650_v5 = vrot.slane %v10603_v28, 6  ;;  %v10652_v0 = vrot.slane %v10604_v20, 5  ;;  %v10821_v57 = vshll.u32 %v21574_v33, 16 }
 0x5f6   :  { %v10654_v25 = vrot.slane %v10605_v49, 4  ;;  %v10260_v31 = vcombine.high %v10148_v44, %v10148_v44  ;;  %v10267_v7 = vrot.slane %v10148_v44, %v22466_v22  ;;  %v10101_v23 = vmul.f32 %v21478_v60, %v10074_v15 }
 0x5f7   :  { %v10651_v12 = vsel %vm7634_vm3, %v10650_v5, %v10649_v17  ;;  %v10077_v11 = vadd.f32 %v21582_v47, %v9980_v35  ;;  %v10823_v34 = vrot.slane %v10821_v57, 1  ;;  %v10826_v54 = vshrl.u32 %v16163_v4, 16 }
 0x5f8   :  { %v10653_v18 = vsel %vm7637_vm14, %v10652_v0, %v10651_v12  ;;  %v10274_v29 = vrot.slane %v10260_v31, %v22466_v22  ;;  %v10275_v30 = vcombine.high %v10267_v7, %v10267_v7  ;;  %v14774_v40 = vrot.slane %v10267_v7, 9  ;;  %v10716_v0 = vld [vmem:[#allocation4 + $0x8] sm:$0x3] }
 0x5f9   :  { %v10655_v6 = vsel %vm7640_vm13, %v10654_v25, %v10653_v18  ;;  %v10124_v61 = vadd.f32 %v21482_v53, %v10101_v23  ;;  %v10102_v36 = vmul.f32 %v21478_v60, %v10077_v11  ;;  %v10824_v32 = vor.u32 %v10823_v34, %v10819_v59  ;;  %v10717_v23 = vld [vmem:[#allocation4 + $0xc] sm:$0x3]  ;;  %v16166_v11 = vld [vmem:[#allocation4 + $0x4] ss:$0 sps:$4 sm:$0x66]  }
 0x5fa   :  { %v10675_v47 = vpack.c.b16 %v10655_v6, %v10655_v6  ;;  %v10276_v41 = vcombine.high %v10274_v29, %v10274_v29  ;;  %v14775_v55 = vrot.slane %v10275_v30, 9  ;;  %v14776_v38 = vrot.slane %v10274_v29, 9 }
 0x5fb   :  { %v10446_v63 = vmax.f32 %v10267_v7, %v14774_v40  ;;  %v10140_v27 = vmax.f32 %v10124_v61, 0.0  ;;  %v10125_v2 = vadd.f32 %v21482_v53, %v10102_v36  ;;  %v10828_v3 = vshll.u32 %v16163_v4, 16  ;;  %v16168_v36 = vld [vmem:[#allocation4 + $0xc] ss:$0 sps:$4 sm:$0x66]  }
 0x5fc   :  { %v10706_v8 = vsel %vm21540_vm12, %v10675_v47, %v10705_v50  ;;  %v14777_v52 = vrot.slane %v10276_v41, 9  ;;  %v10447_v39 = vmax.f32 %v10275_v30, %v14775_v55  ;;  %v10448_v10 = vmax.f32 %v10274_v29, %v14776_v38  ;;  %v16167_v30 = vld [vmem:[#allocation4 + $0x8] ss:$0 sps:$4 sm:$0x66]  }
 0x5fd   :  { %10707 = vst [vmem:[#allocation4 + $0x20] sm:$0x7] %v10706_v8  ;;  %v15295_v60 = vpack.c.bf16 %v10446_v63, %v10446_v63  ;;  %v10141_v26 = vmax.f32 %v10125_v2, 0.0  ;;  %v10830_v33 = vrot.slane %v10828_v3, 1  ;;  %v10833_v59 = vshrl.u32 %v16164_v43, 16 }
 0x5fe   :  { %v10449_v1 = vmax.f32 %v10276_v41, %v14777_v52  ;;  %v15296_v42 = vpack.c.bf16 %v10447_v39, %v10447_v39  ;;  %v15297_v37 = vpack.c.bf16 %v10448_v10, %v10448_v10  ;;  %v10835_v9 = vshll.u32 %v16164_v43, 16  ;;  %v10738_v52 = vld [vmem:[#allocation4 + $0x4] sm:$0x3] }
 0x5ff   :  { %v10606_v19 = vunpack.c.l.b16 %v15295_v60  ;;  %v10149_v46 = vmax.f32 %v10140_v27, %v10141_v26  ;;  %v10831_v53 = vor.u32 %v10830_v33, %v10826_v54  ;;  %v11188_v58 = vcombine.low %v10715_v24, %v10824_v32  ;;  %v10708_v32 = vld [vmem:[#allocation4 + $0x24] sm:$0x7]  ;;  %v10741_v24 = vld [vmem:[#allocation4 + $0x10] sm:$0x3] }
 0x600   :  { %v15298_v16 = vpack.c.bf16 %v10449_v1, %v10449_v1  ;;  %v10607_v45 = vunpack.c.l.b16 %v15296_v42  ;;  %v10608_v28 = vunpack.c.l.b16 %v15297_v37  ;;  %v10837_v20 = vrot.slane %v10835_v9, 1  ;;  %v10740_v37 = vld [vmem:[#allocation4 + $0xc] sm:$0x3] }
 0x601   :  { %v10656_v4 = vrot.slane %v10606_v19, 7  ;;  %v10277_v49 = vcombine.high %v10149_v46, %v10149_v46  ;;  %v10284_v44 = vrot.slane %v10149_v46, %v22466_v22  ;;  %v11196_v15 = vrot.slane %v11188_v58, %v22466_v22 }
 0x602   :  { %v10609_v35 = vunpack.c.l.b16 %v15298_v16  ;;  %v10657_v17 = vrot.slane %v10607_v45, 6  ;;  %v10659_v5 = vrot.slane %v10608_v28, 5  ;;  %v10838_v57 = vor.u32 %v10837_v20, %v10833_v59  ;;  %v10739_v59 = vld [vmem:[#allocation4 + $0x8] sm:$0x3] }
 0x603   :  { %v10291_v25 = vrot.slane %v10277_v49, %v22466_v22  ;;  %v10292_v31 = vcombine.high %v10284_v44, %v10284_v44  ;;  %v14778_v7 = vrot.slane %v10284_v44, 9  ;;  %v11229_v12 = vcombine.low %v10716_v0, %v10831_v53  ;;  %v16218_v45 = vld [vmem:[#allocation4 + $0x1c] ss:$0 sps:$4 sm:$0x77]  }
 0x604   :  { %v10658_v34 = vsel %vm7634_vm3, %v10657_v17, %v10656_v4  ;;  %v10661_v54 = vrot.slane %v10609_v35, 4  ;;  %v11270_v18 = vcombine.low %v10717_v23, %v10838_v57  ;;  %v14862_v29 = vcombine.low %v21509_v51, %v11196_v15  ;;  %v16177_v0 = vld [vmem:[#allocation11 + $0x264] ss:$8 sps:$4 sm:$0xff]  }
 0x605   :  { %v10660_v40 = vsel %vm7637_vm14, %v10659_v5, %v10658_v34  ;;  %v10293_v6 = vcombine.high %v10291_v25, %v10291_v25  ;;  %v14779_v50 = vrot.slane %v10292_v31, 9  ;;  %v14780_v61 = vrot.slane %v10291_v25, 9  ;;  %v10711_v34 = vld [vmem:[#allocation4 + $0x28] sm:$0x7] }
 0x606   :  { %v10662_v43 = vsel %vm7640_vm13, %v10661_v54, %v10660_v40  ;;  %v10450_v47 = vmax.f32 %v10284_v44, %v14778_v7  ;;  %v11237_v41 = vrot.slane %v11229_v12, %v22466_v22  ;;  %v11278_v55 = vrot.slane %v11270_v18, %v22466_v22  ;;  %v16169_v44 = vld [vmem:[#allocation11 + $0x270] ss:$8 sps:$4 sm:$0xff]   ;;  %v16175_v7 = vld [vmem:[#allocation11 + $0x260] ss:$8 sps:$4 sm:$0xff]  }
 0x607   :  { %v10676_v38 = vpack.c.b16 %v10662_v43, %v10662_v43  ;;  %v14781_v63 = vrot.slane %v10293_v6, 9  ;;  %v10451_v27 = vmax.f32 %v10292_v31, %v14779_v50  ;;  %v10452_v2 = vmax.f32 %v10291_v25, %v14780_v61  ;;  %v16221_v18 = vld [vmem:[#allocation4 + $0x18] ss:$0 sps:$4 sm:$0x66]  }
 0x608   :  { %v15299_v51 = vpack.c.bf16 %v10450_v47, %v10450_v47  ;;  %v14864_v3 = vcombine.low %v11237_v41, %v11278_v55  ;;  %v11629_v8 = vrot.slane %v14862_v29, %v22466_v22  ;;  %v10892_v39 = vrot.slane %v16166_v11, 1  ;;  %v16222_v50 = vld [vmem:[#allocation4 + $0x1c] ss:$0 sps:$4 sm:$0x66]   ;;  %v16181_v41 = vld [vmem:[#allocation11 + $0x250] ss:$8 sps:$4 sm:$0xff]  }
 0x609   :  { %v10709_v10 = vsel %vm21540_vm12, %v10676_v38, %v10708_v32  ;;  %v10453_v60 = vmax.f32 %v10293_v6, %v14781_v63  ;;  %v15300_v26 = vpack.c.bf16 %v10451_v27, %v10451_v27  ;;  %v15301_v33 = vpack.c.bf16 %v10452_v2, %v10452_v2  ;;  %v16223_v61 = vld [vmem:[#allocation4 + $0x20] ss:$0 sps:$4 sm:$0x66]   ;;  %v10719_v55 = vld [vmem:[#allocation4 + $0x1c] sm:$0x3] }
 0x60a   :  { %10710 = vst [vmem:[#allocation4 + $0x24] sm:$0x7] %v10709_v10  ;;  %v10610_v1 = vunpack.c.l.b16 %v15299_v51  ;;  %v11643_v42 = vrot.slane %v14864_v3, %v22466_v22  ;;  %v10893_v9 = vrot.slane %v16167_v30, 1  ;;  %v10894_v19 = vrot.slane %v16168_v36, 1  ;;  %v10742_v27 = vld [vmem:[#allocation4 + $0x1c] sm:$0x3] }
 0x60b   :  { %v15302_v46 = vpack.c.bf16 %v10453_v60, %v10453_v60  ;;  %v10611_v53 = vunpack.c.l.b16 %v15300_v26  ;;  %v10612_v58 = vunpack.c.l.b16 %v15301_v33  ;;  %v11148_v16 = vcombine.low %v10891_v13, %v10738_v52  ;;  %v16219_v13 = vld [vmem:[#allocation4 + $0x20] ss:$0 sps:$4 sm:$0x77]   ;;  %v21667_v2 = vld [vmem:[#allocation4 + $0x4] ss:$0 sps:$4 sm:$0x77]  }
 0x60c   :  { %v10663_v28 = vrot.slane %v10610_v1, 7  ;;  %v11651_v20 = vcombine.low %v11629_v8, %v11643_v42  ;;  %v11652_v4 = vcombine.high %v11629_v8, %v11643_v42  ;;  %v11189_v49 = vcombine.low %v10892_v39, %v10739_v59  ;;  %v16189_v3 = vld [vmem:[#allocation11 + $0x244] ss:$8 sps:$4 sm:$0xff]   ;;  %v10743_v39 = vld [vmem:[#allocation4 + $0x20] sm:$0x3] }
 0x60d   :  { %v10613_v15 = vunpack.c.l.b16 %v15302_v46  ;;  %v10664_v35 = vrot.slane %v10611_v53, 6  ;;  %v10666_v17 = vrot.slane %v10612_v58, 5  ;;  %v11162_v5 = vrot.slane %v11148_v16, %v22466_v22  ;;  %v16172_v59 = vld [vmem:[#allocation11 + $0x370] ss:$8 sps:$4 sm:$0xff]  }
 0x60e   :  { %12567 = vmatprep.mubr.bf16.mxu1 %v11652_v4  ;;  %v11203_v57 = vrot.slane %v11189_v49, %v22466_v22  ;;  %v11230_v25 = vcombine.low %v10893_v9, %v10740_v37  ;;  %v11271_v31 = vcombine.low %v10894_v19, %v10741_v24  ;;  %v10845_v23 = vor.u32 %v21520_v56, %v10840_v14  ;;  %v16183_v14 = vld [vmem:[#allocation11 + $0x254] ss:$8 sps:$4 sm:$0xff]   ;;  %v16180_v37 = vld [vmem:[#allocation11 + $0x364] ss:$8 sps:$4 sm:$0xff]   ;;  %v10720_v49 = vld [vmem:[#allocation4 + $0x20] sm:$0x3] }
 0x60f   :  { %v10665_v12 = vsel %vm7634_vm3, %v10664_v35, %v10663_v28  ;;  %v10668_v11 = vrot.slane %v10613_v15, 4  ;;  %12568 = vmatmul.mubr.bf16.vlgmr.msra.gmra.mxu1 %v11651_v20  ;;  %v10849_v54 = vshll.u32 %v16218_v45, 16  ;;  %v10847_v56 = vshrl.u32 %v16218_v45, 16  ;;  %v16232_v20 = vld [vmem:[#allocation4 + $0x8] ss:$0 sps:$4 sm:$0x77]  }
 0x610   :  { %v10667_v29 = vsel %vm7637_vm14, %v10666_v17, %v10665_v12  ;;  %v11244_v30 = vrot.slane %v11230_v25, %v22466_v22  ;;  %v11285_v40 = vrot.slane %v11271_v31, %v22466_v22  ;;  %v14863_v6 = vcombine.low %v11162_v5, %v11203_v57  ;;  %12642 = vmatpush1.bf16.msra.mxu1 %v16169_v44  ;;  %v16195_v4 = vld [vmem:[#allocation11 + $0x234] ss:$8 sps:$4 sm:$0xff]   ;;  %v16178_v5 = vld [vmem:[#allocation11 + $0x360] ss:$8 sps:$4 sm:$0xff]  }
 0x611   :  { %v10669_v21 = vsel %vm7640_vm13, %v10668_v11, %v10667_v29  ;;  %12643 = vmatprep.subr.bf16.mxu1 %v16177_v0  ;;  %v10851_v36 = vrot.slane %v10849_v54, 1  ;;  %v11311_v43 = vcombine.low %v10718_v62, %v10845_v23  ;;  %v16220_v38 = vld [vmem:[#allocation4 + $0x24] ss:$0 sps:$4 sm:$0x77]   ;;  %v10856_v63 = vshll.u32 %v16219_v13, 16 }
 0x612   :  { %v10677_v32 = vpack.c.b16 %v10669_v21, %v10669_v21  ;;  %v14865_v47 = vcombine.low %v11244_v30, %v11285_v40  ;;  %v11636_v51 = vrot.slane %v14863_v6, %v22466_v22  ;;  %v10854_v52 = vshrl.u32 %v16219_v13, 16  ;;  %v10744_v10 = vld [vmem:[#allocation4 + $0x24] sm:$0x3]  ;;  %v16233_v25 = vld [vmem:[#allocation4 + $0xc] ss:$0 sps:$4 sm:$0x77]  }
 0x613   :  { %v10852_v8 = vor.u32 %v10851_v36, %v10847_v56  ;;  %v10895_v60 = vrot.slane %v16221_v18, 1  ;;  %v10858_v1 = vrot.slane %v10856_v63, 1  ;;  %v21674_v42 = vrot.slane %v11311_v43, %v22466_v22  ;;  %v16224_v46 = vld [vmem:[#allocation4 + $0x24] ss:$0 sps:$4 sm:$0x66]  }
 0x614   :  { %v10712_v26 = vsel %vm21540_vm12, %v10677_v32, %v10711_v34  ;;  %v11650_v33 = vrot.slane %v14865_v47, %v22466_v22  ;;  %12644 = vmatpush1.bf16.msra.mxu1 %v16175_v7  ;;  %v10861_v24 = vshrl.u32 %v16220_v38, 16  ;;  %v10863_v9 = vshll.u32 %v16220_v38, 16  ;;  %v16235_v7 = vld [vmem:[#allocation4 + $0x4] ss:$0 sps:$4 sm:$0x66]  }
 0x615   :  { %10713 = vst [vmem:[#allocation4 + $0x28] sm:$0x7] %v10712_v26  ;;  %12645 = vmatprep.subr.bf16.mxu1 %v16183_v14  ;;  %v11352_v19 = vcombine.low %v10719_v55, %v10852_v8  ;;  %v10896_v53 = vrot.slane %v16222_v50, 1  ;;  %v10859_v45 = vor.u32 %v10858_v1, %v10854_v52  ;;  %v10897_v28 = vrot.slane %v16223_v61, 1  ;;  %v16186_v54 = vld [vmem:[#allocation11 + $0x354] ss:$8 sps:$4 sm:$0xff]  }
 0x616   :  { %v11653_v58 = vcombine.low %v11636_v51, %v11650_v33  ;;  %v11654_v16 = vcombine.high %v11636_v51, %v11650_v33  ;;  %v10865_v44 = vrot.slane %v10863_v9, 1  ;;  %v11312_v35 = vcombine.low %v10895_v60, %v10742_v27  ;;  %v16236_v62 = vld [vmem:[#allocation4 + $0x8] ss:$0 sps:$4 sm:$0x66]   ;;  %v10721_v18 = vld [vmem:[#allocation4 + $0x24] sm:$0x3] }
 0x617   :  { %v21677_v15 = vrot.slane %v11352_v19, %v22466_v22  ;;  %v11353_v17 = vcombine.low %v10896_v53, %v10743_v39  ;;  %v11393_v0 = vcombine.low %v10720_v49, %v10859_v45  ;;  %v21679_v57 = vcombine.low %v10897_v28, %v10744_v10  ;;  %v16234_v11 = vld [vmem:[#allocation4 + $0x10] ss:$0 sps:$4 sm:$0x77]   ;;  %v16237_v36 = vld [vmem:[#allocation4 + $0xc] ss:$0 sps:$4 sm:$0x66]  }
 0x618   :  { %12620 = vmatprep.mubr.bf16.mxu0 %v11654_v16  ;;  %12646 = vmatpush1.bf16.msra.mxu1 %v16181_v41  ;;  %v10926_v31 = vshll.u32 %v21667_v2, 16  ;;  %v10866_v13 = vor.u32 %v10865_v44, %v10861_v24  ;;  %v10898_v12 = vrot.slane %v16224_v46, 1  ;;  %v10924_v34 = vshrl.u32 %v21667_v2, 16  ;;  %v16193_v50 = vld [vmem:[#allocation11 + $0x230] ss:$8 sps:$4 sm:$0xff]  }
 0x619   :  { %12621 = vmatmul.mubr.bf16.vlgmr.msra.gmra.mxu0 %v11653_v58  ;;  %12647 = vmatprep.subr.bf16.mxu1 %v16189_v3  ;;  %v14870_v23 = vcombine.low %v21674_v42, %v21677_v15  ;;  %v11326_v29 = vrot.slane %v11312_v35, %v22466_v22  ;;  %v11367_v30 = vrot.slane %v11353_v17, %v22466_v22  ;;  %v10931_v6 = vshrl.u32 %v16232_v20, 16  ;;  %v16238_v38 = vld [vmem:[#allocation4 + $0x10] ss:$0 sps:$4 sm:$0x66]   ;;  %v16201_v27 = vld [vmem:[#allocation11 + $0x224] ss:$8 sps:$4 sm:$0xff]  }
 0x61a   :  { %12695 = vmatpush1.bf16.msra.mxu0 %v16172_v59  ;;  %v10928_v40 = vrot.slane %v10926_v31, 1  ;;  %v11401_v61 = vrot.slane %v11393_v0, %v22466_v22  ;;  %v11434_v21 = vcombine.low %v10721_v18, %v10866_v13  ;;  %v11408_v14 = vrot.slane %v21679_v57, %v22466_v22  ;;  %v21690_v63 = vld [vmem:[#allocation4 + $0x8] ss:$0 sps:$4 sm:$0x77]   ;;  %v16192_v33 = vld [vmem:[#allocation11 + $0x344] ss:$8 sps:$4 sm:$0xff]  }
 0x61b   :  { %12696 = vmatprep.subr.bf16.mxu0 %v16180_v37  ;;  %v10933_v56 = vshll.u32 %v16232_v20, 16  ;;  %v14871_v32 = vcombine.low %v11326_v29, %v11367_v30  ;;  %v10938_v41 = vshrl.u32 %v16233_v25, 16  ;;  %v10940_v55 = vshll.u32 %v16233_v25, 16  ;;  %v16184_v52 = vld [vmem:[#allocation11 + $0x350] ss:$8 sps:$4 sm:$0xff]  }
 0x61c   :  { %12648 = vmatpush1.bf16.msra.mxu1 %v16187_v48  ;;  %v10745_v43 = vld [vmem:[#allocation4 + $0x28] sm:$0x3]  ;;  %v10929_v47 = vor.u32 %v10928_v40, %v10924_v34  ;;  %v11442_v2 = vrot.slane %v11434_v21, %v22466_v22  ;;  %v10947_v8 = vshll.u32 %v16234_v11, 16  ;;  %v10945_v10 = vshrl.u32 %v16234_v11, 16  ;;  %v16190_v24 = vld [vmem:[#allocation11 + $0x340] ss:$8 sps:$4 sm:$0xff]  }
 0x61d   :  { %12649 = vmatprep.subr.bf16.mxu1 %v16195_v4  ;;  %v11435_v51 = vcombine.low %v10898_v12, %v10745_v43  ;;  %v10935_v3 = vrot.slane %v10933_v56, 1  ;;  %v10942_v39 = vrot.slane %v10940_v55, 1  ;;  %v11003_v60 = vrot.slane %v16235_v7, 1  ;;  %v16199_v9 = vld [vmem:[#allocation11 + $0x220] ss:$8 sps:$4 sm:$0xff]  }
 0x61e   :  { %12697 = vmatpush1.bf16.msra.mxu0 %v16178_v5  ;;  %v11004_v26 = vrot.slane %v16236_v62, 1  ;;  %v14872_v59 = vcombine.low %v11401_v61, %v11442_v2  ;;  %v10949_v37 = vrot.slane %v10947_v8, 1  ;;  %v16207_v19 = vld [vmem:[#allocation11 + $0x214] ss:$8 sps:$4 sm:$0xff]   ;;  %v11718_v46 = vrot.slane %v14870_v23, %v22466_v22  ;;  %v16205_v62 = vld [vmem:[#allocation11 + $0x210] ss:$8 sps:$4 sm:$0xff]  }
 0x61f   :  { %12698 = vmatprep.subr.bf16.mxu0 %v16186_v54  ;;  %v11449_v1 = vrot.slane %v11435_v51, %v22466_v22  ;;  %v10936_v42 = vor.u32 %v10935_v3, %v10931_v6  ;;  %v10943_v53 = vor.u32 %v10942_v39, %v10938_v41  ;;  %v11005_v58 = vrot.slane %v16237_v36, 1  ;;  %v16240_v4 = vld [vmem:[#allocation4 + $0xc] ss:$0 sps:$4 sm:$0x77]   ;;  %v16213_v34 = vld [vmem:[#allocation11 + $0x204] ss:$8 sps:$4 sm:$0xff]  }
 0x620   :  { %12650 = vmatpush1.bf16.msra.mxu1 %v16193_v50  ;;  %v11164_v16 = vcombine.low %v10929_v47, %v11003_v60  ;;  %v11732_v48 = vrot.slane %v14872_v59, %v22466_v22  ;;  %v10950_v28 = vor.u32 %v10949_v37, %v10945_v10  ;;  %v11725_v49 = vrot.slane %v14871_v32, %v22466_v22  ;;  %v16241_v35 = vld [vmem:[#allocation4 + $0x10] ss:$0 sps:$4 sm:$0x77]   ;;  %v16198_v5 = vld [vmem:[#allocation11 + $0x334] ss:$8 sps:$4 sm:$0xff]  }
 0x621   :  { %12651 = vmatprep.subr.bf16.mxu1 %v16201_v27  ;;  %v14873_v45 = vcombine.low %v11408_v14, %v11449_v1  ;;  %v11205_v20 = vcombine.low %v10936_v42, %v11004_v26  ;;  %v11006_v44 = vrot.slane %v16238_v38, 1  ;;  %v11246_v15 = vcombine.low %v10943_v53, %v11005_v58  ;;  %v16242_v7 = vld [vmem:[#allocation4 + $0x14] ss:$0 sps:$4 sm:$0x77]   ;;  %v16196_v40 = vld [vmem:[#allocation11 + $0x330] ss:$8 sps:$4 sm:$0xff]  }
 0x622   :  { %12699 = vmatpush1.bf16.msra.mxu0 %v16184_v52  ;;  %v11038_v17 = vshll.u32 %v21690_v63, 16  ;;  %v11741_v0 = vcombine.high %v11718_v46, %v11732_v48  ;;  %v11740_v25 = vcombine.low %v11718_v46, %v11732_v48  ;;  %v11172_v13 = vrot.slane %v11164_v16, %v22466_v22  ;;  %v16204_v14 = vld [vmem:[#allocation11 + $0x324] ss:$8 sps:$4 sm:$0xff]   ;;  %v16211_v47 = vld [vmem:[#allocation11 + $0x200] ss:$8 sps:$4 sm:$0xff]  }
 0x623   :  { %12700 = vmatprep.subr.bf16.mxu0 %v16192_v33  ;;  %v11739_v57 = vrot.slane %v14873_v45, %v22466_v22  ;;  %v11213_v31 = vrot.slane %v11205_v20, %v22466_v22  ;;  %v11287_v23 = vcombine.low %v10950_v28, %v11006_v44  ;;  %v11036_v12 = vshrl.u32 %v21690_v63, 16  ;;  %v10763_v55 = vld [vmem:[#allocation4 + $0x8] sm:$0x3]  ;;  %v16227_v27 = vld [vmem:[#allocation11 + $0x2f4] ss:$8 sps:$4 sm:$0xff]  }
 0x624   :  { %12652 = vmatpush1.bf16.msra.mxu1 %v16199_v9  ;;  %v11040_v11 = vrot.slane %v11038_v17, 1  ;;  %12577 = vmatprep.mubr.bf16.mxu1 %v11741_v0  ;;  %v11254_v29 = vrot.slane %v11246_v15, %v22466_v22  ;;  %v11045_v30 = vshll.u32 %v16240_v4, 16  ;;  %v11052_v21 = vshll.u32 %v16241_v35, 16  ;;  %v16202_v8 = vld [vmem:[#allocation11 + $0x320] ss:$8 sps:$4 sm:$0xff]  }
 0x625   :  { %12653 = vmatprep.subr.bf16.mxu1 %v16207_v19  ;;  %v11743_v54 = vcombine.high %v11725_v49, %v11739_v57  ;;  %v11742_v18 = vcombine.low %v11725_v49, %v11739_v57  ;;  %12578 = vmatmul.mubr.bf16.gmra.mxu1 %v11740_v25  ;;  %v11295_v6 = vrot.slane %v11287_v23, %v22466_v22  ;;  %v11043_v56 = vshrl.u32 %v16240_v4, 16  ;;  %v10764_v10 = vld [vmem:[#allocation4 + $0xc] sm:$0x3]  ;;  %v10766_v60 = vld [vmem:[#allocation4 + $0x14] sm:$0x3] }
 0x626   :  { %12701 = vmatpush1.bf16.msra.mxu0 %v16190_v24  ;;  %v14866_v50 = vcombine.low %v11172_v13, %v11213_v31  ;;  %v11041_v61 = vor.u32 %v11040_v11, %v11036_v12  ;;  %v11047_v36 = vrot.slane %v11045_v30, 1  ;;  %v11057_v43 = vshrl.u32 %v16242_v7, 16  ;;  %v16210_v33 = vld [vmem:[#allocation11 + $0x314] ss:$8 sps:$4 sm:$0xff]   ;;  %v10765_v59 = vld [vmem:[#allocation4 + $0x10] sm:$0x3] }
 0x627   :  { %12702 = vmatprep.subr.bf16.mxu0 %v16198_v5  ;;  %12630 = vmatprep.mubr.bf16.mxu0 %v11743_v54  ;;  %v11059_v32 = vshll.u32 %v16242_v7, 16  ;;  %v14868_v41 = vcombine.low %v11254_v29, %v11295_v6  ;;  %v11050_v38 = vshrl.u32 %v16241_v35, 16  ;;  %v11054_v63 = vrot.slane %v11052_v21, 1  ;;  %v16225_v37 = vld [vmem:[#allocation11 + $0x2f0] ss:$8 sps:$4 sm:$0xff]  }
 0x628   :  { %12654 = vmatpush1.bf16.msra.mxu1 %v16205_v62  ;;  %12631 = vmatmul.mubr.bf16.gmra.mxu0 %v11742_v18  ;;  %v11048_v2 = vor.u32 %v11047_v36, %v11043_v56  ;;  %v11165_v3 = vcombine.low %v10763_v55, %v11041_v61  ;;  %v21705_v52 = vrot.slane %v14866_v50, %v22466_v22  ;;  %v16245_v58 = vld [vmem:[#allocation11 + $0x2e4] ss:$8 sps:$4 sm:$0xff]   ;;  %v16208_v16 = vld [vmem:[#allocation11 + $0x310] ss:$8 sps:$4 sm:$0xff]   ;;  %v16243_v44 = vld [vmem:[#allocation11 + $0x2e0] ss:$8 sps:$4 sm:$0xff]  }
 0x629   :  { %12655 = vmatprep.subr.bf16.mxu1 %v16213_v34  ;;  %v11061_v51 = vrot.slane %v11059_v32, 1  ;;  %v21708_v39 = vrot.slane %v14868_v41, %v22466_v22  ;;  %v11055_v26 = vor.u32 %v11054_v63, %v11050_v38  ;;  %v16291_v45 = vld [vmem:[#allocation4 + $0x28] ss:$0 sps:$4 sm:$0x77]   ;;  %v16216_v28 = vld [vmem:[#allocation11 + $0x304] ss:$8 sps:$4 sm:$0xff]  }
 0x62a   :  { %12703 = vmatpush1.bf16.msra.mxu0 %v16196_v40  ;;  %v11206_v42 = vcombine.low %v10764_v10, %v11048_v2  ;;  %v11179_v19 = vrot.slane %v11165_v3, %v22466_v22  ;;  %v16289_v49 = vld [vmem:[#allocation4 + $0x20] ss:$0 sps:$4 sm:$0x77]   ;;  %v16290_v15 = vld [vmem:[#allocation4 + $0x24] ss:$0 sps:$4 sm:$0x77]  }
 0x62b   :  { %12704 = vmatprep.subr.bf16.mxu0 %v16204_v14  ;;  %v11062_v1 = vor.u32 %v11061_v51, %v11057_v43  ;;  %v11688_v24 = vcombine.high %v21705_v52, %v21708_v39  ;;  %v11247_v9 = vcombine.low %v10765_v59, %v11055_v26  ;;  %v16251_v17 = vld [vmem:[#allocation11 + $0x2d4] ss:$8 sps:$4 sm:$0xff]   ;;  %v16214_v5 = vld [vmem:[#allocation11 + $0x300] ss:$8 sps:$4 sm:$0xff]   ;;  %v10975_v57 = vshll.u32 %v16291_v45, 16 }
 0x62c   :  { %12656 = vmatpush1.bf16.msra.mxu1 %v16211_v47  ;;  %v11220_v46 = vrot.slane %v11206_v42, %v22466_v22  ;;  %v16288_v0 = vld [vmem:[#allocation4 + $0x1c] ss:$0 sps:$4 sm:$0x77]   ;;  %v16230_v25 = vld [vmem:[#allocation11 + $0x3f4] ss:$8 sps:$4 sm:$0xff]   ;;  %v10961_v62 = vshll.u32 %v16289_v49, 16 }
 0x62d   :  { %12657 = vmatprep.subr.bf16.mxu1 %v16227_v27  ;;  %v11288_v53 = vcombine.low %v10766_v60, %v11062_v1  ;;  %12673 = vmatprep.mubr.bf16.mxu1 %v11688_v24  ;;  %v11261_v48 = vrot.slane %v11247_v9, %v22466_v22  ;;  %v16249_v13 = vld [vmem:[#allocation11 + $0x2d0] ss:$8 sps:$4 sm:$0xff]   ;;  %v10968_v23 = vshll.u32 %v16290_v15, 16  ;;  %v16248_v34 = vld [vmem:[#allocation11 + $0x3e4] ss:$8 sps:$4 sm:$0xff]   ;;  %v10954_v18 = vshll.u32 %v16288_v0, 16 }
 0x62e   :  { %12705 = vmatpush1.bf16.msra.mxu0 %v16202_v8  ;;  %v14867_v4 = vcombine.low %v11179_v19, %v11220_v46  ;;  %v16228_v12 = vld [vmem:[#allocation11 + $0x3f0] ss:$8 sps:$4 sm:$0xff]   ;;  %v16257_v54 = vld [vmem:[#allocation11 + $0x2c4] ss:$8 sps:$4 sm:$0xff]   ;;  %v10977_v29 = vrot.slane %v10975_v57, 1  ;;  %v10963_v6 = vrot.slane %v10961_v62, 1 }
 0x62f   :  { %12706 = vmatprep.subr.bf16.mxu0 %v16210_v33  ;;  %v11302_v20 = vrot.slane %v11288_v53, %v22466_v22  ;;  %v21724_v30 = vld [vmem:[#allocation4 + $0x2c] ss:$0 sps:$4 sm:$0x77]   ;;  %v16255_v40 = vld [vmem:[#allocation11 + $0x2c0] ss:$8 sps:$4 sm:$0xff]   ;;  %v10970_v14 = vrot.slane %v10968_v23, 1 }
 0x630   :  { %12658 = vmatpush2.bf16.msra.mxu1 %v16225_v37  ;;  %v21717_v31 = vrot.slane %v14867_v4, %v22466_v22  ;;  %v16293_v50 = vld [vmem:[#allocation4 + $0x20] ss:$0 sps:$4 sm:$0x66]   ;;  %v16295_v61 = vld [vmem:[#allocation4 + $0x28] ss:$0 sps:$4 sm:$0x66]  }
 0x631   :  { %v14869_v35 = vcombine.low %v11261_v48, %v11302_v20  ;;  %12659 = vmatprep.subr.bf16.mxu1 %v16245_v58  ;;  %v16246_v21 = vld [vmem:[#allocation11 + $0x3e0] ss:$8 sps:$4 sm:$0xff]   ;;  %v10973_v56 = vshrl.u32 %v16291_v45, 16  ;;  %v16298_v36 = vld [vmem:[#allocation4 + $0x28] ss:$0 sps:$4 sm:$0x77]  }
 0x632   :  { %12707 = vmatpush1.bf16.msra.mxu0 %v16208_v16  ;;  %v16263_v43 = vld [vmem:[#allocation11 + $0x2b4] ss:$8 sps:$4 sm:$0xff]   ;;  %v10959_v32 = vshrl.u32 %v16289_v49, 16  ;;  %v16292_v47 = vld [vmem:[#allocation4 + $0x1c] ss:$0 sps:$4 sm:$0x66]  }
 0x633   :  { %12708 = vmatprep.subr.bf16.mxu0 %v16216_v28  ;;  %v21720_v7 = vrot.slane %v14869_v35, %v22466_v22  ;;  %v16294_v41 = vld [vmem:[#allocation4 + $0x24] ss:$0 sps:$4 sm:$0x66]   ;;  %v10956_v55 = vrot.slane %v10954_v18, 1  ;;  %v10966_v38 = vshrl.u32 %v16290_v15, 16  ;;  %v10978_v63 = vor.u32 %v10977_v29, %v10973_v56 }
 0x634   :  { %12660 = vmatpush2.bf16.msra.mxu1 %v16243_v44  ;;  %v16297_v27 = vld [vmem:[#allocation4 + $0x24] ss:$0 sps:$4 sm:$0x77]   ;;  %v16254_v2 = vld [vmem:[#allocation11 + $0x3d4] ss:$8 sps:$4 sm:$0xff]   ;;  %v10952_v51 = vshrl.u32 %v16288_v0, 16  ;;  %v10964_v3 = vor.u32 %v10963_v6, %v10959_v32 }
 0x635   :  { %v11690_v11 = vcombine.high %v21717_v31, %v21720_v7  ;;  %12661 = vmatprep.subr.bf16.mxu1 %v16251_v17  ;;  %v16296_v8 = vld [vmem:[#allocation4 + $0x20] ss:$0 sps:$4 sm:$0x77]   ;;  %v16261_v10 = vld [vmem:[#allocation11 + $0x2b0] ss:$8 sps:$4 sm:$0xff]   ;;  %v10971_v60 = vor.u32 %v10970_v14, %v10966_v38  ;;  %v11010_v26 = vrot.slane %v16295_v61, 1 }
 0x636   :  { %12709 = vmatpush1.bf16.msra.mxu0 %v16214_v5  ;;  %v11080_v33 = vshll.u32 %v16298_v36, 16  ;;  %v11087_v59 = vshll.u32 %v21724_v30, 16  ;;  %v16269_v1 = vld [vmem:[#allocation11 + $0x2a4] ss:$8 sps:$4 sm:$0xff]   ;;  %v11008_v42 = vrot.slane %v16293_v50, 1  ;;  %v10957_v24 = vor.u32 %v10956_v55, %v10952_v51 }
 0x637   :  { %12710 = vmatprep.subr.bf16.mxu0 %v16230_v25  ;;  %12726 = vmatprep.mubr.bf16.mxu0 %v11690_v11  ;;  %v16252_v37 = vld [vmem:[#allocation11 + $0x3d0] ss:$8 sps:$4 sm:$0xff]   ;;  %v11009_v9 = vrot.slane %v16294_v41, 1  ;;  %v11451_v19 = vcombine.low %v10978_v63, %v11010_v26  ;;  %v11073_v46 = vshll.u32 %v16297_v27, 16  ;;  %v16260_v53 = vld [vmem:[#allocation11 + $0x3c4] ss:$8 sps:$4 sm:$0xff]   ;;  %v11687_v26 = vcombine.low %v21705_v52, %v21708_v39 }
 0x638   :  { %12662 = vmatpush2.bf16.msra.mxu1 %v16249_v13  ;;  %v11007_v58 = vrot.slane %v16292_v47, 1  ;;  %v11369_v16 = vcombine.low %v10964_v3, %v11008_v42  ;;  %v11066_v48 = vshll.u32 %v16296_v8, 16  ;;  %v16267_v45 = vld [vmem:[#allocation11 + $0x2a0] ss:$8 sps:$4 sm:$0xff]   ;;  %v11082_v20 = vrot.slane %v11080_v33, 1 }
 0x639   :  { %12663 = vmatprep.subr.bf16.mxu1 %v16257_v54  ;;  %v11410_v28 = vcombine.low %v10971_v60, %v11009_v9  ;;  %v11085_v4 = vshrl.u32 %v21724_v30, 16  ;;  %v11089_v49 = vrot.slane %v11087_v59, 1  ;;  %v16275_v44 = vld [vmem:[#allocation11 + $0x294] ss:$8 sps:$4 sm:$0xff]   ;;  %v16258_v15 = vld [vmem:[#allocation11 + $0x3c0] ss:$8 sps:$4 sm:$0xff]   ;;  %v11459_v17 = vrot.slane %v11451_v19, %v22466_v22 }
 0x63a   :  { %12711 = vmatpush2.bf16.msra.mxu0 %v16228_v12  ;;  %v11328_v35 = vcombine.low %v10957_v24, %v11007_v58  ;;  %v11075_v5 = vrot.slane %v11073_v46, 1  ;;  %v11078_v0 = vshrl.u32 %v16298_v36, 16  ;;  %v16266_v57 = vld [vmem:[#allocation11 + $0x3b4] ss:$8 sps:$4 sm:$0xff]   ;;  %v11377_v25 = vrot.slane %v11369_v16, %v22466_v22  ;;  %v16273_v13 = vld [vmem:[#allocation11 + $0x290] ss:$8 sps:$4 sm:$0xff]  }
 0x63b   :  { %12712 = vmatprep.subr.bf16.mxu0 %v16248_v34  ;;  %v11071_v62 = vshrl.u32 %v16297_v27, 16  ;;  %v11418_v23 = vrot.slane %v11410_v28, %v22466_v22  ;;  %v11068_v12 = vrot.slane %v11066_v48, 1  ;;  %v11090_v34 = vor.u32 %v11089_v49, %v11085_v4  ;;  %v16281_v54 = vld [vmem:[#allocation11 + $0x284] ss:$8 sps:$4 sm:$0xff]   ;;  %v10770_v18 = vld [vmem:[#allocation4 + $0x2c] sm:$0x3] }
 0x63c   :  { %12664 = vmatpush2.bf16.msra.mxu1 %v16255_v40  ;;  %v11083_v11 = vor.u32 %v11082_v20, %v11078_v0  ;;  %v16264_v29 = vld [vmem:[#allocation11 + $0x3b0] ss:$8 sps:$4 sm:$0xff]   ;;  %v11336_v30 = vrot.slane %v11328_v35, %v22466_v22  ;;  %v11064_v6 = vshrl.u32 %v16296_v8, 16  ;;  %v16272_v61 = vld [vmem:[#allocation11 + $0x3a4] ss:$8 sps:$4 sm:$0xff]   ;;  %v11689_v28 = vcombine.low %v21717_v31, %v21720_v7 }
 0x63d   :  { %12665 = vmatprep.subr.bf16.mxu1 %v16263_v43  ;;  %v14876_v40 = vcombine.low %v11418_v23, %v11459_v17  ;;  %v11076_v50 = vor.u32 %v11075_v5, %v11071_v62  ;;  %v16279_v14 = vld [vmem:[#allocation11 + $0x280] ss:$8 sps:$4 sm:$0xff]   ;;  %v11452_v32 = vcombine.low %v10770_v18, %v11090_v34  ;;  %v16287_v47 = vld [vmem:[#allocation11 + $0x474] ss:$8 sps:$4 sm:$0xff]   ;;  %v10768_v41 = vld [vmem:[#allocation4 + $0x24] sm:$0x3] }
 0x63e   :  { %12713 = vmatpush2.bf16.msra.mxu0 %v16246_v21  ;;  %v10769_v21 = vld [vmem:[#allocation4 + $0x28] sm:$0x3]  ;;  %v14874_v56 = vcombine.low %v11336_v30, %v11377_v25  ;;  %v11069_v36 = vor.u32 %v11068_v12, %v11064_v6  ;;  %v16270_v55 = vld [vmem:[#allocation11 + $0x3a0] ss:$8 sps:$4 sm:$0xff]   ;;  %v16278_v27 = vld [vmem:[#allocation11 + $0x394] ss:$8 sps:$4 sm:$0xff]  }
 0x63f   :  { %12714 = vmatprep.subr.bf16.mxu0 %v16254_v2  ;;  %v11411_v43 = vcombine.low %v10769_v21, %v11083_v11  ;;  %v11768_v38 = vrot.slane %v14876_v40, %v22466_v22  ;;  %v11370_v63 = vcombine.low %v10768_v41, %v11076_v50  ;;  %v10767_v2 = vld [vmem:[#allocation4 + $0x20] sm:$0x3]  ;;  %v16285_v51 = vld [vmem:[#allocation11 + $0x470] ss:$8 sps:$4 sm:$0xff]   ;;  %v11466_v60 = vrot.slane %v11452_v32, %v22466_v22  ;;  %v16302_v33 = vld [vmem:[#allocation11 + $0x464] ss:$8 sps:$4 sm:$0xff]  }
 0x640   :  { %12666 = vmatpush2.bf16.msra.mxu1 %v16261_v10  ;;  %v11754_v3 = vrot.slane %v14874_v56, %v22466_v22  ;;  %v11329_v8 = vcombine.low %v10767_v2, %v11069_v36  ;;  %v16276_v59 = vld [vmem:[#allocation11 + $0x390] ss:$8 sps:$4 sm:$0xff]   ;;  %v16300_v19 = vld [vmem:[#allocation11 + $0x460] ss:$8 sps:$4 sm:$0xff]   ;;  %v16305_v46 = vld [vmem:[#allocation11 + $0x454] ss:$8 sps:$4 sm:$0xff]  }
 0x641   :  { %12667 = vmatprep.subr.bf16.mxu1 %v16269_v1  ;;  %v11425_v10 = vrot.slane %v11411_v43, %v22466_v22  ;;  %v11384_v42 = vrot.slane %v11370_v63, %v22466_v22  ;;  %v16282_v52 = vld [vmem:[#allocation11 + $0x380] ss:$8 sps:$4 sm:$0xff]   ;;  %v16303_v58 = vld [vmem:[#allocation11 + $0x450] ss:$8 sps:$4 sm:$0xff]   ;;  %v16308_v48 = vld [vmem:[#allocation11 + $0x444] ss:$8 sps:$4 sm:$0xff]  }
 0x642   :  { %12715 = vmatpush2.bf16.msra.mxu0 %v16252_v37  ;;  %v11777_v1 = vcombine.high %v11754_v3, %v11768_v38  ;;  %v16284_v37 = vld [vmem:[#allocation11 + $0x384] ss:$8 sps:$4 sm:$0xff]   ;;  %v11343_v24 = vrot.slane %v11329_v8, %v22466_v22  ;;  %v11776_v16 = vcombine.low %v11754_v3, %v11768_v38  ;;  %v16306_v4 = vld [vmem:[#allocation11 + $0x440] ss:$8 sps:$4 sm:$0xff]   ;;  %v16311_v49 = vld [vmem:[#allocation11 + $0x434] ss:$8 sps:$4 sm:$0xff]  }
 0x643   :  { %12716 = vmatprep.subr.bf16.mxu0 %v16260_v53  ;;  %v14877_v9 = vcombine.low %v11425_v10, %v11466_v60  ;;  %v16324_v35 = vld [vmem:[#allocation4 + $0x14] ss:$0 sps:$4 sm:$0x66]   ;;  %v16322_v17 = vld [vmem:[#allocation4 + $0xc] ss:$0 sps:$4 sm:$0x66]  }
 0x644   :  { %12668 = vmatpush2.bf16.msra.mxu1 %v16267_v45  ;;  %v14875_v39 = vcombine.low %v11343_v24, %v11384_v42  ;;  %v16309_v5 = vld [vmem:[#allocation11 + $0x430] ss:$8 sps:$4 sm:$0xff]   ;;  %v16314_v0 = vld [vmem:[#allocation11 + $0x424] ss:$8 sps:$4 sm:$0xff]   ;;  %v11118_v31 = vrot.slane %v16324_v35, 1  ;;  %v11116_v62 = vrot.slane %v16322_v17, 1 }
 0x645   :  { %12669 = vmatprep.subr.bf16.mxu1 %v16275_v44  ;;  %v11775_v53 = vrot.slane %v14877_v9, %v22466_v22  ;;  %v22472_v44 = vmov 0   ;;  %v16328_v23 = vld [vmem:[#allocation4 + $0x2c] ss:$0 sps:$4 sm:$0x66]   ;;  %v16315_v40 = vld [vmem:[#allocation11 + $0x410] ss:$8 sps:$4 sm:$0xff]  }
 0x646   :  { %12717 = vmatpush2.bf16.msra.mxu0 %v16258_v15  ;;  %v11761_v45 = vrot.slane %v14875_v39, %v22466_v22  ;;  %v16323_v15 = vld [vmem:[#allocation4 + $0x10] ss:$0 sps:$4 sm:$0x66]   ;;  %v16317_v12 = vld [vmem:[#allocation11 + $0x414] ss:$8 sps:$4 sm:$0xff]   ;;  %v11122_v56 = vrot.slane %v16328_v23, 1 }
 0x647   :  { %12718 = vmatprep.subr.bf16.mxu0 %v16266_v57  ;;  %v16321_v57 = vld [vmem:[#allocation4 + $0x8] ss:$0 sps:$4 sm:$0x66]   ;;  %v11117_v25 = vrot.slane %v16323_v15, 1  ;;  %v16320_v6 = vld [vmem:[#allocation11 + $0x404] ss:$8 sps:$4 sm:$0xff]  }
 0x648   :  { %12670 = vmatpush2.bf16.msra.mxu1 %v16273_v13  ;;  %v11779_v20 = vcombine.high %v11761_v45, %v11775_v53  ;;  %v11778_v7 = vcombine.low %v11761_v45, %v11775_v53  ;;  %v16312_v13 = vld [vmem:[#allocation11 + $0x420] ss:$8 sps:$4 sm:$0xff]   ;;  %v11115_v11 = vrot.slane %v16321_v57, 1  ;;  %v16327_v18 = vld [vmem:[#allocation4 + $0x28] ss:$0 sps:$4 sm:$0x66]   ;;  %v11474_v38 = vrot.slane %v11122_v56, %v22466_v22 }
 0x649   :  { %12671 = vmatprep.subr.bf16.mxu1 %v16281_v54  ;;  %v11269_v34 = vrot.slane %v11117_v25, %v22466_v22  ;;  %v11310_v54 = vrot.slane %v11118_v31, %v22466_v22  ;;  %v16326_v30 = vld [vmem:[#allocation4 + $0x24] ss:$0 sps:$4 sm:$0x66]   ;;  %v16325_v21 = vld [vmem:[#allocation4 + $0x20] ss:$0 sps:$4 sm:$0x66]  }
 0x64a   :  { %12719 = vmatpush2.bf16.msra.mxu0 %v16264_v29  ;;  %v11228_v29 = vrot.slane %v11116_v62, %v22466_v22  ;;  %v11187_v50 = vrot.slane %v11115_v11, %v22466_v22  ;;  %v11120_v43 = vrot.slane %v16326_v30, 1  ;;  %v16318_v32 = vld [vmem:[#allocation11 + $0x400] ss:$8 sps:$4 sm:$0xff]   ;;  %v11119_v41 = vrot.slane %v16325_v21, 1 }
 0x64b   :  { %12720 = vmatprep.subr.bf16.mxu0 %v16272_v61  ;;  %v11692_v61 = vcombine.low %v11269_v34, %v11310_v54  ;;  %v16334_v42 = vld [vmem:[%s22132_s10 + $0xec] ss:$16 sps:$4 sm:$0xff]   ;;  %v16337_v24 = vld [vmem:[%s22132_s10 + $0xc4] ss:$16 sps:$4 sm:$0xff]   ;;  %v16338_v9 = vld [vmem:[%s22132_s10 + $0xc8] ss:$16 sps:$4 sm:$0xff]  }
 0x64c   :  { %12672 = vmatpush2.bf16.msra.mxu1 %v16279_v14  ;;  %v11121_v14 = vrot.slane %v16327_v18, 1  ;;  %v11691_v36 = vcombine.low %v11187_v50, %v11228_v29  ;;  %v16344_v39 = vld [vmem:[%s22132_s10 + $0xa8] ss:$16 sps:$4 sm:$0xff]   ;;  %v16346_v53 = vld [vmem:[%s22132_s10 + $0xac] ss:$16 sps:$4 sm:$0xff]   ;;  %vm13024_vm13 = vcmask 1041409  }
 0x64d   :  { %12747 = vmatprep.subr.bf16.mxu1 %v16287_v47  ;;  %v11706_v47 = vrot.slane %v11692_v61, %v22466_v22  ;;  %v16352_v45 = vld [vmem:[%s22132_s10 + $0x8c] ss:$16 sps:$4 sm:$0xff]   ;;  %v16359_v35 = vld [vmem:[%s22132_s10 + $0x40] ss:$16 sps:$4 sm:$0xff]   ;;  %v16362_v17 = vld [vmem:[%s22132_s10 + $0x48] ss:$16 sps:$4 sm:$0xff]  }
 0x64e   :  { %12721 = vmatpush2.bf16.msra.mxu0 %v16270_v55  ;;  %v11433_v55 = vrot.slane %v11121_v14, %v22466_v22  ;;  %v11699_v63 = vrot.slane %v11691_v36, %v22466_v22  ;;  %v16364_v15 = vld [vmem:[%s22132_s10 + $0x4c] ss:$16 sps:$4 sm:$0xff]   ;;  %v16365_v57 = vld [vmem:[%s22132_s10 + $0x20] ss:$16 sps:$4 sm:$0xff]   ;;  %v16368_v25 = vld [vmem:[%s22132_s10 + $0x28] ss:$16 sps:$4 sm:$0xff]  }
 0x64f   :  { %12722 = vmatprep.subr.bf16.mxu0 %v16278_v27  ;;  %12674 = vmatmul.mubr.bf16.vlgmr.msra.gmra.mxu1 %v11687_v26  ;;  %v11392_v27 = vrot.slane %v11120_v43, %v22466_v22  ;;  %v16373_v31 = vld [vmem:[%s22132_s10 + $0x4] ss:$16 sps:$4 sm:$0xff]   ;;  %v16371_v62 = vld [vmem:[%s22132_s10] ss:$16 sps:$4 sm:$0xff]   ;;  %v16380_v34 = vld [vmem:[%s22132_s10 + $0x1e8] ss:$16 sps:$4 sm:$0xff]  }
 0x650   :  { %12683 = vmatprep.mubr.bf16.mxu1 %v11777_v1  ;;  %12748 = vmatpush1.bf16.msra.mxu1 %v16285_v51  ;;  %v11707_v2 = vcombine.low %v11699_v63, %v11706_v47  ;;  %v11351_v51 = vrot.slane %v11119_v41, %v22466_v22  ;;  %v11781_v3 = vcombine.low %v11433_v55, %v11474_v38  ;;  %v16332_v1 = vld [vmem:[%s22132_s10 + $0xe8] ss:$16 sps:$4 sm:$0xff]   ;;  %v16379_v23 = vld [vmem:[%s22132_s10 + $0x1e4] ss:$16 sps:$4 sm:$0xff]   ;;  %v16377_v11 = vld [vmem:[%s22132_s10 + $0x1e0] ss:$16 sps:$4 sm:$0xff]  }
 0x651   :  { %12749 = vmatprep.subr.bf16.mxu1 %v16302_v33  ;;  %v16329_v33 = vld [vmem:[%s22132_s10 + $0xe0] ss:$16 sps:$4 sm:$0xff]   ;;  %v16385_v54 = vld [vmem:[%s22132_s10 + $0x1c4] ss:$16 sps:$4 sm:$0xff]   ;;  %v16388_v18 = vld [vmem:[%s22132_s10 + $0x1cc] ss:$16 sps:$4 sm:$0xff]  }
 0x652   :  { %12723 = vmatpush2.bf16.msra.mxu0 %v16276_v59  ;;  %v11780_v8 = vcombine.low %v11351_v51, %v11392_v27  ;;  %v11795_v10 = vrot.slane %v11781_v3, %v22466_v22  ;;  %v16331_v59 = vld [vmem:[%s22132_s10 + $0xe4] ss:$16 sps:$4 sm:$0xff]   ;;  %v16383_v29 = vld [vmem:[%s22132_s10 + $0x1c0] ss:$16 sps:$4 sm:$0xff]   ;;  %v16386_v30 = vld [vmem:[%s22132_s10 + $0x1c8] ss:$16 sps:$4 sm:$0xff]  }
 0x653   :  { %12724 = vmatprep.subr.bf16.mxu0 %v16284_v37  ;;  %v16335_v37 = vld [vmem:[%s22132_s10 + $0xc0] ss:$16 sps:$4 sm:$0xff]   ;;  %v16392_v61 = vld [vmem:[%s22132_s10 + $0x1a8] ss:$16 sps:$4 sm:$0xff]   ;;  %v16397_v21 = vld [vmem:[%s22132_s10 + $0x184] ss:$16 sps:$4 sm:$0xff]  }
 0x654   :  { %12750 = vmatpush1.bf16.msra.mxu1 %v16300_v19  ;;  %v11788_v60 = vrot.slane %v11780_v8, %v22466_v22  ;;  %v16340_v19 = vld [vmem:[%s22132_s10 + $0xcc] ss:$16 sps:$4 sm:$0xff]   ;;  %v16389_v50 = vld [vmem:[%s22132_s10 + $0x1a0] ss:$16 sps:$4 sm:$0xff]   ;;  %v16398_v36 = vld [vmem:[%s22132_s10 + $0x188] ss:$16 sps:$4 sm:$0xff]  }
 0x655   :  { %12751 = vmatprep.subr.bf16.mxu1 %v16305_v46  ;;  %v16341_v46 = vld [vmem:[%s22132_s10 + $0xa0] ss:$16 sps:$4 sm:$0xff]   ;;  %v16400_v14 = vld [vmem:[%s22132_s10 + $0x18c] ss:$16 sps:$4 sm:$0xff]   ;;  %v16403_v43 = vld [vmem:[%s22132_s10 + $0x164] ss:$16 sps:$4 sm:$0xff]  }
 0x656   :  { %12725 = vmatpush2.bf16.msra.mxu0 %v16282_v52  ;;  %v11796_v26 = vcombine.low %v11788_v60, %v11795_v10  ;;  %v16343_v52 = vld [vmem:[%s22132_s10 + $0xa4] ss:$16 sps:$4 sm:$0xff]   ;;  %v16395_v56 = vld [vmem:[%s22132_s10 + $0x180] ss:$16 sps:$4 sm:$0xff]   ;;  %v16404_v41 = vld [vmem:[%s22132_s10 + $0x168] ss:$16 sps:$4 sm:$0xff]  }
 0x657   :  { %12684 = vmatmul.mubr.bf16.gmra.mxu1 %v11776_v16  ;;  %13542 = vmatprep.subr.bf16.mxu0 %v16334_v42  ;;  %v16349_v16 = vld [vmem:[%s22132_s10 + $0x84] ss:$16 sps:$4 sm:$0xff]   ;;  %v16401_v47 = vld [vmem:[%s22132_s10 + $0x160] ss:$16 sps:$4 sm:$0xff]   ;;  %v16412_v63 = vld [vmem:[%s22132_s10 + $0x14c] ss:$16 sps:$4 sm:$0xff]  }
 0x658   :  { %12752 = vmatpush1.bf16.msra.mxu1 %v16303_v58  ;;  %12779 = vmatprep.mubr.bf16.mxu1 %v22472_v44  ;;  %v16347_v58 = vld [vmem:[%s22132_s10 + $0x80] ss:$16 sps:$4 sm:$0xff]   ;;  %v16409_v55 = vld [vmem:[%s22132_s10 + $0x144] ss:$16 sps:$4 sm:$0xff]   ;;  %v16418_v8 = vld [vmem:[%s22132_s10 + $0x12c] ss:$16 sps:$4 sm:$0xff]  }
 0x659   :  { %12727 = vmatmul.mubr.bf16.vlgmr.msra.gmra.mxu0 %v11689_v28  ;;  %12753 = vmatprep.subr.bf16.mxu1 %v16308_v48  ;;  %v16350_v48 = vld [vmem:[%s22132_s10 + $0x88] ss:$16 sps:$4 sm:$0xff]   ;;  %v16353_v28 = vld [vmem:[%s22132_s10 + $0x60] ss:$16 sps:$4 sm:$0xff]   ;;  %v16415_v51 = vld [vmem:[%s22132_s10 + $0x124] ss:$16 sps:$4 sm:$0xff]  }
 0x65a   :  { %12736 = vmatprep.mubr.bf16.mxu0 %v11779_v20  ;;  %13543 = vmatpush1.bf16.msra.mxu0 %v16332_v1  ;;  %v16355_v20 = vld [vmem:[%s22132_s10 + $0x64] ss:$16 sps:$4 sm:$0xff]   ;;  %v16407_v27 = vld [vmem:[%s22132_s10 + $0x140] ss:$16 sps:$4 sm:$0xff]   ;;  %v16416_v60 = vld [vmem:[%s22132_s10 + $0x128] ss:$16 sps:$4 sm:$0xff]  }
 0x65b   :  { %13544 = vmatprep.subr.bf16.mxu0 %v16340_v19  ;;  %v16413_v10 = vld [vmem:[%s22132_s10 + $0x120] ss:$16 sps:$4 sm:$0xff]   ;;  %v16422_v42 = vld [vmem:[%s22132_s10 + $0x108] ss:$16 sps:$4 sm:$0xff]  }
 0x65c   :  { %12754 = vmatpush1.bf16.msra.mxu1 %v16306_v4  ;;  %v16356_v4 = vld [vmem:[%s22132_s10 + $0x68] ss:$16 sps:$4 sm:$0xff]   ;;  %v16419_v1 = vld [vmem:[%s22132_s10 + $0x100] ss:$16 sps:$4 sm:$0xff]  }
 0x65d   :  { %12755 = vmatprep.subr.bf16.mxu1 %v16311_v49  ;;  %v16358_v49 = vld [vmem:[%s22132_s10 + $0x6c] ss:$16 sps:$4 sm:$0xff]  }
 0x65e   :  { %13545 = vmatpush1.bf16.msra.mxu0 %v16338_v9  ;;  %v16426_v9 = vld [vmem:[%s22134_s12 + $0xf8] sm:$0xff]  }
 0x65f   :  { %13546 = vmatprep.subr.bf16.mxu0 %v16346_v53 }
 0x660   :  { %12756 = vmatpush1.bf16.msra.mxu1 %v16309_v5  ;;  %v16367_v5 = vld [vmem:[%s22132_s10 + $0x24] ss:$16 sps:$4 sm:$0xff]  }
 0x661   :  { %12737 = vmatmul.mubr.bf16.gmra.mxu0 %v11778_v7  ;;  %12757 = vmatprep.subr.bf16.mxu1 %v16314_v0  ;;  %v16370_v0 = vld [vmem:[%s22132_s10 + $0x2c] ss:$16 sps:$4 sm:$0xff]  }
 0x662   :  { %13547 = vmatpush1.bf16.msra.mxu0 %v16344_v39  ;;  %v16376_v7 = vld [vmem:[%s22132_s10 + $0xc] ss:$16 sps:$4 sm:$0xff]  }
 0x663   :  { %13548 = vmatprep.subr.bf16.mxu0 %v16352_v45 }
 0x664   :  { %12758 = vmatpush1.bf16.msra.mxu1 %v16312_v13  ;;  %v16374_v13 = vld [vmem:[%s22132_s10 + $0x8] ss:$16 sps:$4 sm:$0xff]  }
 0x665   :  { %12759 = vmatprep.subr.bf16.mxu1 %v16317_v12  ;;  %v16382_v12 = vld [vmem:[%s22132_s10 + $0x1ec] ss:$16 sps:$4 sm:$0xff]  }
 0x666   :  { %13549 = vmatpush1.bf16.msra.mxu0 %v16350_v48 }
 0x667   :  { %13550 = vmatprep.subr.bf16.mxu0 %v16358_v49 }
 0x668   :  { %12760 = vmatpush1.bf16.msra.mxu1 %v16315_v40  ;;  %v16391_v40 = vld [vmem:[%s22132_s10 + $0x1a4] ss:$16 sps:$4 sm:$0xff]  }
 0x669   :  { %12761 = vmatprep.subr.bf16.mxu1 %v16320_v6  ;;  %v16394_v6 = vld [vmem:[%s22132_s10 + $0x1ac] ss:$16 sps:$4 sm:$0xff]  }
 0x66a   :  { %13551 = vmatpush1.bf16.msra.mxu0 %v16356_v4 }
 0x66b   :  { %13552 = vmatprep.subr.bf16.mxu0 %v16364_v15 }
 0x66c   :  { %12762 = vmatpush1.bf16.msra.mxu1 %v16318_v32  ;;  %v16406_v32 = vld [vmem:[%s22132_s10 + $0x16c] ss:$16 sps:$4 sm:$0xff]  }
 0x66d   :  { %13501 = vmatprep.subr.bf16.mxu1 %v16331_v59  ;;  %v16424_v59 = vld [vmem:[%s22132_s10 + $0x10c] ss:$16 sps:$4 sm:$0xff]  }
 0x66e   :  { %13553 = vmatpush1.bf16.msra.mxu0 %v16362_v17 }
 0x66f   :  { %12780 = vmatmul.mubr.bf16.vlgmr.msra.gmra.mxu1 %v11707_v2  ;;  %13554 = vmatprep.subr.bf16.mxu0 %v16370_v0  ;;  %v16410_v2 = vld [vmem:[%s22132_s10 + $0x148] ss:$16 sps:$4 sm:$0xff]  }
 0x670   :  { %12789 = vmatprep.mubr.bf16.mxu1 %v22472_v44  ;;  %13502 = vmatpush1.bf16.msra.mxu1 %v16329_v33  ;;  %v16361_v44 = vld [vmem:[%s22132_s10 + $0x44] ss:$16 sps:$4 sm:$0xff]  }
 0x671   :  { %13503 = vmatprep.subr.bf16.mxu1 %v16337_v24 }
 0x672   :  { %13555 = vmatpush1.bf16.msra.mxu0 %v16368_v25 }
 0x673   :  { %13556 = vmatprep.subr.bf16.mxu0 %v16376_v7 }
 0x674   :  { %13504 = vmatpush1.bf16.msra.mxu1 %v16335_v37  ;;  %v16425_v37 = vld [vmem:[%s22134_s12 + $0x78] sm:$0xff]  }
 0x675   :  { %13505 = vmatprep.subr.bf16.mxu1 %v16343_v52 }
 0x676   :  { %13557 = vmatpush1.bf16.msra.mxu0 %v16374_v13 }
 0x677   :  { %12790 = vmatmul.mubr.bf16.gmra.mxu1 %v11796_v26  ;;  %13558 = vmatprep.subr.bf16.mxu0 %v16382_v12  ;;  %v16421_v26 = vld [vmem:[%s22132_s10 + $0x104] ss:$16 sps:$4 sm:$0xff]   ;;  %v22473_v12 = vld [vmem:[#allocation33_spill] sm:$0xff] }
 0x678   :  { %13506 = vmatpush1.bf16.msra.mxu1 %v16341_v46 }
 0x679   :  { %13507 = vmatprep.subr.bf16.mxu1 %v16349_v16 }
 0x67a   :  { %13559 = vmatpush2.bf16.msra.mxu0 %v16380_v34  ;;  %v12800_v34 = vld [vmem:[#allocation13] sm:$0x3] }
 0x67b   :  { %13560 = vmatprep.subr.bf16.mxu0 %v16388_v18 }
 0x67c   :  { %13508 = vmatpush1.bf16.msra.mxu1 %v16347_v58 }
 0x67d   :  { %13509 = vmatprep.subr.bf16.mxu1 %v16355_v20 }
 0x67e   :  { %13561 = vmatpush2.bf16.msra.mxu0 %v16386_v30  ;;  %v12820_v30 = vld [vmem:[#allocation14] sm:$0x3] }
 0x67f   :  { %13562 = vmatprep.subr.bf16.mxu0 %v16394_v6 }
 0x680   :  { %13510 = vmatpush1.bf16.msra.mxu1 %v16353_v28 }
 0x681   :  { %13511 = vmatprep.subr.bf16.mxu1 %v16361_v44 }
 0x682   :  { %13563 = vmatpush2.bf16.msra.mxu0 %v16392_v61 }
 0x683   :  { %13564 = vmatprep.subr.bf16.mxu0 %v16400_v14 }
 0x684   :  { %13512 = vmatpush1.bf16.msra.mxu1 %v16359_v35 }
 0x685   :  { %13513 = vmatprep.subr.bf16.mxu1 %v16367_v5 }
 0x686   :  { %13565 = vmatpush2.bf16.msra.mxu0 %v16398_v36 }
 0x687   :  { %13566 = vmatprep.subr.bf16.mxu0 %v16406_v32 }
 0x688   :  { %13514 = vmatpush1.bf16.msra.mxu1 %v16365_v57 }
 0x689   :  { %13515 = vmatprep.subr.bf16.mxu1 %v16373_v31 }
 0x68a   :  { %13567 = vmatpush2.bf16.msra.mxu0 %v16404_v41 }
 0x68b   :  { %13568 = vmatprep.subr.bf16.mxu0 %v16412_v63 }
 0x68c   :  { %13516 = vmatpush1.bf16.msra.mxu1 %v16371_v62 }
 0x68d   :  { %13517 = vmatprep.subr.bf16.mxu1 %v16379_v23 }
 0x68e   :  { %13569 = vmatpush2.bf16.msra.mxu0 %v16410_v2 }
 0x68f   :  { %13570 = vmatprep.subr.bf16.mxu0 %v16418_v8 }
 0x690   :  { %13518 = vmatpush2.bf16.msra.mxu1 %v16377_v11  ;;  %v21957_v11 = vsub.s32 0, %v22473_v12 }
 0x691   :  { %13519 = vmatprep.subr.bf16.mxu1 %v16385_v54  ;;  %v21960_v54 = vsub.s32 1, %v22473_v12 }
 0x692   :  { %13571 = vmatpush2.bf16.msra.mxu0 %v16416_v60  ;;  %v12805_v14 = vrot.slane %v12800_v34, %v21957_v11  ;;  %v21964_v36 = vrot.slane %v12820_v30, %v21957_v11 }
 0x693   :  { %13572 = vmatprep.subr.bf16.mxu0 %v16424_v59  ;;  %v21970_v63 = vrot.slane %v12820_v30, %v21960_v54 }
 0x694   :  { %13520 = vmatpush2.bf16.msra.mxu1 %v16383_v29 }
 0x695   :  { %13521 = vmatprep.subr.bf16.mxu1 %v16391_v40 }
 0x696   :  { %13573 = vmatpush2.bf16.msra.mxu0 %v16422_v42 }
 0x697   :  { %15500 = vmatprep.subr.bf16.mxu0 %v16426_v9 }
 0x698   :  { %13522 = vmatpush2.bf16.msra.mxu1 %v16389_v50 }
 0x699   :  { %13523 = vmatprep.subr.bf16.mxu1 %v16397_v21 }
 0x69c   :  { %13524 = vmatpush2.bf16.msra.mxu1 %v16395_v56 }
 0x69d   :  { %13525 = vmatprep.subr.bf16.mxu1 %v16403_v43  ;;  %v21967_v43 = vrot.slane %v12800_v34, %v21960_v54 }
 0x6a0   :  { %13526 = vmatpush2.bf16.msra.mxu1 %v16401_v47 }
 0x6a1   :  { %13527 = vmatprep.subr.bf16.mxu1 %v16409_v55 }
 0x6a4   :  { %13528 = vmatpush2.bf16.msra.mxu1 %v16407_v27 }
 0x6a5   :  { %13529 = vmatprep.subr.bf16.mxu1 %v16415_v51 }
 0x6a8   :  { %13530 = vmatpush2.bf16.msra.mxu1 %v16413_v10 }
 0x6a9   :  { %13531 = vmatprep.subr.bf16.mxu1 %v16421_v26 }
 0x6ac   :  { %13532 = vmatpush2.bf16.msra.mxu1 %v16419_v1 }
 0x6ad   :  { %15478 = vmatprep.subr.bf16.mxu1 %v16425_v37 }
 0x6cf   :  { %v12569_v38 = vpop.f32.mrf.mxu1 }
 0x6d1   :  { %v12571_v3 = vpop.f32.mrf.mxu1 }
 0x6d3   :  { %v12573_v33 = vpop.f32.mrf.mxu1 }
 0x6d5   :  { %v12575_v24 = vpop.f32.mrf.mxu1 }
 0x6d9   :  { %v12622_v19 = vpop.f32.mrf.mxu0 }
 0x6da   :  { %v12623_v31 = vadd.f32 %v12622_v19, %v12569_v38 }
 0x6db   :  { %v12624_v52 = vpop.f32.mrf.mxu0 }
 0x6dc   :  { %v12625_v62 = vadd.f32 %v12624_v52, %v12571_v3 }
 0x6dd   :  { %v12626_v53 = vpop.f32.mrf.mxu0 }
 0x6de   :  { %v12627_v18 = vadd.f32 %v12626_v53, %v12573_v33 }
 0x6df   :  { %v12628_v16 = vpop.f32.mrf.mxu0 }
 0x6e0   :  { %v12629_v6 = vadd.f32 %v12628_v16, %v12575_v24 }
 0x6e5   :  { %v12579_v46 = vpop.f32.mrf.mxu1 }
 0x6e7   :  { %v12581_v39 = vpop.f32.mrf.mxu1 }
 0x6e8   :  { %v12632_v45 = vpop.f32.mrf.mxu0 }
 0x6e9   :  { %v12583_v58 = vpop.f32.mrf.mxu1  ;;  %v12633_v32 = vadd.f32 %v12632_v45, %v12579_v46 }
 0x6ea   :  { %v12634_v20 = vpop.f32.mrf.mxu0 }
 0x6eb   :  { %v12585_v48 = vpop.f32.mrf.mxu1  ;;  %v12635_v10 = vadd.f32 %v12634_v20, %v12581_v39 }
 0x6ec   :  { %v12636_v49 = vpop.f32.mrf.mxu0 }
 0x6ed   :  { %v12637_v60 = vadd.f32 %v12636_v49, %v12583_v58 }
 0x6ee   :  { %v12638_v15 = vpop.f32.mrf.mxu0 }
 0x6ef   :  { %v12639_v45 = vadd.f32 %v12638_v15, %v12585_v48 }
 0x70f   :  { %v12675_v28 = vpop.f32.mrf.mxu1 }
 0x710   :  { %v12676_v13 = vadd.f32 %v12675_v28, %v12623_v31 }
 0x711   :  { %v12677_v4 = vpop.f32.mrf.mxu1 }
 0x712   :  { %v12678_v29 = vadd.f32 %v12677_v4, %v12625_v62 }
 0x713   :  { %v12679_v44 = vpop.f32.mrf.mxu1 }
 0x714   :  { %v12680_v61 = vadd.f32 %v12679_v44, %v12627_v18 }
 0x715   :  { %v12681_v35 = vpop.f32.mrf.mxu1 }
 0x716   :  { %v12682_v41 = vadd.f32 %v12681_v35, %v12629_v6 }
 0x717   :  { %v12685_v5 = vpop.f32.mrf.mxu1 }
 0x718   :  { %v12686_v2 = vadd.f32 %v12685_v5, %v12633_v32 }
 0x719   :  { %v12728_v17 = vpop.f32.mrf.mxu0  ;;  %v12687_v57 = vpop.f32.mrf.mxu1 }
 0x71a   :  { %v12729_v50 = vadd.f32 %v12728_v17, %v12676_v13  ;;  %v12688_v37 = vadd.f32 %v12687_v57, %v12635_v10  ;;  %v21985_v10 = vsub.s32 2, %v22473_v12 }
 0x71b   :  { %v12730_v0 = vpop.f32.mrf.mxu0  ;;  %v12689_v7 = vpop.f32.mrf.mxu1 }
 0x71c   :  { %v12731_v47 = vadd.f32 %v12730_v0, %v12678_v29  ;;  %v12690_v24 = vadd.f32 %v12689_v7, %v12637_v60 }
 0x71d   :  { %v12732_v25 = vpop.f32.mrf.mxu0  ;;  %v12691_v40 = vpop.f32.mrf.mxu1 }
 0x71e   :  { %v12733_v27 = vadd.f32 %v12732_v25, %v12680_v61  ;;  %v12692_v35 = vadd.f32 %v12691_v40, %v12639_v45 }
 0x71f   :  { %v12734_v23 = vpop.f32.mrf.mxu0 }
 0x720   :  { %v12735_v33 = vadd.f32 %v12734_v23, %v12682_v41 }
 0x721   :  { %v12738_v21 = vpop.f32.mrf.mxu0 }
 0x722   :  { %v12739_v19 = vadd.f32 %v12738_v21, %v12686_v2 }
 0x723   :  { %v12740_v51 = vpop.f32.mrf.mxu0 }
 0x724   :  { %v12741_v44 = vadd.f32 %v12740_v51, %v12688_v37 }
 0x725   :  { %v12742_v46 = vpop.f32.mrf.mxu0 }
 0x726   :  { %v12743_v5 = vadd.f32 %v12742_v46, %v12690_v24 }
 0x727   :  { %v12744_v0 = vpop.f32.mrf.mxu0 }
 0x728   :  { %v12745_v18 = vadd.f32 %v12744_v0, %v12692_v35 }
 0x72f   :  { %v12781_v56 = vpop.f32.mrf.mxu1 }
 0x730   :  { %v12782_v55 = vadd.f32 %v12781_v56, %v12729_v50 }
 0x731   :  { %v12783_v38 = vpop.f32.mrf.mxu1 }
 0x732   :  { %v12812_v3 = vmul.f32 %v12805_v14, %v12782_v55  ;;  %v12784_v8 = vadd.f32 %v12783_v38, %v12731_v47 }
 0x733   :  { %v12785_v26 = vpop.f32.mrf.mxu1 }
 0x734   :  { %v12832_v59 = vadd.f32 %v21964_v36, %v12812_v3  ;;  %v12813_v1 = vmul.f32 %v21967_v43, %v12784_v8  ;;  %v12786_v42 = vadd.f32 %v12785_v26, %v12733_v27 }
 0x735   :  { %v12787_v9 = vpop.f32.mrf.mxu1 }
 0x736   :  { %v12833_v52 = vadd.f32 %v21970_v63, %v12813_v1  ;;  %v12814_v53 = vmul.f32 %v12805_v14, %v12786_v42  ;;  %v12788_v16 = vadd.f32 %v12787_v9, %v12735_v33  ;;  %v12840_v28 = vmax.f32 %v12832_v59, 0.0 }
 0x737   :  { %v12791_v39 = vpop.f32.mrf.mxu1 }
 0x738   :  { %v12841_v58 = vmax.f32 %v12833_v52, 0.0  ;;  %v12834_v20 = vadd.f32 %v21964_v36, %v12814_v53  ;;  %v12815_v4 = vmul.f32 %v21967_v43, %v12788_v16  ;;  %v12792_v49 = vadd.f32 %v12791_v39, %v12739_v19 }
 0x739   :  { %v12793_v17 = vpop.f32.mrf.mxu1 }
 0x73a   :  { %v12856_v57 = vcombine.low %v12840_v28, %v12841_v58  ;;  %v12857_v25 = vcombine.high %v12840_v28, %v12841_v58  ;;  %v12835_v31 = vadd.f32 %v21970_v63, %v12815_v4  ;;  %v12816_v7 = vmul.f32 %v12805_v14, %v12792_v49 }
 0x73b   :  { %v12794_v62 = vadd.f32 %v12793_v17, %v12741_v44  ;;  %v12795_v48 = vpop.f32.mrf.mxu1  ;;  %v12842_v13 = vmax.f32 %v12834_v20, 0.0 }
 0x73c   :  { %v12872_v15 = vmax.f32 %v12856_v57, %v12857_v25  ;;  %v12843_v23 = vmax.f32 %v12835_v31, 0.0  ;;  %v12796_v34 = vadd.f32 %v12795_v48, %v12743_v5  ;;  %v12836_v29 = vadd.f32 %v21964_v36, %v12816_v7 }
 0x73d   :  { %v12817_v30 = vmul.f32 %v21967_v43, %v12794_v62  ;;  %v12797_v40 = vpop.f32.mrf.mxu1 }
 0x73e   :  { %v12886_v6 = vrot.slane %v12872_v15, %v22466_v22  ;;  %v12858_v50 = vcombine.low %v12842_v13, %v12843_v23  ;;  %v12859_v61 = vcombine.high %v12842_v13, %v12843_v23  ;;  %v12818_v21 = vmul.f32 %v12805_v14, %v12796_v34 }
 0x73f   :  { %v12837_v56 = vadd.f32 %v21970_v63, %v12817_v30  ;;  %v12798_v32 = vadd.f32 %v12797_v40, %v12745_v18  ;;  %v12844_v27 = vmax.f32 %v12836_v29, 0.0 }
 0x740   :  { %v12887_v47 = vcombine.high %v12886_v6, %v12886_v6  ;;  %v15022_v41 = vrot.slane %v12886_v6, 9  ;;  %v12873_v55 = vmax.f32 %v12858_v50, %v12859_v61  ;;  %v12838_v38 = vadd.f32 %v21964_v36, %v12818_v21 }
 0x741   :  { %v12845_v2 = vmax.f32 %v12837_v56, 0.0  ;;  %v12819_v51 = vmul.f32 %v21967_v43, %v12798_v32 }
 0x742   :  { %v15023_v3 = vrot.slane %v12887_v47, 9  ;;  %v12944_v8 = vmax.f32 %v12886_v6, %v15022_v41  ;;  %v12894_v60 = vrot.slane %v12873_v55, %v22466_v22  ;;  %v12846_v42 = vmax.f32 %v12838_v38, 0.0 }
 0x743   :  { %v12860_v14 = vcombine.low %v12844_v27, %v12845_v2  ;;  %v12861_v26 = vcombine.high %v12844_v27, %v12845_v2  ;;  %v12839_v33 = vadd.f32 %v21970_v63, %v12819_v51 }
 0x744   :  { %v12945_v59 = vmax.f32 %v12887_v47, %v15023_v3  ;;  %v12895_v1 = vcombine.high %v12894_v60, %v12894_v60  ;;  %v12963_v36 = vrot.slane %v12944_v8, %v21957_v11  ;;  %v15024_v37 = vrot.slane %v12894_v60, 9 }
 0x745   :  { %v12874_v24 = vmax.f32 %v12860_v14, %v12861_v26  ;;  %v12847_v43 = vmax.f32 %v12839_v33, 0.0  ;;  %v12967_v9 = vrot.slane %v12944_v8, %v21985_v10 }
 0x746   :  { %v12971_v19 = vrot.slane %v12945_v59, %v21957_v11  ;;  %v12975_v46 = vrot.slane %v12945_v59, %v21985_v10  ;;  %v15025_v52 = vrot.slane %v12895_v1, 9  ;;  %v12946_v53 = vmax.f32 %v12894_v60, %v15024_v37 }
 0x747   :  { %v12902_v16 = vrot.slane %v12874_v24, %v22466_v22  ;;  %v12862_v63 = vcombine.low %v12846_v42, %v12847_v43  ;;  %v12863_v45 = vcombine.high %v12846_v42, %v12847_v43 }
 0x748   :  { %v12947_v28 = vmax.f32 %v12895_v1, %v15025_v52  ;;  %v13025_v39 = vsel %vm13024_vm13, %v12971_v19, %v12963_v36  ;;  %v13028_v58 = vsel %vm13024_vm13, %v12975_v46, %v12967_v9  ;;  %v12979_v20 = vrot.slane %v12946_v53, %v21957_v11 }
 0x749   :  { %v12983_v4 = vrot.slane %v12946_v53, %v21985_v10  ;;  %v12903_v49 = vcombine.high %v12902_v16, %v12902_v16  ;;  %v15026_v44 = vrot.slane %v12902_v16, 9  ;;  %v12875_v5 = vmax.f32 %v12862_v63, %v12863_v45 }
 0x74a   :  { %v12987_v35 = vrot.slane %v12947_v28, %v21957_v11  ;;  %v12991_v17 = vrot.slane %v12947_v28, %v21985_v10  ;;  %v13026_v25 = vsel %vm7634_vm3, %v12979_v20, %v13025_v39 }
 0x74b   :  { %v15027_v0 = vrot.slane %v12903_v49, 9  ;;  %v12948_v57 = vmax.f32 %v12902_v16, %v15026_v44  ;;  %v13029_v31 = vsel %vm7634_vm3, %v12983_v4, %v13028_v58  ;;  %v12910_v7 = vrot.slane %v12875_v5, %v22466_v22 }
 0x74c   :  { %v13030_v62 = vsel %vm7637_vm14, %v12991_v17, %v13029_v31  ;;  %v13027_v48 = vsel %vm7637_vm14, %v12987_v35, %v13026_v25 }
 0x74d   :  { %v12949_v15 = vmax.f32 %v12903_v49, %v15027_v0  ;;  %v12995_v13 = vrot.slane %v12948_v57, %v21957_v11  ;;  %v13049_v23 = vsel %vm13041_vm15, %v13030_v62, 0.0  ;;  %v12911_v34 = vcombine.high %v12910_v7, %v12910_v7 }
 0x74e   :  { %v15028_v18 = vrot.slane %v12910_v7, 9  ;;  %v13050_v29 = vrot.slane %v13049_v23, 4  ;;  %v13042_v30 = vsel %vm13041_vm15, %v13027_v48, 0.0  ;;  %v12999_v40 = vrot.slane %v12948_v57, %v21985_v10 }
 0x74f   :  { %v13003_v6 = vrot.slane %v12949_v15, %v21957_v11  ;;  %v13007_v22 = vrot.slane %v12949_v15, %v21985_v10  ;;  %v13043_v50 = vrot.slane %v13042_v30, 4  ;;  %v15029_v61 = vrot.slane %v12911_v34, 9 }
 0x750   :  { %v12950_v21 = vmax.f32 %v12910_v7, %v15028_v18  ;;  %v13051_v56 = vadd.f32 %v13050_v29, %v13049_v23 }
 0x751   :  { %v13031_v32 = vsel %vm13024_vm13, %v13003_v6, %v12995_v13  ;;  %v13034_v47 = vsel %vm13024_vm13, %v13007_v22, %v12999_v40  ;;  %v13044_v41 = vadd.f32 %v13043_v50, %v13042_v30  ;;  %v12951_v55 = vmax.f32 %v12911_v34, %v15029_v61  ;;  %v16427_v30 = vld [vmem:[%s22134_s12 + $0x38] sm:$0xff]   ;;  %v16429_v6 = vld [vmem:[%s22134_s12 + $0x70] sm:$0xff]  }
 0x752   :  { %v13011_v38 = vrot.slane %v12950_v21, %v21957_v11  ;;  %v13015_v27 = vrot.slane %v12950_v21, %v21985_v10  ;;  %v13052_v2 = vrot.slane %v13051_v56, 2  ;;  %v16428_v40 = vld [vmem:[%s22134_s12 + $0xb8] sm:$0xff]   ;;  %v16430_v22 = vld [vmem:[%s22134_s12 + $0xf0] sm:$0xff]   ;;  %v16433_v21 = vld [vmem:[%s22134_s12 + $0x68] sm:$0xff]  }
 0x753   :  { %v13045_v51 = vrot.slane %v13044_v41, 2  ;;  %v13019_v3 = vrot.slane %v12951_v55, %v21957_v11  ;;  %v13023_v8 = vrot.slane %v12951_v55, %v21985_v10  ;;  %v16431_v50 = vld [vmem:[%s22134_s12 + $0x30] sm:$0xff]   ;;  %v16438_v55 = vld [vmem:[%s22134_s12 + $0xe0] sm:$0xff]  }
 0x754   :  { %v13032_v60 = vsel %vm7634_vm3, %v13011_v38, %v13031_v32  ;;  %v13035_v14 = vsel %vm7634_vm3, %v13015_v27, %v13034_v47  ;;  %v13053_v59 = vadd.f32 %v13052_v2, %v13051_v56  ;;  %v16432_v61 = vld [vmem:[%s22134_s12 + $0xb0] sm:$0xff]   ;;  %v16434_v56 = vld [vmem:[%s22134_s12 + $0xe8] sm:$0xff]   ;;  %v16439_v38 = vld [vmem:[%s22134_s12 + $0x20] sm:$0xff]  }
 0x755   :  { %v13033_v26 = vsel %vm7637_vm14, %v13019_v3, %v13032_v60  ;;  %v13036_v33 = vsel %vm7637_vm14, %v13023_v8, %v13035_v14  ;;  %v13046_v1 = vadd.f32 %v13045_v51, %v13044_v41  ;;  %v16435_v32 = vld [vmem:[%s22134_s12 + $0x28] sm:$0xff]   ;;  %v16437_v41 = vld [vmem:[%s22134_s12 + $0x60] sm:$0xff]   ;;  %v16441_v2 = vld [vmem:[%s22134_s12 + $0x58] sm:$0xff]   ;;  %vm13934_vm14 = vcmask 74752  }
 0x756   :  { %v13056_v42 = vsel %vm13041_vm15, %v13033_v26, 0.0  ;;  %v13063_v36 = vsel %vm13041_vm15, %v13036_v33, 0.0  ;;  %v13054_v43 = vrot.slane %v13053_v59, 1  ;;  %v16436_v47 = vld [vmem:[%s22134_s12 + $0xa8] sm:$0xff]   ;;  %v16440_v27 = vld [vmem:[%s22134_s12 + $0xa0] sm:$0xff]   ;;  %v16442_v51 = vld [vmem:[%s22134_s12 + $0xd8] sm:$0xff]  }
 0x757   :  { %v13057_v37 = vrot.slane %v13056_v42, 4  ;;  %v13064_v24 = vrot.slane %v13063_v36, 4  ;;  %v13047_v19 = vrot.slane %v13046_v1, 1  ;;  %v16443_v3 = vld [vmem:[%s22134_s12 + $0x18] sm:$0xff]   ;;  %v16445_v60 = vld [vmem:[%s22134_s12 + $0x50] sm:$0xff]  }
 0x758   :  { %v13055_v16 = vadd.f32 %v13054_v43, %v13053_v59  ;;  %v16444_v8 = vld [vmem:[%s22134_s12 + $0x98] sm:$0xff]   ;;  %v16446_v14 = vld [vmem:[%s22134_s12 + $0xd0] sm:$0xff]   ;;  %v16449_v59 = vld [vmem:[%s22134_s12 + $0x48] sm:$0xff]  }
 0x759   :  { %v13065_v9 = vadd.f32 %v13064_v24, %v13063_v36  ;;  %v13058_v46 = vadd.f32 %v13057_v37, %v13056_v42  ;;  %v13048_v45 = vadd.f32 %v13047_v19, %v13046_v1  ;;  %v16447_v26 = vld [vmem:[%s22134_s12 + $0x10] sm:$0xff]   ;;  %v16450_v1 = vld [vmem:[%s22134_s12 + $0xc8] sm:$0xff]   ;;  %v16453_v37 = vld [vmem:[%s22134_s12 + $0x40] sm:$0xff]  }
 0x75a   :  { %v13072_v4 = vmul.f32 0.25, %v13055_v16  ;;  %v16448_v33 = vld [vmem:[%s22134_s12 + $0x90] sm:$0xff]   ;;  %v16451_v42 = vld [vmem:[%s22134_s12 + $0x8] sm:$0xff]   ;;  %v16454_v24 = vld [vmem:[%s22134_s12 + $0xc0] sm:$0xff]  }
 0x75b   :  { %v13066_v52 = vrot.slane %v13065_v9, 2  ;;  %v13059_v53 = vrot.slane %v13058_v46, 2  ;;  %v13071_v44 = vmul.f32 0.25, %v13048_v45  ;;  %v16452_v36 = vld [vmem:[%s22134_s12 + $0x88] sm:$0xff]   ;;  %v16455_v43 = vld [vmem:[%s22134_s12] sm:$0xff]  }
 0x75c   :  { %v13076_v5 = vpack.c.bf16 %v13072_v4, %v13072_v4  ;;  %v13143_v19 = vld [vmem:[#allocation16] sm:$0xf] }
 0x75d   :  { %v13067_v63 = vadd.f32 %v13066_v52, %v13065_v9  ;;  %v13060_v28 = vadd.f32 %v13059_v53, %v13058_v46  ;;  %v13075_v57 = vpack.c.bf16 %v13071_v44, %v13071_v44  ;;  %v16456_v9 = vld [vmem:[%s22134_s12 + $0x80] sm:$0xff]   ;;  %v13159_v46 = vsub.s32 3, %v22473_v12  ;;  %s16716_s12 = smov [#allocation19]  }
 0x75e   :  { %v13170_v62 = vunpack.c.l.b16 %v13076_v5  ;;  %v13148_v52 = vrot.slane %v13143_v19, %v21957_v11  ;;  %v13156_v53 = vrot.slane %v13143_v19, %v21985_v10  ;;  %v13152_v16 = vrot.slane %v13143_v19, %v21960_v54  ;;  %s13942_s21 = sshll.u32 %s16716_s12, 4  ;;  %s13943_s21 = int_to_ptr.vmem [resolvable:$true] %s13942_s21 }
 0x75f   :  { %v13068_v39 = vrot.slane %v13067_v63, 1  ;;  %v13061_v58 = vrot.slane %v13060_v28, 1  ;;  %v13169_v15 = vunpack.c.l.b16 %v13075_v57  ;;  %s16664_s2 = scalar_lea.vmem %s13943_s21, 32  ;;  %p16669_p13 = scmp.lt.s32.totalorder %s13943_s21, %s13943_s21 }
 0x760   :  { %p16665_p12 = scmp.ne.s32.totalorder %s13943_s21, %s16664_s2  ;;  %p16670_p0 = scmp.lt.s32.totalorder %s16664_s2, %s16664_s2 }
 0x761   :  { %v13069_v20 = vadd.f32 %v13068_v39, %v13067_v63  ;;  %v13062_v49 = vadd.f32 %v13061_v58, %v13060_v28  ;;  %v13160_v63 = vrot.slane %v13143_v19, %v13159_v46 }
 0x762   :  { %p16671_p1 = por %p16670_p0, %p16669_p13 }
 0x763   :  { %v13074_v35 = vmul.f32 0.25, %v13069_v20  ;;  %v13073_v17 = vmul.f32 0.25, %v13062_v49 }
 0x764   :  { %p16672_p2 = pnand %p16671_p1, %p16665_p12 }
 0x765   :  { %v13078_v0 = vpack.c.bf16 %v13074_v35, %v13074_v35  ;;  %v13077_v25 = vpack.c.bf16 %v13073_v17, %v13073_v17 }
 0x767   :  { %v13172_v31 = vunpack.c.l.b16 %v13078_v0  ;;  %v13171_v7 = vunpack.c.l.b16 %v13077_v25 }
 0x769   :  { %v13175_v48 = vrot.slane %v13172_v31, 7  ;;  %v13173_v13 = vrot.slane %v13171_v7, 7 }
 0x76b   :  { %v13176_v23 = vsel %vm13024_vm13, %v13175_v48, %v13170_v62  ;;  %v13174_v34 = vsel %vm13024_vm13, %v13173_v13, %v13169_v15  ;;  %v15094_v15 = vld [vmem:[#allocation17] ss:$0 sm:$0xff] }
 0x76c   :  { %v13178_v18 = vpack.c.b16 %v13176_v23, %v13176_v23  ;;  %v13177_v29 = vpack.c.b16 %v13174_v34, %v13174_v34 }
 0x76e   :  { %13533 = vmatprep.mubr.bf16.mxu1 %v13178_v18  ;;  %13574 = vmatprep.mubr.bf16.mxu0 %v13178_v18 }
 0x76f   :  { %13534 = vmatmul.mubr.bf16.vlgmr.msra.gmra.mxu1 %v13177_v29  ;;  %13575 = vmatmul.mubr.bf16.vlgmr.msra.gmra.mxu0 %v13177_v29 }
 0x770   :  { %15479 = vmatpush3.bf16.msra.mxu1 %v16427_v30  ;;  %15501 = vmatpush3.bf16.msra.mxu0 %v16428_v40 }
 0x771   :  { %15480 = vmatprep.subr.bf16.mxu1 %v16429_v6  ;;  %15502 = vmatprep.subr.bf16.mxu0 %v16430_v22 }
 0x774   :  { %15481 = vmatpush3.bf16.msra.mxu1 %v16431_v50  ;;  %15503 = vmatpush3.bf16.msra.mxu0 %v16432_v61 }
 0x775   :  { %15482 = vmatprep.subr.bf16.mxu1 %v16433_v21  ;;  %15504 = vmatprep.subr.bf16.mxu0 %v16434_v56 }
 0x778   :  { %15483 = vmatpush3.bf16.msra.mxu1 %v16435_v32  ;;  %15505 = vmatpush3.bf16.msra.mxu0 %v16436_v47 }
 0x779   :  { %15484 = vmatprep.subr.bf16.mxu1 %v16437_v41  ;;  %15506 = vmatprep.subr.bf16.mxu0 %v16438_v55 }
 0x77c   :  { %15485 = vmatpush3.bf16.msra.mxu1 %v16439_v38  ;;  %15507 = vmatpush3.bf16.msra.mxu0 %v16440_v27 }
 0x77d   :  { %15486 = vmatprep.subr.bf16.mxu1 %v16441_v2  ;;  %15508 = vmatprep.subr.bf16.mxu0 %v16442_v51 }
 0x780   :  { %15487 = vmatpush3.bf16.msra.mxu1 %v16443_v3  ;;  %15509 = vmatpush3.bf16.msra.mxu0 %v16444_v8 }
 0x781   :  { %15488 = vmatprep.subr.bf16.mxu1 %v16445_v60  ;;  %15510 = vmatprep.subr.bf16.mxu0 %v16446_v14 }
 0x784   :  { %15489 = vmatpush3.bf16.msra.mxu1 %v16447_v26  ;;  %15511 = vmatpush3.bf16.msra.mxu0 %v16448_v33 }
 0x785   :  { %15490 = vmatprep.subr.bf16.mxu1 %v16449_v59  ;;  %15512 = vmatprep.subr.bf16.mxu0 %v16450_v1 }
 0x788   :  { %15491 = vmatpush3.bf16.msra.mxu1 %v16451_v42  ;;  %15513 = vmatpush3.bf16.msra.mxu0 %v16452_v36 }
 0x789   :  { %15492 = vmatprep.subr.bf16.mxu1 %v16453_v37  ;;  %15514 = vmatprep.subr.bf16.mxu0 %v16454_v24 }
 0x78c   :  { %15493 = vmatpush3.bf16.msra.mxu1 %v16455_v43  ;;  %15515 = vmatpush3.bf16.msra.mxu0 %v16456_v9 }
 0x82f   :  { %v13535_v45 = vpop.f32.mrf.mxu1  ;;  %v13576_v28 = vpop.f32.mrf.mxu0 }
 0x830   :  { %v13536_v39 = vadd.f32 %v13535_v45, %v13148_v52  ;;  %v13577_v58 = vadd.f32 %v13576_v28, %v13156_v53 }
 0x831   :  { %v13537_v20 = vpop.f32.mrf.mxu1  ;;  %v13578_v4 = vpop.f32.mrf.mxu0 }
 0x832   :  { %v13538_v49 = vadd.f32 %v13537_v20, %v13152_v16  ;;  %v13579_v44 = vadd.f32 %v13578_v4, %v13160_v63  ;;  %v13583_v35 = vmax.f32 %v13536_v39, 0.0  ;;  %v13585_v17 = vmax.f32 %v13577_v58, 0.0 }
 0x833   :  { %v13539_v5 = vpop.f32.mrf.mxu1  ;;  %v13580_v0 = vpop.f32.mrf.mxu0 }
 0x834   :  { %v13584_v12 = vmax.f32 %v13538_v49, 0.0  ;;  %v13586_v57 = vmax.f32 %v13579_v44, 0.0  ;;  %v13587_v54 = vpack.c.bf16 %v13583_v35, %v13583_v35  ;;  %v13589_v7 = vpack.c.bf16 %v13585_v17, %v13585_v17 }
 0x835   :  { %v13540_v11 = vpop.f32.mrf.mxu1  ;;  %v13581_v25 = vpop.f32.mrf.mxu0 }
 0x836   :  { %v13588_v10 = vpack.c.bf16 %v13584_v12, %v13584_v12  ;;  %v13590_v31 = vpack.c.bf16 %v13586_v57, %v13586_v57 }
 0x838   :  { %13886 = vmatprep.mubr.bf16.mxu1 %v13588_v10  ;;  %13926 = vmatprep.mubr.bf16.mxu0 %v13590_v31 }
 0x839   :  { %13887 = vmatmul.mubr.bf16.vlgmr.msra.gmra.mxu1 %v13587_v54  ;;  %13927 = vmatmul.mubr.bf16.vlgmr.msra.gmra.mxu0 %v13589_v7 }
 0x8f9   :  { %v15494_v62 = vpop.f32.mrf.mxu1  ;;  %v15516_v48 = vpop.f32.mrf.mxu0 }
 0x8fb   :  { %v15495_v13 = vpop.f32.mrf.mxu1  ;;  %v15517_v23 = vpop.f32.mrf.mxu0 }
 0x8fc   :  { %v15496_v34 = vadd.f32 %v15495_v13, %v15494_v62  ;;  %v15518_v40 = vadd.f32 %v15517_v23, %v15516_v48 }
 0x8fd   :  { %v15497_v18 = vpop.f32.mrf.mxu1  ;;  %v15519_v29 = vpop.f32.mrf.mxu0 }
 0x8fe   :  { %v13889_v30 = vadd.f32 %v15496_v34, %v15094_v15 }
 0x8ff   :  { %v15498_v6 = vpop.f32.mrf.mxu1  ;;  %v15520_v22 = vpop.f32.mrf.mxu0 }
 0x900   :  { %v13929_v50 = vadd.f32 %v15518_v40, %v13889_v30 }
 0x902   :  { %13935 = vst.msk [vmem:[#allocation19] sm:$0x3] %vm13934_vm14, %v13929_v50 }
 0x903   :  { %16675 = shalt.err (!%p16672_p2)
}
 0x904   :  { %13945 = dma.vmem_to_hbm [thread:$0]  %s13943_s21, 32, %s22136_s14, [#allocation7]  }
 0x905   :  { %16694 = dma.done.wait [#allocation7], 32  }
 0x906   :  { %16695 = vsyncadd [#allocation7], 4294967264 }
 0x907   :  { %13949 = vsyncpa [#allocation6], 1 }
 0x908   :  { %13950 = vsyncpa [#allocation9], 1 }
 0x909   :  { %13951 = vsyncpa [#allocation12], 1 }
 0x90a   :  { %13952 = vsyncpa [#allocation15], 1 }
 0x90b   :  { %13953 = vsyncpa [#allocation18], 1 }
 0x90c   :  { %13954 = vsyncpa [#allocation7], 1 }

</bundles_post_ra>
